<compile_context>
chip_gen: v7x
topology: tpu7x:2x2x1
jax: 0.10.0
libtpu: 0.0.40
codegen_flags: <defaults>
</compile_context>

<pallas_src>
import math
import functools

import jax
import jax.numpy as jnp
from jax.experimental import pallas as pl
from jax.experimental.pallas import tpu as pltpu

LN_EPS = 1e-5
NEG_INF = -1e30


# ----------------------------- in-kernel helpers (operate on jnp values) ---------------

def _layernorm(x, g, b, eps=LN_EPS):
    mean = jnp.mean(x, axis=-1, keepdims=True)
    xc = x - mean
    var = jnp.mean(xc * xc, axis=-1, keepdims=True)
    return xc * jax.lax.rsqrt(var + eps) * g + b


def _dense(x, w, b):
    # x: (rows, K) f32, w: (K, N) bf16 (or f32), b: (1, N) f32 -> (rows, N) f32
    return jnp.dot(x.astype(w.dtype), w, preferred_element_type=jnp.float32) + b


def _mha(x_q, x_kv, bias, wq, bq, wk, bk, wv, bv, wo, bo, *, H, dh):
    """Multi-head attention on VMEM-resident 2-D tiles.

    x_q: (Rq, E), x_kv: (Rk, E).  Per-head weights wq/wk/wv: (H, E, dh) bf16,
    biases bq/bk/bv: (H, 1, dh) f32, wo: (H, dh, E) bf16, bo: (1, E) f32.
    `bias` is a (Rq, Rk) additive mask (0 within the same batch element, -1e30 across
    batch elements) which keeps attention block-diagonal without any head/batch reshapes.
    """
    scale = 1.0 / math.sqrt(dh)
    xq = x_q.astype(wq.dtype)
    xkv = x_kv.astype(wk.dtype)
    acc = None
    for h in range(H):                       # H is small & static -> unrolled
        q = jnp.dot(xq, wq[h], preferred_element_type=jnp.float32) + bq[h]   # (Rq, dh)
        k = jnp.dot(xkv, wk[h], preferred_element_type=jnp.float32) + bk[h]  # (Rk, dh)
        v = jnp.dot(xkv, wv[h], preferred_element_type=jnp.float32) + bv[h]  # (Rk, dh)
        s = jax.lax.dot_general(q, k, (((1,), (1,)), ((), ())),
                                preferred_element_type=jnp.float32) * scale + bias
        m = jnp.max(s, axis=-1, keepdims=True)
        p = jnp.exp(s - m)
        p = p * pl.reciprocal(jnp.sum(p, axis=-1, keepdims=True), approx=True)
        ctx = jnp.dot(p, v, preferred_element_type=jnp.float32)              # (Rq, dh)
        part = jnp.dot(ctx.astype(wo.dtype), wo[h], preferred_element_type=jnp.float32)
        acc = part if acc is None else acc + part
    return acc + bo


# ----------------------------- Pallas kernels ------------------------------------------

def _embed_kernel(src_ref, w_ref, b_ref, pe_ref, o_ref):
    # src: (B*S, In) -> (B*S, E); pe rows already expanded per-row in the wrapper.
    o_ref[...] = (jnp.dot(src_ref[...], w_ref[...], preferred_element_type=jnp.float32)
                  + b_ref[...] + pe_ref[...])


def _encoder_stack_kernel(x_ref, bias_ref,
                          wq_ref, bq_ref, wk_ref, bk_ref, wv_ref, bv_ref,
                          wo_ref, bo_ref,
                          ln1g_ref, ln1b_ref,
                          w1_ref, b1_ref, w2_ref, b2_ref,
                          ln2g_ref, ln2b_ref,
                          fng_ref, fnb_ref,
                          mem_ref, carry_ref, *, H, dh):
    l = pl.program_id(0)
    nl = pl.num_programs(0)

    @pl.when(l == 0)
    def _():
        carry_ref[...] = x_ref[...]

    x = carry_ref[...]
    bias = bias_ref[...]

    # self attention + add&norm
    attn = _mha(x, x, bias, wq_ref[0], bq_ref[0], wk_ref[0], bk_ref[0],
                wv_ref[0], bv_ref[0], wo_ref[0], bo_ref[0], H=H, dh=dh)
    x2 = _layernorm(x + attn, ln1g_ref[0], ln1b_ref[0])

    # FFN + add&norm
    hidden = jnp.maximum(_dense(x2, w1_ref[0], b1_ref[0]), 0.0)
    y = _layernorm(x2 + _dense(hidden, w2_ref[0], b2_ref[0]), ln2g_ref[0], ln2b_ref[0])

    carry_ref[...] = y

    @pl.when(l == nl - 1)
    def _():
        mem_ref[...] = _layernorm(y, fng_ref[...], fnb_ref[...])   # final encoder norm


def _decoder_stack_kernel(x_ref, mem_ref, bias_ref,
                          sq_w_ref, sq_b_ref, sk_w_ref, sk_b_ref, sv_w_ref, sv_b_ref,
                          so_w_ref, so_b_ref,
                          ln1g_ref, ln1b_ref,
                          cq_w_ref, cq_b_ref, ck_w_ref, ck_b_ref, cv_w_ref, cv_b_ref,
                          co_w_ref, co_b_ref,
                          ln2g_ref, ln2b_ref,
                          w1_ref, b1_ref, w2_ref, b2_ref,
                          ln3g_ref, ln3b_ref,
                          dng_ref, dnb_ref, fcw_ref, fcb_ref,
                          out_ref, carry_ref, *, H, dh):
    l = pl.program_id(0)
    nl = pl.num_programs(0)

    @pl.when(l == 0)
    def _():
        carry_ref[...] = x_ref[...]

    x = carry_ref[...]
    mem = mem_ref[...]
    bias = bias_ref[...]

    # self attention + add&norm
    attn = _mha(x, x, bias, sq_w_ref[0], sq_b_ref[0], sk_w_ref[0], sk_b_ref[0],
                sv_w_ref[0], sv_b_ref[0], so_w_ref[0], so_b_ref[0], H=H, dh=dh)
    x2 = _layernorm(x + attn, ln1g_ref[0], ln1b_ref[0])

    # cross attention (queries from decoder, keys/values from encoder memory) + add&norm
    attn = _mha(x2, mem, bias, cq_w_ref[0], cq_b_ref[0], ck_w_ref[0], ck_b_ref[0],
                cv_w_ref[0], cv_b_ref[0], co_w_ref[0], co_b_ref[0], H=H, dh=dh)
    x3 = _layernorm(x2 + attn, ln2g_ref[0], ln2b_ref[0])

    # FFN + add&norm
    hidden = jnp.maximum(_dense(x3, w1_ref[0], b1_ref[0]), 0.0)
    y = _layernorm(x3 + _dense(hidden, w2_ref[0], b2_ref[0]), ln3g_ref[0], ln3b_ref[0])

    carry_ref[...] = y

    @pl.when(l == nl - 1)
    def _():
        yn = _layernorm(y, dng_ref[...], dnb_ref[...])             # final decoder norm
        # fused output fc (computed as a lane reduction): (B*S, 1)
        out_ref[...] = jnp.sum(yn * fcw_ref[...], axis=-1, keepdims=True) + fcb_ref[...]


# ----------------------------- pallas_call plumbing -------------------------------------

def _stacked_spec(arr):
    """BlockSpec for a per-layer-stacked array (leading dim = num_layers)."""
    n_trail = arr.ndim - 1
    def idx(l):
        return (l,) + (0,) * n_trail
    return pl.BlockSpec((1,) + arr.shape[1:], idx)


def _const_spec(arr):
    """BlockSpec for an array shared by all layers (fetched once)."""
    zeros = (0,) * arr.ndim
    def idx(l):
        return zeros
    return pl.BlockSpec(arr.shape, idx)


def _stack_call(kernel, inputs, out_shape, num_layers, carry_shape, **static_kwargs):
    """Run one fused layer-stack kernel over grid=(num_layers,)."""
    args = [a for a, _ in inputs]
    in_specs = [_stacked_spec(a) if stacked else _const_spec(a) for a, stacked in inputs]
    out_zeros = (0,) * len(out_shape.shape)
    grid_spec = pltpu.PrefetchScalarGridSpec(
        num_scalar_prefetch=0,
        grid=(num_layers,),
        in_specs=in_specs,
        out_specs=pl.BlockSpec(out_shape.shape, lambda l: out_zeros),
        scratch_shapes=[pltpu.VMEM(carry_shape, jnp.float32)],   # cross-layer activation
    )
    return pl.pallas_call(
        functools.partial(kernel, **static_kwargs),
        out_shape=out_shape,
        grid_spec=grid_spec,
        compiler_params=pltpu.CompilerParams(
            dimension_semantics=("arbitrary",),        # layer l+1 depends on layer l
            vmem_limit_bytes=32 * 1024 * 1024,         # well within v5e/v6e/v7x budgets
        ),
    )(*args)


# ----------------------------- model forward --------------------------------------------

def transformer_model_forward(params, src, *, num_heads):
    """src: (B, S, input_size) -> (B, 1)."""
    B, S, In = src.shape
    E = params["emb_w"].shape[1]
    H = num_heads
    dh = E // H
    rows = B * S
    L = params["enc"]["w1"].shape[0]

    # ---- embedding + positional encoding (one pallas_call) ----
    # Rows are batch-major: row = b * S + s (equivalent to the PyTorch seq-major layout
    # for every per-row op; attention batching handled via the additive bias below).
    # NOTE: faithfully reproduces the original quirk of indexing pe by the *batch* dim.
    pe_rows = jnp.repeat(params["pe"][:B], S, axis=0)            # (B*S, E)
    x = pl.pallas_call(
        _embed_kernel,
        out_shape=jax.ShapeDtypeStruct((rows, E), jnp.float32),
        in_specs=[pl.BlockSpec(memory_space=pltpu.MemorySpace.VMEM)] * 4,
        out_specs=pl.BlockSpec(memory_space=pltpu.MemorySpace.VMEM),
    )(src.reshape(rows, In), params["emb_w"], params["emb_b"], pe_rows)

    # additive attention bias: 0 within the same batch element, -1e30 across batches
    batch_id = jnp.arange(rows, dtype=jnp.int32) // S
    attn_bias = jnp.where(batch_id[:, None] == batch_id[None, :],
                          0.0, NEG_INF).astype(jnp.float32)      # (B*S, B*S)

    # ---- encoder stack + final encoder norm (one pallas_call, grid over layers) ----
    e = params["enc"]
    enc_inputs = [
        (x, False), (attn_bias, False),
        (e["sa_wq"], True), (e["sa_bq"], True), (e["sa_wk"], True), (e["sa_bk"], True),
        (e["sa_wv"], True), (e["sa_bv"], True), (e["sa_wo"], True), (e["sa_bo"], True),
        (e["ln1_g"], True), (e["ln1_b"], True),
        (e["w1"], True), (e["b1"], True), (e["w2"], True), (e["b2"], True),
        (e["ln2_g"], True), (e["ln2_b"], True),
        (params["enc_norm_g"], False), (params["enc_norm_b"], False),
    ]
    mem = _stack_call(_encoder_stack_kernel, enc_inputs,
                      jax.ShapeDtypeStruct((rows, E), jnp.float32),
                      L, (rows, E), H=H, dh=dh)

    # ---- decoder stack + final decoder norm + output fc (one pallas_call) ----
    d = params["dec"]
    dec_inputs = [
        (x, False), (mem, False), (attn_bias, False),
        (d["sa_wq"], True), (d["sa_bq"], True), (d["sa_wk"], True), (d["sa_bk"], True),
        (d["sa_wv"], True), (d["sa_bv"], True), (d["sa_wo"], True), (d["sa_bo"], True),
        (d["ln1_g"], True), (d["ln1_b"], True),
        (d["ca_wq"], True), (d["ca_bq"], True), (d["ca_wk"], True), (d["ca_bk"], True),
        (d["ca_wv"], True), (d["ca_bv"], True), (d["ca_wo"], True), (d["ca_bo"], True),
        (d["ln2_g"], True), (d["ln2_b"], True),
        (d["w1"], True), (d["b1"], True), (d["w2"], True), (d["b2"], True),
        (d["ln3_g"], True), (d["ln3_b"], True),
        (params["dec_norm_g"], False), (params["dec_norm_b"], False),
        (params["fc_w"], False), (params["fc_b"], False),
    ]
    pred_rows = _stack_call(_decoder_stack_kernel, dec_inputs,
                            jax.ShapeDtypeStruct((rows, 1), jnp.float32),
                            L, (rows, E), H=H, dh=dh)

    # select the last sequence position of each batch element -> (B, 1)
    return pred_rows.reshape(B, S)[:, -1:]


# ----------------------------- parameter init -------------------------------------------

def make_positional_encoding(max_len, d_model):
    position = jnp.arange(max_len, dtype=jnp.float32)[:, None]
    div_term = jnp.exp(jnp.arange(0, d_model, 2, dtype=jnp.float32)
                       * (-math.log(10000.0) / d_model))
    pe = jnp.zeros((max_len, d_model), jnp.float32)
    pe = pe.at[:, 0::2].set(jnp.sin(position * div_term))
    pe = pe.at[:, 1::2].set(jnp.cos(position * div_term))
    return pe   # (max_len, d_model)


def init_params(key, input_size, embed_dim, num_heads, num_layers,
                dim_ff=2048, max_len=5000):
    E, H, L, F = embed_dim, num_heads, num_layers, dim_ff
    dh = E // H
    keys = iter(jax.random.split(key, 64))

    def rnd(shape, scale=0.05, dtype=jnp.float32):
        return (jax.random.normal(next(keys), shape, jnp.float32) * scale).astype(dtype)

    def bf16_w(shape):
        return rnd(shape, dtype=jnp.bfloat16)     # matmul weights stored in bf16

    def mha_p(prefix):
        return {
            prefix + "wq": bf16_w((L, H, E, dh)),
            prefix + "bq": jnp.zeros((L, H, 1, dh), jnp.float32),
            prefix + "wk": bf16_w((L, H, E, dh)),
            prefix + "bk": jnp.zeros((L, H, 1, dh), jnp.float32),
            prefix + "wv": bf16_w((L, H, E, dh)),
            prefix + "bv": jnp.zeros((L, H, 1, dh), jnp.float32),
            prefix + "wo": bf16_w((L, H, dh, E)),
            prefix + "bo": jnp.zeros((L, 1, E), jnp.float32),
        }

    def ln_p(name):
        return {name + "_g": jnp.ones((L, 1, E), jnp.float32),
                name + "_b": jnp.zeros((L, 1, E), jnp.float32)}

    def ffn_p():
        return {"w1": bf16_w((L, E, F)), "b1": rnd((L, 1, F)),
                "w2": bf16_w((L, F, E)), "b2": rnd((L, 1, E))}

    enc = {**mha_p("sa_"), **ln_p("ln1"), **ffn_p(), **ln_p("ln2")}
    dec = {**mha_p("sa_"), **ln_p("ln1"), **mha_p("ca_"), **ln_p("ln2"),
           **ffn_p(), **ln_p("ln3")}

    return {
        "emb_w": rnd((input_size, E)),
        "emb_b": rnd((1, E)),
        "pe": make_positional_encoding(max_len, E),
        "enc": enc,
        "dec": dec,
        "enc_norm_g": jnp.ones((1, E), jnp.float32),
        "enc_norm_b": jnp.zeros((1, E), jnp.float32),
        "dec_norm_g": jnp.ones((1, E), jnp.float32),
        "dec_norm_b": jnp.zeros((1, E), jnp.float32),
        "fc_w": rnd((1, E)),
        "fc_b": rnd((1, 1)),
    }


# ----------------------------- main ------------------------------------------------------

if __name__ == "__main__":
    # small shapes consistent with the module
    B, S = 2, 8
    input_size, embed_dim, num_heads, num_layers = 4, 32, 4, 2

    key = jax.random.PRNGKey(0)
    pkey, xkey = jax.random.split(key)

    params = init_params(pkey, input_size, embed_dim, num_heads, num_layers)
    src = jax.random.normal(xkey, (B, S, input_size), jnp.float32)

    fwd = jax.jit(functools.partial(transformer_model_forward, num_heads=num_heads))
    out = jax.block_until_ready(fwd(params, src))

    assert out.shape == (B, 1), out.shape
    assert jnp.all(jnp.isfinite(out))
    print("KERNEL_OK")
</pallas_src>

<mosaic_0001>
module attributes {stable_mosaic.version = 11 : i64} {
  func.func @_embed_kernel(%arg0: memref<16x4xf32, #tpu.memory_space<vmem>>, %arg1: memref<4x32xf32, #tpu.memory_space<vmem>>, %arg2: memref<1x32xf32, #tpu.memory_space<vmem>>, %arg3: memref<16x32xf32, #tpu.memory_space<vmem>>, %arg4: memref<16x32xf32, #tpu.memory_space<vmem>>) attributes {dimension_semantics = [], scalar_prefetch = 0 : i64, scratch_operands = 0 : i64, tpu.core_type = #tpu.core_type<tc>} {
    %c0 = arith.constant 0 : index
    %c0_0 = arith.constant 0 : index
    %0 = vector.load %arg0[%c0, %c0_0] : memref<16x4xf32, #tpu.memory_space<vmem>>, vector<16x4xf32>
    %c0_1 = arith.constant 0 : index
    %c0_2 = arith.constant 0 : index
    %1 = vector.load %arg1[%c0_1, %c0_2] : memref<4x32xf32, #tpu.memory_space<vmem>>, vector<4x32xf32>
    %cst = arith.constant dense<0.000000e+00> : vector<16x32xf32>
    %2 = tpu.matmul %0, %1, %cst {dimension_numbers = #tpu.dot_dimension_numbers<[1], [0], [0], [1], [0, 0, 1, 1], [], []>} : vector<16x4xf32>, vector<4x32xf32>, vector<16x32xf32> -> vector<16x32xf32>
    %c0_3 = arith.constant 0 : index
    %c0_4 = arith.constant 0 : index
    %3 = vector.load %arg2[%c0_3, %c0_4] : memref<1x32xf32, #tpu.memory_space<vmem>>, vector<1x32xf32>
    %4 = vector.broadcast %3 : vector<1x32xf32> to vector<16x32xf32>
    %5 = arith.addf %2, %4 : vector<16x32xf32>
    %c0_5 = arith.constant 0 : index
    %c0_6 = arith.constant 0 : index
    %6 = vector.load %arg3[%c0_5, %c0_6] : memref<16x32xf32, #tpu.memory_space<vmem>>, vector<16x32xf32>
    %7 = arith.addf %5, %6 : vector<16x32xf32>
    %c0_7 = arith.constant 0 : index
    %c0_8 = arith.constant 0 : index
    %8 = vector.load %arg4[%c0_7, %c0_8] : memref<16x32xf32, #tpu.memory_space<vmem>>, vector<16x32xf32>
    tpu.vector_store %arg4[%c0_7, %c0_8], %7 {strides = array<i32>} : memref<16x32xf32, #tpu.memory_space<vmem>>, vector<16x32xf32>,
    return
  }
}

module attributes {stable_mosaic.version = 11 : i64} {
  func.func @_encoder_stack_kernel(%arg0: i32, %arg1: memref<16x32xf32, #tpu.memory_space<vmem>>, %arg2: memref<16x16xf32, #tpu.memory_space<vmem>>, %arg3: memref<1x4x32x8xbf16, #tpu.memory_space<vmem>>, %arg4: memref<1x4x1x8xf32, #tpu.memory_space<vmem>>, %arg5: memref<1x4x32x8xbf16, #tpu.memory_space<vmem>>, %arg6: memref<1x4x1x8xf32, #tpu.memory_space<vmem>>, %arg7: memref<1x4x32x8xbf16, #tpu.memory_space<vmem>>, %arg8: memref<1x4x1x8xf32, #tpu.memory_space<vmem>>, %arg9: memref<1x4x8x32xbf16, #tpu.memory_space<vmem>>, %arg10: memref<1x1x32xf32, #tpu.memory_space<vmem>>, %arg11: memref<1x1x32xf32, #tpu.memory_space<vmem>>, %arg12: memref<1x1x32xf32, #tpu.memory_space<vmem>>, %arg13: memref<1x32x2048xbf16, #tpu.memory_space<vmem>>, %arg14: memref<1x1x2048xf32, #tpu.memory_space<vmem>>, %arg15: memref<1x2048x32xbf16, #tpu.memory_space<vmem>>, %arg16: memref<1x1x32xf32, #tpu.memory_space<vmem>>, %arg17: memref<1x1x32xf32, #tpu.memory_space<vmem>>, %arg18: memref<1x1x32xf32, #tpu.memory_space<vmem>>, %arg19: memref<1x32xf32, #tpu.memory_space<vmem>>, %arg20: memref<1x32xf32, #tpu.memory_space<vmem>>, %arg21: memref<16x32xf32, #tpu.memory_space<vmem>>, %arg22: memref<16x32xf32, #tpu.memory_space<vmem>>) attributes {dimension_semantics = [#tpu.dimension_semantics<arbitrary>], iteration_bounds = array<i64: 2>, scalar_prefetch = 0 : i64, scratch_operands = 1 : i64, tpu.core_type = #tpu.core_type<tc>, window_params = [{pipeline_mode = #tpu.pipeline_mode<synchronous>, transform_indices = @transform_0, window_bounds = array<i64: 16, 32>}, {pipeline_mode = #tpu.pipeline_mode<synchronous>, transform_indices = @transform_1, window_bounds = array<i64: 16, 16>}, {transform_indices = @transform_2, window_bounds = array<i64: 1, 4, 32, 8>}, {transform_indices = @transform_3, window_bounds = array<i64: 1, 4, 1, 8>}, {transform_indices = @transform_4, window_bounds = array<i64: 1, 4, 32, 8>}, {transform_indices = @transform_5, window_bounds = array<i64: 1, 4, 1, 8>}, {transform_indices = @transform_6, window_bounds = array<i64: 1, 4, 32, 8>}, {transform_indices = @transform_7, window_bounds = array<i64: 1, 4, 1, 8>}, {transform_indices = @transform_8, window_bounds = array<i64: 1, 4, 8, 32>}, {transform_indices = @transform_9, window_bounds = array<i64: 1, 1, 32>}, {transform_indices = @transform_10, window_bounds = array<i64: 1, 1, 32>}, {transform_indices = @transform_11, window_bounds = array<i64: 1, 1, 32>}, {transform_indices = @transform_12, window_bounds = array<i64: 1, 32, 2048>}, {transform_indices = @transform_13, window_bounds = array<i64: 1, 1, 2048>}, {transform_indices = @transform_14, window_bounds = array<i64: 1, 2048, 32>}, {transform_indices = @transform_15, window_bounds = array<i64: 1, 1, 32>}, {transform_indices = @transform_16, window_bounds = array<i64: 1, 1, 32>}, {transform_indices = @transform_17, window_bounds = array<i64: 1, 1, 32>}, {pipeline_mode = #tpu.pipeline_mode<synchronous>, transform_indices = @transform_18, window_bounds = array<i64: 1, 32>}, {pipeline_mode = #tpu.pipeline_mode<synchronous>, transform_indices = @transform_19, window_bounds = array<i64: 1, 32>}, {pipeline_mode = #tpu.pipeline_mode<synchronous>, transform_indices = @transform_20, window_bounds = array<i64: 16, 32>}]} {
    %c0_i32 = arith.constant 0 : i32
    %0 = arith.cmpi eq, %arg0, %c0_i32 : i32
    %1 = arith.extui %0 : i1 to i32
    %c0_i32_0 = arith.constant 0 : i32
    %2 = arith.cmpi ne, %1, %c0_i32_0 : i32
    scf.if %2 {
      %c0_110 = arith.constant 0 : index
      %c0_111 = arith.constant 0 : index
      %260 = vector.load %arg1[%c0_110, %c0_111] : memref<16x32xf32, #tpu.memory_space<vmem>>, vector<16x32xf32>
      %c0_112 = arith.constant 0 : index
      %c0_113 = arith.constant 0 : index
      %261 = vector.load %arg22[%c0_112, %c0_113] : memref<16x32xf32, #tpu.memory_space<vmem>>, vector<16x32xf32>
      tpu.vector_store %arg22[%c0_112, %c0_113], %260 {strides = array<i32>} : memref<16x32xf32, #tpu.memory_space<vmem>>, vector<16x32xf32>,
    } else {
    }
    %c0 = arith.constant 0 : index
    %c0_1 = arith.constant 0 : index
    %3 = vector.load %arg22[%c0, %c0_1] : memref<16x32xf32, #tpu.memory_space<vmem>>, vector<16x32xf32>
    %c0_2 = arith.constant 0 : index
    %c0_3 = arith.constant 0 : index
    %4 = vector.load %arg2[%c0_2, %c0_3] : memref<16x16xf32, #tpu.memory_space<vmem>>, vector<16x16xf32>
    %c0_4 = arith.constant 0 : index
    %c0_5 = arith.constant 0 : index
    %c0_6 = arith.constant 0 : index
    %c0_7 = arith.constant 0 : index
    %5 = vector.load %arg3[%c0_4, %c0_5, %c0_6, %c0_7] : memref<1x4x32x8xbf16, #tpu.memory_space<vmem>>, vector<1x4x32x8xbf16>
    %6 = vector.shape_cast %5 : vector<1x4x32x8xbf16> to vector<4x32x8xbf16>
    %c0_8 = arith.constant 0 : index
    %c0_9 = arith.constant 0 : index
    %c0_10 = arith.constant 0 : index
    %c0_11 = arith.constant 0 : index
    %7 = vector.load %arg4[%c0_8, %c0_9, %c0_10, %c0_11] : memref<1x4x1x8xf32, #tpu.memory_space<vmem>>, vector<1x4x1x8xf32>
    %8 = vector.shape_cast %7 : vector<1x4x1x8xf32> to vector<4x1x8xf32>
    %c0_12 = arith.constant 0 : index
    %c0_13 = arith.constant 0 : index
    %c0_14 = arith.constant 0 : index
    %c0_15 = arith.constant 0 : index
    %9 = vector.load %arg5[%c0_12, %c0_13, %c0_14, %c0_15] : memref<1x4x32x8xbf16, #tpu.memory_space<vmem>>, vector<1x4x32x8xbf16>
    %10 = vector.shape_cast %9 : vector<1x4x32x8xbf16> to vector<4x32x8xbf16>
    %c0_16 = arith.constant 0 : index
    %c0_17 = arith.constant 0 : index
    %c0_18 = arith.constant 0 : index
    %c0_19 = arith.constant 0 : index
    %11 = vector.load %arg6[%c0_16, %c0_17, %c0_18, %c0_19] : memref<1x4x1x8xf32, #tpu.memory_space<vmem>>, vector<1x4x1x8xf32>
    %12 = vector.shape_cast %11 : vector<1x4x1x8xf32> to vector<4x1x8xf32>
    %c0_20 = arith.constant 0 : index
    %c0_21 = arith.constant 0 : index
    %c0_22 = arith.constant 0 : index
    %c0_23 = arith.constant 0 : index
    %13 = vector.load %arg7[%c0_20, %c0_21, %c0_22, %c0_23] : memref<1x4x32x8xbf16, #tpu.memory_space<vmem>>, vector<1x4x32x8xbf16>
    %14 = vector.shape_cast %13 : vector<1x4x32x8xbf16> to vector<4x32x8xbf16>
    %c0_24 = arith.constant 0 : index
    %c0_25 = arith.constant 0 : index
    %c0_26 = arith.constant 0 : index
    %c0_27 = arith.constant 0 : index
    %15 = vector.load %arg8[%c0_24, %c0_25, %c0_26, %c0_27] : memref<1x4x1x8xf32, #tpu.memory_space<vmem>>, vector<1x4x1x8xf32>
    %16 = vector.shape_cast %15 : vector<1x4x1x8xf32> to vector<4x1x8xf32>
    %c0_28 = arith.constant 0 : index
    %c0_29 = arith.constant 0 : index
    %c0_30 = arith.constant 0 : index
    %c0_31 = arith.constant 0 : index
    %17 = vector.load %arg9[%c0_28, %c0_29, %c0_30, %c0_31] : memref<1x4x8x32xbf16, #tpu.memory_space<vmem>>, vector<1x4x8x32xbf16>
    %18 = vector.shape_cast %17 : vector<1x4x8x32xbf16> to vector<4x8x32xbf16>
    %c0_32 = arith.constant 0 : index
    %c0_33 = arith.constant 0 : index
    %c0_34 = arith.constant 0 : index
    %19 = vector.load %arg10[%c0_32, %c0_33, %c0_34] : memref<1x1x32xf32, #tpu.memory_space<vmem>>, vector<1x1x32xf32>
    %20 = vector.shape_cast %19 : vector<1x1x32xf32> to vector<1x32xf32>
    %21 = arith.truncf %3 : vector<16x32xf32> to vector<16x32xbf16>
    %22 = arith.truncf %3 : vector<16x32xf32> to vector<16x32xbf16>
    %23 = vector.extract_strided_slice %6 {offsets = [0, 0, 0], sizes = [1, 32, 8], strides = [1, 1, 1]} : vector<4x32x8xbf16> to vector<1x32x8xbf16>
    %24 = vector.shape_cast %23 : vector<1x32x8xbf16> to vector<32x8xbf16>
    %cst = arith.constant dense<0.000000e+00> : vector<16x8xf32>
    %25 = tpu.matmul %21, %24, %cst {dimension_numbers = #tpu.dot_dimension_numbers<[1], [0], [0], [1], [0, 0, 1, 1], [], []>} : vector<16x32xbf16>, vector<32x8xbf16>, vector<16x8xf32> -> vector<16x8xf32>
    %26 = vector.extract_strided_slice %8 {offsets = [0, 0, 0], sizes = [1, 1, 8], strides = [1, 1, 1]} : vector<4x1x8xf32> to vector<1x1x8xf32>
    %27 = vector.shape_cast %26 : vector<1x1x8xf32> to vector<1x8xf32>
    %28 = vector.broadcast %27 : vector<1x8xf32> to vector<16x8xf32>
    %29 = arith.addf %25, %28 : vector<16x8xf32>
    %30 = vector.extract_strided_slice %10 {offsets = [0, 0, 0], sizes = [1, 32, 8], strides = [1, 1, 1]} : vector<4x32x8xbf16> to vector<1x32x8xbf16>
    %31 = vector.shape_cast %30 : vector<1x32x8xbf16> to vector<32x8xbf16>
    %cst_35 = arith.constant dense<0.000000e+00> : vector<16x8xf32>
    %32 = tpu.matmul %22, %31, %cst_35 {dimension_numbers = #tpu.dot_dimension_numbers<[1], [0], [0], [1], [0, 0, 1, 1], [], []>} : vector<16x32xbf16>, vector<32x8xbf16>, vector<16x8xf32> -> vector<16x8xf32>
    %33 = vector.extract_strided_slice %12 {offsets = [0, 0, 0], sizes = [1, 1, 8], strides = [1, 1, 1]} : vector<4x1x8xf32> to vector<1x1x8xf32>
    %34 = vector.shape_cast %33 : vector<1x1x8xf32> to vector<1x8xf32>
    %35 = vector.broadcast %34 : vector<1x8xf32> to vector<16x8xf32>
    %36 = arith.addf %32, %35 : vector<16x8xf32>
    %37 = vector.extract_strided_slice %14 {offsets = [0, 0, 0], sizes = [1, 32, 8], strides = [1, 1, 1]} : vector<4x32x8xbf16> to vector<1x32x8xbf16>
    %38 = vector.shape_cast %37 : vector<1x32x8xbf16> to vector<32x8xbf16>
    %cst_36 = arith.constant dense<0.000000e+00> : vector<16x8xf32>
    %39 = tpu.matmul %22, %38, %cst_36 {dimension_numbers = #tpu.dot_dimension_numbers<[1], [0], [0], [1], [0, 0, 1, 1], [], []>} : vector<16x32xbf16>, vector<32x8xbf16>, vector<16x8xf32> -> vector<16x8xf32>
    %40 = vector.extract_strided_slice %16 {offsets = [0, 0, 0], sizes = [1, 1, 8], strides = [1, 1, 1]} : vector<4x1x8xf32> to vector<1x1x8xf32>
    %41 = vector.shape_cast %40 : vector<1x1x8xf32> to vector<1x8xf32>
    %42 = vector.broadcast %41 : vector<1x8xf32> to vector<16x8xf32>
    %43 = arith.addf %39, %42 : vector<16x8xf32>
    %cst_37 = arith.constant dense<0.000000e+00> : vector<16x16xf32>
    %44 = tpu.matmul %29, %36, %cst_37 {dimension_numbers = #tpu.dot_dimension_numbers<[1], [1], [0], [0], [0, 0, 1, 0], [], []>} : vector<16x8xf32>, vector<16x8xf32>, vector<16x16xf32> -> vector<16x16xf32>
    %cst_38 = arith.constant 0.353553385 : f32
    %45 = vector.broadcast %cst_38 : f32 to vector<16x16xf32>
    %46 = arith.mulf %44, %45 : vector<16x16xf32>
    %47 = arith.addf %46, %4 : vector<16x16xf32>
    %cst_39 = arith.constant dense<0xFF800000> : vector<16xf32>
    %48 = vector.multi_reduction <maximumf>, %47, %cst_39 [1] : vector<16x16xf32> to vector<16xf32>
    %49 = vector.shape_cast %48 : vector<16xf32> to vector<16x1xf32>
    %50 = vector.broadcast %49 : vector<16x1xf32> to vector<16x16xf32>
    %51 = arith.subf %47, %50 : vector<16x16xf32>
    %52 = math.exp %51 : vector<16x16xf32>
    %cst_40 = arith.constant dense<0.000000e+00> : vector<16xf32>
    %53 = vector.multi_reduction <add>, %52, %cst_40 [1] : vector<16x16xf32> to vector<16xf32>
    %54 = vector.shape_cast %53 : vector<16xf32> to vector<16x1xf32>
    %55 = tpu.reciprocal %54 {approx = true} : vector<16x1xf32> -> vector<16x1xf32>
    %56 = vector.broadcast %55 : vector<16x1xf32> to vector<16x16xf32>
    %57 = arith.mulf %52, %56 : vector<16x16xf32>
    %cst_41 = arith.constant dense<0.000000e+00> : vector<16x8xf32>
    %58 = tpu.matmul %57, %43, %cst_41 {dimension_numbers = #tpu.dot_dimension_numbers<[1], [0], [0], [1], [0, 0, 1, 1], [], []>} : vector<16x16xf32>, vector<16x8xf32>, vector<16x8xf32> -> vector<16x8xf32>
    %59 = arith.truncf %58 : vector<16x8xf32> to vector<16x8xbf16>
    %60 = vector.extract_strided_slice %18 {offsets = [0, 0, 0], sizes = [1, 8, 32], strides = [1, 1, 1]} : vector<4x8x32xbf16> to vector<1x8x32xbf16>
    %61 = vector.shape_cast %60 : vector<1x8x32xbf16> to vector<8x32xbf16>
    %cst_42 = arith.constant dense<0.000000e+00> : vector<16x32xf32>
    %62 = tpu.matmul %59, %61, %cst_42 {dimension_numbers = #tpu.dot_dimension_numbers<[1], [0], [0], [1], [0, 0, 1, 1], [], []>} : vector<16x8xbf16>, vector<8x32xbf16>, vector<16x32xf32> -> vector<16x32xf32>
    %63 = vector.extract_strided_slice %6 {offsets = [1, 0, 0], sizes = [1, 32, 8], strides = [1, 1, 1]} : vector<4x32x8xbf16> to vector<1x32x8xbf16>
    %64 = vector.shape_cast %63 : vector<1x32x8xbf16> to vector<32x8xbf16>
    %cst_43 = arith.constant dense<0.000000e+00> : vector<16x8xf32>
    %65 = tpu.matmul %21, %64, %cst_43 {dimension_numbers = #tpu.dot_dimension_numbers<[1], [0], [0], [1], [0, 0, 1, 1], [], []>} : vector<16x32xbf16>, vector<32x8xbf16>, vector<16x8xf32> -> vector<16x8xf32>
    %66 = vector.extract_strided_slice %8 {offsets = [1, 0, 0], sizes = [1, 1, 8], strides = [1, 1, 1]} : vector<4x1x8xf32> to vector<1x1x8xf32>
    %67 = vector.shape_cast %66 : vector<1x1x8xf32> to vector<1x8xf32>
    %68 = vector.broadcast %67 : vector<1x8xf32> to vector<16x8xf32>
    %69 = arith.addf %65, %68 : vector<16x8xf32>
    %70 = vector.extract_strided_slice %10 {offsets = [1, 0, 0], sizes = [1, 32, 8], strides = [1, 1, 1]} : vector<4x32x8xbf16> to vector<1x32x8xbf16>
    %71 = vector.shape_cast %70 : vector<1x32x8xbf16> to vector<32x8xbf16>
    %cst_44 = arith.constant dense<0.000000e+00> : vector<16x8xf32>
    %72 = tpu.matmul %22, %71, %cst_44 {dimension_numbers = #tpu.dot_dimension_numbers<[1], [0], [0], [1], [0, 0, 1, 1], [], []>} : vector<16x32xbf16>, vector<32x8xbf16>, vector<16x8xf32> -> vector<16x8xf32>
    %73 = vector.extract_strided_slice %12 {offsets = [1, 0, 0], sizes = [1, 1, 8], strides = [1, 1, 1]} : vector<4x1x8xf32> to vector<1x1x8xf32>
    %74 = vector.shape_cast %73 : vector<1x1x8xf32> to vector<1x8xf32>
    %75 = vector.broadcast %74 : vector<1x8xf32> to vector<16x8xf32>
    %76 = arith.addf %72, %75 : vector<16x8xf32>
    %77 = vector.extract_strided_slice %14 {offsets = [1, 0, 0], sizes = [1, 32, 8], strides = [1, 1, 1]} : vector<4x32x8xbf16> to vector<1x32x8xbf16>
    %78 = vector.shape_cast %77 : vector<1x32x8xbf16> to vector<32x8xbf16>
    %cst_45 = arith.constant dense<0.000000e+00> : vector<16x8xf32>
    %79 = tpu.matmul %22, %78, %cst_45 {dimension_numbers = #tpu.dot_dimension_numbers<[1], [0], [0], [1], [0, 0, 1, 1], [], []>} : vector<16x32xbf16>, vector<32x8xbf16>, vector<16x8xf32> -> vector<16x8xf32>
    %80 = vector.extract_strided_slice %16 {offsets = [1, 0, 0], sizes = [1, 1, 8], strides = [1, 1, 1]} : vector<4x1x8xf32> to vector<1x1x8xf32>
    %81 = vector.shape_cast %80 : vector<1x1x8xf32> to vector<1x8xf32>
    %82 = vector.broadcast %81 : vector<1x8xf32> to vector<16x8xf32>
    %83 = arith.addf %79, %82 : vector<16x8xf32>
    %cst_46 = arith.constant dense<0.000000e+00> : vector<16x16xf32>
    %84 = tpu.matmul %69, %76, %cst_46 {dimension_numbers = #tpu.dot_dimension_numbers<[1], [1], [0], [0], [0, 0, 1, 0], [], []>} : vector<16x8xf32>, vector<16x8xf32>, vector<16x16xf32> -> vector<16x16xf32>
    %cst_47 = arith.constant 0.353553385 : f32
    %85 = vector.broadcast %cst_47 : f32 to vector<16x16xf32>
    %86 = arith.mulf %84, %85 : vector<16x16xf32>
    %87 = arith.addf %86, %4 : vector<16x16xf32>
    %cst_48 = arith.constant dense<0xFF800000> : vector<16xf32>
    %88 = vector.multi_reduction <maximumf>, %87, %cst_48 [1] : vector<16x16xf32> to vector<16xf32>
    %89 = vector.shape_cast %88 : vector<16xf32> to vector<16x1xf32>
    %90 = vector.broadcast %89 : vector<16x1xf32> to vector<16x16xf32>
    %91 = arith.subf %87, %90 : vector<16x16xf32>
    %92 = math.exp %91 : vector<16x16xf32>
    %cst_49 = arith.constant dense<0.000000e+00> : vector<16xf32>
    %93 = vector.multi_reduction <add>, %92, %cst_49 [1] : vector<16x16xf32> to vector<16xf32>
    %94 = vector.shape_cast %93 : vector<16xf32> to vector<16x1xf32>
    %95 = tpu.reciprocal %94 {approx = true} : vector<16x1xf32> -> vector<16x1xf32>
    %96 = vector.broadcast %95 : vector<16x1xf32> to vector<16x16xf32>
    %97 = arith.mulf %92, %96 : vector<16x16xf32>
    %cst_50 = arith.constant dense<0.000000e+00> : vector<16x8xf32>
    %98 = tpu.matmul %97, %83, %cst_50 {dimension_numbers = #tpu.dot_dimension_numbers<[1], [0], [0], [1], [0, 0, 1, 1], [], []>} : vector<16x16xf32>, vector<16x8xf32>, vector<16x8xf32> -> vector<16x8xf32>
    %99 = arith.truncf %98 : vector<16x8xf32> to vector<16x8xbf16>
    %100 = vector.extract_strided_slice %18 {offsets = [1, 0, 0], sizes = [1, 8, 32], strides = [1, 1, 1]} : vector<4x8x32xbf16> to vector<1x8x32xbf16>
    %101 = vector.shape_cast %100 : vector<1x8x32xbf16> to vector<8x32xbf16>
    %cst_51 = arith.constant dense<0.000000e+00> : vector<16x32xf32>
    %102 = tpu.matmul %99, %101, %cst_51 {dimension_numbers = #tpu.dot_dimension_numbers<[1], [0], [0], [1], [0, 0, 1, 1], [], []>} : vector<16x8xbf16>, vector<8x32xbf16>, vector<16x32xf32> -> vector<16x32xf32>
    %103 = arith.addf %62, %102 : vector<16x32xf32>
    %104 = vector.extract_strided_slice %6 {offsets = [2, 0, 0], sizes = [1, 32, 8], strides = [1, 1, 1]} : vector<4x32x8xbf16> to vector<1x32x8xbf16>
    %105 = vector.shape_cast %104 : vector<1x32x8xbf16> to vector<32x8xbf16>
    %cst_52 = arith.constant dense<0.000000e+00> : vector<16x8xf32>
    %106 = tpu.matmul %21, %105, %cst_52 {dimension_numbers = #tpu.dot_dimension_numbers<[1], [0], [0], [1], [0, 0, 1, 1], [], []>} : vector<16x32xbf16>, vector<32x8xbf16>, vector<16x8xf32> -> vector<16x8xf32>
    %107 = vector.extract_strided_slice %8 {offsets = [2, 0, 0], sizes = [1, 1, 8], strides = [1, 1, 1]} : vector<4x1x8xf32> to vector<1x1x8xf32>
    %108 = vector.shape_cast %107 : vector<1x1x8xf32> to vector<1x8xf32>
    %109 = vector.broadcast %108 : vector<1x8xf32> to vector<16x8xf32>
    %110 = arith.addf %106, %109 : vector<16x8xf32>
    %111 = vector.extract_strided_slice %10 {offsets = [2, 0, 0], sizes = [1, 32, 8], strides = [1, 1, 1]} : vector<4x32x8xbf16> to vector<1x32x8xbf16>
    %112 = vector.shape_cast %111 : vector<1x32x8xbf16> to vector<32x8xbf16>
    %cst_53 = arith.constant dense<0.000000e+00> : vector<16x8xf32>
    %113 = tpu.matmul %22, %112, %cst_53 {dimension_numbers = #tpu.dot_dimension_numbers<[1], [0], [0], [1], [0, 0, 1, 1], [], []>} : vector<16x32xbf16>, vector<32x8xbf16>, vector<16x8xf32> -> vector<16x8xf32>
    %114 = vector.extract_strided_slice %12 {offsets = [2, 0, 0], sizes = [1, 1, 8], strides = [1, 1, 1]} : vector<4x1x8xf32> to vector<1x1x8xf32>
    %115 = vector.shape_cast %114 : vector<1x1x8xf32> to vector<1x8xf32>
    %116 = vector.broadcast %115 : vector<1x8xf32> to vector<16x8xf32>
    %117 = arith.addf %113, %116 : vector<16x8xf32>
    %118 = vector.extract_strided_slice %14 {offsets = [2, 0, 0], sizes = [1, 32, 8], strides = [1, 1, 1]} : vector<4x32x8xbf16> to vector<1x32x8xbf16>
    %119 = vector.shape_cast %118 : vector<1x32x8xbf16> to vector<32x8xbf16>
    %cst_54 = arith.constant dense<0.000000e+00> : vector<16x8xf32>
    %120 = tpu.matmul %22, %119, %cst_54 {dimension_numbers = #tpu.dot_dimension_numbers<[1], [0], [0], [1], [0, 0, 1, 1], [], []>} : vector<16x32xbf16>, vector<32x8xbf16>, vector<16x8xf32> -> vector<16x8xf32>
    %121 = vector.extract_strided_slice %16 {offsets = [2, 0, 0], sizes = [1, 1, 8], strides = [1, 1, 1]} : vector<4x1x8xf32> to vector<1x1x8xf32>
    %122 = vector.shape_cast %121 : vector<1x1x8xf32> to vector<1x8xf32>
    %123 = vector.broadcast %122 : vector<1x8xf32> to vector<16x8xf32>
    %124 = arith.addf %120, %123 : vector<16x8xf32>
    %cst_55 = arith.constant dense<0.000000e+00> : vector<16x16xf32>
    %125 = tpu.matmul %110, %117, %cst_55 {dimension_numbers = #tpu.dot_dimension_numbers<[1], [1], [0], [0], [0, 0, 1, 0], [], []>} : vector<16x8xf32>, vector<16x8xf32>, vector<16x16xf32> -> vector<16x16xf32>
    %cst_56 = arith.constant 0.353553385 : f32
    %126 = vector.broadcast %cst_56 : f32 to vector<16x16xf32>
    %127 = arith.mulf %125, %126 : vector<16x16xf32>
    %128 = arith.addf %127, %4 : vector<16x16xf32>
    %cst_57 = arith.constant dense<0xFF800000> : vector<16xf32>
    %129 = vector.multi_reduction <maximumf>, %128, %cst_57 [1] : vector<16x16xf32> to vector<16xf32>
    %130 = vector.shape_cast %129 : vector<16xf32> to vector<16x1xf32>
    %131 = vector.broadcast %130 : vector<16x1xf32> to vector<16x16xf32>
    %132 = arith.subf %128, %131 : vector<16x16xf32>
    %133 = math.exp %132 : vector<16x16xf32>
    %cst_58 = arith.constant dense<0.000000e+00> : vector<16xf32>
    %134 = vector.multi_reduction <add>, %133, %cst_58 [1] : vector<16x16xf32> to vector<16xf32>
    %135 = vector.shape_cast %134 : vector<16xf32> to vector<16x1xf32>
    %136 = tpu.reciprocal %135 {approx = true} : vector<16x1xf32> -> vector<16x1xf32>
    %137 = vector.broadcast %136 : vector<16x1xf32> to vector<16x16xf32>
    %138 = arith.mulf %133, %137 : vector<16x16xf32>
    %cst_59 = arith.constant dense<0.000000e+00> : vector<16x8xf32>
    %139 = tpu.matmul %138, %124, %cst_59 {dimension_numbers = #tpu.dot_dimension_numbers<[1], [0], [0], [1], [0, 0, 1, 1], [], []>} : vector<16x16xf32>, vector<16x8xf32>, vector<16x8xf32> -> vector<16x8xf32>
    %140 = arith.truncf %139 : vector<16x8xf32> to vector<16x8xbf16>
    %141 = vector.extract_strided_slice %18 {offsets = [2, 0, 0], sizes = [1, 8, 32], strides = [1, 1, 1]} : vector<4x8x32xbf16> to vector<1x8x32xbf16>
    %142 = vector.shape_cast %141 : vector<1x8x32xbf16> to vector<8x32xbf16>
    %cst_60 = arith.constant dense<0.000000e+00> : vector<16x32xf32>
    %143 = tpu.matmul %140, %142, %cst_60 {dimension_numbers = #tpu.dot_dimension_numbers<[1], [0], [0], [1], [0, 0, 1, 1], [], []>} : vector<16x8xbf16>, vector<8x32xbf16>, vector<16x32xf32> -> vector<16x32xf32>
    %144 = arith.addf %103, %143 : vector<16x32xf32>
    %145 = vector.extract_strided_slice %6 {offsets = [3, 0, 0], sizes = [1, 32, 8], strides = [1, 1, 1]} : vector<4x32x8xbf16> to vector<1x32x8xbf16>
    %146 = vector.shape_cast %145 : vector<1x32x8xbf16> to vector<32x8xbf16>
    %cst_61 = arith.constant dense<0.000000e+00> : vector<16x8xf32>
    %147 = tpu.matmul %21, %146, %cst_61 {dimension_numbers = #tpu.dot_dimension_numbers<[1], [0], [0], [1], [0, 0, 1, 1], [], []>} : vector<16x32xbf16>, vector<32x8xbf16>, vector<16x8xf32> -> vector<16x8xf32>
    %148 = vector.extract_strided_slice %8 {offsets = [3, 0, 0], sizes = [1, 1, 8], strides = [1, 1, 1]} : vector<4x1x8xf32> to vector<1x1x8xf32>
    %149 = vector.shape_cast %148 : vector<1x1x8xf32> to vector<1x8xf32>
    %150 = vector.broadcast %149 : vector<1x8xf32> to vector<16x8xf32>
    %151 = arith.addf %147, %150 : vector<16x8xf32>
    %152 = vector.extract_strided_slice %10 {offsets = [3, 0, 0], sizes = [1, 32, 8], strides = [1, 1, 1]} : vector<4x32x8xbf16> to vector<1x32x8xbf16>
    %153 = vector.shape_cast %152 : vector<1x32x8xbf16> to vector<32x8xbf16>
    %cst_62 = arith.constant dense<0.000000e+00> : vector<16x8xf32>
    %154 = tpu.matmul %22, %153, %cst_62 {dimension_numbers = #tpu.dot_dimension_numbers<[1], [0], [0], [1], [0, 0, 1, 1], [], []>} : vector<16x32xbf16>, vector<32x8xbf16>, vector<16x8xf32> -> vector<16x8xf32>
    %155 = vector.extract_strided_slice %12 {offsets = [3, 0, 0], sizes = [1, 1, 8], strides = [1, 1, 1]} : vector<4x1x8xf32> to vector<1x1x8xf32>
    %156 = vector.shape_cast %155 : vector<1x1x8xf32> to vector<1x8xf32>
    %157 = vector.broadcast %156 : vector<1x8xf32> to vector<16x8xf32>
    %158 = arith.addf %154, %157 : vector<16x8xf32>
    %159 = vector.extract_strided_slice %14 {offsets = [3, 0, 0], sizes = [1, 32, 8], strides = [1, 1, 1]} : vector<4x32x8xbf16> to vector<1x32x8xbf16>
    %160 = vector.shape_cast %159 : vector<1x32x8xbf16> to vector<32x8xbf16>
    %cst_63 = arith.constant dense<0.000000e+00> : vector<16x8xf32>
    %161 = tpu.matmul %22, %160, %cst_63 {dimension_numbers = #tpu.dot_dimension_numbers<[1], [0], [0], [1], [0, 0, 1, 1], [], []>} : vector<16x32xbf16>, vector<32x8xbf16>, vector<16x8xf32> -> vector<16x8xf32>
    %162 = vector.extract_strided_slice %16 {offsets = [3, 0, 0], sizes = [1, 1, 8], strides = [1, 1, 1]} : vector<4x1x8xf32> to vector<1x1x8xf32>
    %163 = vector.shape_cast %162 : vector<1x1x8xf32> to vector<1x8xf32>
    %164 = vector.broadcast %163 : vector<1x8xf32> to vector<16x8xf32>
    %165 = arith.addf %161, %164 : vector<16x8xf32>
    %cst_64 = arith.constant dense<0.000000e+00> : vector<16x16xf32>
    %166 = tpu.matmul %151, %158, %cst_64 {dimension_numbers = #tpu.dot_dimension_numbers<[1], [1], [0], [0], [0, 0, 1, 0], [], []>} : vector<16x8xf32>, vector<16x8xf32>, vector<16x16xf32> -> vector<16x16xf32>
    %cst_65 = arith.constant 0.353553385 : f32
    %167 = vector.broadcast %cst_65 : f32 to vector<16x16xf32>
    %168 = arith.mulf %166, %167 : vector<16x16xf32>
    %169 = arith.addf %168, %4 : vector<16x16xf32>
    %cst_66 = arith.constant dense<0xFF800000> : vector<16xf32>
    %170 = vector.multi_reduction <maximumf>, %169, %cst_66 [1] : vector<16x16xf32> to vector<16xf32>
    %171 = vector.shape_cast %170 : vector<16xf32> to vector<16x1xf32>
    %172 = vector.broadcast %171 : vector<16x1xf32> to vector<16x16xf32>
    %173 = arith.subf %169, %172 : vector<16x16xf32>
    %174 = math.exp %173 : vector<16x16xf32>
    %cst_67 = arith.constant dense<0.000000e+00> : vector<16xf32>
    %175 = vector.multi_reduction <add>, %174, %cst_67 [1] : vector<16x16xf32> to vector<16xf32>
    %176 = vector.shape_cast %175 : vector<16xf32> to vector<16x1xf32>
    %177 = tpu.reciprocal %176 {approx = true} : vector<16x1xf32> -> vector<16x1xf32>
    %178 = vector.broadcast %177 : vector<16x1xf32> to vector<16x16xf32>
    %179 = arith.mulf %174, %178 : vector<16x16xf32>
    %cst_68 = arith.constant dense<0.000000e+00> : vector<16x8xf32>
    %180 = tpu.matmul %179, %165, %cst_68 {dimension_numbers = #tpu.dot_dimension_numbers<[1], [0], [0], [1], [0, 0, 1, 1], [], []>} : vector<16x16xf32>, vector<16x8xf32>, vector<16x8xf32> -> vector<16x8xf32>
    %181 = arith.truncf %180 : vector<16x8xf32> to vector<16x8xbf16>
    %182 = vector.extract_strided_slice %18 {offsets = [3, 0, 0], sizes = [1, 8, 32], strides = [1, 1, 1]} : vector<4x8x32xbf16> to vector<1x8x32xbf16>
    %183 = vector.shape_cast %182 : vector<1x8x32xbf16> to vector<8x32xbf16>
    %cst_69 = arith.constant dense<0.000000e+00> : vector<16x32xf32>
    %184 = tpu.matmul %181, %183, %cst_69 {dimension_numbers = #tpu.dot_dimension_numbers<[1], [0], [0], [1], [0, 0, 1, 1], [], []>} : vector<16x8xbf16>, vector<8x32xbf16>, vector<16x32xf32> -> vector<16x32xf32>
    %185 = arith.addf %144, %184 : vector<16x32xf32>
    %186 = vector.broadcast %20 : vector<1x32xf32> to vector<16x32xf32>
    %187 = arith.addf %185, %186 : vector<16x32xf32>
    %188 = arith.addf %3, %187 : vector<16x32xf32>
    %c0_70 = arith.constant 0 : index
    %c0_71 = arith.constant 0 : index
    %c0_72 = arith.constant 0 : index
    %189 = vector.load %arg11[%c0_70, %c0_71, %c0_72] : memref<1x1x32xf32, #tpu.memory_space<vmem>>, vector<1x1x32xf32>
    %190 = vector.shape_cast %189 : vector<1x1x32xf32> to vector<1x32xf32>
    %c0_73 = arith.constant 0 : index
    %c0_74 = arith.constant 0 : index
    %c0_75 = arith.constant 0 : index
    %191 = vector.load %arg12[%c0_73, %c0_74, %c0_75] : memref<1x1x32xf32, #tpu.memory_space<vmem>>, vector<1x1x32xf32>
    %192 = vector.shape_cast %191 : vector<1x1x32xf32> to vector<1x32xf32>
    %cst_76 = arith.constant dense<0.000000e+00> : vector<16xf32>
    %193 = vector.multi_reduction <add>, %188, %cst_76 [1] : vector<16x32xf32> to vector<16xf32>
    %194 = vector.shape_cast %193 : vector<16xf32> to vector<16x1xf32>
    %cst_77 = arith.constant 3.200000e+01 : f32
    %195 = vector.broadcast %cst_77 : f32 to vector<16x1xf32>
    %196 = arith.divf %194, %195 : vector<16x1xf32>
    %197 = vector.broadcast %196 : vector<16x1xf32> to vector<16x32xf32>
    %198 = arith.subf %188, %197 : vector<16x32xf32>
    %199 = arith.mulf %198, %198 : vector<16x32xf32>
    %cst_78 = arith.constant dense<0.000000e+00> : vector<16xf32>
    %200 = vector.multi_reduction <add>, %199, %cst_78 [1] : vector<16x32xf32> to vector<16xf32>
    %201 = vector.shape_cast %200 : vector<16xf32> to vector<16x1xf32>
    %cst_79 = arith.constant 3.200000e+01 : f32
    %202 = vector.broadcast %cst_79 : f32 to vector<16x1xf32>
    %203 = arith.divf %201, %202 : vector<16x1xf32>
    %cst_80 = arith.constant 9.99999974E-6 : f32
    %204 = vector.broadcast %cst_80 : f32 to vector<16x1xf32>
    %205 = arith.addf %203, %204 : vector<16x1xf32>
    %206 = math.rsqrt %205 : vector<16x1xf32>
    %207 = vector.broadcast %206 : vector<16x1xf32> to vector<16x32xf32>
    %208 = arith.mulf %198, %207 : vector<16x32xf32>
    %209 = vector.broadcast %190 : vector<1x32xf32> to vector<16x32xf32>
    %210 = arith.mulf %208, %209 : vector<16x32xf32>
    %211 = vector.broadcast %192 : vector<1x32xf32> to vector<16x32xf32>
    %212 = arith.addf %210, %211 : vector<16x32xf32>
    %c0_81 = arith.constant 0 : index
    %c0_82 = arith.constant 0 : index
    %c0_83 = arith.constant 0 : index
    %213 = vector.load %arg13[%c0_81, %c0_82, %c0_83] : memref<1x32x2048xbf16, #tpu.memory_space<vmem>>, vector<1x32x2048xbf16>
    %214 = vector.shape_cast %213 : vector<1x32x2048xbf16> to vector<32x2048xbf16>
    %c0_84 = arith.constant 0 : index
    %c0_85 = arith.constant 0 : index
    %c0_86 = arith.constant 0 : index
    %215 = vector.load %arg14[%c0_84, %c0_85, %c0_86] : memref<1x1x2048xf32, #tpu.memory_space<vmem>>, vector<1x1x2048xf32>
    %216 = vector.shape_cast %215 : vector<1x1x2048xf32> to vector<1x2048xf32>
    %217 = arith.truncf %212 : vector<16x32xf32> to vector<16x32xbf16>
    %cst_87 = arith.constant dense<0.000000e+00> : vector<16x2048xf32>
    %218 = tpu.matmul %217, %214, %cst_87 {dimension_numbers = #tpu.dot_dimension_numbers<[1], [0], [0], [1], [0, 0, 1, 1], [], []>} : vector<16x32xbf16>, vector<32x2048xbf16>, vector<16x2048xf32> -> vector<16x2048xf32>
    %219 = vector.broadcast %216 : vector<1x2048xf32> to vector<16x2048xf32>
    %220 = arith.addf %218, %219 : vector<16x2048xf32>
    %cst_88 = arith.constant 0.000000e+00 : f32
    %221 = vector.broadcast %cst_88 : f32 to vector<16x2048xf32>
    %222 = arith.maximumf %220, %221 : vector<16x2048xf32>
    %c0_89 = arith.constant 0 : index
    %c0_90 = arith.constant 0 : index
    %c0_91 = arith.constant 0 : index
    %223 = vector.load %arg15[%c0_89, %c0_90, %c0_91] : memref<1x2048x32xbf16, #tpu.memory_space<vmem>>, vector<1x2048x32xbf16>
    %224 = vector.shape_cast %223 : vector<1x2048x32xbf16> to vector<2048x32xbf16>
    %c0_92 = arith.constant 0 : index
    %c0_93 = arith.constant 0 : index
    %c0_94 = arith.constant 0 : index
    %225 = vector.load %arg16[%c0_92, %c0_93, %c0_94] : memref<1x1x32xf32, #tpu.memory_space<vmem>>, vector<1x1x32xf32>
    %226 = vector.shape_cast %225 : vector<1x1x32xf32> to vector<1x32xf32>
    %227 = arith.truncf %222 : vector<16x2048xf32> to vector<16x2048xbf16>
    %cst_95 = arith.constant dense<0.000000e+00> : vector<16x32xf32>
    %228 = tpu.matmul %227, %224, %cst_95 {dimension_numbers = #tpu.dot_dimension_numbers<[1], [0], [0], [1], [0, 0, 1, 1], [], []>} : vector<16x2048xbf16>, vector<2048x32xbf16>, vector<16x32xf32> -> vector<16x32xf32>
    %229 = vector.broadcast %226 : vector<1x32xf32> to vector<16x32xf32>
    %230 = arith.addf %228, %229 : vector<16x32xf32>
    %231 = arith.addf %212, %230 : vector<16x32xf32>
    %c0_96 = arith.constant 0 : index
    %c0_97 = arith.constant 0 : index
    %c0_98 = arith.constant 0 : index
    %232 = vector.load %arg17[%c0_96, %c0_97, %c0_98] : memref<1x1x32xf32, #tpu.memory_space<vmem>>, vector<1x1x32xf32>
    %233 = vector.shape_cast %232 : vector<1x1x32xf32> to vector<1x32xf32>
    %c0_99 = arith.constant 0 : index
    %c0_100 = arith.constant 0 : index
    %c0_101 = arith.constant 0 : index
    %234 = vector.load %arg18[%c0_99, %c0_100, %c0_101] : memref<1x1x32xf32, #tpu.memory_space<vmem>>, vector<1x1x32xf32>
    %235 = vector.shape_cast %234 : vector<1x1x32xf32> to vector<1x32xf32>
    %cst_102 = arith.constant dense<0.000000e+00> : vector<16xf32>
    %236 = vector.multi_reduction <add>, %231, %cst_102 [1] : vector<16x32xf32> to vector<16xf32>
    %237 = vector.shape_cast %236 : vector<16xf32> to vector<16x1xf32>
    %cst_103 = arith.constant 3.200000e+01 : f32
    %238 = vector.broadcast %cst_103 : f32 to vector<16x1xf32>
    %239 = arith.divf %237, %238 : vector<16x1xf32>
    %240 = vector.broadcast %239 : vector<16x1xf32> to vector<16x32xf32>
    %241 = arith.subf %231, %240 : vector<16x32xf32>
    %242 = arith.mulf %241, %241 : vector<16x32xf32>
    %cst_104 = arith.constant dense<0.000000e+00> : vector<16xf32>
    %243 = vector.multi_reduction <add>, %242, %cst_104 [1] : vector<16x32xf32> to vector<16xf32>
    %244 = vector.shape_cast %243 : vector<16xf32> to vector<16x1xf32>
    %cst_105 = arith.constant 3.200000e+01 : f32
    %245 = vector.broadcast %cst_105 : f32 to vector<16x1xf32>
    %246 = arith.divf %244, %245 : vector<16x1xf32>
    %cst_106 = arith.constant 9.99999974E-6 : f32
    %247 = vector.broadcast %cst_106 : f32 to vector<16x1xf32>
    %248 = arith.addf %246, %247 : vector<16x1xf32>
    %249 = math.rsqrt %248 : vector<16x1xf32>
    %250 = vector.broadcast %249 : vector<16x1xf32> to vector<16x32xf32>
    %251 = arith.mulf %241, %250 : vector<16x32xf32>
    %252 = vector.broadcast %233 : vector<1x32xf32> to vector<16x32xf32>
    %253 = arith.mulf %251, %252 : vector<16x32xf32>
    %254 = vector.broadcast %235 : vector<1x32xf32> to vector<16x32xf32>
    %255 = arith.addf %253, %254 : vector<16x32xf32>
    %c0_107 = arith.constant 0 : index
    %c0_108 = arith.constant 0 : index
    %256 = vector.load %arg22[%c0_107, %c0_108] : memref<16x32xf32, #tpu.memory_space<vmem>>, vector<16x32xf32>
    tpu.vector_store %arg22[%c0_107, %c0_108], %255 {strides = array<i32>} : memref<16x32xf32, #tpu.memory_space<vmem>>, vector<16x32xf32>,
    %c1_i32 = arith.constant 1 : i32
    %257 = arith.cmpi eq, %arg0, %c1_i32 : i32
    %258 = arith.extui %257 : i1 to i32
    %c0_i32_109 = arith.constant 0 : i32
    %259 = arith.cmpi ne, %258, %c0_i32_109 : i32
    scf.if %259 {
      %c0_110 = arith.constant 0 : index
      %c0_111 = arith.constant 0 : index
      %260 = vector.load %arg19[%c0_110, %c0_111] : memref<1x32xf32, #tpu.memory_space<vmem>>, vector<1x32xf32>
      %c0_112 = arith.constant 0 : index
      %c0_113 = arith.constant 0 : index
      %261 = vector.load %arg20[%c0_112, %c0_113] : memref<1x32xf32, #tpu.memory_space<vmem>>, vector<1x32xf32>
      %cst_114 = arith.constant dense<0.000000e+00> : vector<16xf32>
      %262 = vector.multi_reduction <add>, %255, %cst_114 [1] : vector<16x32xf32> to vector<16xf32>
      %263 = vector.shape_cast %262 : vector<16xf32> to vector<16x1xf32>
      %cst_115 = arith.constant 3.200000e+01 : f32
      %264 = vector.broadcast %cst_115 : f32 to vector<16x1xf32>
      %265 = arith.divf %263, %264 : vector<16x1xf32>
      %266 = vector.broadcast %265 : vector<16x1xf32> to vector<16x32xf32>
      %267 = arith.subf %255, %266 : vector<16x32xf32>
      %268 = arith.mulf %267, %267 : vector<16x32xf32>
      %cst_116 = arith.constant dense<0.000000e+00> : vector<16xf32>
      %269 = vector.multi_reduction <add>, %268, %cst_116 [1] : vector<16x32xf32> to vector<16xf32>
      %270 = vector.shape_cast %269 : vector<16xf32> to vector<16x1xf32>
      %cst_117 = arith.constant 3.200000e+01 : f32
      %271 = vector.broadcast %cst_117 : f32 to vector<16x1xf32>
      %272 = arith.divf %270, %271 : vector<16x1xf32>
      %cst_118 = arith.constant 9.99999974E-6 : f32
      %273 = vector.broadcast %cst_118 : f32 to vector<16x1xf32>
      %274 = arith.addf %272, %273 : vector<16x1xf32>
      %275 = math.rsqrt %274 : vector<16x1xf32>
      %276 = vector.broadcast %275 : vector<16x1xf32> to vector<16x32xf32>
      %277 = arith.mulf %267, %276 : vector<16x32xf32>
      %278 = vector.broadcast %260 : vector<1x32xf32> to vector<16x32xf32>
      %279 = arith.mulf %277, %278 : vector<16x32xf32>
      %280 = vector.broadcast %261 : vector<1x32xf32> to vector<16x32xf32>
      %281 = arith.addf %279, %280 : vector<16x32xf32>
      %c0_119 = arith.constant 0 : index
      %c0_120 = arith.constant 0 : index
      %282 = vector.load %arg21[%c0_119, %c0_120] : memref<16x32xf32, #tpu.memory_space<vmem>>, vector<16x32xf32>
      tpu.vector_store %arg21[%c0_119, %c0_120], %281 {strides = array<i32>} : memref<16x32xf32, #tpu.memory_space<vmem>>, vector<16x32xf32>,
    } else {
    }
    return
  }
  func.func @transform_0(%arg0: i32) -> (i32, i32) {
    %c0_i32 = arith.constant 0 : i32
    %c0_i32_0 = arith.constant 0 : i32
    %c0_i32_1 = arith.constant 0 : i32
    return %c0_i32, %c0_i32_0 : i32, i32
  }
  func.func @transform_1(%arg0: i32) -> (i32, i32) {
    %c0_i32 = arith.constant 0 : i32
    %c0_i32_0 = arith.constant 0 : i32
    %c0_i32_1 = arith.constant 0 : i32
    return %c0_i32, %c0_i32_0 : i32, i32
  }
  func.func @transform_2(%arg0: i32) -> (i32, i32, i32, i32) {
    %c0_i32 = arith.constant 0 : i32
    %c0_i32_0 = arith.constant 0 : i32
    %c0_i32_1 = arith.constant 0 : i32
    %c0_i32_2 = arith.constant 0 : i32
    return %arg0, %c0_i32, %c0_i32_0, %c0_i32_1 : i32, i32, i32, i32
  }
  func.func @transform_3(%arg0: i32) -> (i32, i32, i32, i32) {
    %c0_i32 = arith.constant 0 : i32
    %c0_i32_0 = arith.constant 0 : i32
    %c0_i32_1 = arith.constant 0 : i32
    %c0_i32_2 = arith.constant 0 : i32
    return %arg0, %c0_i32, %c0_i32_0, %c0_i32_1 : i32, i32, i32, i32
  }
  func.func @transform_4(%arg0: i32) -> (i32, i32, i32, i32) {
    %c0_i32 = arith.constant 0 : i32
    %c0_i32_0 = arith.constant 0 : i32
    %c0_i32_1 = arith.constant 0 : i32
    %c0_i32_2 = arith.constant 0 : i32
    return %arg0, %c0_i32, %c0_i32_0, %c0_i32_1 : i32, i32, i32, i32
  }
  func.func @transform_5(%arg0: i32) -> (i32, i32, i32, i32) {
    %c0_i32 = arith.constant 0 : i32
    %c0_i32_0 = arith.constant 0 : i32
    %c0_i32_1 = arith.constant 0 : i32
    %c0_i32_2 = arith.constant 0 : i32
    return %arg0, %c0_i32, %c0_i32_0, %c0_i32_1 : i32, i32, i32, i32
  }
  func.func @transform_6(%arg0: i32) -> (i32, i32, i32, i32) {
    %c0_i32 = arith.constant 0 : i32
    %c0_i32_0 = arith.constant 0 : i32
    %c0_i32_1 = arith.constant 0 : i32
    %c0_i32_2 = arith.constant 0 : i32
    return %arg0, %c0_i32, %c0_i32_0, %c0_i32_1 : i32, i32, i32, i32
  }
  func.func @transform_7(%arg0: i32) -> (i32, i32, i32, i32) {
    %c0_i32 = arith.constant 0 : i32
    %c0_i32_0 = arith.constant 0 : i32
    %c0_i32_1 = arith.constant 0 : i32
    %c0_i32_2 = arith.constant 0 : i32
    return %arg0, %c0_i32, %c0_i32_0, %c0_i32_1 : i32, i32, i32, i32
  }
  func.func @transform_8(%arg0: i32) -> (i32, i32, i32, i32) {
    %c0_i32 = arith.constant 0 : i32
    %c0_i32_0 = arith.constant 0 : i32
    %c0_i32_1 = arith.constant 0 : i32
    %c0_i32_2 = arith.constant 0 : i32
    return %arg0, %c0_i32, %c0_i32_0, %c0_i32_1 : i32, i32, i32, i32
  }
  func.func @transform_9(%arg0: i32) -> (i32, i32, i32) {
    %c0_i32 = arith.constant 0 : i32
    %c0_i32_0 = arith.constant 0 : i32
    %c0_i32_1 = arith.constant 0 : i32
    return %arg0, %c0_i32, %c0_i32_0 : i32, i32, i32
  }
  func.func @transform_10(%arg0: i32) -> (i32, i32, i32) {
    %c0_i32 = arith.constant 0 : i32
    %c0_i32_0 = arith.constant 0 : i32
    %c0_i32_1 = arith.constant 0 : i32
    return %arg0, %c0_i32, %c0_i32_0 : i32, i32, i32
  }
  func.func @transform_11(%arg0: i32) -> (i32, i32, i32) {
    %c0_i32 = arith.constant 0 : i32
    %c0_i32_0 = arith.constant 0 : i32
    %c0_i32_1 = arith.constant 0 : i32
    return %arg0, %c0_i32, %c0_i32_0 : i32, i32, i32
  }
  func.func @transform_12(%arg0: i32) -> (i32, i32, i32) {
    %c0_i32 = arith.constant 0 : i32
    %c0_i32_0 = arith.constant 0 : i32
    %c0_i32_1 = arith.constant 0 : i32
    return %arg0, %c0_i32, %c0_i32_0 : i32, i32, i32
  }
  func.func @transform_13(%arg0: i32) -> (i32, i32, i32) {
    %c0_i32 = arith.constant 0 : i32
    %c0_i32_0 = arith.constant 0 : i32
    %c0_i32_1 = arith.constant 0 : i32
    return %arg0, %c0_i32, %c0_i32_0 : i32, i32, i32
  }
  func.func @transform_14(%arg0: i32) -> (i32, i32, i32) {
    %c0_i32 = arith.constant 0 : i32
    %c0_i32_0 = arith.constant 0 : i32
    %c0_i32_1 = arith.constant 0 : i32
    return %arg0, %c0_i32, %c0_i32_0 : i32, i32, i32
  }
  func.func @transform_15(%arg0: i32) -> (i32, i32, i32) {
    %c0_i32 = arith.constant 0 : i32
    %c0_i32_0 = arith.constant 0 : i32
    %c0_i32_1 = arith.constant 0 : i32
    return %arg0, %c0_i32, %c0_i32_0 : i32, i32, i32
  }
  func.func @transform_16(%arg0: i32) -> (i32, i32, i32) {
    %c0_i32 = arith.constant 0 : i32
    %c0_i32_0 = arith.constant 0 : i32
    %c0_i32_1 = arith.constant 0 : i32
    return %arg0, %c0_i32, %c0_i32_0 : i32, i32, i32
  }
  func.func @transform_17(%arg0: i32) -> (i32, i32, i32) {
    %c0_i32 = arith.constant 0 : i32
    %c0_i32_0 = arith.constant 0 : i32
    %c0_i32_1 = arith.constant 0 : i32
    return %arg0, %c0_i32, %c0_i32_0 : i32, i32, i32
  }
  func.func @transform_18(%arg0: i32) -> (i32, i32) {
    %c0_i32 = arith.constant 0 : i32
    %c0_i32_0 = arith.constant 0 : i32
    %c0_i32_1 = arith.constant 0 : i32
    return %c0_i32, %c0_i32_0 : i32, i32
  }
  func.func @transform_19(%arg0: i32) -> (i32, i32) {
    %c0_i32 = arith.constant 0 : i32
    %c0_i32_0 = arith.constant 0 : i32
    %c0_i32_1 = arith.constant 0 : i32
    return %c0_i32, %c0_i32_0 : i32, i32
  }
  func.func @transform_20(%arg0: i32) -> (i32, i32) {
    %c0_i32 = arith.constant 0 : i32
    %c0_i32_0 = arith.constant 0 : i32
    %c0_i32_1 = arith.constant 0 : i32
    return %c0_i32, %c0_i32_0 : i32, i32
  }
}

module attributes {stable_mosaic.version = 11 : i64} {
  func.func @_decoder_stack_kernel(%arg0: i32, %arg1: memref<16x32xf32, #tpu.memory_space<vmem>>, %arg2: memref<16x32xf32, #tpu.memory_space<vmem>>, %arg3: memref<16x16xf32, #tpu.memory_space<vmem>>, %arg4: memref<1x4x32x8xbf16, #tpu.memory_space<vmem>>, %arg5: memref<1x4x1x8xf32, #tpu.memory_space<vmem>>, %arg6: memref<1x4x32x8xbf16, #tpu.memory_space<vmem>>, %arg7: memref<1x4x1x8xf32, #tpu.memory_space<vmem>>, %arg8: memref<1x4x32x8xbf16, #tpu.memory_space<vmem>>, %arg9: memref<1x4x1x8xf32, #tpu.memory_space<vmem>>, %arg10: memref<1x4x8x32xbf16, #tpu.memory_space<vmem>>, %arg11: memref<1x1x32xf32, #tpu.memory_space<vmem>>, %arg12: memref<1x1x32xf32, #tpu.memory_space<vmem>>, %arg13: memref<1x1x32xf32, #tpu.memory_space<vmem>>, %arg14: memref<1x4x32x8xbf16, #tpu.memory_space<vmem>>, %arg15: memref<1x4x1x8xf32, #tpu.memory_space<vmem>>, %arg16: memref<1x4x32x8xbf16, #tpu.memory_space<vmem>>, %arg17: memref<1x4x1x8xf32, #tpu.memory_space<vmem>>, %arg18: memref<1x4x32x8xbf16, #tpu.memory_space<vmem>>, %arg19: memref<1x4x1x8xf32, #tpu.memory_space<vmem>>, %arg20: memref<1x4x8x32xbf16, #tpu.memory_space<vmem>>, %arg21: memref<1x1x32xf32, #tpu.memory_space<vmem>>, %arg22: memref<1x1x32xf32, #tpu.memory_space<vmem>>, %arg23: memref<1x1x32xf32, #tpu.memory_space<vmem>>, %arg24: memref<1x32x2048xbf16, #tpu.memory_space<vmem>>, %arg25: memref<1x1x2048xf32, #tpu.memory_space<vmem>>, %arg26: memref<1x2048x32xbf16, #tpu.memory_space<vmem>>, %arg27: memref<1x1x32xf32, #tpu.memory_space<vmem>>, %arg28: memref<1x1x32xf32, #tpu.memory_space<vmem>>, %arg29: memref<1x1x32xf32, #tpu.memory_space<vmem>>, %arg30: memref<1x32xf32, #tpu.memory_space<vmem>>, %arg31: memref<1x32xf32, #tpu.memory_space<vmem>>, %arg32: memref<1x32xf32, #tpu.memory_space<vmem>>, %arg33: memref<1x1xf32, #tpu.memory_space<vmem>>, %arg34: memref<16x1xf32, #tpu.memory_space<vmem>>, %arg35: memref<16x32xf32, #tpu.memory_space<vmem>>) attributes {dimension_semantics = [#tpu.dimension_semantics<arbitrary>], iteration_bounds = array<i64: 2>, scalar_prefetch = 0 : i64, scratch_operands = 1 : i64, tpu.core_type = #tpu.core_type<tc>, window_params = [{pipeline_mode = #tpu.pipeline_mode<synchronous>, transform_indices = @transform_0, window_bounds = array<i64: 16, 32>}, {pipeline_mode = #tpu.pipeline_mode<synchronous>, transform_indices = @transform_1, window_bounds = array<i64: 16, 32>}, {pipeline_mode = #tpu.pipeline_mode<synchronous>, transform_indices = @transform_2, window_bounds = array<i64: 16, 16>}, {transform_indices = @transform_3, window_bounds = array<i64: 1, 4, 32, 8>}, {transform_indices = @transform_4, window_bounds = array<i64: 1, 4, 1, 8>}, {transform_indices = @transform_5, window_bounds = array<i64: 1, 4, 32, 8>}, {transform_indices = @transform_6, window_bounds = array<i64: 1, 4, 1, 8>}, {transform_indices = @transform_7, window_bounds = array<i64: 1, 4, 32, 8>}, {transform_indices = @transform_8, window_bounds = array<i64: 1, 4, 1, 8>}, {transform_indices = @transform_9, window_bounds = array<i64: 1, 4, 8, 32>}, {transform_indices = @transform_10, window_bounds = array<i64: 1, 1, 32>}, {transform_indices = @transform_11, window_bounds = array<i64: 1, 1, 32>}, {transform_indices = @transform_12, window_bounds = array<i64: 1, 1, 32>}, {transform_indices = @transform_13, window_bounds = array<i64: 1, 4, 32, 8>}, {transform_indices = @transform_14, window_bounds = array<i64: 1, 4, 1, 8>}, {transform_indices = @transform_15, window_bounds = array<i64: 1, 4, 32, 8>}, {transform_indices = @transform_16, window_bounds = array<i64: 1, 4, 1, 8>}, {transform_indices = @transform_17, window_bounds = array<i64: 1, 4, 32, 8>}, {transform_indices = @transform_18, window_bounds = array<i64: 1, 4, 1, 8>}, {transform_indices = @transform_19, window_bounds = array<i64: 1, 4, 8, 32>}, {transform_indices = @transform_20, window_bounds = array<i64: 1, 1, 32>}, {transform_indices = @transform_21, window_bounds = array<i64: 1, 1, 32>}, {transform_indices = @transform_22, window_bounds = array<i64: 1, 1, 32>}, {transform_indices = @transform_23, window_bounds = array<i64: 1, 32, 2048>}, {transform_indices = @transform_24, window_bounds = array<i64: 1, 1, 2048>}, {transform_indices = @transform_25, window_bounds = array<i64: 1, 2048, 32>}, {transform_indices = @transform_26, window_bounds = array<i64: 1, 1, 32>}, {transform_indices = @transform_27, window_bounds = array<i64: 1, 1, 32>}, {transform_indices = @transform_28, window_bounds = array<i64: 1, 1, 32>}, {pipeline_mode = #tpu.pipeline_mode<synchronous>, transform_indices = @transform_29, window_bounds = array<i64: 1, 32>}, {pipeline_mode = #tpu.pipeline_mode<synchronous>, transform_indices = @transform_30, window_bounds = array<i64: 1, 32>}, {pipeline_mode = #tpu.pipeline_mode<synchronous>, transform_indices = @transform_31, window_bounds = array<i64: 1, 32>}, {pipeline_mode = #tpu.pipeline_mode<synchronous>, transform_indices = @transform_32, window_bounds = array<i64: 1, 1>}, {pipeline_mode = #tpu.pipeline_mode<synchronous>, transform_indices = @transform_33, window_bounds = array<i64: 16, 1>}]} {
    %c0_i32 = arith.constant 0 : i32
    %0 = arith.cmpi eq, %arg0, %c0_i32 : i32
    %1 = arith.extui %0 : i1 to i32
    %c0_i32_0 = arith.constant 0 : i32
    %2 = arith.cmpi ne, %1, %c0_i32_0 : i32
    scf.if %2 {
      %c0_190 = arith.constant 0 : index
      %c0_191 = arith.constant 0 : index
      %469 = vector.load %arg1[%c0_190, %c0_191] : memref<16x32xf32, #tpu.memory_space<vmem>>, vector<16x32xf32>
      %c0_192 = arith.constant 0 : index
      %c0_193 = arith.constant 0 : index
      %470 = vector.load %arg35[%c0_192, %c0_193] : memref<16x32xf32, #tpu.memory_space<vmem>>, vector<16x32xf32>
      tpu.vector_store %arg35[%c0_192, %c0_193], %469 {strides = array<i32>} : memref<16x32xf32, #tpu.memory_space<vmem>>, vector<16x32xf32>,
    } else {
    }
    %c0 = arith.constant 0 : index
    %c0_1 = arith.constant 0 : index
    %3 = vector.load %arg35[%c0, %c0_1] : memref<16x32xf32, #tpu.memory_space<vmem>>, vector<16x32xf32>
    %c0_2 = arith.constant 0 : index
    %c0_3 = arith.constant 0 : index
    %4 = vector.load %arg2[%c0_2, %c0_3] : memref<16x32xf32, #tpu.memory_space<vmem>>, vector<16x32xf32>
    %c0_4 = arith.constant 0 : index
    %c0_5 = arith.constant 0 : index
    %5 = vector.load %arg3[%c0_4, %c0_5] : memref<16x16xf32, #tpu.memory_space<vmem>>, vector<16x16xf32>
    %c0_6 = arith.constant 0 : index
    %c0_7 = arith.constant 0 : index
    %c0_8 = arith.constant 0 : index
    %c0_9 = arith.constant 0 : index
    %6 = vector.load %arg4[%c0_6, %c0_7, %c0_8, %c0_9] : memref<1x4x32x8xbf16, #tpu.memory_space<vmem>>, vector<1x4x32x8xbf16>
    %7 = vector.shape_cast %6 : vector<1x4x32x8xbf16> to vector<4x32x8xbf16>
    %c0_10 = arith.constant 0 : index
    %c0_11 = arith.constant 0 : index
    %c0_12 = arith.constant 0 : index
    %c0_13 = arith.constant 0 : index
    %8 = vector.load %arg5[%c0_10, %c0_11, %c0_12, %c0_13] : memref<1x4x1x8xf32, #tpu.memory_space<vmem>>, vector<1x4x1x8xf32>
    %9 = vector.shape_cast %8 : vector<1x4x1x8xf32> to vector<4x1x8xf32>
    %c0_14 = arith.constant 0 : index
    %c0_15 = arith.constant 0 : index
    %c0_16 = arith.constant 0 : index
    %c0_17 = arith.constant 0 : index
    %10 = vector.load %arg6[%c0_14, %c0_15, %c0_16, %c0_17] : memref<1x4x32x8xbf16, #tpu.memory_space<vmem>>, vector<1x4x32x8xbf16>
    %11 = vector.shape_cast %10 : vector<1x4x32x8xbf16> to vector<4x32x8xbf16>
    %c0_18 = arith.constant 0 : index
    %c0_19 = arith.constant 0 : index
    %c0_20 = arith.constant 0 : index
    %c0_21 = arith.constant 0 : index
    %12 = vector.load %arg7[%c0_18, %c0_19, %c0_20, %c0_21] : memref<1x4x1x8xf32, #tpu.memory_space<vmem>>, vector<1x4x1x8xf32>
    %13 = vector.shape_cast %12 : vector<1x4x1x8xf32> to vector<4x1x8xf32>
    %c0_22 = arith.constant 0 : index
    %c0_23 = arith.constant 0 : index
    %c0_24 = arith.constant 0 : index
    %c0_25 = arith.constant 0 : index
    %14 = vector.load %arg8[%c0_22, %c0_23, %c0_24, %c0_25] : memref<1x4x32x8xbf16, #tpu.memory_space<vmem>>, vector<1x4x32x8xbf16>
    %15 = vector.shape_cast %14 : vector<1x4x32x8xbf16> to vector<4x32x8xbf16>
    %c0_26 = arith.constant 0 : index
    %c0_27 = arith.constant 0 : index
    %c0_28 = arith.constant 0 : index
    %c0_29 = arith.constant 0 : index
    %16 = vector.load %arg9[%c0_26, %c0_27, %c0_28, %c0_29] : memref<1x4x1x8xf32, #tpu.memory_space<vmem>>, vector<1x4x1x8xf32>
    %17 = vector.shape_cast %16 : vector<1x4x1x8xf32> to vector<4x1x8xf32>
    %c0_30 = arith.constant 0 : index
    %c0_31 = arith.constant 0 : index
    %c0_32 = arith.constant 0 : index
    %c0_33 = arith.constant 0 : index
    %18 = vector.load %arg10[%c0_30, %c0_31, %c0_32, %c0_33] : memref<1x4x8x32xbf16, #tpu.memory_space<vmem>>, vector<1x4x8x32xbf16>
    %19 = vector.shape_cast %18 : vector<1x4x8x32xbf16> to vector<4x8x32xbf16>
    %c0_34 = arith.constant 0 : index
    %c0_35 = arith.constant 0 : index
    %c0_36 = arith.constant 0 : index
    %20 = vector.load %arg11[%c0_34, %c0_35, %c0_36] : memref<1x1x32xf32, #tpu.memory_space<vmem>>, vector<1x1x32xf32>
    %21 = vector.shape_cast %20 : vector<1x1x32xf32> to vector<1x32xf32>
    %22 = arith.truncf %3 : vector<16x32xf32> to vector<16x32xbf16>
    %23 = arith.truncf %3 : vector<16x32xf32> to vector<16x32xbf16>
    %24 = vector.extract_strided_slice %7 {offsets = [0, 0, 0], sizes = [1, 32, 8], strides = [1, 1, 1]} : vector<4x32x8xbf16> to vector<1x32x8xbf16>
    %25 = vector.shape_cast %24 : vector<1x32x8xbf16> to vector<32x8xbf16>
    %cst = arith.constant dense<0.000000e+00> : vector<16x8xf32>
    %26 = tpu.matmul %22, %25, %cst {dimension_numbers = #tpu.dot_dimension_numbers<[1], [0], [0], [1], [0, 0, 1, 1], [], []>} : vector<16x32xbf16>, vector<32x8xbf16>, vector<16x8xf32> -> vector<16x8xf32>
    %27 = vector.extract_strided_slice %9 {offsets = [0, 0, 0], sizes = [1, 1, 8], strides = [1, 1, 1]} : vector<4x1x8xf32> to vector<1x1x8xf32>
    %28 = vector.shape_cast %27 : vector<1x1x8xf32> to vector<1x8xf32>
    %29 = vector.broadcast %28 : vector<1x8xf32> to vector<16x8xf32>
    %30 = arith.addf %26, %29 : vector<16x8xf32>
    %31 = vector.extract_strided_slice %11 {offsets = [0, 0, 0], sizes = [1, 32, 8], strides = [1, 1, 1]} : vector<4x32x8xbf16> to vector<1x32x8xbf16>
    %32 = vector.shape_cast %31 : vector<1x32x8xbf16> to vector<32x8xbf16>
    %cst_37 = arith.constant dense<0.000000e+00> : vector<16x8xf32>
    %33 = tpu.matmul %23, %32, %cst_37 {dimension_numbers = #tpu.dot_dimension_numbers<[1], [0], [0], [1], [0, 0, 1, 1], [], []>} : vector<16x32xbf16>, vector<32x8xbf16>, vector<16x8xf32> -> vector<16x8xf32>
    %34 = vector.extract_strided_slice %13 {offsets = [0, 0, 0], sizes = [1, 1, 8], strides = [1, 1, 1]} : vector<4x1x8xf32> to vector<1x1x8xf32>
    %35 = vector.shape_cast %34 : vector<1x1x8xf32> to vector<1x8xf32>
    %36 = vector.broadcast %35 : vector<1x8xf32> to vector<16x8xf32>
    %37 = arith.addf %33, %36 : vector<16x8xf32>
    %38 = vector.extract_strided_slice %15 {offsets = [0, 0, 0], sizes = [1, 32, 8], strides = [1, 1, 1]} : vector<4x32x8xbf16> to vector<1x32x8xbf16>
    %39 = vector.shape_cast %38 : vector<1x32x8xbf16> to vector<32x8xbf16>
    %cst_38 = arith.constant dense<0.000000e+00> : vector<16x8xf32>
    %40 = tpu.matmul %23, %39, %cst_38 {dimension_numbers = #tpu.dot_dimension_numbers<[1], [0], [0], [1], [0, 0, 1, 1], [], []>} : vector<16x32xbf16>, vector<32x8xbf16>, vector<16x8xf32> -> vector<16x8xf32>
    %41 = vector.extract_strided_slice %17 {offsets = [0, 0, 0], sizes = [1, 1, 8], strides = [1, 1, 1]} : vector<4x1x8xf32> to vector<1x1x8xf32>
    %42 = vector.shape_cast %41 : vector<1x1x8xf32> to vector<1x8xf32>
    %43 = vector.broadcast %42 : vector<1x8xf32> to vector<16x8xf32>
    %44 = arith.addf %40, %43 : vector<16x8xf32>
    %cst_39 = arith.constant dense<0.000000e+00> : vector<16x16xf32>
    %45 = tpu.matmul %30, %37, %cst_39 {dimension_numbers = #tpu.dot_dimension_numbers<[1], [1], [0], [0], [0, 0, 1, 0], [], []>} : vector<16x8xf32>, vector<16x8xf32>, vector<16x16xf32> -> vector<16x16xf32>
    %cst_40 = arith.constant 0.353553385 : f32
    %46 = vector.broadcast %cst_40 : f32 to vector<16x16xf32>
    %47 = arith.mulf %45, %46 : vector<16x16xf32>
    %48 = arith.addf %47, %5 : vector<16x16xf32>
    %cst_41 = arith.constant dense<0xFF800000> : vector<16xf32>
    %49 = vector.multi_reduction <maximumf>, %48, %cst_41 [1] : vector<16x16xf32> to vector<16xf32>
    %50 = vector.shape_cast %49 : vector<16xf32> to vector<16x1xf32>
    %51 = vector.broadcast %50 : vector<16x1xf32> to vector<16x16xf32>
    %52 = arith.subf %48, %51 : vector<16x16xf32>
    %53 = math.exp %52 : vector<16x16xf32>
    %cst_42 = arith.constant dense<0.000000e+00> : vector<16xf32>
    %54 = vector.multi_reduction <add>, %53, %cst_42 [1] : vector<16x16xf32> to vector<16xf32>
    %55 = vector.shape_cast %54 : vector<16xf32> to vector<16x1xf32>
    %56 = tpu.reciprocal %55 {approx = true} : vector<16x1xf32> -> vector<16x1xf32>
    %57 = vector.broadcast %56 : vector<16x1xf32> to vector<16x16xf32>
    %58 = arith.mulf %53, %57 : vector<16x16xf32>
    %cst_43 = arith.constant dense<0.000000e+00> : vector<16x8xf32>
    %59 = tpu.matmul %58, %44, %cst_43 {dimension_numbers = #tpu.dot_dimension_numbers<[1], [0], [0], [1], [0, 0, 1, 1], [], []>} : vector<16x16xf32>, vector<16x8xf32>, vector<16x8xf32> -> vector<16x8xf32>
    %60 = arith.truncf %59 : vector<16x8xf32> to vector<16x8xbf16>
    %61 = vector.extract_strided_slice %19 {offsets = [0, 0, 0], sizes = [1, 8, 32], strides = [1, 1, 1]} : vector<4x8x32xbf16> to vector<1x8x32xbf16>
    %62 = vector.shape_cast %61 : vector<1x8x32xbf16> to vector<8x32xbf16>
    %cst_44 = arith.constant dense<0.000000e+00> : vector<16x32xf32>
    %63 = tpu.matmul %60, %62, %cst_44 {dimension_numbers = #tpu.dot_dimension_numbers<[1], [0], [0], [1], [0, 0, 1, 1], [], []>} : vector<16x8xbf16>, vector<8x32xbf16>, vector<16x32xf32> -> vector<16x32xf32>
    %64 = vector.extract_strided_slice %7 {offsets = [1, 0, 0], sizes = [1, 32, 8], strides = [1, 1, 1]} : vector<4x32x8xbf16> to vector<1x32x8xbf16>
    %65 = vector.shape_cast %64 : vector<1x32x8xbf16> to vector<32x8xbf16>
    %cst_45 = arith.constant dense<0.000000e+00> : vector<16x8xf32>
    %66 = tpu.matmul %22, %65, %cst_45 {dimension_numbers = #tpu.dot_dimension_numbers<[1], [0], [0], [1], [0, 0, 1, 1], [], []>} : vector<16x32xbf16>, vector<32x8xbf16>, vector<16x8xf32> -> vector<16x8xf32>
    %67 = vector.extract_strided_slice %9 {offsets = [1, 0, 0], sizes = [1, 1, 8], strides = [1, 1, 1]} : vector<4x1x8xf32> to vector<1x1x8xf32>
    %68 = vector.shape_cast %67 : vector<1x1x8xf32> to vector<1x8xf32>
    %69 = vector.broadcast %68 : vector<1x8xf32> to vector<16x8xf32>
    %70 = arith.addf %66, %69 : vector<16x8xf32>
    %71 = vector.extract_strided_slice %11 {offsets = [1, 0, 0], sizes = [1, 32, 8], strides = [1, 1, 1]} : vector<4x32x8xbf16> to vector<1x32x8xbf16>
    %72 = vector.shape_cast %71 : vector<1x32x8xbf16> to vector<32x8xbf16>
    %cst_46 = arith.constant dense<0.000000e+00> : vector<16x8xf32>
    %73 = tpu.matmul %23, %72, %cst_46 {dimension_numbers = #tpu.dot_dimension_numbers<[1], [0], [0], [1], [0, 0, 1, 1], [], []>} : vector<16x32xbf16>, vector<32x8xbf16>, vector<16x8xf32> -> vector<16x8xf32>
    %74 = vector.extract_strided_slice %13 {offsets = [1, 0, 0], sizes = [1, 1, 8], strides = [1, 1, 1]} : vector<4x1x8xf32> to vector<1x1x8xf32>
    %75 = vector.shape_cast %74 : vector<1x1x8xf32> to vector<1x8xf32>
    %76 = vector.broadcast %75 : vector<1x8xf32> to vector<16x8xf32>
    %77 = arith.addf %73, %76 : vector<16x8xf32>
    %78 = vector.extract_strided_slice %15 {offsets = [1, 0, 0], sizes = [1, 32, 8], strides = [1, 1, 1]} : vector<4x32x8xbf16> to vector<1x32x8xbf16>
    %79 = vector.shape_cast %78 : vector<1x32x8xbf16> to vector<32x8xbf16>
    %cst_47 = arith.constant dense<0.000000e+00> : vector<16x8xf32>
    %80 = tpu.matmul %23, %79, %cst_47 {dimension_numbers = #tpu.dot_dimension_numbers<[1], [0], [0], [1], [0, 0, 1, 1], [], []>} : vector<16x32xbf16>, vector<32x8xbf16>, vector<16x8xf32> -> vector<16x8xf32>
    %81 = vector.extract_strided_slice %17 {offsets = [1, 0, 0], sizes = [1, 1, 8], strides = [1, 1, 1]} : vector<4x1x8xf32> to vector<1x1x8xf32>
    %82 = vector.shape_cast %81 : vector<1x1x8xf32> to vector<1x8xf32>
    %83 = vector.broadcast %82 : vector<1x8xf32> to vector<16x8xf32>
    %84 = arith.addf %80, %83 : vector<16x8xf32>
    %cst_48 = arith.constant dense<0.000000e+00> : vector<16x16xf32>
    %85 = tpu.matmul %70, %77, %cst_48 {dimension_numbers = #tpu.dot_dimension_numbers<[1], [1], [0], [0], [0, 0, 1, 0], [], []>} : vector<16x8xf32>, vector<16x8xf32>, vector<16x16xf32> -> vector<16x16xf32>
    %cst_49 = arith.constant 0.353553385 : f32
    %86 = vector.broadcast %cst_49 : f32 to vector<16x16xf32>
    %87 = arith.mulf %85, %86 : vector<16x16xf32>
    %88 = arith.addf %87, %5 : vector<16x16xf32>
    %cst_50 = arith.constant dense<0xFF800000> : vector<16xf32>
    %89 = vector.multi_reduction <maximumf>, %88, %cst_50 [1] : vector<16x16xf32> to vector<16xf32>
    %90 = vector.shape_cast %89 : vector<16xf32> to vector<16x1xf32>
    %91 = vector.broadcast %90 : vector<16x1xf32> to vector<16x16xf32>
    %92 = arith.subf %88, %91 : vector<16x16xf32>
    %93 = math.exp %92 : vector<16x16xf32>
    %cst_51 = arith.constant dense<0.000000e+00> : vector<16xf32>
    %94 = vector.multi_reduction <add>, %93, %cst_51 [1] : vector<16x16xf32> to vector<16xf32>
    %95 = vector.shape_cast %94 : vector<16xf32> to vector<16x1xf32>
    %96 = tpu.reciprocal %95 {approx = true} : vector<16x1xf32> -> vector<16x1xf32>
    %97 = vector.broadcast %96 : vector<16x1xf32> to vector<16x16xf32>
    %98 = arith.mulf %93, %97 : vector<16x16xf32>
    %cst_52 = arith.constant dense<0.000000e+00> : vector<16x8xf32>
    %99 = tpu.matmul %98, %84, %cst_52 {dimension_numbers = #tpu.dot_dimension_numbers<[1], [0], [0], [1], [0, 0, 1, 1], [], []>} : vector<16x16xf32>, vector<16x8xf32>, vector<16x8xf32> -> vector<16x8xf32>
    %100 = arith.truncf %99 : vector<16x8xf32> to vector<16x8xbf16>
    %101 = vector.extract_strided_slice %19 {offsets = [1, 0, 0], sizes = [1, 8, 32], strides = [1, 1, 1]} : vector<4x8x32xbf16> to vector<1x8x32xbf16>
    %102 = vector.shape_cast %101 : vector<1x8x32xbf16> to vector<8x32xbf16>
    %cst_53 = arith.constant dense<0.000000e+00> : vector<16x32xf32>
    %103 = tpu.matmul %100, %102, %cst_53 {dimension_numbers = #tpu.dot_dimension_numbers<[1], [0], [0], [1], [0, 0, 1, 1], [], []>} : vector<16x8xbf16>, vector<8x32xbf16>, vector<16x32xf32> -> vector<16x32xf32>
    %104 = arith.addf %63, %103 : vector<16x32xf32>
    %105 = vector.extract_strided_slice %7 {offsets = [2, 0, 0], sizes = [1, 32, 8], strides = [1, 1, 1]} : vector<4x32x8xbf16> to vector<1x32x8xbf16>
    %106 = vector.shape_cast %105 : vector<1x32x8xbf16> to vector<32x8xbf16>
    %cst_54 = arith.constant dense<0.000000e+00> : vector<16x8xf32>
    %107 = tpu.matmul %22, %106, %cst_54 {dimension_numbers = #tpu.dot_dimension_numbers<[1], [0], [0], [1], [0, 0, 1, 1], [], []>} : vector<16x32xbf16>, vector<32x8xbf16>, vector<16x8xf32> -> vector<16x8xf32>
    %108 = vector.extract_strided_slice %9 {offsets = [2, 0, 0], sizes = [1, 1, 8], strides = [1, 1, 1]} : vector<4x1x8xf32> to vector<1x1x8xf32>
    %109 = vector.shape_cast %108 : vector<1x1x8xf32> to vector<1x8xf32>
    %110 = vector.broadcast %109 : vector<1x8xf32> to vector<16x8xf32>
    %111 = arith.addf %107, %110 : vector<16x8xf32>
    %112 = vector.extract_strided_slice %11 {offsets = [2, 0, 0], sizes = [1, 32, 8], strides = [1, 1, 1]} : vector<4x32x8xbf16> to vector<1x32x8xbf16>
    %113 = vector.shape_cast %112 : vector<1x32x8xbf16> to vector<32x8xbf16>
    %cst_55 = arith.constant dense<0.000000e+00> : vector<16x8xf32>
    %114 = tpu.matmul %23, %113, %cst_55 {dimension_numbers = #tpu.dot_dimension_numbers<[1], [0], [0], [1], [0, 0, 1, 1], [], []>} : vector<16x32xbf16>, vector<32x8xbf16>, vector<16x8xf32> -> vector<16x8xf32>
    %115 = vector.extract_strided_slice %13 {offsets = [2, 0, 0], sizes = [1, 1, 8], strides = [1, 1, 1]} : vector<4x1x8xf32> to vector<1x1x8xf32>
    %116 = vector.shape_cast %115 : vector<1x1x8xf32> to vector<1x8xf32>
    %117 = vector.broadcast %116 : vector<1x8xf32> to vector<16x8xf32>
    %118 = arith.addf %114, %117 : vector<16x8xf32>
    %119 = vector.extract_strided_slice %15 {offsets = [2, 0, 0], sizes = [1, 32, 8], strides = [1, 1, 1]} : vector<4x32x8xbf16> to vector<1x32x8xbf16>
    %120 = vector.shape_cast %119 : vector<1x32x8xbf16> to vector<32x8xbf16>
    %cst_56 = arith.constant dense<0.000000e+00> : vector<16x8xf32>
    %121 = tpu.matmul %23, %120, %cst_56 {dimension_numbers = #tpu.dot_dimension_numbers<[1], [0], [0], [1], [0, 0, 1, 1], [], []>} : vector<16x32xbf16>, vector<32x8xbf16>, vector<16x8xf32> -> vector<16x8xf32>
    %122 = vector.extract_strided_slice %17 {offsets = [2, 0, 0], sizes = [1, 1, 8], strides = [1, 1, 1]} : vector<4x1x8xf32> to vector<1x1x8xf32>
    %123 = vector.shape_cast %122 : vector<1x1x8xf32> to vector<1x8xf32>
    %124 = vector.broadcast %123 : vector<1x8xf32> to vector<16x8xf32>
    %125 = arith.addf %121, %124 : vector<16x8xf32>
    %cst_57 = arith.constant dense<0.000000e+00> : vector<16x16xf32>
    %126 = tpu.matmul %111, %118, %cst_57 {dimension_numbers = #tpu.dot_dimension_numbers<[1], [1], [0], [0], [0, 0, 1, 0], [], []>} : vector<16x8xf32>, vector<16x8xf32>, vector<16x16xf32> -> vector<16x16xf32>
    %cst_58 = arith.constant 0.353553385 : f32
    %127 = vector.broadcast %cst_58 : f32 to vector<16x16xf32>
    %128 = arith.mulf %126, %127 : vector<16x16xf32>
    %129 = arith.addf %128, %5 : vector<16x16xf32>
    %cst_59 = arith.constant dense<0xFF800000> : vector<16xf32>
    %130 = vector.multi_reduction <maximumf>, %129, %cst_59 [1] : vector<16x16xf32> to vector<16xf32>
    %131 = vector.shape_cast %130 : vector<16xf32> to vector<16x1xf32>
    %132 = vector.broadcast %131 : vector<16x1xf32> to vector<16x16xf32>
    %133 = arith.subf %129, %132 : vector<16x16xf32>
    %134 = math.exp %133 : vector<16x16xf32>
    %cst_60 = arith.constant dense<0.000000e+00> : vector<16xf32>
    %135 = vector.multi_reduction <add>, %134, %cst_60 [1] : vector<16x16xf32> to vector<16xf32>
    %136 = vector.shape_cast %135 : vector<16xf32> to vector<16x1xf32>
    %137 = tpu.reciprocal %136 {approx = true} : vector<16x1xf32> -> vector<16x1xf32>
    %138 = vector.broadcast %137 : vector<16x1xf32> to vector<16x16xf32>
    %139 = arith.mulf %134, %138 : vector<16x16xf32>
    %cst_61 = arith.constant dense<0.000000e+00> : vector<16x8xf32>
    %140 = tpu.matmul %139, %125, %cst_61 {dimension_numbers = #tpu.dot_dimension_numbers<[1], [0], [0], [1], [0, 0, 1, 1], [], []>} : vector<16x16xf32>, vector<16x8xf32>, vector<16x8xf32> -> vector<16x8xf32>
    %141 = arith.truncf %140 : vector<16x8xf32> to vector<16x8xbf16>
    %142 = vector.extract_strided_slice %19 {offsets = [2, 0, 0], sizes = [1, 8, 32], strides = [1, 1, 1]} : vector<4x8x32xbf16> to vector<1x8x32xbf16>
    %143 = vector.shape_cast %142 : vector<1x8x32xbf16> to vector<8x32xbf16>
    %cst_62 = arith.constant dense<0.000000e+00> : vector<16x32xf32>
    %144 = tpu.matmul %141, %143, %cst_62 {dimension_numbers = #tpu.dot_dimension_numbers<[1], [0], [0], [1], [0, 0, 1, 1], [], []>} : vector<16x8xbf16>, vector<8x32xbf16>, vector<16x32xf32> -> vector<16x32xf32>
    %145 = arith.addf %104, %144 : vector<16x32xf32>
    %146 = vector.extract_strided_slice %7 {offsets = [3, 0, 0], sizes = [1, 32, 8], strides = [1, 1, 1]} : vector<4x32x8xbf16> to vector<1x32x8xbf16>
    %147 = vector.shape_cast %146 : vector<1x32x8xbf16> to vector<32x8xbf16>
    %cst_63 = arith.constant dense<0.000000e+00> : vector<16x8xf32>
    %148 = tpu.matmul %22, %147, %cst_63 {dimension_numbers = #tpu.dot_dimension_numbers<[1], [0], [0], [1], [0, 0, 1, 1], [], []>} : vector<16x32xbf16>, vector<32x8xbf16>, vector<16x8xf32> -> vector<16x8xf32>
    %149 = vector.extract_strided_slice %9 {offsets = [3, 0, 0], sizes = [1, 1, 8], strides = [1, 1, 1]} : vector<4x1x8xf32> to vector<1x1x8xf32>
    %150 = vector.shape_cast %149 : vector<1x1x8xf32> to vector<1x8xf32>
    %151 = vector.broadcast %150 : vector<1x8xf32> to vector<16x8xf32>
    %152 = arith.addf %148, %151 : vector<16x8xf32>
    %153 = vector.extract_strided_slice %11 {offsets = [3, 0, 0], sizes = [1, 32, 8], strides = [1, 1, 1]} : vector<4x32x8xbf16> to vector<1x32x8xbf16>
    %154 = vector.shape_cast %153 : vector<1x32x8xbf16> to vector<32x8xbf16>
    %cst_64 = arith.constant dense<0.000000e+00> : vector<16x8xf32>
    %155 = tpu.matmul %23, %154, %cst_64 {dimension_numbers = #tpu.dot_dimension_numbers<[1], [0], [0], [1], [0, 0, 1, 1], [], []>} : vector<16x32xbf16>, vector<32x8xbf16>, vector<16x8xf32> -> vector<16x8xf32>
    %156 = vector.extract_strided_slice %13 {offsets = [3, 0, 0], sizes = [1, 1, 8], strides = [1, 1, 1]} : vector<4x1x8xf32> to vector<1x1x8xf32>
    %157 = vector.shape_cast %156 : vector<1x1x8xf32> to vector<1x8xf32>
    %158 = vector.broadcast %157 : vector<1x8xf32> to vector<16x8xf32>
    %159 = arith.addf %155, %158 : vector<16x8xf32>
    %160 = vector.extract_strided_slice %15 {offsets = [3, 0, 0], sizes = [1, 32, 8], strides = [1, 1, 1]} : vector<4x32x8xbf16> to vector<1x32x8xbf16>
    %161 = vector.shape_cast %160 : vector<1x32x8xbf16> to vector<32x8xbf16>
    %cst_65 = arith.constant dense<0.000000e+00> : vector<16x8xf32>
    %162 = tpu.matmul %23, %161, %cst_65 {dimension_numbers = #tpu.dot_dimension_numbers<[1], [0], [0], [1], [0, 0, 1, 1], [], []>} : vector<16x32xbf16>, vector<32x8xbf16>, vector<16x8xf32> -> vector<16x8xf32>
    %163 = vector.extract_strided_slice %17 {offsets = [3, 0, 0], sizes = [1, 1, 8], strides = [1, 1, 1]} : vector<4x1x8xf32> to vector<1x1x8xf32>
    %164 = vector.shape_cast %163 : vector<1x1x8xf32> to vector<1x8xf32>
    %165 = vector.broadcast %164 : vector<1x8xf32> to vector<16x8xf32>
    %166 = arith.addf %162, %165 : vector<16x8xf32>
    %cst_66 = arith.constant dense<0.000000e+00> : vector<16x16xf32>
    %167 = tpu.matmul %152, %159, %cst_66 {dimension_numbers = #tpu.dot_dimension_numbers<[1], [1], [0], [0], [0, 0, 1, 0], [], []>} : vector<16x8xf32>, vector<16x8xf32>, vector<16x16xf32> -> vector<16x16xf32>
    %cst_67 = arith.constant 0.353553385 : f32
    %168 = vector.broadcast %cst_67 : f32 to vector<16x16xf32>
    %169 = arith.mulf %167, %168 : vector<16x16xf32>
    %170 = arith.addf %169, %5 : vector<16x16xf32>
    %cst_68 = arith.constant dense<0xFF800000> : vector<16xf32>
    %171 = vector.multi_reduction <maximumf>, %170, %cst_68 [1] : vector<16x16xf32> to vector<16xf32>
    %172 = vector.shape_cast %171 : vector<16xf32> to vector<16x1xf32>
    %173 = vector.broadcast %172 : vector<16x1xf32> to vector<16x16xf32>
    %174 = arith.subf %170, %173 : vector<16x16xf32>
    %175 = math.exp %174 : vector<16x16xf32>
    %cst_69 = arith.constant dense<0.000000e+00> : vector<16xf32>
    %176 = vector.multi_reduction <add>, %175, %cst_69 [1] : vector<16x16xf32> to vector<16xf32>
    %177 = vector.shape_cast %176 : vector<16xf32> to vector<16x1xf32>
    %178 = tpu.reciprocal %177 {approx = true} : vector<16x1xf32> -> vector<16x1xf32>
    %179 = vector.broadcast %178 : vector<16x1xf32> to vector<16x16xf32>
    %180 = arith.mulf %175, %179 : vector<16x16xf32>
    %cst_70 = arith.constant dense<0.000000e+00> : vector<16x8xf32>
    %181 = tpu.matmul %180, %166, %cst_70 {dimension_numbers = #tpu.dot_dimension_numbers<[1], [0], [0], [1], [0, 0, 1, 1], [], []>} : vector<16x16xf32>, vector<16x8xf32>, vector<16x8xf32> -> vector<16x8xf32>
    %182 = arith.truncf %181 : vector<16x8xf32> to vector<16x8xbf16>
    %183 = vector.extract_strided_slice %19 {offsets = [3, 0, 0], sizes = [1, 8, 32], strides = [1, 1, 1]} : vector<4x8x32xbf16> to vector<1x8x32xbf16>
    %184 = vector.shape_cast %183 : vector<1x8x32xbf16> to vector<8x32xbf16>
    %cst_71 = arith.constant dense<0.000000e+00> : vector<16x32xf32>
    %185 = tpu.matmul %182, %184, %cst_71 {dimension_numbers = #tpu.dot_dimension_numbers<[1], [0], [0], [1], [0, 0, 1, 1], [], []>} : vector<16x8xbf16>, vector<8x32xbf16>, vector<16x32xf32> -> vector<16x32xf32>
    %186 = arith.addf %145, %185 : vector<16x32xf32>
    %187 = vector.broadcast %21 : vector<1x32xf32> to vector<16x32xf32>
    %188 = arith.addf %186, %187 : vector<16x32xf32>
    %189 = arith.addf %3, %188 : vector<16x32xf32>
    %c0_72 = arith.constant 0 : index
    %c0_73 = arith.constant 0 : index
    %c0_74 = arith.constant 0 : index
    %190 = vector.load %arg12[%c0_72, %c0_73, %c0_74] : memref<1x1x32xf32, #tpu.memory_space<vmem>>, vector<1x1x32xf32>
    %191 = vector.shape_cast %190 : vector<1x1x32xf32> to vector<1x32xf32>
    %c0_75 = arith.constant 0 : index
    %c0_76 = arith.constant 0 : index
    %c0_77 = arith.constant 0 : index
    %192 = vector.load %arg13[%c0_75, %c0_76, %c0_77] : memref<1x1x32xf32, #tpu.memory_space<vmem>>, vector<1x1x32xf32>
    %193 = vector.shape_cast %192 : vector<1x1x32xf32> to vector<1x32xf32>
    %cst_78 = arith.constant dense<0.000000e+00> : vector<16xf32>
    %194 = vector.multi_reduction <add>, %189, %cst_78 [1] : vector<16x32xf32> to vector<16xf32>
    %195 = vector.shape_cast %194 : vector<16xf32> to vector<16x1xf32>
    %cst_79 = arith.constant 3.200000e+01 : f32
    %196 = vector.broadcast %cst_79 : f32 to vector<16x1xf32>
    %197 = arith.divf %195, %196 : vector<16x1xf32>
    %198 = vector.broadcast %197 : vector<16x1xf32> to vector<16x32xf32>
    %199 = arith.subf %189, %198 : vector<16x32xf32>
    %200 = arith.mulf %199, %199 : vector<16x32xf32>
    %cst_80 = arith.constant dense<0.000000e+00> : vector<16xf32>
    %201 = vector.multi_reduction <add>, %200, %cst_80 [1] : vector<16x32xf32> to vector<16xf32>
    %202 = vector.shape_cast %201 : vector<16xf32> to vector<16x1xf32>
    %cst_81 = arith.constant 3.200000e+01 : f32
    %203 = vector.broadcast %cst_81 : f32 to vector<16x1xf32>
    %204 = arith.divf %202, %203 : vector<16x1xf32>
    %cst_82 = arith.constant 9.99999974E-6 : f32
    %205 = vector.broadcast %cst_82 : f32 to vector<16x1xf32>
    %206 = arith.addf %204, %205 : vector<16x1xf32>
    %207 = math.rsqrt %206 : vector<16x1xf32>
    %208 = vector.broadcast %207 : vector<16x1xf32> to vector<16x32xf32>
    %209 = arith.mulf %199, %208 : vector<16x32xf32>
    %210 = vector.broadcast %191 : vector<1x32xf32> to vector<16x32xf32>
    %211 = arith.mulf %209, %210 : vector<16x32xf32>
    %212 = vector.broadcast %193 : vector<1x32xf32> to vector<16x32xf32>
    %213 = arith.addf %211, %212 : vector<16x32xf32>
    %c0_83 = arith.constant 0 : index
    %c0_84 = arith.constant 0 : index
    %c0_85 = arith.constant 0 : index
    %c0_86 = arith.constant 0 : index
    %214 = vector.load %arg14[%c0_83, %c0_84, %c0_85, %c0_86] : memref<1x4x32x8xbf16, #tpu.memory_space<vmem>>, vector<1x4x32x8xbf16>
    %215 = vector.shape_cast %214 : vector<1x4x32x8xbf16> to vector<4x32x8xbf16>
    %c0_87 = arith.constant 0 : index
    %c0_88 = arith.constant 0 : index
    %c0_89 = arith.constant 0 : index
    %c0_90 = arith.constant 0 : index
    %216 = vector.load %arg15[%c0_87, %c0_88, %c0_89, %c0_90] : memref<1x4x1x8xf32, #tpu.memory_space<vmem>>, vector<1x4x1x8xf32>
    %217 = vector.shape_cast %216 : vector<1x4x1x8xf32> to vector<4x1x8xf32>
    %c0_91 = arith.constant 0 : index
    %c0_92 = arith.constant 0 : index
    %c0_93 = arith.constant 0 : index
    %c0_94 = arith.constant 0 : index
    %218 = vector.load %arg16[%c0_91, %c0_92, %c0_93, %c0_94] : memref<1x4x32x8xbf16, #tpu.memory_space<vmem>>, vector<1x4x32x8xbf16>
    %219 = vector.shape_cast %218 : vector<1x4x32x8xbf16> to vector<4x32x8xbf16>
    %c0_95 = arith.constant 0 : index
    %c0_96 = arith.constant 0 : index
    %c0_97 = arith.constant 0 : index
    %c0_98 = arith.constant 0 : index
    %220 = vector.load %arg17[%c0_95, %c0_96, %c0_97, %c0_98] : memref<1x4x1x8xf32, #tpu.memory_space<vmem>>, vector<1x4x1x8xf32>
    %221 = vector.shape_cast %220 : vector<1x4x1x8xf32> to vector<4x1x8xf32>
    %c0_99 = arith.constant 0 : index
    %c0_100 = arith.constant 0 : index
    %c0_101 = arith.constant 0 : index
    %c0_102 = arith.constant 0 : index
    %222 = vector.load %arg18[%c0_99, %c0_100, %c0_101, %c0_102] : memref<1x4x32x8xbf16, #tpu.memory_space<vmem>>, vector<1x4x32x8xbf16>
    %223 = vector.shape_cast %222 : vector<1x4x32x8xbf16> to vector<4x32x8xbf16>
    %c0_103 = arith.constant 0 : index
    %c0_104 = arith.constant 0 : index
    %c0_105 = arith.constant 0 : index
    %c0_106 = arith.constant 0 : index
    %224 = vector.load %arg19[%c0_103, %c0_104, %c0_105, %c0_106] : memref<1x4x1x8xf32, #tpu.memory_space<vmem>>, vector<1x4x1x8xf32>
    %225 = vector.shape_cast %224 : vector<1x4x1x8xf32> to vector<4x1x8xf32>
    %c0_107 = arith.constant 0 : index
    %c0_108 = arith.constant 0 : index
    %c0_109 = arith.constant 0 : index
    %c0_110 = arith.constant 0 : index
    %226 = vector.load %arg20[%c0_107, %c0_108, %c0_109, %c0_110] : memref<1x4x8x32xbf16, #tpu.memory_space<vmem>>, vector<1x4x8x32xbf16>
    %227 = vector.shape_cast %226 : vector<1x4x8x32xbf16> to vector<4x8x32xbf16>
    %c0_111 = arith.constant 0 : index
    %c0_112 = arith.constant 0 : index
    %c0_113 = arith.constant 0 : index
    %228 = vector.load %arg21[%c0_111, %c0_112, %c0_113] : memref<1x1x32xf32, #tpu.memory_space<vmem>>, vector<1x1x32xf32>
    %229 = vector.shape_cast %228 : vector<1x1x32xf32> to vector<1x32xf32>
    %230 = arith.truncf %213 : vector<16x32xf32> to vector<16x32xbf16>
    %231 = arith.truncf %4 : vector<16x32xf32> to vector<16x32xbf16>
    %232 = vector.extract_strided_slice %215 {offsets = [0, 0, 0], sizes = [1, 32, 8], strides = [1, 1, 1]} : vector<4x32x8xbf16> to vector<1x32x8xbf16>
    %233 = vector.shape_cast %232 : vector<1x32x8xbf16> to vector<32x8xbf16>
    %cst_114 = arith.constant dense<0.000000e+00> : vector<16x8xf32>
    %234 = tpu.matmul %230, %233, %cst_114 {dimension_numbers = #tpu.dot_dimension_numbers<[1], [0], [0], [1], [0, 0, 1, 1], [], []>} : vector<16x32xbf16>, vector<32x8xbf16>, vector<16x8xf32> -> vector<16x8xf32>
    %235 = vector.extract_strided_slice %217 {offsets = [0, 0, 0], sizes = [1, 1, 8], strides = [1, 1, 1]} : vector<4x1x8xf32> to vector<1x1x8xf32>
    %236 = vector.shape_cast %235 : vector<1x1x8xf32> to vector<1x8xf32>
    %237 = vector.broadcast %236 : vector<1x8xf32> to vector<16x8xf32>
    %238 = arith.addf %234, %237 : vector<16x8xf32>
    %239 = vector.extract_strided_slice %219 {offsets = [0, 0, 0], sizes = [1, 32, 8], strides = [1, 1, 1]} : vector<4x32x8xbf16> to vector<1x32x8xbf16>
    %240 = vector.shape_cast %239 : vector<1x32x8xbf16> to vector<32x8xbf16>
    %cst_115 = arith.constant dense<0.000000e+00> : vector<16x8xf32>
    %241 = tpu.matmul %231, %240, %cst_115 {dimension_numbers = #tpu.dot_dimension_numbers<[1], [0], [0], [1], [0, 0, 1, 1], [], []>} : vector<16x32xbf16>, vector<32x8xbf16>, vector<16x8xf32> -> vector<16x8xf32>
    %242 = vector.extract_strided_slice %221 {offsets = [0, 0, 0], sizes = [1, 1, 8], strides = [1, 1, 1]} : vector<4x1x8xf32> to vector<1x1x8xf32>
    %243 = vector.shape_cast %242 : vector<1x1x8xf32> to vector<1x8xf32>
    %244 = vector.broadcast %243 : vector<1x8xf32> to vector<16x8xf32>
    %245 = arith.addf %241, %244 : vector<16x8xf32>
    %246 = vector.extract_strided_slice %223 {offsets = [0, 0, 0], sizes = [1, 32, 8], strides = [1, 1, 1]} : vector<4x32x8xbf16> to vector<1x32x8xbf16>
    %247 = vector.shape_cast %246 : vector<1x32x8xbf16> to vector<32x8xbf16>
    %cst_116 = arith.constant dense<0.000000e+00> : vector<16x8xf32>
    %248 = tpu.matmul %231, %247, %cst_116 {dimension_numbers = #tpu.dot_dimension_numbers<[1], [0], [0], [1], [0, 0, 1, 1], [], []>} : vector<16x32xbf16>, vector<32x8xbf16>, vector<16x8xf32> -> vector<16x8xf32>
    %249 = vector.extract_strided_slice %225 {offsets = [0, 0, 0], sizes = [1, 1, 8], strides = [1, 1, 1]} : vector<4x1x8xf32> to vector<1x1x8xf32>
    %250 = vector.shape_cast %249 : vector<1x1x8xf32> to vector<1x8xf32>
    %251 = vector.broadcast %250 : vector<1x8xf32> to vector<16x8xf32>
    %252 = arith.addf %248, %251 : vector<16x8xf32>
    %cst_117 = arith.constant dense<0.000000e+00> : vector<16x16xf32>
    %253 = tpu.matmul %238, %245, %cst_117 {dimension_numbers = #tpu.dot_dimension_numbers<[1], [1], [0], [0], [0, 0, 1, 0], [], []>} : vector<16x8xf32>, vector<16x8xf32>, vector<16x16xf32> -> vector<16x16xf32>
    %cst_118 = arith.constant 0.353553385 : f32
    %254 = vector.broadcast %cst_118 : f32 to vector<16x16xf32>
    %255 = arith.mulf %253, %254 : vector<16x16xf32>
    %256 = arith.addf %255, %5 : vector<16x16xf32>
    %cst_119 = arith.constant dense<0xFF800000> : vector<16xf32>
    %257 = vector.multi_reduction <maximumf>, %256, %cst_119 [1] : vector<16x16xf32> to vector<16xf32>
    %258 = vector.shape_cast %257 : vector<16xf32> to vector<16x1xf32>
    %259 = vector.broadcast %258 : vector<16x1xf32> to vector<16x16xf32>
    %260 = arith.subf %256, %259 : vector<16x16xf32>
    %261 = math.exp %260 : vector<16x16xf32>
    %cst_120 = arith.constant dense<0.000000e+00> : vector<16xf32>
    %262 = vector.multi_reduction <add>, %261, %cst_120 [1] : vector<16x16xf32> to vector<16xf32>
    %263 = vector.shape_cast %262 : vector<16xf32> to vector<16x1xf32>
    %264 = tpu.reciprocal %263 {approx = true} : vector<16x1xf32> -> vector<16x1xf32>
    %265 = vector.broadcast %264 : vector<16x1xf32> to vector<16x16xf32>
    %266 = arith.mulf %261, %265 : vector<16x16xf32>
    %cst_121 = arith.constant dense<0.000000e+00> : vector<16x8xf32>
    %267 = tpu.matmul %266, %252, %cst_121 {dimension_numbers = #tpu.dot_dimension_numbers<[1], [0], [0], [1], [0, 0, 1, 1], [], []>} : vector<16x16xf32>, vector<16x8xf32>, vector<16x8xf32> -> vector<16x8xf32>
    %268 = arith.truncf %267 : vector<16x8xf32> to vector<16x8xbf16>
    %269 = vector.extract_strided_slice %227 {offsets = [0, 0, 0], sizes = [1, 8, 32], strides = [1, 1, 1]} : vector<4x8x32xbf16> to vector<1x8x32xbf16>
    %270 = vector.shape_cast %269 : vector<1x8x32xbf16> to vector<8x32xbf16>
    %cst_122 = arith.constant dense<0.000000e+00> : vector<16x32xf32>
    %271 = tpu.matmul %268, %270, %cst_122 {dimension_numbers = #tpu.dot_dimension_numbers<[1], [0], [0], [1], [0, 0, 1, 1], [], []>} : vector<16x8xbf16>, vector<8x32xbf16>, vector<16x32xf32> -> vector<16x32xf32>
    %272 = vector.extract_strided_slice %215 {offsets = [1, 0, 0], sizes = [1, 32, 8], strides = [1, 1, 1]} : vector<4x32x8xbf16> to vector<1x32x8xbf16>
    %273 = vector.shape_cast %272 : vector<1x32x8xbf16> to vector<32x8xbf16>
    %cst_123 = arith.constant dense<0.000000e+00> : vector<16x8xf32>
    %274 = tpu.matmul %230, %273, %cst_123 {dimension_numbers = #tpu.dot_dimension_numbers<[1], [0], [0], [1], [0, 0, 1, 1], [], []>} : vector<16x32xbf16>, vector<32x8xbf16>, vector<16x8xf32> -> vector<16x8xf32>
    %275 = vector.extract_strided_slice %217 {offsets = [1, 0, 0], sizes = [1, 1, 8], strides = [1, 1, 1]} : vector<4x1x8xf32> to vector<1x1x8xf32>
    %276 = vector.shape_cast %275 : vector<1x1x8xf32> to vector<1x8xf32>
    %277 = vector.broadcast %276 : vector<1x8xf32> to vector<16x8xf32>
    %278 = arith.addf %274, %277 : vector<16x8xf32>
    %279 = vector.extract_strided_slice %219 {offsets = [1, 0, 0], sizes = [1, 32, 8], strides = [1, 1, 1]} : vector<4x32x8xbf16> to vector<1x32x8xbf16>
    %280 = vector.shape_cast %279 : vector<1x32x8xbf16> to vector<32x8xbf16>
    %cst_124 = arith.constant dense<0.000000e+00> : vector<16x8xf32>
    %281 = tpu.matmul %231, %280, %cst_124 {dimension_numbers = #tpu.dot_dimension_numbers<[1], [0], [0], [1], [0, 0, 1, 1], [], []>} : vector<16x32xbf16>, vector<32x8xbf16>, vector<16x8xf32> -> vector<16x8xf32>
    %282 = vector.extract_strided_slice %221 {offsets = [1, 0, 0], sizes = [1, 1, 8], strides = [1, 1, 1]} : vector<4x1x8xf32> to vector<1x1x8xf32>
    %283 = vector.shape_cast %282 : vector<1x1x8xf32> to vector<1x8xf32>
    %284 = vector.broadcast %283 : vector<1x8xf32> to vector<16x8xf32>
    %285 = arith.addf %281, %284 : vector<16x8xf32>
    %286 = vector.extract_strided_slice %223 {offsets = [1, 0, 0], sizes = [1, 32, 8], strides = [1, 1, 1]} : vector<4x32x8xbf16> to vector<1x32x8xbf16>
    %287 = vector.shape_cast %286 : vector<1x32x8xbf16> to vector<32x8xbf16>
    %cst_125 = arith.constant dense<0.000000e+00> : vector<16x8xf32>
    %288 = tpu.matmul %231, %287, %cst_125 {dimension_numbers = #tpu.dot_dimension_numbers<[1], [0], [0], [1], [0, 0, 1, 1], [], []>} : vector<16x32xbf16>, vector<32x8xbf16>, vector<16x8xf32> -> vector<16x8xf32>
    %289 = vector.extract_strided_slice %225 {offsets = [1, 0, 0], sizes = [1, 1, 8], strides = [1, 1, 1]} : vector<4x1x8xf32> to vector<1x1x8xf32>
    %290 = vector.shape_cast %289 : vector<1x1x8xf32> to vector<1x8xf32>
    %291 = vector.broadcast %290 : vector<1x8xf32> to vector<16x8xf32>
    %292 = arith.addf %288, %291 : vector<16x8xf32>
    %cst_126 = arith.constant dense<0.000000e+00> : vector<16x16xf32>
    %293 = tpu.matmul %278, %285, %cst_126 {dimension_numbers = #tpu.dot_dimension_numbers<[1], [1], [0], [0], [0, 0, 1, 0], [], []>} : vector<16x8xf32>, vector<16x8xf32>, vector<16x16xf32> -> vector<16x16xf32>
    %cst_127 = arith.constant 0.353553385 : f32
    %294 = vector.broadcast %cst_127 : f32 to vector<16x16xf32>
    %295 = arith.mulf %293, %294 : vector<16x16xf32>
    %296 = arith.addf %295, %5 : vector<16x16xf32>
    %cst_128 = arith.constant dense<0xFF800000> : vector<16xf32>
    %297 = vector.multi_reduction <maximumf>, %296, %cst_128 [1] : vector<16x16xf32> to vector<16xf32>
    %298 = vector.shape_cast %297 : vector<16xf32> to vector<16x1xf32>
    %299 = vector.broadcast %298 : vector<16x1xf32> to vector<16x16xf32>
    %300 = arith.subf %296, %299 : vector<16x16xf32>
    %301 = math.exp %300 : vector<16x16xf32>
    %cst_129 = arith.constant dense<0.000000e+00> : vector<16xf32>
    %302 = vector.multi_reduction <add>, %301, %cst_129 [1] : vector<16x16xf32> to vector<16xf32>
    %303 = vector.shape_cast %302 : vector<16xf32> to vector<16x1xf32>
    %304 = tpu.reciprocal %303 {approx = true} : vector<16x1xf32> -> vector<16x1xf32>
    %305 = vector.broadcast %304 : vector<16x1xf32> to vector<16x16xf32>
    %306 = arith.mulf %301, %305 : vector<16x16xf32>
    %cst_130 = arith.constant dense<0.000000e+00> : vector<16x8xf32>
    %307 = tpu.matmul %306, %292, %cst_130 {dimension_numbers = #tpu.dot_dimension_numbers<[1], [0], [0], [1], [0, 0, 1, 1], [], []>} : vector<16x16xf32>, vector<16x8xf32>, vector<16x8xf32> -> vector<16x8xf32>
    %308 = arith.truncf %307 : vector<16x8xf32> to vector<16x8xbf16>
    %309 = vector.extract_strided_slice %227 {offsets = [1, 0, 0], sizes = [1, 8, 32], strides = [1, 1, 1]} : vector<4x8x32xbf16> to vector<1x8x32xbf16>
    %310 = vector.shape_cast %309 : vector<1x8x32xbf16> to vector<8x32xbf16>
    %cst_131 = arith.constant dense<0.000000e+00> : vector<16x32xf32>
    %311 = tpu.matmul %308, %310, %cst_131 {dimension_numbers = #tpu.dot_dimension_numbers<[1], [0], [0], [1], [0, 0, 1, 1], [], []>} : vector<16x8xbf16>, vector<8x32xbf16>, vector<16x32xf32> -> vector<16x32xf32>
    %312 = arith.addf %271, %311 : vector<16x32xf32>
    %313 = vector.extract_strided_slice %215 {offsets = [2, 0, 0], sizes = [1, 32, 8], strides = [1, 1, 1]} : vector<4x32x8xbf16> to vector<1x32x8xbf16>
    %314 = vector.shape_cast %313 : vector<1x32x8xbf16> to vector<32x8xbf16>
    %cst_132 = arith.constant dense<0.000000e+00> : vector<16x8xf32>
    %315 = tpu.matmul %230, %314, %cst_132 {dimension_numbers = #tpu.dot_dimension_numbers<[1], [0], [0], [1], [0, 0, 1, 1], [], []>} : vector<16x32xbf16>, vector<32x8xbf16>, vector<16x8xf32> -> vector<16x8xf32>
    %316 = vector.extract_strided_slice %217 {offsets = [2, 0, 0], sizes = [1, 1, 8], strides = [1, 1, 1]} : vector<4x1x8xf32> to vector<1x1x8xf32>
    %317 = vector.shape_cast %316 : vector<1x1x8xf32> to vector<1x8xf32>
    %318 = vector.broadcast %317 : vector<1x8xf32> to vector<16x8xf32>
    %319 = arith.addf %315, %318 : vector<16x8xf32>
    %320 = vector.extract_strided_slice %219 {offsets = [2, 0, 0], sizes = [1, 32, 8], strides = [1, 1, 1]} : vector<4x32x8xbf16> to vector<1x32x8xbf16>
    %321 = vector.shape_cast %320 : vector<1x32x8xbf16> to vector<32x8xbf16>
    %cst_133 = arith.constant dense<0.000000e+00> : vector<16x8xf32>
    %322 = tpu.matmul %231, %321, %cst_133 {dimension_numbers = #tpu.dot_dimension_numbers<[1], [0], [0], [1], [0, 0, 1, 1], [], []>} : vector<16x32xbf16>, vector<32x8xbf16>, vector<16x8xf32> -> vector<16x8xf32>
    %323 = vector.extract_strided_slice %221 {offsets = [2, 0, 0], sizes = [1, 1, 8], strides = [1, 1, 1]} : vector<4x1x8xf32> to vector<1x1x8xf32>
    %324 = vector.shape_cast %323 : vector<1x1x8xf32> to vector<1x8xf32>
    %325 = vector.broadcast %324 : vector<1x8xf32> to vector<16x8xf32>
    %326 = arith.addf %322, %325 : vector<16x8xf32>
    %327 = vector.extract_strided_slice %223 {offsets = [2, 0, 0], sizes = [1, 32, 8], strides = [1, 1, 1]} : vector<4x32x8xbf16> to vector<1x32x8xbf16>
    %328 = vector.shape_cast %327 : vector<1x32x8xbf16> to vector<32x8xbf16>
    %cst_134 = arith.constant dense<0.000000e+00> : vector<16x8xf32>
    %329 = tpu.matmul %231, %328, %cst_134 {dimension_numbers = #tpu.dot_dimension_numbers<[1], [0], [0], [1], [0, 0, 1, 1], [], []>} : vector<16x32xbf16>, vector<32x8xbf16>, vector<16x8xf32> -> vector<16x8xf32>
    %330 = vector.extract_strided_slice %225 {offsets = [2, 0, 0], sizes = [1, 1, 8], strides = [1, 1, 1]} : vector<4x1x8xf32> to vector<1x1x8xf32>
    %331 = vector.shape_cast %330 : vector<1x1x8xf32> to vector<1x8xf32>
    %332 = vector.broadcast %331 : vector<1x8xf32> to vector<16x8xf32>
    %333 = arith.addf %329, %332 : vector<16x8xf32>
    %cst_135 = arith.constant dense<0.000000e+00> : vector<16x16xf32>
    %334 = tpu.matmul %319, %326, %cst_135 {dimension_numbers = #tpu.dot_dimension_numbers<[1], [1], [0], [0], [0, 0, 1, 0], [], []>} : vector<16x8xf32>, vector<16x8xf32>, vector<16x16xf32> -> vector<16x16xf32>
    %cst_136 = arith.constant 0.353553385 : f32
    %335 = vector.broadcast %cst_136 : f32 to vector<16x16xf32>
    %336 = arith.mulf %334, %335 : vector<16x16xf32>
    %337 = arith.addf %336, %5 : vector<16x16xf32>
    %cst_137 = arith.constant dense<0xFF800000> : vector<16xf32>
    %338 = vector.multi_reduction <maximumf>, %337, %cst_137 [1] : vector<16x16xf32> to vector<16xf32>
    %339 = vector.shape_cast %338 : vector<16xf32> to vector<16x1xf32>
    %340 = vector.broadcast %339 : vector<16x1xf32> to vector<16x16xf32>
    %341 = arith.subf %337, %340 : vector<16x16xf32>
    %342 = math.exp %341 : vector<16x16xf32>
    %cst_138 = arith.constant dense<0.000000e+00> : vector<16xf32>
    %343 = vector.multi_reduction <add>, %342, %cst_138 [1] : vector<16x16xf32> to vector<16xf32>
    %344 = vector.shape_cast %343 : vector<16xf32> to vector<16x1xf32>
    %345 = tpu.reciprocal %344 {approx = true} : vector<16x1xf32> -> vector<16x1xf32>
    %346 = vector.broadcast %345 : vector<16x1xf32> to vector<16x16xf32>
    %347 = arith.mulf %342, %346 : vector<16x16xf32>
    %cst_139 = arith.constant dense<0.000000e+00> : vector<16x8xf32>
    %348 = tpu.matmul %347, %333, %cst_139 {dimension_numbers = #tpu.dot_dimension_numbers<[1], [0], [0], [1], [0, 0, 1, 1], [], []>} : vector<16x16xf32>, vector<16x8xf32>, vector<16x8xf32> -> vector<16x8xf32>
    %349 = arith.truncf %348 : vector<16x8xf32> to vector<16x8xbf16>
    %350 = vector.extract_strided_slice %227 {offsets = [2, 0, 0], sizes = [1, 8, 32], strides = [1, 1, 1]} : vector<4x8x32xbf16> to vector<1x8x32xbf16>
    %351 = vector.shape_cast %350 : vector<1x8x32xbf16> to vector<8x32xbf16>
    %cst_140 = arith.constant dense<0.000000e+00> : vector<16x32xf32>
    %352 = tpu.matmul %349, %351, %cst_140 {dimension_numbers = #tpu.dot_dimension_numbers<[1], [0], [0], [1], [0, 0, 1, 1], [], []>} : vector<16x8xbf16>, vector<8x32xbf16>, vector<16x32xf32> -> vector<16x32xf32>
    %353 = arith.addf %312, %352 : vector<16x32xf32>
    %354 = vector.extract_strided_slice %215 {offsets = [3, 0, 0], sizes = [1, 32, 8], strides = [1, 1, 1]} : vector<4x32x8xbf16> to vector<1x32x8xbf16>
    %355 = vector.shape_cast %354 : vector<1x32x8xbf16> to vector<32x8xbf16>
    %cst_141 = arith.constant dense<0.000000e+00> : vector<16x8xf32>
    %356 = tpu.matmul %230, %355, %cst_141 {dimension_numbers = #tpu.dot_dimension_numbers<[1], [0], [0], [1], [0, 0, 1, 1], [], []>} : vector<16x32xbf16>, vector<32x8xbf16>, vector<16x8xf32> -> vector<16x8xf32>
    %357 = vector.extract_strided_slice %217 {offsets = [3, 0, 0], sizes = [1, 1, 8], strides = [1, 1, 1]} : vector<4x1x8xf32> to vector<1x1x8xf32>
    %358 = vector.shape_cast %357 : vector<1x1x8xf32> to vector<1x8xf32>
    %359 = vector.broadcast %358 : vector<1x8xf32> to vector<16x8xf32>
    %360 = arith.addf %356, %359 : vector<16x8xf32>
    %361 = vector.extract_strided_slice %219 {offsets = [3, 0, 0], sizes = [1, 32, 8], strides = [1, 1, 1]} : vector<4x32x8xbf16> to vector<1x32x8xbf16>
    %362 = vector.shape_cast %361 : vector<1x32x8xbf16> to vector<32x8xbf16>
    %cst_142 = arith.constant dense<0.000000e+00> : vector<16x8xf32>
    %363 = tpu.matmul %231, %362, %cst_142 {dimension_numbers = #tpu.dot_dimension_numbers<[1], [0], [0], [1], [0, 0, 1, 1], [], []>} : vector<16x32xbf16>, vector<32x8xbf16>, vector<16x8xf32> -> vector<16x8xf32>
    %364 = vector.extract_strided_slice %221 {offsets = [3, 0, 0], sizes = [1, 1, 8], strides = [1, 1, 1]} : vector<4x1x8xf32> to vector<1x1x8xf32>
    %365 = vector.shape_cast %364 : vector<1x1x8xf32> to vector<1x8xf32>
    %366 = vector.broadcast %365 : vector<1x8xf32> to vector<16x8xf32>
    %367 = arith.addf %363, %366 : vector<16x8xf32>
    %368 = vector.extract_strided_slice %223 {offsets = [3, 0, 0], sizes = [1, 32, 8], strides = [1, 1, 1]} : vector<4x32x8xbf16> to vector<1x32x8xbf16>
    %369 = vector.shape_cast %368 : vector<1x32x8xbf16> to vector<32x8xbf16>
    %cst_143 = arith.constant dense<0.000000e+00> : vector<16x8xf32>
    %370 = tpu.matmul %231, %369, %cst_143 {dimension_numbers = #tpu.dot_dimension_numbers<[1], [0], [0], [1], [0, 0, 1, 1], [], []>} : vector<16x32xbf16>, vector<32x8xbf16>, vector<16x8xf32> -> vector<16x8xf32>
    %371 = vector.extract_strided_slice %225 {offsets = [3, 0, 0], sizes = [1, 1, 8], strides = [1, 1, 1]} : vector<4x1x8xf32> to vector<1x1x8xf32>
    %372 = vector.shape_cast %371 : vector<1x1x8xf32> to vector<1x8xf32>
    %373 = vector.broadcast %372 : vector<1x8xf32> to vector<16x8xf32>
    %374 = arith.addf %370, %373 : vector<16x8xf32>
    %cst_144 = arith.constant dense<0.000000e+00> : vector<16x16xf32>
    %375 = tpu.matmul %360, %367, %cst_144 {dimension_numbers = #tpu.dot_dimension_numbers<[1], [1], [0], [0], [0, 0, 1, 0], [], []>} : vector<16x8xf32>, vector<16x8xf32>, vector<16x16xf32> -> vector<16x16xf32>
    %cst_145 = arith.constant 0.353553385 : f32
    %376 = vector.broadcast %cst_145 : f32 to vector<16x16xf32>
    %377 = arith.mulf %375, %376 : vector<16x16xf32>
    %378 = arith.addf %377, %5 : vector<16x16xf32>
    %cst_146 = arith.constant dense<0xFF800000> : vector<16xf32>
    %379 = vector.multi_reduction <maximumf>, %378, %cst_146 [1] : vector<16x16xf32> to vector<16xf32>
    %380 = vector.shape_cast %379 : vector<16xf32> to vector<16x1xf32>
    %381 = vector.broadcast %380 : vector<16x1xf32> to vector<16x16xf32>
    %382 = arith.subf %378, %381 : vector<16x16xf32>
    %383 = math.exp %382 : vector<16x16xf32>
    %cst_147 = arith.constant dense<0.000000e+00> : vector<16xf32>
    %384 = vector.multi_reduction <add>, %383, %cst_147 [1] : vector<16x16xf32> to vector<16xf32>
    %385 = vector.shape_cast %384 : vector<16xf32> to vector<16x1xf32>
    %386 = tpu.reciprocal %385 {approx = true} : vector<16x1xf32> -> vector<16x1xf32>
    %387 = vector.broadcast %386 : vector<16x1xf32> to vector<16x16xf32>
    %388 = arith.mulf %383, %387 : vector<16x16xf32>
    %cst_148 = arith.constant dense<0.000000e+00> : vector<16x8xf32>
    %389 = tpu.matmul %388, %374, %cst_148 {dimension_numbers = #tpu.dot_dimension_numbers<[1], [0], [0], [1], [0, 0, 1, 1], [], []>} : vector<16x16xf32>, vector<16x8xf32>, vector<16x8xf32> -> vector<16x8xf32>
    %390 = arith.truncf %389 : vector<16x8xf32> to vector<16x8xbf16>
    %391 = vector.extract_strided_slice %227 {offsets = [3, 0, 0], sizes = [1, 8, 32], strides = [1, 1, 1]} : vector<4x8x32xbf16> to vector<1x8x32xbf16>
    %392 = vector.shape_cast %391 : vector<1x8x32xbf16> to vector<8x32xbf16>
    %cst_149 = arith.constant dense<0.000000e+00> : vector<16x32xf32>
    %393 = tpu.matmul %390, %392, %cst_149 {dimension_numbers = #tpu.dot_dimension_numbers<[1], [0], [0], [1], [0, 0, 1, 1], [], []>} : vector<16x8xbf16>, vector<8x32xbf16>, vector<16x32xf32> -> vector<16x32xf32>
    %394 = arith.addf %353, %393 : vector<16x32xf32>
    %395 = vector.broadcast %229 : vector<1x32xf32> to vector<16x32xf32>
    %396 = arith.addf %394, %395 : vector<16x32xf32>
    %397 = arith.addf %213, %396 : vector<16x32xf32>
    %c0_150 = arith.constant 0 : index
    %c0_151 = arith.constant 0 : index
    %c0_152 = arith.constant 0 : index
    %398 = vector.load %arg22[%c0_150, %c0_151, %c0_152] : memref<1x1x32xf32, #tpu.memory_space<vmem>>, vector<1x1x32xf32>
    %399 = vector.shape_cast %398 : vector<1x1x32xf32> to vector<1x32xf32>
    %c0_153 = arith.constant 0 : index
    %c0_154 = arith.constant 0 : index
    %c0_155 = arith.constant 0 : index
    %400 = vector.load %arg23[%c0_153, %c0_154, %c0_155] : memref<1x1x32xf32, #tpu.memory_space<vmem>>, vector<1x1x32xf32>
    %401 = vector.shape_cast %400 : vector<1x1x32xf32> to vector<1x32xf32>
    %cst_156 = arith.constant dense<0.000000e+00> : vector<16xf32>
    %402 = vector.multi_reduction <add>, %397, %cst_156 [1] : vector<16x32xf32> to vector<16xf32>
    %403 = vector.shape_cast %402 : vector<16xf32> to vector<16x1xf32>
    %cst_157 = arith.constant 3.200000e+01 : f32
    %404 = vector.broadcast %cst_157 : f32 to vector<16x1xf32>
    %405 = arith.divf %403, %404 : vector<16x1xf32>
    %406 = vector.broadcast %405 : vector<16x1xf32> to vector<16x32xf32>
    %407 = arith.subf %397, %406 : vector<16x32xf32>
    %408 = arith.mulf %407, %407 : vector<16x32xf32>
    %cst_158 = arith.constant dense<0.000000e+00> : vector<16xf32>
    %409 = vector.multi_reduction <add>, %408, %cst_158 [1] : vector<16x32xf32> to vector<16xf32>
    %410 = vector.shape_cast %409 : vector<16xf32> to vector<16x1xf32>
    %cst_159 = arith.constant 3.200000e+01 : f32
    %411 = vector.broadcast %cst_159 : f32 to vector<16x1xf32>
    %412 = arith.divf %410, %411 : vector<16x1xf32>
    %cst_160 = arith.constant 9.99999974E-6 : f32
    %413 = vector.broadcast %cst_160 : f32 to vector<16x1xf32>
    %414 = arith.addf %412, %413 : vector<16x1xf32>
    %415 = math.rsqrt %414 : vector<16x1xf32>
    %416 = vector.broadcast %415 : vector<16x1xf32> to vector<16x32xf32>
    %417 = arith.mulf %407, %416 : vector<16x32xf32>
    %418 = vector.broadcast %399 : vector<1x32xf32> to vector<16x32xf32>
    %419 = arith.mulf %417, %418 : vector<16x32xf32>
    %420 = vector.broadcast %401 : vector<1x32xf32> to vector<16x32xf32>
    %421 = arith.addf %419, %420 : vector<16x32xf32>
    %c0_161 = arith.constant 0 : index
    %c0_162 = arith.constant 0 : index
    %c0_163 = arith.constant 0 : index
    %422 = vector.load %arg24[%c0_161, %c0_162, %c0_163] : memref<1x32x2048xbf16, #tpu.memory_space<vmem>>, vector<1x32x2048xbf16>
    %423 = vector.shape_cast %422 : vector<1x32x2048xbf16> to vector<32x2048xbf16>
    %c0_164 = arith.constant 0 : index
    %c0_165 = arith.constant 0 : index
    %c0_166 = arith.constant 0 : index
    %424 = vector.load %arg25[%c0_164, %c0_165, %c0_166] : memref<1x1x2048xf32, #tpu.memory_space<vmem>>, vector<1x1x2048xf32>
    %425 = vector.shape_cast %424 : vector<1x1x2048xf32> to vector<1x2048xf32>
    %426 = arith.truncf %421 : vector<16x32xf32> to vector<16x32xbf16>
    %cst_167 = arith.constant dense<0.000000e+00> : vector<16x2048xf32>
    %427 = tpu.matmul %426, %423, %cst_167 {dimension_numbers = #tpu.dot_dimension_numbers<[1], [0], [0], [1], [0, 0, 1, 1], [], []>} : vector<16x32xbf16>, vector<32x2048xbf16>, vector<16x2048xf32> -> vector<16x2048xf32>
    %428 = vector.broadcast %425 : vector<1x2048xf32> to vector<16x2048xf32>
    %429 = arith.addf %427, %428 : vector<16x2048xf32>
    %cst_168 = arith.constant 0.000000e+00 : f32
    %430 = vector.broadcast %cst_168 : f32 to vector<16x2048xf32>
    %431 = arith.maximumf %429, %430 : vector<16x2048xf32>
    %c0_169 = arith.constant 0 : index
    %c0_170 = arith.constant 0 : index
    %c0_171 = arith.constant 0 : index
    %432 = vector.load %arg26[%c0_169, %c0_170, %c0_171] : memref<1x2048x32xbf16, #tpu.memory_space<vmem>>, vector<1x2048x32xbf16>
    %433 = vector.shape_cast %432 : vector<1x2048x32xbf16> to vector<2048x32xbf16>
    %c0_172 = arith.constant 0 : index
    %c0_173 = arith.constant 0 : index
    %c0_174 = arith.constant 0 : index
    %434 = vector.load %arg27[%c0_172, %c0_173, %c0_174] : memref<1x1x32xf32, #tpu.memory_space<vmem>>, vector<1x1x32xf32>
    %435 = vector.shape_cast %434 : vector<1x1x32xf32> to vector<1x32xf32>
    %436 = arith.truncf %431 : vector<16x2048xf32> to vector<16x2048xbf16>
    %cst_175 = arith.constant dense<0.000000e+00> : vector<16x32xf32>
    %437 = tpu.matmul %436, %433, %cst_175 {dimension_numbers = #tpu.dot_dimension_numbers<[1], [0], [0], [1], [0, 0, 1, 1], [], []>} : vector<16x2048xbf16>, vector<2048x32xbf16>, vector<16x32xf32> -> vector<16x32xf32>
    %438 = vector.broadcast %435 : vector<1x32xf32> to vector<16x32xf32>
    %439 = arith.addf %437, %438 : vector<16x32xf32>
    %440 = arith.addf %421, %439 : vector<16x32xf32>
    %c0_176 = arith.constant 0 : index
    %c0_177 = arith.constant 0 : index
    %c0_178 = arith.constant 0 : index
    %441 = vector.load %arg28[%c0_176, %c0_177, %c0_178] : memref<1x1x32xf32, #tpu.memory_space<vmem>>, vector<1x1x32xf32>
    %442 = vector.shape_cast %441 : vector<1x1x32xf32> to vector<1x32xf32>
    %c0_179 = arith.constant 0 : index
    %c0_180 = arith.constant 0 : index
    %c0_181 = arith.constant 0 : index
    %443 = vector.load %arg29[%c0_179, %c0_180, %c0_181] : memref<1x1x32xf32, #tpu.memory_space<vmem>>, vector<1x1x32xf32>
    %444 = vector.shape_cast %443 : vector<1x1x32xf32> to vector<1x32xf32>
    %cst_182 = arith.constant dense<0.000000e+00> : vector<16xf32>
    %445 = vector.multi_reduction <add>, %440, %cst_182 [1] : vector<16x32xf32> to vector<16xf32>
    %446 = vector.shape_cast %445 : vector<16xf32> to vector<16x1xf32>
    %cst_183 = arith.constant 3.200000e+01 : f32
    %447 = vector.broadcast %cst_183 : f32 to vector<16x1xf32>
    %448 = arith.divf %446, %447 : vector<16x1xf32>
    %449 = vector.broadcast %448 : vector<16x1xf32> to vector<16x32xf32>
    %450 = arith.subf %440, %449 : vector<16x32xf32>
    %451 = arith.mulf %450, %450 : vector<16x32xf32>
    %cst_184 = arith.constant dense<0.000000e+00> : vector<16xf32>
    %452 = vector.multi_reduction <add>, %451, %cst_184 [1] : vector<16x32xf32> to vector<16xf32>
    %453 = vector.shape_cast %452 : vector<16xf32> to vector<16x1xf32>
    %cst_185 = arith.constant 3.200000e+01 : f32
    %454 = vector.broadcast %cst_185 : f32 to vector<16x1xf32>
    %455 = arith.divf %453, %454 : vector<16x1xf32>
    %cst_186 = arith.constant 9.99999974E-6 : f32
    %456 = vector.broadcast %cst_186 : f32 to vector<16x1xf32>
    %457 = arith.addf %455, %456 : vector<16x1xf32>
    %458 = math.rsqrt %457 : vector<16x1xf32>
    %459 = vector.broadcast %458 : vector<16x1xf32> to vector<16x32xf32>
    %460 = arith.mulf %450, %459 : vector<16x32xf32>
    %461 = vector.broadcast %442 : vector<1x32xf32> to vector<16x32xf32>
    %462 = arith.mulf %460, %461 : vector<16x32xf32>
    %463 = vector.broadcast %444 : vector<1x32xf32> to vector<16x32xf32>
    %464 = arith.addf %462, %463 : vector<16x32xf32>
    %c0_187 = arith.constant 0 : index
    %c0_188 = arith.constant 0 : index
    %465 = vector.load %arg35[%c0_187, %c0_188] : memref<16x32xf32, #tpu.memory_space<vmem>>, vector<16x32xf32>
    tpu.vector_store %arg35[%c0_187, %c0_188], %464 {strides = array<i32>} : memref<16x32xf32, #tpu.memory_space<vmem>>, vector<16x32xf32>,
    %c1_i32 = arith.constant 1 : i32
    %466 = arith.cmpi eq, %arg0, %c1_i32 : i32
    %467 = arith.extui %466 : i1 to i32
    %c0_i32_189 = arith.constant 0 : i32
    %468 = arith.cmpi ne, %467, %c0_i32_189 : i32
    scf.if %468 {
      %c0_190 = arith.constant 0 : index
      %c0_191 = arith.constant 0 : index
      %469 = vector.load %arg30[%c0_190, %c0_191] : memref<1x32xf32, #tpu.memory_space<vmem>>, vector<1x32xf32>
      %c0_192 = arith.constant 0 : index
      %c0_193 = arith.constant 0 : index
      %470 = vector.load %arg31[%c0_192, %c0_193] : memref<1x32xf32, #tpu.memory_space<vmem>>, vector<1x32xf32>
      %cst_194 = arith.constant dense<0.000000e+00> : vector<16xf32>
      %471 = vector.multi_reduction <add>, %464, %cst_194 [1] : vector<16x32xf32> to vector<16xf32>
      %472 = vector.shape_cast %471 : vector<16xf32> to vector<16x1xf32>
      %cst_195 = arith.constant 3.200000e+01 : f32
      %473 = vector.broadcast %cst_195 : f32 to vector<16x1xf32>
      %474 = arith.divf %472, %473 : vector<16x1xf32>
      %475 = vector.broadcast %474 : vector<16x1xf32> to vector<16x32xf32>
      %476 = arith.subf %464, %475 : vector<16x32xf32>
      %477 = arith.mulf %476, %476 : vector<16x32xf32>
      %cst_196 = arith.constant dense<0.000000e+00> : vector<16xf32>
      %478 = vector.multi_reduction <add>, %477, %cst_196 [1] : vector<16x32xf32> to vector<16xf32>
      %479 = vector.shape_cast %478 : vector<16xf32> to vector<16x1xf32>
      %cst_197 = arith.constant 3.200000e+01 : f32
      %480 = vector.broadcast %cst_197 : f32 to vector<16x1xf32>
      %481 = arith.divf %479, %480 : vector<16x1xf32>
      %cst_198 = arith.constant 9.99999974E-6 : f32
      %482 = vector.broadcast %cst_198 : f32 to vector<16x1xf32>
      %483 = arith.addf %481, %482 : vector<16x1xf32>
      %484 = math.rsqrt %483 : vector<16x1xf32>
      %485 = vector.broadcast %484 : vector<16x1xf32> to vector<16x32xf32>
      %486 = arith.mulf %476, %485 : vector<16x32xf32>
      %487 = vector.broadcast %469 : vector<1x32xf32> to vector<16x32xf32>
      %488 = arith.mulf %486, %487 : vector<16x32xf32>
      %489 = vector.broadcast %470 : vector<1x32xf32> to vector<16x32xf32>
      %490 = arith.addf %488, %489 : vector<16x32xf32>
      %c0_199 = arith.constant 0 : index
      %c0_200 = arith.constant 0 : index
      %491 = vector.load %arg32[%c0_199, %c0_200] : memref<1x32xf32, #tpu.memory_space<vmem>>, vector<1x32xf32>
      %492 = vector.broadcast %491 : vector<1x32xf32> to vector<16x32xf32>
      %493 = arith.mulf %490, %492 : vector<16x32xf32>
      %cst_201 = arith.constant dense<0.000000e+00> : vector<16xf32>
      %494 = vector.multi_reduction <add>, %493, %cst_201 [1] : vector<16x32xf32> to vector<16xf32>
      %495 = vector.shape_cast %494 : vector<16xf32> to vector<16x1xf32>
      %c0_202 = arith.constant 0 : index
      %c0_203 = arith.constant 0 : index
      %496 = vector.load %arg33[%c0_202, %c0_203] : memref<1x1xf32, #tpu.memory_space<vmem>>, vector<1x1xf32>
      %497 = vector.broadcast %496 : vector<1x1xf32> to vector<16x1xf32>
      %498 = arith.addf %495, %497 : vector<16x1xf32>
      %c0_204 = arith.constant 0 : index
      %c0_205 = arith.constant 0 : index
      %499 = vector.load %arg34[%c0_204, %c0_205] : memref<16x1xf32, #tpu.memory_space<vmem>>, vector<16x1xf32>
      tpu.vector_store %arg34[%c0_204, %c0_205], %498 {strides = array<i32>} : memref<16x1xf32, #tpu.memory_space<vmem>>, vector<16x1xf32>,
    } else {
    }
    return
  }
  func.func @transform_0(%arg0: i32) -> (i32, i32) {
    %c0_i32 = arith.constant 0 : i32
    %c0_i32_0 = arith.constant 0 : i32
    %c0_i32_1 = arith.constant 0 : i32
    return %c0_i32, %c0_i32_0 : i32, i32
  }
  func.func @transform_1(%arg0: i32) -> (i32, i32) {
    %c0_i32 = arith.constant 0 : i32
    %c0_i32_0 = arith.constant 0 : i32
    %c0_i32_1 = arith.constant 0 : i32
    return %c0_i32, %c0_i32_0 : i32, i32
  }
  func.func @transform_2(%arg0: i32) -> (i32, i32) {
    %c0_i32 = arith.constant 0 : i32
    %c0_i32_0 = arith.constant 0 : i32
    %c0_i32_1 = arith.constant 0 : i32
    return %c0_i32, %c0_i32_0 : i32, i32
  }
  func.func @transform_3(%arg0: i32) -> (i32, i32, i32, i32) {
    %c0_i32 = arith.constant 0 : i32
    %c0_i32_0 = arith.constant 0 : i32
    %c0_i32_1 = arith.constant 0 : i32
    %c0_i32_2 = arith.constant 0 : i32
    return %arg0, %c0_i32, %c0_i32_0, %c0_i32_1 : i32, i32, i32, i32
  }
  func.func @transform_4(%arg0: i32) -> (i32, i32, i32, i32) {
    %c0_i32 = arith.constant 0 : i32
    %c0_i32_0 = arith.constant 0 : i32
    %c0_i32_1 = arith.constant 0 : i32
    %c0_i32_2 = arith.constant 0 : i32
    return %arg0, %c0_i32, %c0_i32_0, %c0_i32_1 : i32, i32, i32, i32
  }
  func.func @transform_5(%arg0: i32) -> (i32, i32, i32, i32) {
    %c0_i32 = arith.constant 0 : i32
    %c0_i32_0 = arith.constant 0 : i32
    %c0_i32_1 = arith.constant 0 : i32
    %c0_i32_2 = arith.constant 0 : i32
    return %arg0, %c0_i32, %c0_i32_0, %c0_i32_1 : i32, i32, i32, i32
  }
  func.func @transform_6(%arg0: i32) -> (i32, i32, i32, i32) {
    %c0_i32 = arith.constant 0 : i32
    %c0_i32_0 = arith.constant 0 : i32
    %c0_i32_1 = arith.constant 0 : i32
    %c0_i32_2 = arith.constant 0 : i32
    return %arg0, %c0_i32, %c0_i32_0, %c0_i32_1 : i32, i32, i32, i32
  }
  func.func @transform_7(%arg0: i32) -> (i32, i32, i32, i32) {
    %c0_i32 = arith.constant 0 : i32
    %c0_i32_0 = arith.constant 0 : i32
    %c0_i32_1 = arith.constant 0 : i32
    %c0_i32_2 = arith.constant 0 : i32
    return %arg0, %c0_i32, %c0_i32_0, %c0_i32_1 : i32, i32, i32, i32
  }
  func.func @transform_8(%arg0: i32) -> (i32, i32, i32, i32) {
    %c0_i32 = arith.constant 0 : i32
    %c0_i32_0 = arith.constant 0 : i32
    %c0_i32_1 = arith.constant 0 : i32
    %c0_i32_2 = arith.constant 0 : i32
    return %arg0, %c0_i32, %c0_i32_0, %c0_i32_1 : i32, i32, i32, i32
  }
  func.func @transform_9(%arg0: i32) -> (i32, i32, i32, i32) {
    %c0_i32 = arith.constant 0 : i32
    %c0_i32_0 = arith.constant 0 : i32
    %c0_i32_1 = arith.constant 0 : i32
    %c0_i32_2 = arith.constant 0 : i32
    return %arg0, %c0_i32, %c0_i32_0, %c0_i32_1 : i32, i32, i32, i32
  }
  func.func @transform_10(%arg0: i32) -> (i32, i32, i32) {
    %c0_i32 = arith.constant 0 : i32
    %c0_i32_0 = arith.constant 0 : i32
    %c0_i32_1 = arith.constant 0 : i32
    return %arg0, %c0_i32, %c0_i32_0 : i32, i32, i32
  }
  func.func @transform_11(%arg0: i32) -> (i32, i32, i32) {
    %c0_i32 = arith.constant 0 : i32
    %c0_i32_0 = arith.constant 0 : i32
    %c0_i32_1 = arith.constant 0 : i32
    return %arg0, %c0_i32, %c0_i32_0 : i32, i32, i32
  }
  func.func @transform_12(%arg0: i32) -> (i32, i32, i32) {
    %c0_i32 = arith.constant 0 : i32
    %c0_i32_0 = arith.constant 0 : i32
    %c0_i32_1 = arith.constant 0 : i32
    return %arg0, %c0_i32, %c0_i32_0 : i32, i32, i32
  }
  func.func @transform_13(%arg0: i32) -> (i32, i32, i32, i32) {
    %c0_i32 = arith.constant 0 : i32
    %c0_i32_0 = arith.constant 0 : i32
    %c0_i32_1 = arith.constant 0 : i32
    %c0_i32_2 = arith.constant 0 : i32
    return %arg0, %c0_i32, %c0_i32_0, %c0_i32_1 : i32, i32, i32, i32
  }
  func.func @transform_14(%arg0: i32) -> (i32, i32, i32, i32) {
    %c0_i32 = arith.constant 0 : i32
    %c0_i32_0 = arith.constant 0 : i32
    %c0_i32_1 = arith.constant 0 : i32
    %c0_i32_2 = arith.constant 0 : i32
    return %arg0, %c0_i32, %c0_i32_0, %c0_i32_1 : i32, i32, i32, i32
  }
  func.func @transform_15(%arg0: i32) -> (i32, i32, i32, i32) {
    %c0_i32 = arith.constant 0 : i32
    %c0_i32_0 = arith.constant 0 : i32
    %c0_i32_1 = arith.constant 0 : i32
    %c0_i32_2 = arith.constant 0 : i32
    return %arg0, %c0_i32, %c0_i32_0, %c0_i32_1 : i32, i32, i32, i32
  }
  func.func @transform_16(%arg0: i32) -> (i32, i32, i32, i32) {
    %c0_i32 = arith.constant 0 : i32
    %c0_i32_0 = arith.constant 0 : i32
    %c0_i32_1 = arith.constant 0 : i32
    %c0_i32_2 = arith.constant 0 : i32
    return %arg0, %c0_i32, %c0_i32_0, %c0_i32_1 : i32, i32, i32, i32
  }
  func.func @transform_17(%arg0: i32) -> (i32, i32, i32, i32) {
    %c0_i32 = arith.constant 0 : i32
    %c0_i32_0 = arith.constant 0 : i32
    %c0_i32_1 = arith.constant 0 : i32
    %c0_i32_2 = arith.constant 0 : i32
    return %arg0, %c0_i32, %c0_i32_0, %c0_i32_1 : i32, i32, i32, i32
  }
  func.func @transform_18(%arg0: i32) -> (i32, i32, i32, i32) {
    %c0_i32 = arith.constant 0 : i32
    %c0_i32_0 = arith.constant 0 : i32
    %c0_i32_1 = arith.constant 0 : i32
    %c0_i32_2 = arith.constant 0 : i32
    return %arg0, %c0_i32, %c0_i32_0, %c0_i32_1 : i32, i32, i32, i32
  }
  func.func @transform_19(%arg0: i32) -> (i32, i32, i32, i32) {
    %c0_i32 = arith.constant 0 : i32
    %c0_i32_0 = arith.constant 0 : i32
    %c0_i32_1 = arith.constant 0 : i32
    %c0_i32_2 = arith.constant 0 : i32
    return %arg0, %c0_i32, %c0_i32_0, %c0_i32_1 : i32, i32, i32, i32
  }
  func.func @transform_20(%arg0: i32) -> (i32, i32, i32) {
    %c0_i32 = arith.constant 0 : i32
    %c0_i32_0 = arith.constant 0 : i32
    %c0_i32_1 = arith.constant 0 : i32
    return %arg0, %c0_i32, %c0_i32_0 : i32, i32, i32
  }
  func.func @transform_21(%arg0: i32) -> (i32, i32, i32) {
    %c0_i32 = arith.constant 0 : i32
    %c0_i32_0 = arith.constant 0 : i32
    %c0_i32_1 = arith.constant 0 : i32
    return %arg0, %c0_i32, %c0_i32_0 : i32, i32, i32
  }
  func.func @transform_22(%arg0: i32) -> (i32, i32, i32) {
    %c0_i32 = arith.constant 0 : i32
    %c0_i32_0 = arith.constant 0 : i32
    %c0_i32_1 = arith.constant 0 : i32
    return %arg0, %c0_i32, %c0_i32_0 : i32, i32, i32
  }
  func.func @transform_23(%arg0: i32) -> (i32, i32, i32) {
    %c0_i32 = arith.constant 0 : i32
    %c0_i32_0 = arith.constant 0 : i32
    %c0_i32_1 = arith.constant 0 : i32
    return %arg0, %c0_i32, %c0_i32_0 : i32, i32, i32
  }
  func.func @transform_24(%arg0: i32) -> (i32, i32, i32) {
    %c0_i32 = arith.constant 0 : i32
    %c0_i32_0 = arith.constant 0 : i32
    %c0_i32_1 = arith.constant 0 : i32
    return %arg0, %c0_i32, %c0_i32_0 : i32, i32, i32
  }
  func.func @transform_25(%arg0: i32) -> (i32, i32, i32) {
    %c0_i32 = arith.constant 0 : i32
    %c0_i32_0 = arith.constant 0 : i32
    %c0_i32_1 = arith.constant 0 : i32
    return %arg0, %c0_i32, %c0_i32_0 : i32, i32, i32
  }
  func.func @transform_26(%arg0: i32) -> (i32, i32, i32) {
    %c0_i32 = arith.constant 0 : i32
    %c0_i32_0 = arith.constant 0 : i32
    %c0_i32_1 = arith.constant 0 : i32
    return %arg0, %c0_i32, %c0_i32_0 : i32, i32, i32
  }
  func.func @transform_27(%arg0: i32) -> (i32, i32, i32) {
    %c0_i32 = arith.constant 0 : i32
    %c0_i32_0 = arith.constant 0 : i32
    %c0_i32_1 = arith.constant 0 : i32
    return %arg0, %c0_i32, %c0_i32_0 : i32, i32, i32
  }
  func.func @transform_28(%arg0: i32) -> (i32, i32, i32) {
    %c0_i32 = arith.constant 0 : i32
    %c0_i32_0 = arith.constant 0 : i32
    %c0_i32_1 = arith.constant 0 : i32
    return %arg0, %c0_i32, %c0_i32_0 : i32, i32, i32
  }
  func.func @transform_29(%arg0: i32) -> (i32, i32) {
    %c0_i32 = arith.constant 0 : i32
    %c0_i32_0 = arith.constant 0 : i32
    %c0_i32_1 = arith.constant 0 : i32
    return %c0_i32, %c0_i32_0 : i32, i32
  }
  func.func @transform_30(%arg0: i32) -> (i32, i32) {
    %c0_i32 = arith.constant 0 : i32
    %c0_i32_0 = arith.constant 0 : i32
    %c0_i32_1 = arith.constant 0 : i32
    return %c0_i32, %c0_i32_0 : i32, i32
  }
  func.func @transform_31(%arg0: i32) -> (i32, i32) {
    %c0_i32 = arith.constant 0 : i32
    %c0_i32_0 = arith.constant 0 : i32
    %c0_i32_1 = arith.constant 0 : i32
    return %c0_i32, %c0_i32_0 : i32, i32
  }
  func.func @transform_32(%arg0: i32) -> (i32, i32) {
    %c0_i32 = arith.constant 0 : i32
    %c0_i32_0 = arith.constant 0 : i32
    %c0_i32_1 = arith.constant 0 : i32
    return %c0_i32, %c0_i32_0 : i32, i32
  }
  func.func @transform_33(%arg0: i32) -> (i32, i32) {
    %c0_i32 = arith.constant 0 : i32
    %c0_i32_0 = arith.constant 0 : i32
    %c0_i32_1 = arith.constant 0 : i32
    return %c0_i32, %c0_i32_0 : i32, i32
  }
}

</mosaic_0001>

<bundles_post_ra>
// kernel: transformer_model_forward.3
= control target key start
LH: loop header
LB: loop body
LE: loop exit
PB: predicated region body
PF: predicated region fallthrough
CT: control target
= control target key end

     0   :  { %vm34_vm0 = vcmask 1043456   ;;  %vm27_vm1 = vcmask 31744   ;;  %vm117_vm2 = vcmask 261120   ;;  %s185_s1 = inlined_call_operand.vmem [shape: f32[4,32], index: 1, kind: input, shape index: {}]   ;;  %s186_s0 = inlined_call_operand.vmem [shape: f32[16,4], index: 0, kind: input, shape index: {}]   ;;  %s187_s2 = inlined_call_operand.vmem [shape: f32[1,32], index: 2, kind: input, shape index: {}]   ;;  %s188_s3 = inlined_call_operand.vmem [shape: f32[16,32], index: 3, kind: input, shape index: {}]   ;;  %s189_s4 = inlined_call_operand.vmem [shape: f32[16,32], index: 4, kind: output, shape index: {}]  }
   0x1   :  { %v19_v0 = vld [vmem:[%s185_s1] sm:$0xf]  ;;  %v18_v2 = vld [vmem:[%s186_s0 + $0x8] sm:$0xff] }
   0x2   :  { %v17_v1 = vld [vmem:[%s186_s0] sm:$0xff]  ;;  %131 = vmatprep.subr.msk.mxu0 %vm34_vm0, %v19_v0  ;;  %v114_v5 = vld [vmem:[%s188_s3 + $0x8] sm:$0xff] }
   0x3   :  { %133 = vmatprep.mubr.msk.f32.mxu0 %vm27_vm1, %v17_v1  ;;  %132 = vmatpush3.msk.msra.mxu0 %vm34_vm0, %v19_v0  ;;  %v124_v3 = vld [vmem:[%s187_s2] ss:$0 sm:$0xff] }
   0x4   :  { %134 = vmatmul.mubr.msk.f32.vlgmr.msra.gmra.mrb[0].mxu0 %vm27_vm1, %v18_v2  ;;  %v113_v8 = vld [vmem:[%s188_s3] sm:$0xff] }
  0xd7   :  { %v135_v4 = vpop.f32.mrb[0].mxu0 }
  0xd8   :  { %v110_v6 = vadd.f32 %v135_v4, %v124_v3  ;;  %v104_v7 = vpop.f32.mrb[1].mxu0 }
  0xd9   :  { %v105_v9 = vadd.f32 %v124_v3, %v104_v7 }
  0xda   :  { %v116_v10 = vadd.f32 %v114_v5, %v110_v6 }
  0xdb   :  { %v115_v11 = vadd.f32 %v113_v8, %v105_v9 }
  0xdc   :  { %119 = vst.msk [vmem:[%s189_s4 + $0x8] sm:$0xff] %vm117_vm2, %v116_v10 }
  0xdd   :  { %118 = vst.msk [vmem:[%s189_s4] sm:$0xff] %vm117_vm2, %v115_v11 }

// kernel: transformer_model_forward.4
= control target key start
LH: loop header
LB: loop body
LE: loop exit
PB: predicated region body
PF: predicated region fallthrough
CT: control target
= control target key end

     0   :  { %s6742_s0 = inlined_call_operand.vmem [shape: f32[16,32], index: 0, kind: input, shape index: {}]   ;;  %s6743_s1 = inlined_call_operand.vmem [shape: f32[16,16], index: 1, kind: input, shape index: {}]   ;;  %s6744_s2 = inlined_call_operand.vmem [shape: bf16[2,4,32,8], index: 2, kind: input, shape index: {}]   ;;  %s6745_s3 = inlined_call_operand.vmem [shape: f32[2,4,1,8], index: 3, kind: input, shape index: {}]   ;;  %s6746_s4 = inlined_call_operand.vmem [shape: bf16[2,4,32,8], index: 4, kind: input, shape index: {}]   ;;  %s6747_s5 = inlined_call_operand.vmem [shape: f32[2,4,1,8], index: 5, kind: input, shape index: {}]   ;;  %s6748_s6 = inlined_call_operand.vmem [shape: bf16[2,4,32,8], index: 6, kind: input, shape index: {}]   ;;  %s6749_s7 = inlined_call_operand.vmem [shape: f32[2,4,1,8], index: 7, kind: input, shape index: {}]   ;;  %s6750_s8 = inlined_call_operand.vmem [shape: bf16[2,4,8,32], index: 8, kind: input, shape index: {}]   ;;  %s6751_s9 = inlined_call_operand.vmem [shape: f32[2,1,32], index: 9, kind: input, shape index: {}]   ;;  %s6752_s10 = inlined_call_operand.vmem [shape: f32[2,1,32], index: 10, kind: input, shape index: {}]   ;;  %s6753_s11 = inlined_call_operand.vmem [shape: f32[2,1,32], index: 11, kind: input, shape index: {}]   ;;  %s6754_s12 = inlined_call_operand.vmem [shape: bf16[2,32,2048], index: 12, kind: input, shape index: {}]   ;;  %s6755_s13 = inlined_call_operand.vmem [shape: f32[2,1,2048], index: 13, kind: input, shape index: {}]   ;;  %s6756_s14 = inlined_call_operand.vmem [shape: bf16[2,2048,32], index: 14, kind: input, shape index: {}]   ;;  %s6757_s15 = inlined_call_operand.vmem [shape: f32[2,1,32], index: 15, kind: input, shape index: {}]   ;;  %s6758_s16 = inlined_call_operand.vmem [shape: f32[2,1,32], index: 16, kind: input, shape index: {}]   ;;  %s6759_s17 = inlined_call_operand.vmem [shape: f32[2,1,32], index: 17, kind: input, shape index: {}]   ;;  %s6760_s18 = inlined_call_operand.vmem [shape: f32[1,32], index: 18, kind: input, shape index: {}]   ;;  %s6761_s19 = inlined_call_operand.vmem [shape: f32[1,32], index: 19, kind: input, shape index: {}]   ;;  %s6762_s20 = inlined_call_operand.vmem [shape: f32[16,32], index: 20, kind: output, shape index: {}]  }
   0x1   :  { %6771 = sst [smem:[#allocation8_spill]] %s6742_s0 }
   0x2   :  { %6772 = sst [smem:[#allocation9_spill]] %s6743_s1  ;;  %s6083_s1 = smov 0  }
   0x3   :  { %6773 = sst [smem:[#allocation10_spill]] %s6744_s2 }
   0x4   :  { %6774 = sst [smem:[#allocation11_spill]] %s6745_s3 }
   0x5   :  { %6775 = sst [smem:[#allocation12_spill]] %s6746_s4 }
   0x6   :  { %6776 = sst [smem:[#allocation13_spill]] %s6747_s5 }
   0x7   :  { %6777 = sst [smem:[#allocation14_spill]] %s6748_s6 }
   0x8   :  { %6778 = sst [smem:[#allocation15_spill]] %s6749_s7 }
   0x9   :  { %6779 = sst [smem:[#allocation16_spill]] %s6750_s8 }
   0xa   :  { %6780 = sst [smem:[#allocation17_spill]] %s6754_s12 }
   0xb   :  { %6781 = sst [smem:[#allocation18_spill]] %s6760_s18 }
   0xc   :  { %6782 = sst [smem:[#allocation19_spill]] %s6761_s19 }
   0xd   :  { %6783 = sst [smem:[#allocation20_spill]] %s6762_s20 }
   0xe LB: > { %6784 = sst [smem:[#allocation3_spill]] %s5973_s1  ;;  %s6089_s22 = sadd.s32 4294967295, %s5973_s1   ;;  %s5973_s1 = sphi %s6083_s1, %s30_s1  }
   0xf   : > { %6785 = sst [smem:[#allocation4_spill]] %s6089_s22  ;;  %p5011_p0 = scmp.ge.s32.totalorder %s5973_s1, 1 }
  0x10   : > { %p691_p1 = scmp.lt.s32.totalorder %s5973_s1, 3 }
  0x12   : > { %p692_p2 = pnand %p5011_p0, %p691_p1 }
  0x14   : > { %695 = sbr.rel (%p692_p2) target bundleno = 5466 (0x155a), region = 100 }
  0x1b   : > { %p803_p3 = scmp.lt.s32.totalorder %s6089_s22, 1  ;;  %s6786_s26 = sld [smem:[#allocation10_spill]] }
  0x1c   : > { %s6788_s29 = sld [smem:[#allocation11_spill]]  ;;  %s6790_s1 = sld [smem:[#allocation12_spill]] }
  0x1d   : > { %s6095_s23 = scalar_select %p803_p3, %s6089_s22, 1 }
  0x1e   : > { %s6791_s5 = sld [smem:[#allocation13_spill]]  ;;  %s6793_s6 = sld [smem:[#allocation14_spill]] }
  0x1f   : > { %s5284_s24 = sshll.u32 %s6095_s23, 6  ;;  %s5014_s2 = sshll.u32 %s6095_s23, 2 }
  0x20   : > { %s6794_s7 = sld [smem:[#allocation15_spill]]  ;;  %s5287_s0 = sshll.u32 %s6095_s23, 4 }
  0x21   : > { %s6102_s27 = scalar_lea.vmem %s6786_s26, %s5284_s24  ;;  %s6795_s8 = sld [smem:[#allocation16_spill]] }
  0x22   : > { %6787 = sst [smem:[#allocation5_spill]] %s6102_s27  ;;  %s6107_s30 = scalar_lea.vmem %s6788_s29, %s5014_s2 }
  0x23   : > { %6789 = sst [smem:[#allocation6_spill]] %s6107_s30  ;;  %s6112_s20 = scalar_lea.vmem %s6790_s1, %s5284_s24 }
  0x24   : > { %s6117_s22 = scalar_lea.vmem %s6791_s5, %s5014_s2  ;;  %s6122_s26 = scalar_lea.vmem %s6793_s6, %s5284_s24 }
  0x25   : > { %6792 = sst [smem:[#allocation7_spill]] %s6117_s22  ;;  %s6796_s12 = sld [smem:[#allocation17_spill]] }
  0x26   : > { %s6127_s29 = scalar_lea.vmem %s6794_s7, %s5014_s2  ;;  %s5288_s2 = sshll.u32 %s6095_s23, 8 }
  0x27   : > { %s6137_s19 = scalar_lea.vmem %s6795_s8, %s5287_s0  ;;  %s6156_s27 = scalar_lea.vmem %s6755_s13, %s5287_s0 }
  0x28   : > { %s5289_s18 = sshll.u32 %s6095_s23, 10  ;;  %s860_s5 = scalar_lea.vmem %s6757_s15, %s6095_s23 }
  0x29   : > { %s6166_s25 = scalar_lea.vmem %s6756_s14, %s5289_s18  ;;  %s863_s6 = scalar_lea.vmem %s6758_s16, %s6095_s23 }
  0x2a   : > { %s866_s21 = scalar_lea.vmem %s6759_s17, %s6095_s23  ;;  %s6797_s0 = sld [smem:[#allocation4_spill]] }
  0x2b   : > { %s6151_s7 = scalar_lea.vmem %s6796_s12, %s5288_s2 }
  0x30   : > { %p5028_p4 = scmp.ne.s32.totalorder %s6797_s0, 0 }
  0x31   : > { %s6798_s8 = sld [smem:[#allocation8_spill]] (!%p5028_p4)  ;;  %vm874_vm0 = vcmask (!%p5028_p4), 261120  }
  0x32   : > { %871 = sbr.rel (%p5028_p4) target bundleno = 57 (0x39), region = 104 }
  0x37   : > { %v872_v0 = vld [vmem:[%s6798_s8] sm:$0xff] (!%p5028_p4)  ;;  %v873_v1 = vld [vmem:[%s6798_s8 + $0x8] sm:$0xff] (!%p5028_p4) }
  0x38   : > { %875 = vst.msk [vmem:[#allocation2] sm:$0xff] (!%p5028_p4), %vm874_vm0, %v872_v0  ;;  %876 = vst.msk [vmem:[#allocation2 + $0x8] sm:$0xff] (!%p5028_p4), %vm874_vm0, %v873_v1 }
  0x39 PF: > { %s6799_s28 = sld [smem:[#allocation5_spill]]  ;;  %v5769_v2 = vld [vmem:[%s6112_s20] sm:$0xff]   ;;  %v5975_v3 = vmov 0.0   ;;  %v5770_v4 = vld [vmem:[%s6112_s20 + $0x8] sm:$0xff]   ;;  %vm5976_vm1 = vmmov 0   ;;  %s6800_s12 = sld [smem:[#allocation7_spill]] }
  0x3a   : > { %5550 = vmatprep.subr.bf16.mxu1 %v5975_v3  ;;  %5542 = vmatprep.subr.bf16.mxu0 %v5975_v3  ;;  %s6801_s18 = sld [smem:[#allocation6_spill]]  ;;  %vm965_vm2 = vcmask 261120   ;;  %vm1128_vm3 = vcmask 64512   ;;  %v5773_v26 = vld [vmem:[%s6122_s26] sm:$0xff]   ;;  %v5774_v27 = vld [vmem:[%s6122_s26 + $0x8] sm:$0xff]   ;;  %s6804_s2 = sld [smem:[#allocation9_spill]] }
  0x3b   : > { %5551 = vmatpush3.bf16.msra.mxu1 %v5769_v2  ;;  %5554 = vmatprep.mubr.msk.bf16.mxu1 %vm5976_vm1, %v5975_v3  ;;  %vm6208_vm4 = vmpackc.low %vm1128_vm3, %vm1128_vm3  ;;  %vm1220_vm5 = vcmask 130048   ;;  %v5037_v48 = vld [vmem:[%s6127_s29] ss:$0 sm:$0xff]  ;;  %v5775_v63 = vld [vmem:[%s6112_s20 + $0x10] sm:$0xff]   ;;  %vm1700_vm6 = vcmask 1043456   ;;  %s6806_s30 = scalar_lea.vmem %s6752_s10, %s6095_s23  ;;  %s6808_s3 = sld [smem:[#allocation4_spill]] }
  0x3c   : > { %5552 = vmatprep.subr.bf16.mxu1 %v5975_v3  ;;  %5546 = vmatprep.mubr.msk.bf16.mxu0 %vm5976_vm1, %v5975_v3  ;;  %v5776_v1 = vld [vmem:[%s6112_s20 + $0x18] sm:$0xff]  }
  0x3f   : > { %v5771_v5 = vld [vmem:[%s6799_s28] sm:$0xff]   ;;  %v878_v7 = vld [vmem:[#allocation2 + $0x8] sm:$0xff]  ;;  %5553 = vmatpush3.bf16.msra.mxu1 %v5770_v4  ;;  %v5777_v56 = vld [vmem:[%s6799_s28 + $0x10] sm:$0xff]  }
  0x40   : > { %v877_v6 = vld [vmem:[#allocation2] sm:$0xff]  ;;  %5543 = vmatpush3.bf16.msra.mxu0 %v5771_v5  ;;  %v5772_v8 = vld [vmem:[%s6799_s28 + $0x8] sm:$0xff]   ;;  %v5778_v57 = vld [vmem:[%s6799_s28 + $0x18] sm:$0xff]  }
  0x41   : > { %v6194_v9 = vpack.c.bf16 %v878_v7, %v877_v6  ;;  %5544 = vmatprep.subr.bf16.mxu0 %v5975_v3  ;;  %v5033_v10 = vld [vmem:[%s6800_s12] ss:$0 sm:$0xff]  ;;  %v6234_v33 = vld [vmem:[%s6804_s2 + $0x8] sm:$0xff]  ;;  %v5047_v2 = vld [vmem:[%s6801_s18 + $0x1] ss:$0 sm:$0xff]  ;;  %p5279_p5 = scmp.ne.s32.totalorder %s6808_s3, 1 }
  0x42   : > { %v5029_v12 = vld [vmem:[%s6801_s18] ss:$0 sm:$0xff] }
  0x43   : > { %5555 = vmatmul.mubr.msk.bf16.vlgmr.msra.gmra.mrb[0].mxu1 %vm965_vm2, %v6194_v9  ;;  %v6229_v30 = vld [vmem:[%s6804_s2] sm:$0xff] }
  0x44   : > { %5545 = vmatpush3.bf16.msra.mxu0 %v5772_v8 }
  0x45   : > { %5558 = vmatprep.subr.bf16.mxu0 %v5975_v3 }
  0x47   : > { %5547 = vmatmul.mubr.msk.bf16.vlgmr.msra.gmra.mrb[0].mxu0 %vm965_vm2, %v6194_v9 }
  0x48   : > { %5562 = vmatprep.mubr.msk.bf16.mxu0 %vm5976_vm1, %v5975_v3  ;;  %5559 = vmatpush3.bf16.msra.mxu0 %v5773_v26 }
  0x49   : > { %5560 = vmatprep.subr.bf16.mxu0 %v5975_v3 }
  0x4c   : > { %5561 = vmatpush3.bf16.msra.mxu0 %v5774_v27 }
  0x4d   : > { %5580 = vmatprep.subr.bf16.mxu0 %v5975_v3 }
  0x4f   : > { %5563 = vmatmul.mubr.msk.bf16.vlgmr.msra.gmra.mrb[4].mxu0 %vm965_vm2, %v6194_v9 }
  0x50   : > { %5584 = vmatprep.mubr.msk.bf16.mxu0 %vm5976_vm1, %v5975_v3  ;;  %5581 = vmatpush3.bf16.msra.mxu0 %v5777_v56  ;;  %v941_v56 = vld [vmem:[%s6137_s19] sm:$0xf] }
  0x51   : > { %5582 = vmatprep.subr.bf16.mxu0 %v5975_v3 }
  0x54   : > { %5583 = vmatpush3.bf16.msra.mxu0 %v5778_v57 }
  0x55   : > { %5596 = vmatprep.subr.bf16.mxu0 %v5975_v3 }
  0x57   : > { %5585 = vmatmul.mubr.msk.bf16.vlgmr.msra.gmra.mrb[8].mxu0 %vm965_vm2, %v6194_v9 }
  0x58   : > { %5600 = vmatprep.mubr.msk.bf16.mxu0 %vm5976_vm1, %v5975_v3 }
 0x116   : > { %v1062_v11 = vpop.f32.mrb[0].mxu1 }
 0x117   : > { %v5556_v13 = vpop.f32.mrb[1].mxu1  ;;  %v1063_v16 = vadd.f32 %v5033_v10, %v1062_v11 }
 0x118   : > { %v1065_v14 = vpop.f32.mrb[2].mxu1 }
 0x119   : > { %v1066_v17 = vadd.f32 %v5033_v10, %v1065_v14  ;;  %v5557_v18 = vpop.f32.mrb[3].mxu1  ;;  %v5051_v14 = vld [vmem:[%s6800_s12 + $0x1] ss:$0 sm:$0xff] }
 0x11a   : > { %v1003_v15 = vpop.f32.mrb[0].mxu0 }
 0x11b   : > { %v1004_v19 = vadd.f32 %v5029_v12, %v1003_v15  ;;  %v5548_v20 = vpop.f32.mrb[1].mxu0  ;;  %v5718_v23 = vpack.c.bf16 %v1066_v17, %v1063_v16 }
 0x11c   : > { %v1006_v22 = vpop.f32.mrb[2].mxu0 }
 0x11d   : > { %v5549_v24 = vpop.f32.mrb[3].mxu0  ;;  %5570 = vmatprep.mubr.msk.f32.mxu1 %vm1128_vm3, %v1004_v19  ;;  %5720 = vmatprep.subr.msk.bf16.mxu1 %vm6208_vm4, %v5718_v23  ;;  %v1007_v25 = vadd.f32 %v5029_v12, %v1006_v22 }
 0x11e   : > { %5723 = vmatpush3.bf16.xpose.msk.msra.mxu1 %vm6208_vm4, %v5718_v23  ;;  %v5779_v23 = vld [vmem:[%s6122_s26 + $0x10] sm:$0xff]   ;;  %v5780_v24 = vld [vmem:[%s6122_s26 + $0x18] sm:$0xff]  }
 0x11f   : > { %5597 = vmatpush3.bf16.msra.mxu0 %v5779_v23 }
 0x120   : > { %5598 = vmatprep.subr.bf16.mxu0 %v5975_v3 }
 0x122   : > { %v1121_v49 = vpop.f32.mrb[4].mxu0 }
 0x123   : > { %v5564_v50 = vpop.f32.mrb[5].mxu0  ;;  %v1122_v51 = vadd.f32 %v5037_v48, %v1121_v49  ;;  %5599 = vmatpush3.bf16.msra.mxu0 %v5780_v24 }
 0x124   : > { %v1124_v52 = vpop.f32.mrb[6].mxu0 }
 0x125   : > { %5571 = vmatmul.mubr.msk.f32.vlgmr.msra.gmra.mrb[4].mxu1 %vm1128_vm3, %v1007_v25  ;;  %v1125_v53 = vadd.f32 %v5037_v48, %v1124_v52  ;;  %v5565_v54 = vpop.f32.mrb[7].mxu0 }
 0x126   : > { %5601 = vmatmul.mubr.msk.bf16.vlgmr.msra.gmra.mrb[12].mxu0 %vm965_vm2, %v6194_v9 }
 0x127   : > { %v5724_v55 = vpack.c.bf16 %v1125_v53, %v1122_v51 }
 0x129   : > { %5725 = vmatprep.subr.bf16.mxu1 %v5724_v55 }
 0x12a   : > { %5727 = vmatpush3.bf16.msra.mxu1 %v5724_v55  ;;  %v1377_v4 = vpop.f32.mrb[8].mxu0 }
 0x12b   : > { %5588 = vmatprep.subr.bf16.mxu1 %v5975_v3  ;;  %v1378_v5 = vadd.f32 %v5047_v2, %v1377_v4  ;;  %v5586_v6 = vpop.f32.mrb[9].mxu0  ;;  %v5783_v4 = vld [vmem:[%s6799_s28 + $0x20] sm:$0xff]  }
 0x12c   : > { %v1380_v7 = vpop.f32.mrb[10].mxu0 }
 0x12d   : > { %v1381_v8 = vadd.f32 %v5047_v2, %v1380_v7  ;;  %v5587_v10 = vpop.f32.mrb[11].mxu0 }
 0x1f8   : > { %v5572_v28 = vpop.f32.mrb[4].mxu1 }
 0x1f9   : > { %v1207_v29 = vpop.f32.mrb[5].mxu1  ;;  %v1217_v31 = vmul.f32 0.35355338, %v5572_v28 }
 0x1fa   : > { %v1216_v32 = vmul.f32 0.35355338, %v1207_v29 }
 0x1fb   : > { %v1219_v36 = vadd.f32 %v1217_v31, %v6234_v33 }
 0x1fc   : > { %v1218_v34 = vadd.f32 %v1216_v32, %v6229_v30 }
 0x1fd   : > { %v1224_v37 = vsel %vm1220_vm5, %v1219_v36, -inf }
 0x1fe   : > { %v1221_v35 = vsel %vm1220_vm5, %v1218_v34, -inf }
 0x1ff   : > { %1222 = vmax.xlane.f32.xlu0 %v1221_v35  ;;  %v1495_v35 = vpop.f32.mrb[12].mxu0 }
 0x203   : > { %1225 = vmax.xlane.f32.xlu0 %v1224_v37 }
 0x28c   : > { %v1223_v38 = vpop.xlane.xlu0 %1222 }
 0x28d   : > { %v1227_v39 = vsub.f32 %v1218_v34, %v1223_v38 }
 0x28f   : > { %v1229_v40 = vmul.f32 1.442695, %v1227_v39 }
 0x290   : > { %v1226_v41 = vpop.xlane.xlu0 %1225 }
 0x291   : > { %5921 = vpow2.f32 %v1229_v40  ;;  %v1228_v42 = vsub.f32 %v1219_v36, %v1226_v41  ;;  %v5602_v36 = vpop.f32.mrb[13].mxu0 }
 0x292   : > { %v1498_v49 = vpop.f32.mrb[14].mxu0  ;;  %v5785_v36 = vld [vmem:[%s6122_s26 + $0x20] sm:$0xff]  }
 0x293   : > { %v1231_v43 = vmul.f32 1.442695, %v1228_v42  ;;  %v5603_v51 = vpop.f32.mrb[15].mxu0 }
 0x295   : > { %5923 = vpow2.f32 %v1231_v43 }
 0x29b   : > { %v5922_v44 = vpop.eup %5921 }
 0x29c   : > { %v1233_v45 = vsel %vm1220_vm5, %v5922_v44, 0.0 }
 0x29d   : > { %1234 = vadd.xlane.f32.xlu1 %v1233_v45 }
 0x29f   : > { %v5924_v46 = vpop.eup %5923 }
 0x2a0   : > { %v1236_v47 = vsel %vm1220_vm5, %v5924_v46, 0.0 }
 0x2a1   : > { %1237 = vadd.xlane.f32.xlu1 %v1236_v47  ;;  %v5055_v47 = vld [vmem:[%s6127_s29 + $0x1] ss:$0 sm:$0xff] }
 0x2a2   : > { %v1496_v48 = vadd.f32 %v5055_v47, %v1495_v35  ;;  %v1499_v50 = vadd.f32 %v5055_v47, %v1498_v49 }
 0x2a4   : > { %v5734_v52 = vpack.c.bf16 %v1499_v50, %v1496_v48 }
 0x2a6   : > { %5735 = vmatprep.subr.bf16.mxu0 %v5734_v52 }
 0x2a7   : > { %5737 = vmatpush3.bf16.msra.mxu0 %v5734_v52 }
 0x2a8   : > { %5624 = vmatprep.subr.bf16.mxu0 %v5975_v3 }
 0x32a   : > { %v1235_v58 = vpop.xlane.xlu1 %1234 }
 0x32b   : > { %5925 = vrcp.f32 %v1235_v58 }
 0x32e   : > { %v1238_v59 = vpop.xlane.xlu1 %1237 }
 0x32f   : > { %5927 = vrcp.f32 %v1238_v59 }
 0x335   : > { %v5926_v60 = vpop.eup %5925 }
 0x336   : > { %v1241_v61 = vmul.f32 %v5926_v60, %v5922_v44  ;;  %v1749_v60 = vsel %vm1700_vm6, %v941_v56, 0 }
 0x338   : > { %5577 = vmatprep.mubr.msk.f32.mxu1 %vm1220_vm5, %v1241_v61  ;;  %v5781_v61 = vld [vmem:[%s6112_s20 + $0x20] sm:$0xff]  }
 0x339   : > { %v5928_v62 = vpop.eup %5927 }
 0x33a   : > { %v1242_v0 = vmul.f32 %v5928_v62, %v5924_v46  ;;  %v5782_v62 = vld [vmem:[%s6112_s20 + $0x28] sm:$0xff]  }
 0x33c   : > { %5578 = vmatmul.mubr.msk.f32.vlgmr.msra.gmra.mrb[6].mxu1 %vm1220_vm5, %v1242_v0 }
 0x33d   : > { %5589 = vmatpush3.bf16.msra.mxu1 %v5775_v63  ;;  %5592 = vmatprep.mubr.msk.bf16.mxu1 %vm5976_vm1, %v5975_v3  ;;  %v942_v63 = vld [vmem:[%s6137_s19 + $0x4] sm:$0xf] }
 0x33e   : > { %5590 = vmatprep.subr.bf16.mxu1 %v5975_v3  ;;  %v1702_v0 = vsel %vm1700_vm6, %v942_v63, 0 }
 0x341   : > { %5591 = vmatpush3.bf16.msra.mxu1 %v5776_v1 }
 0x344   : > { %5593 = vmatmul.mubr.msk.bf16.vlgmr.msra.gmra.mrb[8].mxu1 %vm965_vm2, %v6194_v9 }
 0x345   : > { %5608 = vmatprep.mubr.msk.f32.mxu1 %vm1128_vm3, %v1378_v5 }
 0x40f   : > { %v6263_v11 = vpop.f32.mrb[6].mxu1 }
 0x410   : > { %v6265_v12 = vpop.f32.mrb[7].mxu1 }
 0x411   : > { %v1324_v13 = vpack.c.bf16 %v6263_v11, %v6265_v12  ;;  %v5071_v12 = vld [vmem:[%s6800_s12 + $0x2] ss:$0 sm:$0xff] }
 0x417   : > { %v1436_v15 = vpop.f32.mrb[8].mxu1 }
 0x418   : > { %v5594_v16 = vpop.f32.mrb[9].mxu1  ;;  %v1437_v18 = vadd.f32 %v5051_v14, %v1436_v15 }
 0x419   : > { %v1439_v17 = vpop.f32.mrb[10].mxu1 }
 0x41a   : > { %v1440_v19 = vadd.f32 %v5051_v14, %v1439_v17  ;;  %v5595_v20 = vpop.f32.mrb[11].mxu1 }
 0x41c   : > { %v5728_v22 = vpack.c.bf16 %v1440_v19, %v1437_v18 }
 0x41e   : > { %5730 = vmatprep.subr.msk.bf16.mxu1 %vm6208_vm4, %v5728_v22 }
 0x41f   : > { %5733 = vmatpush3.bf16.xpose.msk.msra.mxu1 %vm6208_vm4, %v5728_v22 }
 0x420   : > { %5618 = vmatprep.subr.bf16.mxu1 %v5975_v3 }
 0x426   : > { %5609 = vmatmul.mubr.msk.f32.vlgmr.msra.gmra.mrb[12].mxu1 %vm1128_vm3, %v1381_v8  ;;  %v5784_v8 = vld [vmem:[%s6799_s28 + $0x28] sm:$0xff]  }
 0x427   : > { %5620 = vmatprep.mubr.msk.bf16.mxu1 %vm5976_vm1, %v5975_v3  ;;  %5619 = vmatpush3.bf16.msra.mxu1 %v1702_v0  ;;  %v943_v0 = vld [vmem:[%s6137_s19 + $0x8] sm:$0xf] }
 0x428   : > { %5630 = vmatprep.subr.bf16.mxu1 %v5975_v3 }
 0x4f9   : > { %v5610_v25 = vpop.f32.mrb[12].mxu1 }
 0x4fa   : > { %v1590_v26 = vmul.f32 0.35355338, %v5610_v25  ;;  %v1580_v27 = vpop.f32.mrb[13].mxu1 }
 0x4fb   : > { %v1589_v28 = vmul.f32 0.35355338, %v1580_v27  ;;  %v5067_v27 = vld [vmem:[%s6801_s18 + $0x2] ss:$0 sm:$0xff] }
 0x4fc   : > { %v1592_v29 = vadd.f32 %v1590_v26, %v6234_v33 }
 0x4fd   : > { %v1591_v31 = vadd.f32 %v1589_v28, %v6229_v30 }
 0x4fe   : > { %v1596_v32 = vsel %vm1220_vm5, %v1592_v29, -inf }
 0x4ff   : > { %1597 = vmax.xlane.f32.xlu1 %v1596_v32  ;;  %v1593_v34 = vsel %vm1220_vm5, %v1591_v31, -inf }
 0x500   : > { %1594 = vmax.xlane.f32.xlu0 %v1593_v34 }
 0x58c   : > { %v1598_v37 = vpop.xlane.xlu1 %1597 }
 0x58d   : > { %v1600_v38 = vsub.f32 %v1592_v29, %v1598_v37  ;;  %v1595_v39 = vpop.xlane.xlu0 %1594  ;;  %v5786_v37 = vld [vmem:[%s6122_s26 + $0x28] sm:$0xff]  }
 0x58e   : > { %v1599_v40 = vsub.f32 %v1591_v31, %v1595_v39 }
 0x58f   : > { %v1603_v41 = vmul.f32 1.442695, %v1600_v38 }
 0x590   : > { %v1601_v42 = vmul.f32 1.442695, %v1599_v40 }
 0x591   : > { %5929 = vpow2.f32 %v1603_v41 }
 0x592   : > { %5931 = vpow2.f32 %v1601_v42 }
 0x59b   : > { %v5930_v43 = vpop.eup %5929 }
 0x59c   : > { %v5932_v44 = vpop.eup %5931  ;;  %v1608_v45 = vsel %vm1220_vm5, %v5930_v43, 0.0 }
 0x59d   : > { %1609 = vadd.xlane.f32.xlu1 %v1608_v45  ;;  %v1605_v46 = vsel %vm1220_vm5, %v5932_v44, 0.0 }
 0x59e   : > { %1606 = vadd.xlane.f32.xlu0 %v1605_v46 }
 0x62a   : > { %v1610_v53 = vpop.xlane.xlu1 %1609 }
 0x62b   : > { %5933 = vrcp.f32 %v1610_v53  ;;  %v1607_v54 = vpop.xlane.xlu0 %1606 }
 0x62c   : > { %5935 = vrcp.f32 %v1607_v54 }
 0x635   : > { %v5934_v55 = vpop.eup %5933 }
 0x636   : > { %v5936_v57 = vpop.eup %5935  ;;  %v1614_v59 = vmul.f32 %v5934_v55, %v5930_v43 }
 0x637   : > { %v1613_v58 = vmul.f32 %v5936_v57, %v5932_v44 }
 0x639   : > { %5615 = vmatprep.mubr.msk.f32.mxu0 %vm1220_vm5, %v1613_v58  ;;  %v5075_v58 = vld [vmem:[%s6127_s29 + $0x2] ss:$0 sm:$0xff] }
 0x63a   : > { %5616 = vmatmul.mubr.msk.f32.vlgmr.msra.gmra.mrb[16].mxu0 %vm1220_vm5, %v1614_v59 }
 0x63b   : > { %5625 = vmatpush3.bf16.msra.mxu0 %v1749_v60  ;;  %5626 = vmatprep.mubr.msk.bf16.mxu0 %vm5976_vm1, %v5975_v3 }
 0x63c   : > { %5638 = vmatprep.subr.bf16.mxu0 %v5975_v3 }
 0x63e   : > { %5627 = vmatmul.mubr.msk.bf16.vlgmr.msra.gmra.mrb[20].mxu0 %vm1128_vm3, %v1324_v13 }
 0x63f   : > { %5639 = vmatpush3.bf16.msra.mxu0 %v5781_v61  ;;  %5642 = vmatprep.mubr.msk.bf16.mxu0 %vm5976_vm1, %v5975_v3 }
 0x640   : > { %5640 = vmatprep.subr.bf16.mxu0 %v5975_v3 }
 0x643   : > { %5641 = vmatpush3.bf16.msra.mxu0 %v5782_v62 }
 0x646   : > { %5643 = vmatmul.mubr.msk.bf16.vlgmr.msra.gmra.mrb[24].mxu0 %vm965_vm2, %v6194_v9 }
 0x70d   : > { %v5617_v1 = vpop.f32.mrb[16].mxu0 }
 0x70e   : > { %v1687_v2 = vpop.f32.mrb[17].mxu0 }
 0x70f   : > { %v1696_v5 = vpack.c.bf16 %v5617_v1, %v1687_v2  ;;  %v2168_v1 = vsel %vm1700_vm6, %v943_v0, 0  ;;  %v944_v0 = vld [vmem:[%s6137_s19 + $0xc] sm:$0xf]  ;;  %s6811_s19 = sld [smem:[#allocation20_spill]] (!%p5279_p5) }
 0x711   : > { %5621 = vmatmul.mubr.msk.bf16.vlgmr.msra.gmra.mrb[16].mxu1 %vm1128_vm3, %v1696_v5  ;;  %v1785_v6 = vpop.f32.mrb[20].mxu0 }
 0x712   : > { %v5628_v7 = vpop.f32.mrb[21].mxu0  ;;  %5631 = vmatpush3.bf16.msra.mxu1 %v5783_v4  ;;  %5634 = vmatprep.mubr.msk.bf16.mxu1 %vm5976_vm1, %v5975_v3 }
 0x713   : > { %v1788_v10 = vpop.f32.mrb[22].mxu0  ;;  %5632 = vmatprep.subr.bf16.mxu1 %v5975_v3 }
 0x714   : > { %v5629_v11 = vpop.f32.mrb[23].mxu0 }
 0x715   : > { %v5790_v11 = vld [vmem:[%s6799_s28 + $0x38] sm:$0xff]  }
 0x716   : > { %5633 = vmatpush3.bf16.msra.mxu1 %v5784_v8 }
 0x717   : > { %5646 = vmatprep.subr.bf16.mxu1 %v5975_v3 }
 0x719   : > { %5635 = vmatmul.mubr.msk.bf16.vlgmr.msra.gmra.mrb[20].mxu1 %vm965_vm2, %v6194_v9  ;;  %v1903_v13 = vpop.f32.mrb[24].mxu0 }
 0x71a   : > { %v1904_v14 = vadd.f32 %v5071_v12, %v1903_v13  ;;  %v5644_v15 = vpop.f32.mrb[25].mxu0  ;;  %5650 = vmatprep.mubr.msk.bf16.mxu1 %vm5976_vm1, %v5975_v3  ;;  %5647 = vmatpush3.bf16.msra.mxu1 %v5785_v36 }
 0x71b   : > { %v1906_v16 = vpop.f32.mrb[26].mxu0  ;;  %5648 = vmatprep.subr.bf16.mxu1 %v5975_v3 }
 0x71c   : > { %v1907_v17 = vadd.f32 %v5071_v12, %v1906_v16  ;;  %v5645_v18 = vpop.f32.mrb[27].mxu0  ;;  %v5788_v16 = vld [vmem:[%s6112_s20 + $0x38] sm:$0xff]  }
 0x71e   : > { %v5738_v19 = vpack.c.bf16 %v1907_v17, %v1904_v14  ;;  %5649 = vmatpush3.bf16.msra.mxu1 %v5786_v37  ;;  %v5787_v14 = vld [vmem:[%s6112_s20 + $0x30] sm:$0xff]   ;;  %v5086_v17 = vld [vmem:[%s6801_s18 + $0x3] ss:$0 sm:$0xff]  ;;  %s6810_s20 = sld [smem:[#allocation19_spill]] (!%p5279_p5) }
 0x71f   : > { %5668 = vmatprep.subr.bf16.mxu1 %v5975_v3 }
 0x720   : > { %5740 = vmatprep.subr.msk.bf16.mxu0 %vm6208_vm4, %v5738_v19 }
 0x721   : > { %5743 = vmatpush3.bf16.xpose.msk.msra.mxu0 %vm6208_vm4, %v5738_v19  ;;  %5651 = vmatmul.mubr.msk.bf16.vlgmr.msra.gmra.mrb[24].mxu1 %vm965_vm2, %v6194_v9 }
 0x722   : > { %5670 = vmatprep.mubr.msk.bf16.mxu1 %vm5976_vm1, %v5975_v3  ;;  %5669 = vmatpush3.bf16.msra.mxu1 %v2168_v1  ;;  %v2589_v1 = vsel %vm1700_vm6, %v944_v0, 0 }
 0x723   : > { %5682 = vmatprep.subr.bf16.mxu1 %v5975_v3 }
 0x7e4   : > { %v1738_v20 = vpop.f32.mrb[16].mxu1 }
 0x7e5   : > { %v6328_v22 = vadd.f32 %v1785_v6, %v1738_v20  ;;  %v5622_v23 = vpop.f32.mrb[17].mxu1 }
 0x7e6   : > { %v1741_v24 = vpop.f32.mrb[18].mxu1 }
 0x7e7   : > { %v6330_v25 = vadd.f32 %v1788_v10, %v1741_v24  ;;  %v5623_v26 = vpop.f32.mrb[19].mxu1  ;;  %v5789_v10 = vld [vmem:[%s6799_s28 + $0x30] sm:$0xff]  }
 0x7ec   : > { %v1844_v28 = vpop.f32.mrb[20].mxu1 }
 0x7ed   : > { %v1845_v29 = vadd.f32 %v5067_v27, %v1844_v28  ;;  %v5636_v31 = vpop.f32.mrb[21].mxu1 }
 0x7ee   : > { %v1847_v32 = vpop.f32.mrb[22].mxu1 }
 0x7ef   : > { %v1848_v34 = vadd.f32 %v5067_v27, %v1847_v32  ;;  %v5637_v35 = vpop.f32.mrb[23].mxu1  ;;  %5658 = vmatprep.mubr.msk.f32.mxu0 %vm1128_vm3, %v1845_v29 }
 0x7f0   : > { %v5090_v35 = vld [vmem:[%s6800_s12 + $0x3] ss:$0 sm:$0xff]  ;;  %s6807_s12 = scalar_lea.vmem %s6753_s11, %s6095_s23 }
 0x7f1   : > { %5659 = vmatmul.mubr.msk.f32.vlgmr.msra.gmra.mrb[18].mxu0 %vm1128_vm3, %v1848_v34 }
 0x7f4   : > { %v1962_v56 = vpop.f32.mrb[24].mxu1 }
 0x7f5   : > { %v5652_v57 = vpop.f32.mrb[25].mxu1  ;;  %v1963_v60 = vadd.f32 %v5075_v58, %v1962_v56 }
 0x7f6   : > { %v1965_v59 = vpop.f32.mrb[26].mxu1 }
 0x7f7   : > { %v1966_v61 = vadd.f32 %v5075_v58, %v1965_v59  ;;  %v5653_v62 = vpop.f32.mrb[27].mxu1  ;;  %v5094_v58 = vld [vmem:[%s6127_s29 + $0x3] ss:$0 sm:$0xff]  ;;  %s6805_s29 = scalar_lea.vmem %s6751_s9, %s6095_s23 }
 0x7f9   : > { %v5744_v63 = vpack.c.bf16 %v1966_v61, %v1963_v60 }
 0x7fb   : > { %5745 = vmatprep.subr.bf16.mxu0 %v5744_v63 }
 0x7fc   : > { %5747 = vmatpush3.bf16.msra.mxu0 %v5744_v63 }
 0x7fd   : > { %5674 = vmatprep.subr.bf16.mxu0 %v5975_v3 }
 0x8c4   : > { %v5660_v38 = vpop.f32.mrb[18].mxu0 }
 0x8c5   : > { %v2057_v39 = vmul.f32 0.35355338, %v5660_v38  ;;  %v2047_v40 = vpop.f32.mrb[19].mxu0 }
 0x8c6   : > { %v2056_v41 = vmul.f32 0.35355338, %v2047_v40 }
 0x8c7   : > { %v2059_v42 = vadd.f32 %v2057_v39, %v6234_v33 }
 0x8c8   : > { %v2058_v43 = vadd.f32 %v2056_v41, %v6229_v30 }
 0x8c9   : > { %v2063_v44 = vsel %vm1220_vm5, %v2059_v42, -inf }
 0x8ca   : > { %2064 = vmax.xlane.f32.xlu1 %v2063_v44  ;;  %v2060_v45 = vsel %vm1220_vm5, %v2058_v43, -inf }
 0x8cb   : > { %2061 = vmax.xlane.f32.xlu0 %v2060_v45 }
 0x957   : > { %v2065_v46 = vpop.xlane.xlu1 %2064 }
 0x958   : > { %v2067_v47 = vsub.f32 %v2059_v42, %v2065_v46  ;;  %v2062_v48 = vpop.xlane.xlu0 %2061 }
 0x959   : > { %v2066_v49 = vsub.f32 %v2058_v43, %v2062_v48 }
 0x95a   : > { %v2070_v50 = vmul.f32 1.442695, %v2067_v47 }
 0x95b   : > { %v2068_v51 = vmul.f32 1.442695, %v2066_v49 }
 0x95c   : > { %5937 = vpow2.f32 %v2070_v50 }
 0x95d   : > { %5939 = vpow2.f32 %v2068_v51 }
 0x966   : > { %v5938_v52 = vpop.eup %5937 }
 0x967   : > { %v5940_v53 = vpop.eup %5939  ;;  %v2075_v54 = vsel %vm1220_vm5, %v5938_v52, 0.0 }
 0x968   : > { %2076 = vadd.xlane.f32.xlu1 %v2075_v54  ;;  %v2072_v55 = vsel %vm1220_vm5, %v5940_v53, 0.0 }
 0x969   : > { %2073 = vadd.xlane.f32.xlu0 %v2072_v55 }
 0x9f5   : > { %v2077_v2 = vpop.xlane.xlu1 %2076 }
 0x9f6   : > { %5941 = vrcp.f32 %v2077_v2  ;;  %v2074_v4 = vpop.xlane.xlu0 %2073 }
 0x9f7   : > { %5943 = vrcp.f32 %v2074_v4 }
 0xa00   : > { %v5942_v5 = vpop.eup %5941 }
 0xa01   : > { %v5944_v6 = vpop.eup %5943  ;;  %v2081_v8 = vmul.f32 %v5942_v5, %v5938_v52 }
 0xa02   : > { %v2080_v7 = vmul.f32 %v5944_v6, %v5940_v53 }
 0xa04   : > { %5665 = vmatprep.mubr.msk.f32.mxu0 %vm1220_vm5, %v2080_v7 }
 0xa05   : > { %5666 = vmatmul.mubr.msk.f32.vlgmr.msra.gmra.mrb[28].mxu0 %vm1220_vm5, %v2081_v8 }
 0xa06   : > { %5678 = vmatprep.mubr.msk.bf16.mxu0 %vm5976_vm1, %v5975_v3  ;;  %5675 = vmatpush3.bf16.msra.mxu0 %v5789_v10 }
 0xa07   : > { %5676 = vmatprep.subr.bf16.mxu0 %v5975_v3 }
 0xa0a   : > { %5677 = vmatpush3.bf16.msra.mxu0 %v5790_v11 }
 0xa0b   : > { %5690 = vmatprep.subr.bf16.mxu0 %v5975_v3 }
 0xa0d   : > { %5679 = vmatmul.mubr.msk.bf16.vlgmr.msra.gmra.mrb[32].mxu0 %vm965_vm2, %v6194_v9 }
 0xa0e   : > { %5694 = vmatprep.mubr.msk.bf16.mxu0 %vm5976_vm1, %v5975_v3 }
 0xad8   : > { %v5667_v12 = vpop.f32.mrb[28].mxu0 }
 0xad9   : > { %v2154_v13 = vpop.f32.mrb[29].mxu0 }
 0xada   : > { %v2163_v15 = vpack.c.bf16 %v5667_v12, %v2154_v13  ;;  %v5105_v13 = vld [vmem:[%s6805_s29] ss:$0 sm:$0xff] }
 0xadc   : > { %5671 = vmatmul.mubr.msk.bf16.vlgmr.msra.gmra.mrb[28].mxu1 %vm1128_vm3, %v2163_v15 }
 0xadd   : > { %5683 = vmatpush3.bf16.msra.mxu1 %v5787_v14  ;;  %5686 = vmatprep.mubr.msk.bf16.mxu1 %vm5976_vm1, %v5975_v3 }
 0xade   : > { %5684 = vmatprep.subr.bf16.mxu1 %v5975_v3 }
 0xae0   : > { %v2265_v18 = vpop.f32.mrb[32].mxu0 }
 0xae1   : > { %5685 = vmatpush3.bf16.msra.mxu1 %v5788_v16  ;;  %v2266_v19 = vadd.f32 %v5086_v17, %v2265_v18  ;;  %v5680_v20 = vpop.f32.mrb[33].mxu0 }
 0xae2   : > { %v2268_v23 = vpop.f32.mrb[34].mxu0 }
 0xae3   : > { %v2269_v24 = vadd.f32 %v5086_v17, %v2268_v23  ;;  %v5681_v26 = vpop.f32.mrb[35].mxu0 }
 0xae4   : > { %5687 = vmatmul.mubr.msk.bf16.vlgmr.msra.gmra.mrb[32].mxu1 %vm965_vm2, %v6194_v9 }
 0xae5   : > { %5702 = vmatprep.mubr.msk.f32.mxu1 %vm1128_vm3, %v2266_v19 }
 0xbaf   : > { %v2204_v27 = vpop.f32.mrb[28].mxu1 }
 0xbb0   : > { %v6377_v28 = vadd.f32 %v2204_v27, %v6328_v22  ;;  %v5672_v29 = vpop.f32.mrb[29].mxu1  ;;  %v5791_v22 = vld [vmem:[%s6122_s26 + $0x30] sm:$0xff]  }
 0xbb1   : > { %v2207_v31 = vpop.f32.mrb[30].mxu1  ;;  %5691 = vmatpush3.bf16.msra.mxu0 %v5791_v22  ;;  %v5962_v29 = vld [vmem:[#allocation2 + $0x8] sm:$0xff]  ;;  %v2689_v22 = vld [vmem:[%s6151_s7] sm:$0xff] }
 0xbb2   : > { %v6380_v32 = vadd.f32 %v2207_v31, %v6330_v25  ;;  %v5673_v34 = vpop.f32.mrb[31].mxu1  ;;  %v5792_v25 = vld [vmem:[%s6122_s26 + $0x38] sm:$0xff]   ;;  %5692 = vmatprep.subr.bf16.mxu0 %v5975_v3 }
 0xbb5   : > { %5693 = vmatpush3.bf16.msra.mxu0 %v5792_v25  ;;  %v2697_v25 = vld [vmem:[%s6151_s7 + $0x40] sm:$0xff] }
 0xbb6   : > { %5712 = vmatprep.subr.bf16.mxu0 %v5975_v3 }
 0xbb7   : > { %v2324_v36 = vpop.f32.mrb[32].mxu1 }
 0xbb8   : > { %v5688_v37 = vpop.f32.mrb[33].mxu1  ;;  %v2325_v39 = vadd.f32 %v5090_v35, %v2324_v36  ;;  %5695 = vmatmul.mubr.msk.bf16.vlgmr.msra.gmra.mrb[36].mxu0 %vm965_vm2, %v6194_v9 }
 0xbb9   : > { %v2327_v38 = vpop.f32.mrb[34].mxu1  ;;  %5714 = vmatprep.mubr.msk.bf16.mxu0 %vm5976_vm1, %v5975_v3  ;;  %5713 = vmatpush3.bf16.msra.mxu0 %v2589_v1 }
 0xbba   : > { %v2328_v40 = vadd.f32 %v5090_v35, %v2327_v38  ;;  %v5689_v41 = vpop.f32.mrb[35].mxu1 }
 0xbbc   : > { %v5748_v42 = vpack.c.bf16 %v2328_v40, %v2325_v39 }
 0xbbe   : > { %5750 = vmatprep.subr.msk.bf16.mxu1 %vm6208_vm4, %v5748_v42 }
 0xbbf   : > { %5753 = vmatpush3.bf16.xpose.msk.msra.mxu1 %vm6208_vm4, %v5748_v42 }
 0xbc6   : > { %5703 = vmatmul.mubr.msk.f32.vlgmr.msra.gmra.mrb[14].mxu1 %vm1128_vm3, %v2269_v24  ;;  %v5961_v24 = vld [vmem:[#allocation2] sm:$0xff] }
 0xc8b   : > { %v2383_v56 = vpop.f32.mrb[36].mxu0 }
 0xc8c   : > { %v5696_v57 = vpop.f32.mrb[37].mxu0  ;;  %v2384_v60 = vadd.f32 %v5094_v58, %v2383_v56  ;;  %v2700_v56 = vld [vmem:[%s6151_s7 + $0x58] sm:$0xff] }
 0xc8d   : > { %v2386_v59 = vpop.f32.mrb[38].mxu0  ;;  %v5977_v57 = vmov 0  }
 0xc8e   : > { %v2387_v61 = vadd.f32 %v5094_v58, %v2386_v59  ;;  %v5697_v62 = vpop.f32.mrb[39].mxu0 }
 0xc90   : > { %v5754_v63 = vpack.c.bf16 %v2387_v61, %v2384_v60 }
 0xc92   : > { %5755 = vmatprep.subr.bf16.mxu1 %v5754_v63 }
 0xc93   : > { %5757 = vmatpush3.bf16.msra.mxu1 %v5754_v63 }
 0xc99   : > { %v5704_v43 = vpop.f32.mrb[14].mxu1 }
 0xc9a   : > { %v2478_v44 = vmul.f32 0.35355338, %v5704_v43  ;;  %v2468_v21 = vpop.f32.mrb[15].mxu1  ;;  %v2690_v43 = vld [vmem:[%s6151_s7 + $0x8] sm:$0xff] }
 0xc9b   : > { %v2477_v45 = vmul.f32 0.35355338, %v2468_v21  ;;  %v2698_v21 = vld [vmem:[%s6151_s7 + $0x48] sm:$0xff] }
 0xc9c   : > { %v2480_v46 = vadd.f32 %v2478_v44, %v6234_v33  ;;  %v5109_v44 = vcombine.high %v2689_v22, %v2697_v25 }
 0xc9d   : > { %v2479_v47 = vadd.f32 %v2477_v45, %v6229_v30  ;;  %v5108_v45 = vcombine.low %v2689_v22, %v2697_v25  ;;  %v2695_v22 = vld [vmem:[%s6151_s7 + $0x30] sm:$0xff] }
 0xc9e   : > { %v2484_v48 = vsel %vm1220_vm5, %v2480_v46, -inf  ;;  %2969 = vmatprep.subr.bf16.mxu1 %v5109_v44  ;;  %v2703_v25 = vld [vmem:[%s6151_s7 + $0x70] sm:$0xff]  ;;  %v2704_v44 = vld [vmem:[%s6151_s7 + $0x78] sm:$0xff] }
 0xc9f   : > { %2485 = vmax.xlane.f32.xlu1 %v2484_v48  ;;  %v2481_v49 = vsel %vm1220_vm5, %v2479_v47, -inf  ;;  %v2705_v48 = vld [vmem:[%s6151_s7 + $0x80] sm:$0xff] }
 0xca0   : > { %2482 = vmax.xlane.f32.xlu0 %v2481_v49  ;;  %v2713_v49 = vld [vmem:[%s6151_s7 + $0xc0] sm:$0xff] }
 0xd2c   : > { %v2486_v50 = vpop.xlane.xlu1 %2485 }
 0xd2d   : > { %v2488_v9 = vsub.f32 %v2480_v46, %v2486_v50  ;;  %v2483_v51 = vpop.xlane.xlu0 %2482  ;;  %v5110_v46 = vcombine.low %v2690_v43, %v2698_v21  ;;  %v2706_v50 = vld [vmem:[%s6151_s7 + $0x88] sm:$0xff] }
 0xd2e   : > { %v2487_v52 = vsub.f32 %v2479_v47, %v2483_v51  ;;  %v5111_v47 = vcombine.high %v2690_v43, %v2698_v21  ;;  %v2714_v51 = vld [vmem:[%s6151_s7 + $0xc8] sm:$0xff]  ;;  %v2696_v43 = vld [vmem:[%s6151_s7 + $0x38] sm:$0xff] }
 0xd2f   : > { %v2491_v3 = vmul.f32 1.442695, %v2488_v9  ;;  %v5125_v9 = vcombine.high %v2705_v48, %v2713_v49 }
 0xd30   : > { %v2489_v53 = vmul.f32 1.442695, %v2487_v52  ;;  %3012 = vmatprep.subr.bf16.mxu0 %v5111_v47  ;;  %v5124_v52 = vcombine.low %v2705_v48, %v2713_v49  ;;  %v5123_v47 = vcombine.high %v2696_v43, %v2704_v44  ;;  %v2711_v48 = vld [vmem:[%s6151_s7 + $0xb0] sm:$0xff] }
 0xd31   : > { %5945 = vpow2.f32 %v2491_v3  ;;  %v5126_v3 = vcombine.low %v2706_v50, %v2714_v51  ;;  %v2719_v49 = vld [vmem:[%s6151_s7 + $0xf0] sm:$0xff] }
 0xd32   : > { %5947 = vpow2.f32 %v2489_v53  ;;  %v5127_v53 = vcombine.high %v2706_v50, %v2714_v51  ;;  %v2712_v50 = vld [vmem:[%s6151_s7 + $0xb8] sm:$0xff]  ;;  %v5120_v51 = vcombine.low %v2695_v22, %v2703_v25 }
 0xd3b   : > { %v5946_v54 = vpop.eup %5945 }
 0xd3c   : > { %v5948_v33 = vpop.eup %5947  ;;  %v2496_v30 = vsel %vm1220_vm5, %v5946_v54, 0.0 }
 0xd3d   : > { %2497 = vadd.xlane.f32.xlu1 %v2496_v30  ;;  %v2493_v55 = vsel %vm1220_vm5, %v5948_v33, 0.0  ;;  %v2692_v30 = vld [vmem:[%s6151_s7 + $0x18] sm:$0xff] }
 0xd3e   : > { %2494 = vadd.xlane.f32.xlu0 %v2493_v55  ;;  %v5114_v59 = vcombine.low %v2692_v30, %v2700_v56  ;;  %v5115_v60 = vcombine.high %v2692_v30, %v2700_v56  ;;  %v5793_v30 = vld [vmem:[%s6166_s25 + $0x40] sm:$0xff]  }
 0xd3f   : > { %v5795_v56 = vld [vmem:[%s6166_s25] sm:$0xff]  }
 0xdca   : > { %v2498_v2 = vpop.xlane.xlu1 %2497 }
 0xdcb   : > { %5949 = vrcp.f32 %v2498_v2  ;;  %v2495_v4 = vpop.xlane.xlu0 %2494 }
 0xdcc   : > { %5951 = vrcp.f32 %v2495_v4 }
 0xdd5   : > { %v5950_v5 = vpop.eup %5949 }
 0xdd6   : > { %v5952_v6 = vpop.eup %5951  ;;  %v2502_v8 = vmul.f32 %v5950_v5, %v5946_v54  ;;  %v2691_v54 = vld [vmem:[%s6151_s7 + $0x10] sm:$0xff]  ;;  %v5106_v5 = vld [vmem:[%s6806_s30] ss:$0 sm:$0xff] }
 0xdd7   : > { %v2501_v7 = vmul.f32 %v5952_v6, %v5948_v33  ;;  %v2699_v33 = vld [vmem:[%s6151_s7 + $0x50] sm:$0xff] }
 0xdd8   : > { %v5113_v55 = vcombine.high %v2691_v54, %v2699_v33  ;;  %v5112_v58 = vcombine.low %v2691_v54, %v2699_v33  ;;  %v5136_v54 = vcombine.low %v2711_v48, %v2719_v49 }
 0xdd9   : > { %5709 = vmatprep.mubr.msk.f32.mxu1 %vm1220_vm5, %v2501_v7 }
 0xdda   : > { %5710 = vmatmul.mubr.msk.f32.vlgmr.msra.gmra.mrb[36].mxu1 %vm1220_vm5, %v2502_v8 }
 0xddb   : > { %2970 = vmatpush1.bf16.msra.mxu1 %v5108_v45  ;;  %3001 = vmatprep.mubr.bf16.mxu1 %v5977_v57 }
 0xddc   : > { %2971 = vmatprep.subr.bf16.mxu1 %v5125_v9  ;;  %v2720_v9 = vld [vmem:[%s6151_s7 + $0xf8] sm:$0xff] }
 0xddd   : > { %v5138_v33 = vcombine.low %v2712_v50, %v2720_v9 }
 0xddf   : > { %2972 = vmatpush1.bf16.msra.mxu1 %v5124_v52  ;;  %v5122_v52 = vcombine.low %v2696_v43, %v2704_v44 }
 0xde0   : > { %3055 = vmatprep.subr.bf16.mxu1 %v5113_v55  ;;  %v5794_v55 = vld [vmem:[%s6166_s25 + $0xc0] sm:$0xff]  }
 0xead   : > { %v5711_v10 = vpop.f32.mrb[36].mxu1 }
 0xeae   : > { %v2575_v11 = vpop.f32.mrb[37].mxu1 }
 0xeaf   : > { %v2584_v12 = vpack.c.bf16 %v5711_v10, %v2575_v11  ;;  %v5107_v11 = vld [vmem:[%s6807_s12] ss:$0 sm:$0xff] }
 0xeb1   : > { %5715 = vmatmul.mubr.msk.bf16.vlgmr.msra.gmra.mrb[40].mxu0 %vm1128_vm3, %v2584_v12 }
 0xeb2   : > { %3013 = vmatpush1.bf16.msra.mxu0 %v5110_v46  ;;  %3044 = vmatprep.mubr.bf16.mxu0 %v5977_v57  ;;  %v5121_v46 = vcombine.high %v2695_v22, %v2703_v25 }
 0xeb3   : > { %3014 = vmatprep.subr.bf16.mxu0 %v5127_v53  ;;  %v5139_v53 = vcombine.high %v2712_v50, %v2720_v9 }
 0xeb6   : > { %3015 = vmatpush1.bf16.msra.mxu0 %v5126_v3  ;;  %v5137_v3 = vcombine.high %v2711_v48, %v2719_v49 }
 0xeb7   : > { %3098 = vmatprep.subr.bf16.mxu0 %v5115_v60  ;;  %v5798_v60 = vld [vmem:[%s6166_s25 + $0xc8] sm:$0xff]  }
 0xf84   : > { %v2625_v14 = vpop.f32.mrb[40].mxu0 }
 0xf85   : > { %v2632_v15 = vadd.f32 %v2625_v14, %v6377_v28  ;;  %v5716_v16 = vpop.f32.mrb[41].mxu0  ;;  %v2715_v14 = vld [vmem:[%s6151_s7 + $0xd0] sm:$0xff] }
 0xf86   : > { %v2628_v17 = vpop.f32.mrb[42].mxu0  ;;  %v2716_v16 = vld [vmem:[%s6151_s7 + $0xd8] sm:$0xff] }
 0xf87   : > { %v2640_v18 = vadd.f32 %v5105_v13, %v2632_v15  ;;  %v2633_v19 = vadd.f32 %v2628_v17, %v6380_v32  ;;  %v5717_v20 = vpop.f32.mrb[43].mxu0  ;;  %v2708_v15 = vld [vmem:[%s6151_s7 + $0x98] sm:$0xff] }
 0xf89   : > { %v2641_v23 = vadd.f32 %v5105_v13, %v2633_v19  ;;  %v2642_v26 = vadd.f32 %v5961_v24, %v2640_v18  ;;  %v2707_v13 = vld [vmem:[%s6151_s7 + $0x90] sm:$0xff]  ;;  %v2693_v24 = vld [vmem:[%s6151_s7 + $0x20] sm:$0xff] }
 0xf8a   : > { %v5129_v20 = vcombine.high %v2707_v13, %v2715_v14 }
 0xf8b   : > { %v2646_v27 = vsel %vm965_vm2, %v2642_v26, 0.0  ;;  %v2643_v31 = vadd.f32 %v5962_v29, %v2641_v23  ;;  %v5131_v23 = vcombine.high %v2708_v15, %v2716_v16  ;;  %v2702_v29 = vld [vmem:[%s6151_s7 + $0x68] sm:$0xff] }
 0xf8c   : > { %2647 = vadd.xlane.f32.xlu0 %v2646_v27  ;;  %v2694_v27 = vld [vmem:[%s6151_s7 + $0x28] sm:$0xff] }
 0xf8d   : > { %v2649_v34 = vsel %vm965_vm2, %v2643_v31, 0.0 }
 0xf8e   : > { %2650 = vadd.xlane.f32.xlu1 %v2649_v34  ;;  %v5130_v34 = vcombine.low %v2708_v15, %v2716_v16  ;;  %v5816_v15 = vld [vmem:[%s6166_s25 + $0xa8] sm:$0xff]   ;;  %v5817_v16 = vld [vmem:[%s6166_s25 + $0x70] sm:$0xff]  }
0x1019   : > { %v2648_v28 = vpop.xlane.xlu0 %2647 }
0x101a   : > { %v2653_v35 = vmul.f32 0.03125, %v2648_v28 }
0x101b   : > { %v2651_v36 = vpop.xlane.xlu1 %2650 }
0x101c   : > { %v2655_v32 = vsub.f32 %v2642_v26, %v2653_v35  ;;  %v2654_v37 = vmul.f32 0.03125, %v2651_v36  ;;  %v2701_v26 = vld [vmem:[%s6151_s7 + $0x60] sm:$0xff]  ;;  %v5119_v35 = vcombine.high %v2694_v27, %v2702_v29 }
0x101d   : > { %v5117_v28 = vcombine.high %v2693_v24, %v2701_v26  ;;  %v2709_v36 = vld [vmem:[%s6151_s7 + $0xa0] sm:$0xff] }
0x101e   : > { %v2656_v38 = vsub.f32 %v2643_v31, %v2654_v37  ;;  %v2657_v39 = vmul.f32 %v2655_v32, %v2655_v32  ;;  %v5128_v31 = vcombine.low %v2707_v13, %v2715_v14  ;;  %v2710_v37 = vld [vmem:[%s6151_s7 + $0xa8] sm:$0xff] }
0x101f   : > { %v5814_v13 = vld [vmem:[%s6166_s25 + $0xe8] sm:$0xff]  }
0x1020   : > { %v2659_v40 = vsel %vm965_vm2, %v2657_v39, 0.0  ;;  %v2658_v41 = vmul.f32 %v2656_v38, %v2656_v38  ;;  %v5116_v39 = vcombine.low %v2693_v24, %v2701_v26  ;;  %v5815_v14 = vld [vmem:[%s6166_s25 + $0x28] sm:$0xff]   ;;  %v5821_v24 = vld [vmem:[%s6166_s25 + $0x78] sm:$0xff]  }
0x1021   : > { %2660 = vadd.xlane.f32.xlu0 %v2659_v40  ;;  %v5118_v40 = vcombine.low %v2694_v27, %v2702_v29  ;;  %v5822_v26 = vld [vmem:[%s6166_s25 + $0xf8] sm:$0xff]  }
0x1022   : > { %v2662_v42 = vsel %vm965_vm2, %v2658_v41, 0.0  ;;  %v5823_v27 = vld [vmem:[%s6166_s25 + $0x38] sm:$0xff]  }
0x1023   : > { %2663 = vadd.xlane.f32.xlu1 %v2662_v42  ;;  %v5824_v29 = vld [vmem:[%s6166_s25 + $0xb8] sm:$0xff]  }
0x10ae   : > { %v2661_v61 = vpop.xlane.xlu0 %2660 }
0x10af   : > { %v2665_v62 = vmul.f32 0.03125, %v2661_v61  ;;  %v5800_v61 = vld [vmem:[%s6166_s25 + $0x88] sm:$0xff]  }
0x10b0   : > { %v2664_v63 = vpop.xlane.xlu1 %2663 }
0x10b1   : > { %v2667_v0 = vadd.f32 1e-05, %v2665_v62  ;;  %v2666_v1 = vmul.f32 0.03125, %v2664_v63  ;;  %v5801_v62 = vld [vmem:[%s6166_s25 + $0x50] sm:$0xff]  }
0x10b2   : > { %v5802_v63 = vld [vmem:[%s6166_s25 + $0xd0] sm:$0xff]  }
0x10b3   : > { %5953 = vrsqrt.f32 %v2667_v0  ;;  %v2668_v2 = vadd.f32 1e-05, %v2666_v1  ;;  %v5803_v0 = vld [vmem:[%s6166_s25 + $0x10] sm:$0xff]  }
0x10b4   : > { %v5804_v1 = vld [vmem:[%s6166_s25 + $0x90] sm:$0xff]  }
0x10b5   : > { %5955 = vrsqrt.f32 %v2668_v2  ;;  %v5805_v2 = vld [vmem:[%s6166_s25 + $0x58] sm:$0xff]  }
0x10bd   : > { %v5954_v4 = vpop.eup %5953 }
0x10be   : > { %v2671_v6 = vmul.f32 %v5954_v4, %v2655_v32  ;;  %v2717_v32 = vld [vmem:[%s6151_s7 + $0xe0] sm:$0xff]  ;;  %v5806_v4 = vld [vmem:[%s6166_s25 + $0xd8] sm:$0xff]  }
0x10bf   : > { %v5956_v7 = vpop.eup %5955  ;;  %v5133_v41 = vcombine.high %v2709_v36, %v2717_v32  ;;  %v5132_v21 = vcombine.low %v2709_v36, %v2717_v32  ;;  %v6531_v32 = vld [vmem:[%s6156_s27 + $0x8] sm:$0xff] }
0x10c0   : > { %v2679_v8 = vmul.f32 %v5106_v5, %v2671_v6  ;;  %v2672_v10 = vmul.f32 %v5956_v7, %v2656_v38  ;;  %v2718_v38 = vld [vmem:[%s6151_s7 + $0xe8] sm:$0xff]  ;;  %v5808_v6 = vld [vmem:[%s6166_s25 + $0x98] sm:$0xff]   ;;  %v5809_v7 = vld [vmem:[%s6166_s25 + $0x60] sm:$0xff]  }
0x10c1   : > { %v5135_v42 = vcombine.high %v2710_v37, %v2718_v38  ;;  %v5134_v45 = vcombine.low %v2710_v37, %v2718_v38 }
0x10c2   : > { %v2680_v12 = vmul.f32 %v5106_v5, %v2672_v10  ;;  %v6447_v17 = vadd.f32 %v5107_v11, %v2679_v8  ;;  %v5807_v5 = vld [vmem:[%s6166_s25 + $0x18] sm:$0xff]   ;;  %v5810_v8 = vld [vmem:[%s6166_s25 + $0xe0] sm:$0xff]  }
0x10c3   : > { %v5811_v10 = vld [vmem:[%s6166_s25 + $0x20] sm:$0xff]  }
0x10c4   : > { %v6449_v18 = vadd.f32 %v5107_v11, %v2680_v12  ;;  %v5812_v11 = vld [vmem:[%s6166_s25 + $0xa0] sm:$0xff]   ;;  %v5813_v12 = vld [vmem:[%s6166_s25 + $0x68] sm:$0xff]  }
0x10c6   : > { %v6453_v19 = vpack.c.bf16 %v6449_v18, %v6447_v17 }
0x10c8   : > { %5140 = vmatmul.mubr.msk.bf16.vlgmr.msra.gmra.mrb[40].mxu1 %vm965_vm2, %v6453_v19  ;;  %5141 = vmatmul.mubr.msk.bf16.vlgmr.msra.gmra.mrb[44].mxu0 %vm965_vm2, %v6453_v19 }
0x10c9   : > { %3056 = vmatpush1.bf16.msra.mxu1 %v5112_v58  ;;  %3099 = vmatpush1.bf16.msra.mxu0 %v5114_v59  ;;  %v5796_v58 = vld [vmem:[%s6166_s25 + $0x80] sm:$0xff]   ;;  %v5797_v59 = vld [vmem:[%s6166_s25 + $0x48] sm:$0xff]  }
0x10ca   : > { %3057 = vmatprep.subr.bf16.mxu1 %v5129_v20  ;;  %3100 = vmatprep.subr.bf16.mxu0 %v5131_v23  ;;  %v5819_v20 = vld [vmem:[%s6166_s25 + $0x30] sm:$0xff]  }
0x10cb   : > { %3087 = vmatprep.mubr.bf16.mxu1 %v5977_v57  ;;  %3130 = vmatprep.mubr.bf16.mxu0 %v5977_v57  ;;  %v5820_v23 = vld [vmem:[%s6166_s25 + $0xb0] sm:$0xff]  }
0x10cd   : > { %3058 = vmatpush1.bf16.msra.mxu1 %v5128_v31  ;;  %3101 = vmatpush1.bf16.msra.mxu0 %v5130_v34  ;;  %v5825_v31 = vld [vmem:[%s6166_s25 + $0x140] sm:$0xff]  }
0x10ce   : > { %3141 = vmatprep.subr.bf16.mxu1 %v5117_v28  ;;  %3184 = vmatprep.subr.bf16.mxu0 %v5119_v35  ;;  %v5826_v34 = vld [vmem:[%s6166_s25 + $0x1c0] sm:$0xff]   ;;  %v2726_v28 = vlaneseq }
0x10d0   : > { %5142 = vmatmul.mubr.msk.bf16.vlgmr.msra.gmra.mrb[44].mxu1 %vm965_vm2, %v6453_v19  ;;  %5143 = vmatmul.mubr.msk.bf16.vlgmr.msra.gmra.mrb[48].mxu0 %vm965_vm2, %v6453_v19  ;;  %v6527_v35 = vshrl.u32 %v2726_v28, 7 }
0x10d1   : > { %3142 = vmatpush1.bf16.msra.mxu1 %v5116_v39  ;;  %3185 = vmatpush1.bf16.msra.mxu0 %v5118_v40  ;;  %v2721_v40 = vld [vmem:[%s6156_s27] sm:$0xff] }
0x10d2   : > { %3143 = vmatprep.subr.bf16.mxu1 %v5133_v41  ;;  %3186 = vmatprep.subr.bf16.mxu0 %v5135_v42  ;;  %v2752_v36 = vsub.s32 6, %v6527_v35  ;;  %v2728_v38 = vsub.s32 0, %v6527_v35  ;;  %v2736_v39 = vsub.s32 2, %v6527_v35  ;;  %v2732_v41 = vsub.s32 1, %v6527_v35 }
0x10d3   : > { %3173 = vmatprep.mubr.bf16.mxu1 %v5977_v57  ;;  %3216 = vmatprep.mubr.bf16.mxu0 %v5977_v57  ;;  %v2740_v42 = vsub.s32 3, %v6527_v35  ;;  %v2756_v48 = vsub.s32 7, %v6527_v35 }
0x10d4   : > { %v6534_v37 = vrot.slane %v6531_v32, %v2752_v36  ;;  %v2729_v22 = vrot.slane %v2721_v40, %v2728_v38  ;;  %v2737_v25 = vrot.slane %v2721_v40, %v2736_v39  ;;  %v2733_v43 = vrot.slane %v2721_v40, %v2732_v41 }
0x10d5   : > { %3144 = vmatpush1.bf16.msra.mxu1 %v5132_v21  ;;  %3187 = vmatpush1.bf16.msra.mxu0 %v5134_v45  ;;  %v2741_v44 = vrot.slane %v2721_v40, %v2740_v42  ;;  %v2744_v21 = vsub.s32 4, %v6527_v35 }
0x10d6   : > { %3227 = vmatprep.subr.bf16.mxu1 %v5121_v46  ;;  %3270 = vmatprep.subr.bf16.mxu0 %v5123_v47  ;;  %v2748_v47 = vsub.s32 5, %v6527_v35 }
0x10d8   : > { %5144 = vmatmul.mubr.msk.bf16.vlgmr.msra.gmra.mrb[48].mxu1 %vm965_vm2, %v6453_v19  ;;  %5145 = vmatmul.mubr.msk.bf16.vlgmr.msra.gmra.mrb[52].mxu0 %vm965_vm2, %v6453_v19 }
0x10d9   : > { %3228 = vmatpush1.bf16.msra.mxu1 %v5120_v51  ;;  %3271 = vmatpush1.bf16.msra.mxu0 %v5122_v52 }
0x10da   : > { %3229 = vmatprep.subr.bf16.mxu1 %v5137_v3  ;;  %3272 = vmatprep.subr.bf16.mxu0 %v5139_v53 }
0x10db   : > { %3259 = vmatprep.mubr.bf16.mxu1 %v5977_v57  ;;  %3302 = vmatprep.mubr.bf16.mxu0 %v5977_v57  ;;  %v5799_v57 = vld [vmem:[%s6166_s25 + $0x8] sm:$0xff]  }
0x10dd   : > { %3230 = vmatpush1.bf16.msra.mxu1 %v5136_v54  ;;  %3273 = vmatpush1.bf16.msra.mxu0 %v5138_v33 }
0x10de   : > { %5366 = vmatprep.subr.bf16.mxu1 %v5793_v30  ;;  %5388 = vmatprep.subr.bf16.mxu0 %v5794_v55 }
0x10e0   : > { %5146 = vmatmul.mubr.msk.bf16.vlgmr.msra.gmra.mrb[52].mxu1 %vm965_vm2, %v6453_v19  ;;  %5147 = vmatmul.mubr.msk.bf16.vlgmr.msra.gmra.mrb[56].mxu0 %vm965_vm2, %v6453_v19  ;;  %v5818_v19 = vld [vmem:[%s6166_s25 + $0xf0] sm:$0xff]  }
0x10e1   : > { %5367 = vmatpush3.bf16.msra.mxu1 %v5795_v56  ;;  %5389 = vmatpush3.bf16.msra.mxu0 %v5796_v58  ;;  %v2745_v58 = vrot.slane %v2721_v40, %v2744_v21 }
0x10e2   : > { %5368 = vmatprep.subr.bf16.mxu1 %v5797_v59  ;;  %5390 = vmatprep.subr.bf16.mxu0 %v5798_v60  ;;  %v2753_v59 = vrot.slane %v2721_v40, %v2752_v36 }
0x10e5   : > { %5369 = vmatpush3.bf16.msra.mxu1 %v5799_v57  ;;  %5391 = vmatpush3.bf16.msra.mxu0 %v5800_v61  ;;  %v2749_v61 = vrot.slane %v2721_v40, %v2748_v47 }
0x10e6   : > { %5370 = vmatprep.subr.bf16.mxu1 %v5801_v62  ;;  %5392 = vmatprep.subr.bf16.mxu0 %v5802_v63  ;;  %v2757_v62 = vrot.slane %v2721_v40, %v2756_v48  ;;  %v2769_v40 = vrot.slane %v6531_v32, %v2736_v39  ;;  %v2773_v39 = vrot.slane %v6531_v32, %v2740_v42 }
0x10e9   : > { %5371 = vmatpush3.bf16.msra.mxu1 %v5803_v0  ;;  %5393 = vmatpush3.bf16.msra.mxu0 %v5804_v1 }
0x10ea   : > { %5372 = vmatprep.subr.bf16.mxu1 %v5805_v2  ;;  %5394 = vmatprep.subr.bf16.mxu0 %v5806_v4 }
0x10ed   : > { %5373 = vmatpush3.bf16.msra.mxu1 %v5807_v5  ;;  %5395 = vmatpush3.bf16.msra.mxu0 %v5808_v6 }
0x10ee   : > { %5374 = vmatprep.subr.bf16.mxu1 %v5809_v7  ;;  %5396 = vmatprep.subr.bf16.mxu0 %v5810_v8 }
0x10f1   : > { %5375 = vmatpush3.bf16.msra.mxu1 %v5811_v10  ;;  %5397 = vmatpush3.bf16.msra.mxu0 %v5812_v11 }
0x10f2   : > { %5376 = vmatprep.subr.bf16.mxu1 %v5813_v12  ;;  %5398 = vmatprep.subr.bf16.mxu0 %v5814_v13 }
0x10f5   : > { %5377 = vmatpush3.bf16.msra.mxu1 %v5815_v14  ;;  %5399 = vmatpush3.bf16.msra.mxu0 %v5816_v15  ;;  %v5827_v15 = vld [vmem:[%s6166_s25 + $0x100] sm:$0xff]  }
0x10f6   : > { %5378 = vmatprep.subr.bf16.mxu1 %v5817_v16  ;;  %5400 = vmatprep.subr.bf16.mxu0 %v5818_v19  ;;  %v5828_v16 = vld [vmem:[%s6166_s25 + $0x180] sm:$0xff]  }
0x10f9   : > { %5379 = vmatpush3.bf16.msra.mxu1 %v5819_v20  ;;  %5401 = vmatpush3.bf16.msra.mxu0 %v5820_v23 }
0x10fa   : > { %5380 = vmatprep.subr.bf16.mxu1 %v5821_v24  ;;  %5402 = vmatprep.subr.bf16.mxu0 %v5822_v26  ;;  %v5829_v26 = vld [vmem:[%s6166_s25 + $0x148] sm:$0xff]  }
0x10fd   : > { %5381 = vmatpush3.bf16.msra.mxu1 %v5823_v27  ;;  %5403 = vmatpush3.bf16.msra.mxu0 %v5824_v29  ;;  %v5830_v27 = vld [vmem:[%s6166_s25 + $0x1c8] sm:$0xff]   ;;  %v2761_v29 = vrot.slane %v6531_v32, %v2728_v38  ;;  %v2765_v38 = vrot.slane %v6531_v32, %v2732_v41  ;;  %v5834_v41 = vld [vmem:[%s6166_s25 + $0x1d0] sm:$0xff]  }
0x10fe   : > { %5410 = vmatprep.subr.bf16.mxu1 %v5825_v31  ;;  %5432 = vmatprep.subr.bf16.mxu0 %v5826_v34 }
0x119b   : > { %v3003_v45 = vpop.f32.mrb[40].mxu1  ;;  %v3046_v46 = vpop.f32.mrb[44].mxu0 }
0x119c   : > { %v3004_v49 = vadd.f32 %v3003_v45, %v2729_v22  ;;  %v3047_v50 = vadd.f32 %v3046_v46, %v2737_v25  ;;  %v3005_v9 = vpop.f32.mrb[41].mxu1  ;;  %v3048_v51 = vpop.f32.mrb[45].mxu0 }
0x119d   : > { %v3006_v52 = vadd.f32 %v3005_v9, %v2733_v43  ;;  %v3049_v3 = vadd.f32 %v3048_v51, %v2741_v44  ;;  %v3007_v53 = vpop.f32.mrb[42].mxu1  ;;  %v3050_v54 = vpop.f32.mrb[46].mxu0 }
0x119e   : > { %v3008_v33 = vadd.f32 %v3007_v53, %v2729_v22  ;;  %v3051_v30 = vadd.f32 %v3050_v54, %v2737_v25  ;;  %v3009_v55 = vpop.f32.mrb[43].mxu1  ;;  %v3052_v56 = vpop.f32.mrb[47].mxu0  ;;  %v3313_v63 = vmax.f32 %v3004_v49, 0.0  ;;  %v3315_v0 = vmax.f32 %v3047_v50, 0.0  ;;  %v5831_v49 = vld [vmem:[%s6166_s25 + $0x108] sm:$0xff]   ;;  %v5833_v53 = vld [vmem:[%s6166_s25 + $0x150] sm:$0xff]  }
0x119f   : > { %v3010_v60 = vadd.f32 %v3009_v55, %v2733_v43  ;;  %v3053_v57 = vadd.f32 %v3052_v56, %v2741_v44  ;;  %v3314_v4 = vmax.f32 %v3006_v52, 0.0  ;;  %v3316_v5 = vmax.f32 %v3049_v3, 0.0  ;;  %v5832_v50 = vld [vmem:[%s6166_s25 + $0x188] sm:$0xff]  }
0x11a0   : > { %v3329_v1 = vmax.f32 %v3008_v33, 0.0  ;;  %v3331_v2 = vmax.f32 %v3051_v30, 0.0 }
0x11a1   : > { %v3330_v6 = vmax.f32 %v3010_v60, 0.0  ;;  %v3332_v7 = vmax.f32 %v3053_v57, 0.0 }
0x11a2   : > { %v3602_v8 = vpack.c.bf16 %v3329_v1, %v3313_v63  ;;  %v3604_v10 = vpack.c.bf16 %v3331_v2, %v3315_v0 }
0x11a3   : > { %v3603_v11 = vpack.c.bf16 %v3330_v6, %v3314_v4  ;;  %v3605_v12 = vpack.c.bf16 %v3332_v7, %v3316_v5  ;;  %v3089_v13 = vpop.f32.mrb[44].mxu1  ;;  %v3132_v14 = vpop.f32.mrb[48].mxu0  ;;  %v5837_v4 = vld [vmem:[%s6166_s25 + $0x158] sm:$0xff]  }
0x11a4   : > { %v3090_v19 = vadd.f32 %v3089_v13, %v2745_v58  ;;  %v3133_v20 = vadd.f32 %v3132_v14, %v2753_v59  ;;  %v3091_v23 = vpop.f32.mrb[45].mxu1  ;;  %v3134_v24 = vpop.f32.mrb[49].mxu0  ;;  %v5838_v5 = vld [vmem:[%s6166_s25 + $0x1d8] sm:$0xff]  }
0x11a5   : > { %v3092_v31 = vadd.f32 %v3091_v23, %v2749_v61  ;;  %v3135_v34 = vadd.f32 %v3134_v24, %v2757_v62  ;;  %v3093_v28 = vpop.f32.mrb[46].mxu1  ;;  %v3136_v36 = vpop.f32.mrb[50].mxu0  ;;  %4424 = vmatprep.mubr.bf16.mxu1 %v3603_v11  ;;  %4465 = vmatprep.mubr.bf16.mxu0 %v3605_v12  ;;  %v5839_v23 = vld [vmem:[%s6166_s25 + $0x118] sm:$0xff]  }
0x11a6   : > { %v3094_v22 = vadd.f32 %v3093_v28, %v2745_v58  ;;  %v3137_v25 = vadd.f32 %v3136_v36, %v2753_v59  ;;  %v3095_v43 = vpop.f32.mrb[47].mxu1  ;;  %v3138_v44 = vpop.f32.mrb[51].mxu0  ;;  %4425 = vmatmul.mubr.bf16.vlgmr.msra.gmra.mrb[56].mxu1 %v3602_v8  ;;  %4466 = vmatmul.mubr.bf16.vlgmr.msra.gmra.mrb[60].mxu0 %v3604_v10  ;;  %v3317_v9 = vmax.f32 %v3090_v19, 0.0  ;;  %v3319_v51 = vmax.f32 %v3133_v20, 0.0  ;;  %v5840_v24 = vld [vmem:[%s6166_s25 + $0x198] sm:$0xff]  }
0x11a7   : > { %v3096_v45 = vadd.f32 %v3095_v43, %v2749_v61  ;;  %v3139_v46 = vadd.f32 %v3138_v44, %v2757_v62  ;;  %5411 = vmatpush3.bf16.msra.mxu1 %v5827_v15  ;;  %5433 = vmatpush3.bf16.msra.mxu0 %v5828_v16  ;;  %v3318_v54 = vmax.f32 %v3092_v31, 0.0  ;;  %v3320_v33 = vmax.f32 %v3135_v34, 0.0  ;;  %v5835_v61 = vld [vmem:[%s6166_s25 + $0x110] sm:$0xff]  }
0x11a8   : > { %v3333_v52 = vmax.f32 %v3094_v22, 0.0  ;;  %v3335_v3 = vmax.f32 %v3137_v25, 0.0  ;;  %5412 = vmatprep.subr.bf16.mxu1 %v5829_v26  ;;  %5434 = vmatprep.subr.bf16.mxu0 %v5830_v27  ;;  %v5836_v62 = vld [vmem:[%s6166_s25 + $0x190] sm:$0xff]   ;;  %v2777_v15 = vrot.slane %v6531_v32, %v2744_v21  ;;  %v2781_v16 = vrot.slane %v6531_v32, %v2748_v47  ;;  %v5841_v21 = vld [vmem:[%s6166_s25 + $0x160] sm:$0xff]  }
0x11a9   : > { %v3334_v30 = vmax.f32 %v3096_v45, 0.0  ;;  %v3336_v55 = vmax.f32 %v3139_v46, 0.0  ;;  %v2789_v26 = vrot.slane %v6531_v32, %v2756_v48  ;;  %v5842_v47 = vld [vmem:[%s6166_s25 + $0x1e0] sm:$0xff]  }
0x11aa   : > { %v6570_v56 = vpack.c.bf16 %v3333_v52, %v3317_v9  ;;  %v6572_v58 = vpack.c.bf16 %v3335_v3, %v3319_v51  ;;  %v5844_v45 = vld [vmem:[%s6166_s25 + $0x1a0] sm:$0xff]   ;;  %v5845_v9 = vld [vmem:[%s6166_s25 + $0x168] sm:$0xff]  }
0x11ab   : > { %v3607_v42 = vpack.c.bf16 %v3334_v30, %v3318_v54  ;;  %v3609_v59 = vpack.c.bf16 %v3336_v55, %v3320_v33  ;;  %5413 = vmatpush3.bf16.msra.mxu1 %v5831_v49  ;;  %5435 = vmatpush3.bf16.msra.mxu0 %v5832_v50  ;;  %v3175_v60 = vpop.f32.mrb[48].mxu1  ;;  %v3218_v57 = vpop.f32.mrb[52].mxu0  ;;  %v5846_v51 = vld [vmem:[%s6166_s25 + $0x1e8] sm:$0xff]  }
0x11ac   : > { %v3176_v63 = vadd.f32 %v3175_v60, %v2761_v29  ;;  %v3219_v0 = vadd.f32 %v3218_v57, %v2769_v40  ;;  %v3177_v1 = vpop.f32.mrb[49].mxu1  ;;  %v3220_v2 = vpop.f32.mrb[53].mxu0  ;;  %5414 = vmatprep.subr.bf16.mxu1 %v5833_v53  ;;  %5436 = vmatprep.subr.bf16.mxu0 %v5834_v41  ;;  %v5847_v60 = vld [vmem:[%s6166_s25 + $0x128] sm:$0xff]  }
0x11ad   : > { %v3178_v6 = vadd.f32 %v3177_v1, %v2765_v38  ;;  %v3221_v7 = vadd.f32 %v3220_v2, %v2773_v39  ;;  %v3179_v8 = vpop.f32.mrb[50].mxu1  ;;  %v3222_v10 = vpop.f32.mrb[54].mxu0  ;;  %4506 = vmatprep.mubr.bf16.mxu1 %v3607_v42  ;;  %4547 = vmatprep.mubr.bf16.mxu0 %v3609_v59  ;;  %v5848_v57 = vld [vmem:[%s6166_s25 + $0x1a8] sm:$0xff]   ;;  %v5849_v1 = vld [vmem:[%s6166_s25 + $0x170] sm:$0xff]  }
0x11ae   : > { %v3180_v11 = vadd.f32 %v3179_v8, %v2761_v29  ;;  %v3223_v12 = vadd.f32 %v3222_v10, %v2769_v40  ;;  %v3181_v13 = vpop.f32.mrb[51].mxu1  ;;  %v3224_v14 = vpop.f32.mrb[55].mxu0  ;;  %v3321_v27 = vmax.f32 %v3176_v63, 0.0  ;;  %v3323_v29 = vmax.f32 %v3219_v0, 0.0 }
0x11af   : > { %v3182_v19 = vadd.f32 %v3181_v13, %v2765_v38  ;;  %v3225_v20 = vadd.f32 %v3224_v14, %v2773_v39  ;;  %5415 = vmatpush3.bf16.msra.mxu1 %v5835_v61  ;;  %5437 = vmatpush3.bf16.msra.mxu0 %v5836_v62  ;;  %v3322_v28 = vmax.f32 %v3178_v6, 0.0  ;;  %v3324_v36 = vmax.f32 %v3221_v7, 0.0  ;;  %v5843_v38 = vld [vmem:[%s6166_s25 + $0x120] sm:$0xff]   ;;  %v5852_v13 = vld [vmem:[%s6166_s25 + $0x1b0] sm:$0xff]   ;;  %v5853_v14 = vld [vmem:[%s6166_s25 + $0x178] sm:$0xff]  }
0x11b0   : > { %v3337_v31 = vmax.f32 %v3180_v11, 0.0  ;;  %v3339_v34 = vmax.f32 %v3223_v12, 0.0  ;;  %5416 = vmatprep.subr.bf16.mxu1 %v5837_v4  ;;  %5438 = vmatprep.subr.bf16.mxu0 %v5838_v5  ;;  %v5851_v12 = vld [vmem:[%s6166_s25 + $0x130] sm:$0xff]  }
0x11b1   : > { %v3338_v40 = vmax.f32 %v3182_v19, 0.0  ;;  %v3340_v22 = vmax.f32 %v3225_v20, 0.0  ;;  %v5856_v19 = vld [vmem:[%s6166_s25 + $0x1b8] sm:$0xff]   ;;  %v5857_v20 = vld [vmem:[%s6166_s25 + $0x240] sm:$0xff]  }
0x11b2   : > { %v6591_v25 = vpack.c.bf16 %v3337_v31, %v3321_v27  ;;  %v6593_v35 = vpack.c.bf16 %v3339_v34, %v3323_v29  ;;  %v5861_v27 = vld [vmem:[%s6166_s25 + $0x248] sm:$0xff]  }
0x11b3   : > { %v6595_v32 = vpack.c.bf16 %v3338_v40, %v3322_v28  ;;  %v6597_v48 = vpack.c.bf16 %v3340_v22, %v3324_v36  ;;  %5417 = vmatpush3.bf16.msra.mxu1 %v5839_v23  ;;  %5439 = vmatpush3.bf16.msra.mxu0 %v5840_v24  ;;  %v3261_v43 = vpop.f32.mrb[52].mxu1  ;;  %v3304_v44 = vpop.f32.mrb[56].mxu0  ;;  %v5858_v23 = vld [vmem:[%s6166_s25 + $0x2c0] sm:$0xff]   ;;  %v5862_v29 = vld [vmem:[%s6166_s25 + $0x2c8] sm:$0xff]   ;;  %v5869_v28 = vld [vmem:[%s6166_s25 + $0x258] sm:$0xff]  }
0x11b4   : > { %v3262_v46 = vadd.f32 %v3261_v43, %v2777_v15  ;;  %v3305_v49 = vadd.f32 %v3304_v44, %v6534_v37  ;;  %v3263_v50 = vpop.f32.mrb[53].mxu1  ;;  %v3306_v39 = vpop.f32.mrb[57].mxu0  ;;  %5418 = vmatprep.subr.bf16.mxu1 %v5841_v21  ;;  %5440 = vmatprep.subr.bf16.mxu0 %v5842_v47  ;;  %v5859_v24 = vld [vmem:[%s6166_s25 + $0x200] sm:$0xff]   ;;  %v5863_v31 = vld [vmem:[%s6166_s25 + $0x208] sm:$0xff]   ;;  %v5865_v21 = vld [vmem:[%s6166_s25 + $0x250] sm:$0xff]  }
0x11b5   : > { %v3264_v52 = vadd.f32 %v3263_v50, %v2781_v16  ;;  %v3307_v3 = vadd.f32 %v3306_v39, %v2789_v26  ;;  %v3265_v53 = vpop.f32.mrb[54].mxu1  ;;  %v3308_v41 = vpop.f32.mrb[58].mxu0  ;;  %v5864_v34 = vld [vmem:[%s6166_s25 + $0x288] sm:$0xff]   ;;  %v5868_v47 = vld [vmem:[%s6166_s25 + $0x290] sm:$0xff]   ;;  %v5870_v36 = vld [vmem:[%s6166_s25 + $0x2d8] sm:$0xff]  }
0x11b6   : > { %v3266_v54 = vadd.f32 %v3265_v53, %v2777_v15  ;;  %v3309_v33 = vadd.f32 %v3308_v41, %v6534_v37  ;;  %v3267_v30 = vpop.f32.mrb[55].mxu1  ;;  %v3310_v55 = vpop.f32.mrb[59].mxu0  ;;  %v3325_v61 = vmax.f32 %v3262_v46, 0.0  ;;  %v3327_v62 = vmax.f32 %v3305_v49, 0.0  ;;  %v5850_v37 = vld [vmem:[%s6166_s25 + $0x1f0] sm:$0xff]   ;;  %v5854_v15 = vld [vmem:[%s6166_s25 + $0x1f8] sm:$0xff]  }
0x11b7   : > { %v3268_v42 = vadd.f32 %v3267_v30, %v2781_v16  ;;  %v3311_v59 = vadd.f32 %v3310_v55, %v2789_v26  ;;  %5419 = vmatpush3.bf16.msra.mxu1 %v5843_v38  ;;  %5441 = vmatpush3.bf16.msra.mxu0 %v5844_v45  ;;  %v3326_v2 = vmax.f32 %v3264_v52, 0.0  ;;  %v3328_v4 = vmax.f32 %v3307_v3, 0.0  ;;  %v5855_v16 = vld [vmem:[%s6166_s25 + $0x138] sm:$0xff]   ;;  %v5860_v26 = vld [vmem:[%s6166_s25 + $0x280] sm:$0xff]   ;;  %v5877_v38 = vld [vmem:[%s6166_s25 + $0x268] sm:$0xff]  }
0x11b8   : > { %v3341_v63 = vmax.f32 %v3266_v54, 0.0  ;;  %v3343_v0 = vmax.f32 %v3309_v33, 0.0  ;;  %5420 = vmatprep.subr.bf16.mxu1 %v5845_v9  ;;  %5442 = vmatprep.subr.bf16.mxu0 %v5846_v51  ;;  %v5871_v40 = vld [vmem:[%s6166_s25 + $0x218] sm:$0xff]   ;;  %v5875_v43 = vld [vmem:[%s6166_s25 + $0x220] sm:$0xff]   ;;  %v5878_v45 = vld [vmem:[%s6166_s25 + $0x2e8] sm:$0xff]  }
0x11b9   : > { %v3342_v5 = vmax.f32 %v3268_v42, 0.0  ;;  %v3344_v6 = vmax.f32 %v3311_v59, 0.0  ;;  %v5872_v22 = vld [vmem:[%s6166_s25 + $0x298] sm:$0xff]   ;;  %v5876_v44 = vld [vmem:[%s6166_s25 + $0x2a0] sm:$0xff]   ;;  %v5879_v46 = vld [vmem:[%s6166_s25 + $0x228] sm:$0xff]  }
0x11ba   : > { %v6609_v7 = vpack.c.bf16 %v3341_v63, %v3325_v61  ;;  %v6611_v8 = vpack.c.bf16 %v3343_v0, %v3327_v62  ;;  %v5880_v49 = vld [vmem:[%s6166_s25 + $0x2a8] sm:$0xff]   ;;  %v5881_v50 = vld [vmem:[%s6166_s25 + $0x270] sm:$0xff]   ;;  %v5885_v52 = vld [vmem:[%s6166_s25 + $0x278] sm:$0xff]  }
0x11bb   : > { %v6613_v10 = vpack.c.bf16 %v3342_v5, %v3326_v2  ;;  %v6615_v11 = vpack.c.bf16 %v3344_v6, %v3328_v4  ;;  %5421 = vmatpush3.bf16.msra.mxu1 %v5847_v60  ;;  %5443 = vmatpush3.bf16.msra.mxu0 %v5848_v57  ;;  %v5882_v39 = vld [vmem:[%s6166_s25 + $0x2f0] sm:$0xff]   ;;  %v5886_v3 = vld [vmem:[%s6166_s25 + $0x2f8] sm:$0xff]   ;;  %v5889_v54 = vld [vmem:[%s6166_s25 + $0x340] sm:$0xff]  }
0x11bc   : > { %5422 = vmatprep.subr.bf16.mxu1 %v5849_v1  ;;  %5444 = vmatprep.subr.bf16.mxu0 %v5850_v37  ;;  %v5883_v9 = vld [vmem:[%s6166_s25 + $0x230] sm:$0xff]   ;;  %v5887_v53 = vld [vmem:[%s6166_s25 + $0x238] sm:$0xff]   ;;  %v5890_v33 = vld [vmem:[%s6166_s25 + $0x3c0] sm:$0xff]  }
0x11bd   : > { %v5884_v51 = vld [vmem:[%s6166_s25 + $0x2b0] sm:$0xff]   ;;  %v5888_v41 = vld [vmem:[%s6166_s25 + $0x2b8] sm:$0xff]   ;;  %v5891_v30 = vld [vmem:[%s6166_s25 + $0x300] sm:$0xff]  }
0x11be   : > { %v5892_v55 = vld [vmem:[%s6166_s25 + $0x380] sm:$0xff]   ;;  %v5893_v42 = vld [vmem:[%s6166_s25 + $0x348] sm:$0xff]   ;;  %v5897_v61 = vld [vmem:[%s6166_s25 + $0x350] sm:$0xff]  }
0x11bf   : > { %5423 = vmatpush3.bf16.msra.mxu1 %v5851_v12  ;;  %5445 = vmatpush3.bf16.msra.mxu0 %v5852_v13  ;;  %v5894_v59 = vld [vmem:[%s6166_s25 + $0x3c8] sm:$0xff]   ;;  %v5900_v62 = vld [vmem:[%s6166_s25 + $0x390] sm:$0xff]   ;;  %v5901_v63 = vld [vmem:[%s6166_s25 + $0x358] sm:$0xff]  }
0x11c0   : > { %5424 = vmatprep.subr.bf16.mxu1 %v5853_v14  ;;  %5446 = vmatprep.subr.bf16.mxu0 %v5854_v15  ;;  %v5895_v60 = vld [vmem:[%s6166_s25 + $0x308] sm:$0xff]   ;;  %v5902_v0 = vld [vmem:[%s6166_s25 + $0x3d8] sm:$0xff]   ;;  %v5905_v2 = vld [vmem:[%s6166_s25 + $0x360] sm:$0xff]  }
0x11c1   : > { %v5896_v57 = vld [vmem:[%s6166_s25 + $0x388] sm:$0xff]   ;;  %v5903_v1 = vld [vmem:[%s6166_s25 + $0x318] sm:$0xff]   ;;  %v5906_v4 = vld [vmem:[%s6166_s25 + $0x3e0] sm:$0xff]  }
0x11c2   : > { %v5904_v37 = vld [vmem:[%s6166_s25 + $0x398] sm:$0xff]   ;;  %v5907_v5 = vld [vmem:[%s6166_s25 + $0x320] sm:$0xff]   ;;  %v5911_v12 = vld [vmem:[%s6166_s25 + $0x328] sm:$0xff]  }
0x11c3   : > { %5425 = vmatpush3.bf16.msra.mxu1 %v5855_v16  ;;  %5447 = vmatpush3.bf16.msra.mxu0 %v5856_v19  ;;  %v5908_v6 = vld [vmem:[%s6166_s25 + $0x3a0] sm:$0xff]   ;;  %v5912_v13 = vld [vmem:[%s6166_s25 + $0x3a8] sm:$0xff]   ;;  %v5913_v14 = vld [vmem:[%s6166_s25 + $0x370] sm:$0xff]  }
0x11c4   : > { %5454 = vmatprep.subr.bf16.mxu1 %v5857_v20  ;;  %5476 = vmatprep.subr.bf16.mxu0 %v5858_v23  ;;  %v5914_v15 = vld [vmem:[%s6166_s25 + $0x3f0] sm:$0xff]   ;;  %v5917_v20 = vld [vmem:[%s6166_s25 + $0x378] sm:$0xff]  }
0x11c5   : > { %v5915_v16 = vld [vmem:[%s6166_s25 + $0x330] sm:$0xff]   ;;  %v5918_v23 = vld [vmem:[%s6166_s25 + $0x3f8] sm:$0xff]  }
0x11c6   : > { %4507 = vmatmul.mubr.bf16.vlgmr.msra.gmra.mrb[60].mxu1 %v6570_v56  ;;  %4548 = vmatmul.mubr.bf16.vlgmr.msra.gmra.mrb[64].mxu0 %v6572_v58  ;;  %v5866_v56 = vld [vmem:[%s6166_s25 + $0x2d0] sm:$0xff]  }
0x11c7   : > { %5455 = vmatpush3.bf16.msra.mxu1 %v5859_v24  ;;  %4588 = vmatprep.mubr.bf16.mxu1 %v6595_v32  ;;  %v5867_v58 = vld [vmem:[%s6166_s25 + $0x210] sm:$0xff]   ;;  %v5873_v32 = vld [vmem:[%s6166_s25 + $0x260] sm:$0xff]   ;;  %v5919_v24 = vld [vmem:[%s6166_s25 + $0x338] sm:$0xff]  }
0x11c8   : > { %5477 = vmatpush3.bf16.msra.mxu0 %v5860_v26  ;;  %4629 = vmatprep.mubr.bf16.mxu0 %v6597_v48  ;;  %v5874_v48 = vld [vmem:[%s6166_s25 + $0x2e0] sm:$0xff]   ;;  %v5916_v19 = vld [vmem:[%s6166_s25 + $0x3b0] sm:$0xff]   ;;  %v5920_v26 = vld [vmem:[%s6166_s25 + $0x3b8] sm:$0xff]  }
0x11c9   : > { %5456 = vmatprep.subr.bf16.mxu1 %v5861_v27  ;;  %5478 = vmatprep.subr.bf16.mxu0 %v5862_v29 }
0x11cb   : > { %5457 = vmatpush3.bf16.msra.mxu1 %v5863_v31  ;;  %v5148_v31 = vld [vmem:[%s860_s5] ss:$0 sm:$0xff] }
0x11cc   : > { %5479 = vmatpush3.bf16.msra.mxu0 %v5864_v34  ;;  %5458 = vmatprep.subr.bf16.mxu1 %v5865_v21 }
0x11cd   : > { %5480 = vmatprep.subr.bf16.mxu0 %v5866_v56 }
0x11cf   : > { %5459 = vmatpush3.bf16.msra.mxu1 %v5867_v58 }
0x11d0   : > { %5481 = vmatpush3.bf16.msra.mxu0 %v5868_v47  ;;  %5460 = vmatprep.subr.bf16.mxu1 %v5869_v28 }
0x11d1   : > { %5482 = vmatprep.subr.bf16.mxu0 %v5870_v36 }
0x11d3   : > { %5461 = vmatpush3.bf16.msra.mxu1 %v5871_v40 }
0x11d4   : > { %5483 = vmatpush3.bf16.msra.mxu0 %v5872_v22  ;;  %5462 = vmatprep.subr.bf16.mxu1 %v5873_v32 }
0x11d5   : > { %5484 = vmatprep.subr.bf16.mxu0 %v5874_v48 }
0x11d7   : > { %5463 = vmatpush3.bf16.msra.mxu1 %v5875_v43 }
0x11d8   : > { %5485 = vmatpush3.bf16.msra.mxu0 %v5876_v44  ;;  %5464 = vmatprep.subr.bf16.mxu1 %v5877_v38 }
0x11d9   : > { %5486 = vmatprep.subr.bf16.mxu0 %v5878_v45 }
0x11db   : > { %5465 = vmatpush3.bf16.msra.mxu1 %v5879_v46 }
0x11dc   : > { %5487 = vmatpush3.bf16.msra.mxu0 %v5880_v49  ;;  %5466 = vmatprep.subr.bf16.mxu1 %v5881_v50 }
0x11dd   : > { %5488 = vmatprep.subr.bf16.mxu0 %v5882_v39 }
0x11df   : > { %5467 = vmatpush3.bf16.msra.mxu1 %v5883_v9 }
0x11e0   : > { %5489 = vmatpush3.bf16.msra.mxu0 %v5884_v51  ;;  %5468 = vmatprep.subr.bf16.mxu1 %v5885_v52 }
0x11e1   : > { %5490 = vmatprep.subr.bf16.mxu0 %v5886_v3 }
0x11e3   : > { %5469 = vmatpush3.bf16.msra.mxu1 %v5887_v53 }
0x11e4   : > { %5491 = vmatpush3.bf16.msra.mxu0 %v5888_v41  ;;  %5498 = vmatprep.subr.bf16.mxu1 %v5889_v54 }
0x11e5   : > { %5520 = vmatprep.subr.bf16.mxu0 %v5890_v33 }
0x11e6   : > { %4589 = vmatmul.mubr.bf16.vlgmr.msra.gmra.mrb[64].mxu1 %v6591_v25  ;;  %v5898_v25 = vld [vmem:[%s6166_s25 + $0x3d0] sm:$0xff]  }
0x11e7   : > { %4630 = vmatmul.mubr.bf16.vlgmr.msra.gmra.mrb[68].mxu0 %v6593_v35  ;;  %5499 = vmatpush3.bf16.msra.mxu1 %v5891_v30  ;;  %v5899_v35 = vld [vmem:[%s6166_s25 + $0x310] sm:$0xff]  }
0x11e8   : > { %4670 = vmatprep.mubr.bf16.mxu1 %v6613_v10  ;;  %5521 = vmatpush3.bf16.msra.mxu0 %v5892_v55  ;;  %v5909_v10 = vld [vmem:[%s6166_s25 + $0x368] sm:$0xff]  }
0x11e9   : > { %4711 = vmatprep.mubr.bf16.mxu0 %v6615_v11  ;;  %5500 = vmatprep.subr.bf16.mxu1 %v5893_v42  ;;  %v5910_v11 = vld [vmem:[%s6166_s25 + $0x3e8] sm:$0xff]  }
0x11ea   : > { %5522 = vmatprep.subr.bf16.mxu0 %v5894_v59 }
0x11eb   : > { %5501 = vmatpush3.bf16.msra.mxu1 %v5895_v60 }
0x11ec   : > { %5523 = vmatpush3.bf16.msra.mxu0 %v5896_v57  ;;  %5502 = vmatprep.subr.bf16.mxu1 %v5897_v61 }
0x11ed   : > { %5524 = vmatprep.subr.bf16.mxu0 %v5898_v25 }
0x11ef   : > { %5503 = vmatpush3.bf16.msra.mxu1 %v5899_v35 }
0x11f0   : > { %5525 = vmatpush3.bf16.msra.mxu0 %v5900_v62  ;;  %5504 = vmatprep.subr.bf16.mxu1 %v5901_v63 }
0x11f1   : > { %5526 = vmatprep.subr.bf16.mxu0 %v5902_v0 }
0x11f3   : > { %5505 = vmatpush3.bf16.msra.mxu1 %v5903_v1 }
0x11f4   : > { %5527 = vmatpush3.bf16.msra.mxu0 %v5904_v37  ;;  %5506 = vmatprep.subr.bf16.mxu1 %v5905_v2 }
0x11f5   : > { %5528 = vmatprep.subr.bf16.mxu0 %v5906_v4 }
0x11f7   : > { %5507 = vmatpush3.bf16.msra.mxu1 %v5907_v5 }
0x11f8   : > { %5529 = vmatpush3.bf16.msra.mxu0 %v5908_v6  ;;  %5508 = vmatprep.subr.bf16.mxu1 %v5909_v10 }
0x11f9   : > { %5530 = vmatprep.subr.bf16.mxu0 %v5910_v11 }
0x11fb   : > { %5509 = vmatpush3.bf16.msra.mxu1 %v5911_v12 }
0x11fc   : > { %5531 = vmatpush3.bf16.msra.mxu0 %v5912_v13  ;;  %5510 = vmatprep.subr.bf16.mxu1 %v5913_v14 }
0x11fd   : > { %5532 = vmatprep.subr.bf16.mxu0 %v5914_v15 }
0x11ff   : > { %5511 = vmatpush3.bf16.msra.mxu1 %v5915_v16 }
0x1200   : > { %5533 = vmatpush3.bf16.msra.mxu0 %v5916_v19  ;;  %5512 = vmatprep.subr.bf16.mxu1 %v5917_v20 }
0x1201   : > { %5534 = vmatprep.subr.bf16.mxu0 %v5918_v23 }
0x1203   : > { %5513 = vmatpush3.bf16.msra.mxu1 %v5919_v24 }
0x1204   : > { %5535 = vmatpush3.bf16.msra.mxu0 %v5920_v26 }
0x1206   : > { %4671 = vmatmul.mubr.bf16.vlgmr.msra.gmra.mrb[68].mxu1 %v6609_v7 }
0x1207   : > { %4712 = vmatmul.mubr.bf16.vlgmr.msra.gmra.mrb[72].mxu0 %v6611_v8 }
0x1279   : > { %v5382_v27 = vpop.f32.mrb[56].mxu1  ;;  %v5404_v29 = vpop.f32.mrb[60].mxu0 }
0x127a   : > { %v5383_v34 = vpop.f32.mrb[57].mxu1  ;;  %v5405_v21 = vpop.f32.mrb[61].mxu0 }
0x127b   : > { %v5384_v56 = vadd.f32 %v5383_v34, %v5382_v27  ;;  %v5406_v58 = vadd.f32 %v5405_v21, %v5404_v29  ;;  %v5385_v47 = vpop.f32.mrb[58].mxu1  ;;  %v5407_v28 = vpop.f32.mrb[62].mxu0 }
0x127c   : > { %v5386_v36 = vpop.f32.mrb[59].mxu1  ;;  %v5408_v40 = vpop.f32.mrb[63].mxu0 }
0x127d   : > { %v4427_v22 = vadd.f32 %v5384_v56, %v5148_v31  ;;  %v5387_v32 = vadd.f32 %v5386_v36, %v5385_v47  ;;  %v5409_v7 = vadd.f32 %v5408_v40, %v5407_v28 }
0x127f   : > { %v4468_v48 = vadd.f32 %v5406_v58, %v4427_v22  ;;  %v4430_v8 = vadd.f32 %v5387_v32, %v5148_v31 }
0x1281   : > { %v4471_v43 = vadd.f32 %v5409_v7, %v4430_v8 }
0x1299   : > { %v5426_v44 = vpop.f32.mrb[60].mxu1  ;;  %v5448_v38 = vpop.f32.mrb[64].mxu0 }
0x129a   : > { %v5427_v45 = vpop.f32.mrb[61].mxu1  ;;  %v5449_v46 = vpop.f32.mrb[65].mxu0 }
0x129b   : > { %v5428_v49 = vadd.f32 %v5427_v45, %v5426_v44  ;;  %v5450_v50 = vadd.f32 %v5449_v46, %v5448_v38  ;;  %v5429_v39 = vpop.f32.mrb[62].mxu1  ;;  %v5451_v9 = vpop.f32.mrb[66].mxu0 }
0x129c   : > { %v5430_v51 = vpop.f32.mrb[63].mxu1  ;;  %v5452_v52 = vpop.f32.mrb[67].mxu0 }
0x129d   : > { %v4509_v3 = vadd.f32 %v5428_v49, %v4468_v48  ;;  %v5431_v53 = vadd.f32 %v5430_v51, %v5429_v39  ;;  %v5453_v41 = vadd.f32 %v5452_v52, %v5451_v9  ;;  %v5278_v51 = vld [vmem:[%s866_s21] ss:$0 sm:$0xff]  ;;  %s6809_s21 = sld [smem:[#allocation18_spill]] (!%p5279_p5) }
0x129f   : > { %v4550_v54 = vadd.f32 %v5450_v50, %v4509_v3  ;;  %v4512_v33 = vadd.f32 %v5431_v53, %v4471_v43  ;;  %v5277_v50 = vld [vmem:[%s863_s6] ss:$0 sm:$0xff] }
0x12a1   : > { %v4553_v30 = vadd.f32 %v5453_v41, %v4512_v33 }
0x12b9   : > { %v5470_v55 = vpop.f32.mrb[64].mxu1 }
0x12ba   : > { %v5492_v42 = vpop.f32.mrb[68].mxu0  ;;  %v5471_v59 = vpop.f32.mrb[65].mxu1 }
0x12bb   : > { %v5472_v60 = vadd.f32 %v5471_v59, %v5470_v55  ;;  %v5493_v57 = vpop.f32.mrb[69].mxu0  ;;  %v5473_v61 = vpop.f32.mrb[66].mxu1 }
0x12bc   : > { %v5494_v25 = vadd.f32 %v5493_v57, %v5492_v42  ;;  %v5495_v35 = vpop.f32.mrb[70].mxu0  ;;  %v5474_v62 = vpop.f32.mrb[67].mxu1 }
0x12bd   : > { %v4591_v63 = vadd.f32 %v5472_v60, %v4550_v54  ;;  %v5475_v0 = vadd.f32 %v5474_v62, %v5473_v61  ;;  %v5496_v1 = vpop.f32.mrb[71].mxu0 }
0x12be   : > { %v5497_v37 = vadd.f32 %v5496_v1, %v5495_v35 }
0x12bf   : > { %v4632_v2 = vadd.f32 %v5494_v25, %v4591_v63  ;;  %v4594_v4 = vadd.f32 %v5475_v0, %v4553_v30 }
0x12c1   : > { %v4635_v5 = vadd.f32 %v5497_v37, %v4594_v4 }
0x12d9   : > { %v5514_v6 = vpop.f32.mrb[68].mxu1 }
0x12da   : > { %v5536_v10 = vpop.f32.mrb[72].mxu0  ;;  %v5515_v11 = vpop.f32.mrb[69].mxu1 }
0x12db   : > { %v5516_v12 = vadd.f32 %v5515_v11, %v5514_v6  ;;  %v5537_v13 = vpop.f32.mrb[73].mxu0  ;;  %v5517_v14 = vpop.f32.mrb[70].mxu1 }
0x12dc   : > { %v5538_v15 = vadd.f32 %v5537_v13, %v5536_v10  ;;  %v5539_v16 = vpop.f32.mrb[74].mxu0  ;;  %v5518_v19 = vpop.f32.mrb[71].mxu1  ;;  %v5280_v10 = vld [vmem:[%s6809_s21] ss:$0 sm:$0xff] (!%p5279_p5) }
0x12dd   : > { %v4673_v20 = vadd.f32 %v5516_v12, %v4632_v2  ;;  %v5519_v23 = vadd.f32 %v5518_v19, %v5517_v14  ;;  %v5540_v24 = vpop.f32.mrb[75].mxu0  ;;  %v5281_v12 = vld [vmem:[%s6810_s20] ss:$0 sm:$0xff] (!%p5279_p5) }
0x12de   : > { %v5541_v26 = vadd.f32 %v5540_v24, %v5539_v16 }
0x12df   : > { %v4714_v27 = vadd.f32 %v5538_v15, %v4673_v20  ;;  %v4676_v29 = vadd.f32 %v5519_v23, %v4635_v5 }
0x12e1   : > { %v4717_v31 = vadd.f32 %v5541_v26, %v4676_v29  ;;  %v4720_v34 = vadd.f32 %v4714_v27, %v6447_v17 }
0x12e3   : > { %v4724_v21 = vsel %vm965_vm2, %v4720_v34, 0.0  ;;  %v4721_v56 = vadd.f32 %v4717_v31, %v6449_v18 }
0x12e4   : > { %4725 = vadd.xlane.f32.xlu0 %v4724_v21 }
0x12e5   : > { %v4727_v58 = vsel %vm965_vm2, %v4721_v56, 0.0 }
0x12e6   : > { %4728 = vadd.xlane.f32.xlu1 %v4727_v58 }
0x1371   : > { %v4726_v47 = vpop.xlane.xlu0 %4725 }
0x1372   : > { %v4730_v28 = vmul.f32 0.03125, %v4726_v47 }
0x1373   : > { %v4729_v36 = vpop.xlane.xlu1 %4728 }
0x1374   : > { %v4732_v40 = vsub.f32 %v4720_v34, %v4730_v28  ;;  %v4731_v22 = vmul.f32 0.03125, %v4729_v36 }
0x1376   : > { %v4733_v32 = vsub.f32 %v4721_v56, %v4731_v22  ;;  %v4734_v7 = vmul.f32 %v4732_v40, %v4732_v40 }
0x1378   : > { %v4736_v48 = vsel %vm965_vm2, %v4734_v7, 0.0  ;;  %v4735_v8 = vmul.f32 %v4733_v32, %v4733_v32 }
0x1379   : > { %4737 = vadd.xlane.f32.xlu0 %v4736_v48 }
0x137a   : > { %v4739_v17 = vsel %vm965_vm2, %v4735_v8, 0.0 }
0x137b   : > { %4740 = vadd.xlane.f32.xlu1 %v4739_v17 }
0x1406   : > { %v4738_v18 = vpop.xlane.xlu0 %4737 }
0x1407   : > { %v4742_v43 = vmul.f32 0.03125, %v4738_v18 }
0x1408   : > { %v4741_v44 = vpop.xlane.xlu1 %4740 }
0x1409   : > { %v4744_v38 = vadd.f32 1e-05, %v4742_v43  ;;  %v4743_v45 = vmul.f32 0.03125, %v4741_v44 }
0x140b   : > { %5957 = vrsqrt.f32 %v4744_v38  ;;  %v4745_v46 = vadd.f32 1e-05, %v4743_v45 }
0x140d   : > { %5959 = vrsqrt.f32 %v4745_v46 }
0x1415   : > { %v5958_v49 = vpop.eup %5957 }
0x1416   : > { %v4748_v39 = vmul.f32 %v5958_v49, %v4732_v40 }
0x1417   : > { %v5960_v9 = vpop.eup %5959 }
0x1418   : > { %v4756_v52 = vmul.f32 %v5277_v50, %v4748_v39  ;;  %v4749_v3 = vmul.f32 %v5960_v9, %v4733_v32  ;;  %4771 = sbr.rel (%p5279_p5) target bundleno = 5466 (0x155a), region = 108 }
0x141a   : > { %v4764_v53 = vadd.f32 %v5278_v51, %v4756_v52  ;;  %v4757_v41 = vmul.f32 %v5277_v50, %v4749_v3 }
0x141c   : > { %4766 = vst.msk [vmem:[#allocation2] sm:$0xff] %vm965_vm2, %v4764_v53  ;;  %v4765_v54 = vadd.f32 %v5278_v51, %v4757_v41  ;;  %v4774_v33 = vsel (!%p5279_p5), %vm965_vm2, %v4764_v53, 0.0 }
0x141d   : > { %4775 = vadd.xlane.f32.xlu0 (!%p5279_p5), %v4774_v33 }
0x141e   : > { %4767 = vst.msk [vmem:[#allocation2 + $0x8] sm:$0xff] %vm965_vm2, %v4765_v54  ;;  %v4777_v30 = vsel (!%p5279_p5), %vm965_vm2, %v4765_v54, 0.0 }
0x1421   : > { %4778 = vadd.xlane.f32.xlu0 %v4777_v30 }
0x14aa   : > { %v4776_v55 = vpop.xlane.xlu0 %4775 }
0x14ab   : > { %v4780_v42 = vmul.f32 0.03125, %v4776_v55 }
0x14ad   : > { %v4782_v59 = vsub.f32 %v4764_v53, %v4780_v42 }
0x14ae   : > { %v4779_v60 = vpop.xlane.xlu0 %4778 }
0x14af   : > { %v4781_v57 = vmul.f32 0.03125, %v4779_v60  ;;  %v4784_v61 = vmul.f32 %v4782_v59, %v4782_v59 }
0x14b1   : > { %v4783_v25 = vsub.f32 %v4765_v54, %v4781_v57  ;;  %v4786_v35 = vsel %vm965_vm2, %v4784_v61, 0.0 }
0x14b2   : > { %4787 = vadd.xlane.f32.xlu1 %v4786_v35 }
0x14b3   : > { %v4785_v62 = vmul.f32 %v4783_v25, %v4783_v25 }
0x14b5   : > { %v4789_v63 = vsel %vm965_vm2, %v4785_v62, 0.0 }
0x14b6   : > { %4790 = vadd.xlane.f32.xlu1 %v4789_v63 }
0x153f   : > { %v4788_v0 = vpop.xlane.xlu1 %4787 }
0x1540   : > { %v4792_v1 = vmul.f32 0.03125, %v4788_v0 }
0x1542   : > { %v4794_v37 = vadd.f32 1e-05, %v4792_v1 }
0x1543   : > { %v4791_v2 = vpop.xlane.xlu1 %4790 }
0x1544   : > { %5963 = vrsqrt.f32 %v4794_v37  ;;  %v4793_v4 = vmul.f32 0.03125, %v4791_v2 }
0x1546   : > { %v4795_v5 = vadd.f32 1e-05, %v4793_v4 }
0x1548   : > { %5965 = vrsqrt.f32 %v4795_v5 }
0x154e   : > { %v5964_v6 = vpop.eup %5963 }
0x154f   : > { %v4798_v11 = vmul.f32 %v5964_v6, %v4782_v59 }
0x1551   : > { %v4806_v13 = vmul.f32 %v5280_v10, %v4798_v11 }
0x1552   : > { %v5966_v14 = vpop.eup %5965 }
0x1553   : > { %v4814_v15 = vadd.f32 %v5281_v12, %v4806_v13  ;;  %v4799_v16 = vmul.f32 %v5966_v14, %v4783_v25 }
0x1555   : > { %4816 = vst.msk [vmem:[%s6811_s19] sm:$0xff] %vm965_vm2, %v4814_v15  ;;  %v4807_v19 = vmul.f32 %v5280_v10, %v4799_v16 }
0x1557   : > { %v4815_v20 = vadd.f32 %v5281_v12, %v4807_v19 }
0x1559   : > { %4817 = vst.msk [vmem:[%s6811_s19 + $0x8] sm:$0xff] %vm965_vm2, %v4815_v20 }
0x155a PF: > { %s6812_s24 = sld [smem:[#allocation3_spill]] }
0x1560   : > { %s30_s1 = sadd.s32 1, %s6812_s24  }
0x1561   : > { %p27_p6 = scmp.ge.s32.totalorder %s30_s1, 4  }
0x1563   :  { %29 = sbr.rel (!%p27_p6) target bundleno = 14 (0xe), region = 179 }

// kernel: transformer_model_forward.5
= control target key start
LH: loop header
LB: loop body
LE: loop exit
PB: predicated region body
PF: predicated region fallthrough
CT: control target
= control target key end

     0   :  { %s8996_s6 = smov 1   ;;  %s8997_s10 = smov 2   ;;  %s10074_s0 = inlined_call_operand.smem [shape: u32[34], index: -1, kind: input, shape index: {}] }
   0x1   :  { %s9040_s5 = sld [smem:[%s10074_s0]]   ;;  %s8998_s14 = smov 3  }
   0x2   :  { %s9045_s9 = sld [smem:[%s10074_s0 + %s8996_s6]]   ;;  %s8999_s18 = smov 4  }
   0x3   :  { %s9050_s13 = sld [smem:[%s10074_s0 + %s8997_s10]]   ;;  %s9000_s22 = smov 5  }
   0x4   :  { %s9055_s17 = sld [smem:[%s10074_s0 + %s8998_s14]]   ;;  %s9001_s26 = smov 6  }
   0x5   :  { %s9060_s21 = sld [smem:[%s10074_s0 + %s8999_s18]]   ;;  %s9002_s30 = smov 7  }
   0x6   :  { %s9065_s25 = sld [smem:[%s10074_s0 + %s9000_s22]]   ;;  %s9003_s4 = smov 8  }
   0x7   :  { %10091 = sst [smem:[#allocation4_spill]] %s9040_s5  ;;  %s9004_s10 = smov 9  }
   0x8   :  { %10092 = sst [smem:[#allocation5_spill]] %s9045_s9  ;;  %s9005_s15 = smov 10  }
   0x9   :  { %10093 = sst [smem:[#allocation6_spill]] %s9050_s13  ;;  %s9006_s20 = smov 11  }
   0xa   :  { %10094 = sst [smem:[#allocation7_spill]] %s9055_s17  ;;  %s9008_s1 = smov 13  }
   0xb   :  { %10095 = sst [smem:[#allocation8_spill]] %s9060_s21  ;;  %s9009_s7 = smov 14  }
   0xc   :  { %10096 = sst [smem:[#allocation9_spill]] %s9065_s25  ;;  %s9011_s22 = smov 16  }
   0xd   :  { %s9070_s29 = sld [smem:[%s10074_s0 + %s9001_s26]]   ;;  %s9007_s26 = smov 12  }
   0xe   :  { %s9075_s3 = sld [smem:[%s10074_s0 + %s9002_s30]]   ;;  %s9012_s28 = smov 17  }
   0xf   :  { %s9080_s8 = sld [smem:[%s10074_s0 + %s9003_s4]]  }
  0x10   :  { %s9085_s14 = sld [smem:[%s10074_s0 + %s9004_s10]]  }
  0x11   :  { %s9090_s19 = sld [smem:[%s10074_s0 + %s9005_s15]]   ;;  %s9010_s15 = smov 15  }
  0x12   :  { %s9095_s24 = sld [smem:[%s10074_s0 + %s9006_s20]]  }
  0x13   :  { %10097 = sst [smem:[#allocation10_spill]] %s9070_s29 }
  0x14   :  { %10098 = sst [smem:[#allocation11_spill]] %s9075_s3 }
  0x15   :  { %10099 = sst [smem:[#allocation12_spill]] %s9080_s8 }
  0x16   :  { %10100 = sst [smem:[#allocation13_spill]] %s9085_s14 }
  0x17   :  { %10101 = sst [smem:[#allocation14_spill]] %s9090_s19 }
  0x18   :  { %10102 = sst [smem:[#allocation15_spill]] %s9095_s24 }
  0x19   :  { %s9100_s30 = sld [smem:[%s10074_s0 + %s9007_s26]]  }
  0x1a   :  { %s9105_s6 = sld [smem:[%s10074_s0 + %s9008_s1]]   ;;  %s9028_s1 = smov 33  }
  0x1b   :  { %s9110_s12 = sld [smem:[%s10074_s0 + %s9009_s7]]   ;;  %s9013_s7 = smov 18  }
  0x1c   :  { %s9115_s20 = sld [smem:[%s10074_s0 + %s9010_s15]]   ;;  %s9014_s15 = smov 19  }
  0x1d   :  { %s9120_s27 = sld [smem:[%s10074_s0 + %s9011_s22]]   ;;  %s9015_s22 = smov 20  }
  0x1e   :  { %s9125_s4 = sld [smem:[%s10074_s0 + %s9012_s28]]   ;;  %s9016_s28 = smov 21  }
  0x1f   :  { %10103 = sst [smem:[#allocation16_spill]] %s9100_s30 }
  0x20   :  { %10104 = sst [smem:[#allocation17_spill]] %s9105_s6 }
  0x21   :  { %10105 = sst [smem:[#allocation18_spill]] %s9110_s12 }
  0x22   :  { %10106 = sst [smem:[#allocation19_spill]] %s9115_s20 }
  0x23   :  { %10107 = sst [smem:[#allocation20_spill]] %s9120_s27 }
  0x24   :  { %10108 = sst [smem:[#allocation21_spill]] %s9125_s4 }
  0x25   :  { %s9130_s9 = sld [smem:[%s10074_s0 + %s9013_s7]]   ;;  %s9017_s7 = smov 22  }
  0x26   :  { %s9135_s13 = sld [smem:[%s10074_s0 + %s9014_s15]]   ;;  %s9018_s15 = smov 23  }
  0x27   :  { %s9140_s5 = sld [smem:[%s10074_s0 + %s9015_s22]]   ;;  %s9019_s22 = smov 24  }
  0x28   :  { %s9145_s4 = sld [smem:[%s10074_s0 + %s9016_s28]]   ;;  %s9020_s28 = smov 25  }
  0x2b   :  { %10109 = sst [smem:[#allocation22_spill]] %s9130_s9 }
  0x2c   :  { %10110 = sst [smem:[#allocation23_spill]] %s9135_s13 }
  0x2d   :  { %10111 = sst [smem:[#allocation24_spill]] %s9140_s5 }
  0x2e   :  { %10112 = sst [smem:[#allocation25_spill]] %s9145_s4 }
  0x2f   :  { %s9150_s9 = sld [smem:[%s10074_s0 + %s9017_s7]]   ;;  %s9021_s7 = smov 26  }
  0x30   :  { %s9155_s13 = sld [smem:[%s10074_s0 + %s9018_s15]]   ;;  %s9022_s15 = smov 27  }
  0x31   :  { %s9160_s5 = sld [smem:[%s10074_s0 + %s9019_s22]]   ;;  %s9023_s22 = smov 28  }
  0x32   :  { %s9165_s4 = sld [smem:[%s10074_s0 + %s9020_s28]]   ;;  %s9024_s28 = smov 29  }
  0x35   :  { %10113 = sst [smem:[#allocation26_spill]] %s9150_s9 }
  0x36   :  { %10114 = sst [smem:[#allocation27_spill]] %s9155_s13 }
  0x37   :  { %10115 = sst [smem:[#allocation28_spill]] %s9160_s5 }
  0x38   :  { %10116 = sst [smem:[#allocation29_spill]] %s9165_s4 }
  0x39   :  { %s9170_s9 = sld [smem:[%s10074_s0 + %s9021_s7]]   ;;  %s9025_s7 = smov 30  }
  0x3a   :  { %s9175_s13 = sld [smem:[%s10074_s0 + %s9022_s15]]   ;;  %s9026_s15 = smov 31  }
  0x3b   :  { %s9180_s5 = sld [smem:[%s10074_s0 + %s9023_s22]]   ;;  %s9027_s22 = smov 32  }
  0x3c   :  { %s9185_s4 = sld [smem:[%s10074_s0 + %s9024_s28]]  }
  0x3f   :  { %10117 = sst [smem:[#allocation30_spill]] %s9170_s9 }
  0x40   :  { %10118 = sst [smem:[#allocation31_spill]] %s9175_s13 }
  0x41   :  { %10119 = sst [smem:[#allocation32_spill]] %s9180_s5 }
  0x42   :  { %10120 = sst [smem:[#allocation33_spill]] %s9185_s4 }
  0x43   :  { %s9190_s9 = sld [smem:[%s10074_s0 + %s9025_s7]]   ;;  %s9205_s7 = smov 0  }
  0x44   :  { %s9195_s13 = sld [smem:[%s10074_s0 + %s9026_s15]]  }
  0x45   :  { %s7544_s5 = sld [smem:[%s10074_s0 + %s9027_s22]]  }
  0x46   :  { %s9203_s4 = sld [smem:[%s10074_s0 + %s9028_s1]]  }
  0x49   :  { %10121 = sst [smem:[#allocation34_spill]] %s9190_s9 }
  0x4a   :  { %10122 = sst [smem:[#allocation35_spill]] %s9195_s13 }
  0x4b   :  { %v72_v0 = vstv %s7544_s5 }
  0x4c   :  { %10123 = sst [smem:[#allocation36_spill]] %s9203_s4  ;;  %73 = vst [vmem:[#allocation3] sm:$0x1] %v72_v0 }
  0x4d LB: > { %10124 = sst [smem:[#allocation37_spill]] %s8994_s7  ;;  %s9211_s10 = sadd.s32 4294967295, %s8994_s7   ;;  %s8994_s7 = sphi %s9205_s7, %s79_s7  }
  0x4e   : > { %10125 = sst [smem:[#allocation38_spill]] %s9211_s10  ;;  %p7549_p0 = scmp.ge.s32.totalorder %s8994_s7, 1 }
  0x4f   : > { %p1143_p1 = scmp.lt.s32.totalorder %s8994_s7, 3 }
  0x51   : > { %p1144_p2 = pnand %p7549_p0, %p1143_p1 }
  0x53   : > { %1147 = sbr.rel (%p1144_p2) target bundleno = 9913 (0x26b9), region = 152 }
  0x5a   : > { %s10126_s17 = sld [smem:[#allocation7_spill]]  ;;  %s10127_s21 = sld [smem:[#allocation8_spill]] }
  0x5b   : > { %s10128_s25 = sld [smem:[#allocation9_spill]]  ;;  %s10129_s29 = sld [smem:[#allocation10_spill]] }
  0x5c   : > { %s10130_s3 = sld [smem:[#allocation11_spill]]  ;;  %s10131_s8 = sld [smem:[#allocation12_spill]] }
  0x5d   : > { %s10133_s14 = sld [smem:[#allocation13_spill]]  ;;  %s10136_s6 = sld [smem:[#allocation17_spill]] }
  0x5e   : > { %p1322_p3 = scmp.lt.s32.totalorder %s9211_s10, 1  ;;  %s10137_s12 = sld [smem:[#allocation18_spill]] }
  0x5f   : > { %s10138_s20 = sld [smem:[#allocation19_spill]]  ;;  %s10139_s27 = sld [smem:[#allocation20_spill]] }
  0x60   : > { %s9217_s0 = scalar_select %p1322_p3, %s9211_s10, 1 }
  0x61   : > { %s10140_s15 = sld [smem:[#allocation21_spill]]  ;;  %s10142_s18 = sld [smem:[#allocation22_spill]] }
  0x62   : > { %s7914_s5 = sshll.u32 %s9217_s0, 6  ;;  %s7552_s11 = sshll.u32 %s9217_s0, 2 }
  0x63   : > { %s9222_s16 = scalar_lea.vmem %s10126_s17, %s7914_s5  ;;  %s9225_s22 = scalar_lea.vmem %s10127_s21, %s7552_s11 }
  0x64   : > { %10141 = sst [smem:[#allocation39_spill]] %s9222_s16  ;;  %s9228_s26 = scalar_lea.vmem %s10128_s25, %s7914_s5 }
  0x65   : > { %10143 = sst [smem:[#allocation40_spill]] %s9225_s22  ;;  %s10144_s23 = sld [smem:[#allocation23_spill]] }
  0x66   : > { %10145 = sst [smem:[#allocation41_spill]] %s9228_s26  ;;  %s10146_s1 = sld [smem:[#allocation24_spill]] }
  0x67   : > { %s9231_s28 = scalar_lea.vmem %s10129_s29, %s7552_s11  ;;  %s10148_s2 = sld [smem:[#allocation25_spill]] }
  0x68   : > { %10147 = sst [smem:[#allocation42_spill]] %s9231_s28  ;;  %s9234_s7 = scalar_lea.vmem %s10130_s3, %s7914_s5 }
  0x69   : > { %10149 = sst [smem:[#allocation43_spill]] %s9234_s7  ;;  %s10150_s4 = sld [smem:[#allocation26_spill]] }
  0x6a   : > { %s9237_s13 = scalar_lea.vmem %s10131_s8, %s7552_s11  ;;  %s7917_s17 = sshll.u32 %s9217_s0, 4 }
  0x6b   : > { %10151 = sst [smem:[#allocation44_spill]] %s9237_s13  ;;  %s10152_s9 = sld [smem:[#allocation27_spill]] }
  0x6c   : > { %s10153_s22 = sld [smem:[#allocation28_spill]]  ;;  %s9243_s16 = scalar_lea.vmem %s10133_s14, %s7917_s17 }
  0x6d   : > { %10154 = sst [smem:[#allocation45_spill]] %s9243_s16  ;;  %s10155_s29 = sld [smem:[#allocation30_spill]] }
  0x6e   : > { %s10156_s26 = sld [smem:[#allocation29_spill]]  ;;  %s9250_s10 = scalar_lea.vmem %s10136_s6, %s7914_s5 }
  0x6f   : > { %10157 = sst [smem:[#allocation46_spill]] %s9250_s10  ;;  %s10158_s3 = sld [smem:[#allocation31_spill]] }
  0x70   : > { %s9253_s7 = scalar_lea.vmem %s10137_s12, %s7552_s11  ;;  %s10160_s8 = sld [smem:[#allocation32_spill]] }
  0x71   : > { %10159 = sst [smem:[#allocation47_spill]] %s9253_s7  ;;  %s9256_s13 = scalar_lea.vmem %s10138_s20, %s7914_s5 }
  0x72   : > { %s9259_s21 = scalar_lea.vmem %s10139_s27, %s7552_s11  ;;  %s9262_s14 = scalar_lea.vmem %s10140_s15, %s7914_s5 }
  0x73   : > { %10161 = sst [smem:[#allocation48_spill]] %s9259_s21  ;;  %s9265_s19 = scalar_lea.vmem %s10142_s18, %s7552_s11 }
  0x74   : > { %s9268_s25 = scalar_lea.vmem %s10144_s23, %s7917_s17  ;;  %s1397_s28 = scalar_lea.vmem %s10146_s1, %s9217_s0 }
  0x75   : > { %s1400_s30 = scalar_lea.vmem %s10148_s2, %s9217_s0  ;;  %s1403_s6 = scalar_lea.vmem %s10150_s4, %s9217_s0 }
  0x76   : > { %s7922_s24 = sshll.u32 %s9217_s0, 8  ;;  %s9281_s12 = scalar_lea.vmem %s10153_s22, %s7917_s17 }
  0x77   : > { %s9278_s10 = scalar_lea.vmem %s10152_s9, %s7922_s24  ;;  %s7923_s7 = sshll.u32 %s9217_s0, 10 }
  0x78   : > { %s1420_s16 = scalar_lea.vmem %s10155_s29, %s9217_s0  ;;  %s9287_s20 = scalar_lea.vmem %s10156_s26, %s7923_s7 }
  0x79   : > { %s1423_s27 = scalar_lea.vmem %s10158_s3, %s9217_s0  ;;  %s1426_s21 = scalar_lea.vmem %s10160_s8, %s9217_s0 }
  0x7a   : > { %s10162_s5 = sld [smem:[#allocation38_spill]] }
  0x80   : > { %p7577_p4 = scmp.ne.s32.totalorder %s10162_s5, 0 }
  0x81   : > { %s10163_s11 = sld [smem:[#allocation4_spill]] (!%p7577_p4)  ;;  %vm1434_vm0 = vcmask (!%p7577_p4), 261120  }
  0x82   : > { %1431 = sbr.rel (%p7577_p4) target bundleno = 137 (0x89), region = 156 }
  0x87   : > { %v1432_v1 = vld [vmem:[%s10163_s11] sm:$0xff] (!%p7577_p4)  ;;  %v1433_v2 = vld [vmem:[%s10163_s11 + $0x8] sm:$0xff] (!%p7577_p4) }
  0x88   : > { %1435 = vst.msk [vmem:[#allocation2] sm:$0xff] (!%p7577_p4), %vm1434_vm0, %v1432_v1  ;;  %1436 = vst.msk [vmem:[#allocation2 + $0x8] sm:$0xff] (!%p7577_p4), %vm1434_vm0, %v1433_v2 }
  0x89 PF: > { %s10164_s9 = sld [smem:[#allocation41_spill]]  ;;  %s10165_s17 = sld [smem:[#allocation39_spill]]  ;;  %v9029_v4 = vmov 0.0   ;;  %vm9030_vm1 = vmmov 0   ;;  %vm1527_vm2 = vcmask 261120   ;;  %vm1690_vm3 = vcmask 64512  }
  0x8a   : > { %8260 = vmatprep.subr.bf16.mxu1 %v9029_v4  ;;  %8252 = vmatprep.subr.bf16.mxu0 %v9029_v4  ;;  %s10166_s29 = sld [smem:[#allocation42_spill]]  ;;  %s10167_s3 = sld [smem:[#allocation40_spill]]  ;;  %vm9321_vm4 = vmpackc.low %vm1690_vm3, %vm1690_vm3  ;;  %vm1782_vm5 = vcmask 130048   ;;  %vm2262_vm6 = vcmask 1043456  }
  0x8b   : > { %8264 = vmatprep.mubr.msk.bf16.mxu1 %vm9030_vm1, %v9029_v4  ;;  %8256 = vmatprep.mubr.msk.bf16.mxu0 %vm9030_vm1, %v9029_v4  ;;  %s10168_s8 = sld [smem:[#allocation43_spill]]  ;;  %s10171_s24 = sld [smem:[#allocation6_spill]] }
  0x8c   : > { %s10172_s4 = sld [smem:[#allocation44_spill]]  ;;  %s10173_s7 = sld [smem:[#allocation45_spill]] }
  0x8d   : > { %s10174_s15 = sld [smem:[#allocation14_spill]]  ;;  %s10176_s22 = sld [smem:[#allocation5_spill]] }
  0x8e   : > { %s10177_s23 = sld [smem:[#allocation46_spill]]  ;;  %s10178_s26 = sld [smem:[#allocation15_spill]] }
  0x8f   : > { %v8728_v3 = vld [vmem:[%s10164_s9] sm:$0xff]   ;;  %v8729_v5 = vld [vmem:[%s10164_s9 + $0x8] sm:$0xff]   ;;  %v8736_v57 = vld [vmem:[%s10165_s17 + $0x10] sm:$0xff]   ;;  %s10179_s1 = sld [smem:[#allocation16_spill]] }
  0x90   : > { %8261 = vmatpush3.bf16.msra.mxu1 %v8728_v3  ;;  %v8730_v6 = vld [vmem:[%s10165_s17] sm:$0xff]   ;;  %v1438_v8 = vld [vmem:[#allocation2 + $0x8] sm:$0xff]  ;;  %v8737_v58 = vld [vmem:[%s10165_s17 + $0x18] sm:$0xff]  }
  0x91   : > { %8262 = vmatprep.subr.bf16.mxu1 %v9029_v4  ;;  %v1437_v7 = vld [vmem:[#allocation2] sm:$0xff]  ;;  %8253 = vmatpush3.bf16.msra.mxu0 %v8730_v6  ;;  %v8731_v9 = vld [vmem:[%s10165_s17 + $0x8] sm:$0xff]   ;;  %v8734_v0 = vld [vmem:[%s10164_s9 + $0x10] sm:$0xff]  }
  0x92   : > { %v9307_v10 = vpack.c.bf16 %v1438_v8, %v1437_v7  ;;  %8254 = vmatprep.subr.bf16.mxu0 %v9029_v4  ;;  %v7582_v11 = vld [vmem:[%s10166_s29] ss:$0 sm:$0xff]  ;;  %v8733_v28 = vld [vmem:[%s10168_s8 + $0x8] sm:$0xff]   ;;  %v8735_v2 = vld [vmem:[%s10164_s9 + $0x18] sm:$0xff]  }
  0x93   : > { %v7578_v13 = vld [vmem:[%s10167_s3] ss:$0 sm:$0xff]  ;;  %v9343_v34 = vld [vmem:[%s10171_s24 + $0x8] sm:$0xff]  ;;  %v7596_v3 = vld [vmem:[%s10167_s3 + $0x1] ss:$0 sm:$0xff]  ;;  %s10175_s18 = scalar_lea.vmem %s10174_s15, %s9217_s0 }
  0x94   : > { %8263 = vmatpush3.bf16.msra.mxu1 %v8729_v5  ;;  %v8732_v27 = vld [vmem:[%s10168_s8] sm:$0xff]   ;;  %s10180_s2 = scalar_lea.vmem %s10178_s26, %s9217_s0 }
  0x95   : > { %8255 = vmatpush3.bf16.msra.mxu0 %v8731_v9  ;;  %v9340_v31 = vld [vmem:[%s10171_s24] sm:$0xff]  ;;  %s10181_s5 = scalar_lea.vmem %s10179_s1, %s9217_s0 }
  0x96   : > { %8268 = vmatprep.subr.bf16.mxu0 %v9029_v4  ;;  %v7586_v49 = vld [vmem:[%s10172_s4] ss:$0 sm:$0xff] }
  0x97   : > { %8265 = vmatmul.mubr.msk.bf16.vlgmr.msra.gmra.mrb[0].mxu1 %vm1527_vm2, %v9307_v10 }
  0x98   : > { %8257 = vmatmul.mubr.msk.bf16.vlgmr.msra.gmra.mrb[0].mxu0 %vm1527_vm2, %v9307_v10 }
  0x99   : > { %8272 = vmatprep.mubr.msk.bf16.mxu0 %vm9030_vm1, %v9029_v4  ;;  %8269 = vmatpush3.bf16.msra.mxu0 %v8732_v27 }
  0x9a   : > { %8270 = vmatprep.subr.bf16.mxu0 %v9029_v4 }
  0x9d   : > { %8271 = vmatpush3.bf16.msra.mxu0 %v8733_v28 }
  0x9e   : > { %8290 = vmatprep.subr.bf16.mxu0 %v9029_v4 }
  0xa0   : > { %8273 = vmatmul.mubr.msk.bf16.vlgmr.msra.gmra.mrb[4].mxu0 %vm1527_vm2, %v9307_v10 }
  0xa1   : > { %8294 = vmatprep.mubr.msk.bf16.mxu0 %vm9030_vm1, %v9029_v4  ;;  %8291 = vmatpush3.bf16.msra.mxu0 %v8736_v57  ;;  %v1503_v57 = vld [vmem:[%s10173_s7] sm:$0xf] }
  0xa2   : > { %8292 = vmatprep.subr.bf16.mxu0 %v9029_v4 }
  0xa5   : > { %8293 = vmatpush3.bf16.msra.mxu0 %v8737_v58 }
  0xa6   : > { %8306 = vmatprep.subr.bf16.mxu0 %v9029_v4 }
  0xa8   : > { %8295 = vmatmul.mubr.msk.bf16.vlgmr.msra.gmra.mrb[8].mxu0 %vm1527_vm2, %v9307_v10 }
  0xa9   : > { %8310 = vmatprep.mubr.msk.bf16.mxu0 %vm9030_vm1, %v9029_v4 }
 0x16a   : > { %v1624_v12 = vpop.f32.mrb[0].mxu1 }
 0x16b   : > { %v8266_v14 = vpop.f32.mrb[1].mxu1  ;;  %v1565_v16 = vpop.f32.mrb[0].mxu0  ;;  %v1625_v17 = vadd.f32 %v7582_v11, %v1624_v12 }
 0x16c   : > { %v1627_v15 = vpop.f32.mrb[2].mxu1  ;;  %v1566_v20 = vadd.f32 %v7578_v13, %v1565_v16  ;;  %v8258_v21 = vpop.f32.mrb[1].mxu0 }
 0x16d   : > { %v1628_v18 = vadd.f32 %v7582_v11, %v1627_v15  ;;  %v8267_v19 = vpop.f32.mrb[3].mxu1  ;;  %v1568_v23 = vpop.f32.mrb[2].mxu0  ;;  %v7600_v15 = vld [vmem:[%s10166_s29 + $0x1] ss:$0 sm:$0xff] }
 0x16e   : > { %v8259_v25 = vpop.f32.mrb[3].mxu0  ;;  %8280 = vmatprep.mubr.msk.f32.mxu1 %vm1690_vm3, %v1566_v20  ;;  %v1569_v26 = vadd.f32 %v7578_v13, %v1568_v23 }
 0x16f   : > { %v8604_v24 = vpack.c.bf16 %v1628_v18, %v1625_v17  ;;  %v8739_v25 = vld [vmem:[%s10168_s8 + $0x18] sm:$0xff]  }
 0x171   : > { %8606 = vmatprep.subr.msk.bf16.mxu1 %vm9321_vm4, %v8604_v24 }
 0x172   : > { %8609 = vmatpush3.bf16.xpose.msk.msra.mxu1 %vm9321_vm4, %v8604_v24  ;;  %v8738_v24 = vld [vmem:[%s10168_s8 + $0x10] sm:$0xff]  }
 0x173   : > { %v1683_v50 = vpop.f32.mrb[4].mxu0  ;;  %8307 = vmatpush3.bf16.msra.mxu0 %v8738_v24 }
 0x174   : > { %v8274_v51 = vpop.f32.mrb[5].mxu0  ;;  %v1684_v52 = vadd.f32 %v7586_v49, %v1683_v50  ;;  %8308 = vmatprep.subr.bf16.mxu0 %v9029_v4 }
 0x175   : > { %v1686_v53 = vpop.f32.mrb[6].mxu0 }
 0x176   : > { %v1687_v54 = vadd.f32 %v7586_v49, %v1686_v53  ;;  %v8275_v55 = vpop.f32.mrb[7].mxu0 }
 0x177   : > { %8309 = vmatpush3.bf16.msra.mxu0 %v8739_v25 }
 0x178   : > { %v8610_v56 = vpack.c.bf16 %v1687_v54, %v1684_v52 }
 0x179   : > { %8281 = vmatmul.mubr.msk.f32.vlgmr.msra.gmra.mrb[4].mxu1 %vm1690_vm3, %v1569_v26 }
 0x17a   : > { %8611 = vmatprep.subr.bf16.mxu1 %v8610_v56  ;;  %8311 = vmatmul.mubr.msk.bf16.vlgmr.msra.gmra.mrb[12].mxu0 %vm1527_vm2, %v9307_v10 }
 0x17b   : > { %8613 = vmatpush3.bf16.msra.mxu1 %v8610_v56  ;;  %v1939_v5 = vpop.f32.mrb[8].mxu0 }
 0x17c   : > { %8298 = vmatprep.subr.bf16.mxu1 %v9029_v4  ;;  %v1940_v6 = vadd.f32 %v7596_v3, %v1939_v5  ;;  %v8296_v7 = vpop.f32.mrb[9].mxu0  ;;  %v8742_v5 = vld [vmem:[%s10165_s17 + $0x20] sm:$0xff]  }
 0x17d   : > { %v1942_v8 = vpop.f32.mrb[10].mxu0 }
 0x17e   : > { %v1943_v9 = vadd.f32 %v7596_v3, %v1942_v8  ;;  %v8297_v11 = vpop.f32.mrb[11].mxu0 }
 0x24c   : > { %v8282_v29 = vpop.f32.mrb[4].mxu1 }
 0x24d   : > { %v1769_v30 = vpop.f32.mrb[5].mxu1  ;;  %v1779_v32 = vmul.f32 0.35355338, %v8282_v29 }
 0x24e   : > { %v1778_v33 = vmul.f32 0.35355338, %v1769_v30 }
 0x24f   : > { %v1781_v37 = vadd.f32 %v1779_v32, %v9343_v34 }
 0x250   : > { %v1780_v35 = vadd.f32 %v1778_v33, %v9340_v31 }
 0x251   : > { %v1786_v38 = vsel %vm1782_vm5, %v1781_v37, -inf }
 0x252   : > { %v1783_v36 = vsel %vm1782_vm5, %v1780_v35, -inf }
 0x253   : > { %1784 = vmax.xlane.f32.xlu0 %v1783_v36  ;;  %v2057_v36 = vpop.f32.mrb[12].mxu0 }
 0x257   : > { %1787 = vmax.xlane.f32.xlu0 %v1786_v38 }
 0x2e0   : > { %v1785_v39 = vpop.xlane.xlu0 %1784 }
 0x2e1   : > { %v1789_v40 = vsub.f32 %v1780_v35, %v1785_v39 }
 0x2e3   : > { %v1791_v41 = vmul.f32 1.442695, %v1789_v40 }
 0x2e4   : > { %v1788_v42 = vpop.xlane.xlu0 %1787 }
 0x2e5   : > { %8904 = vpow2.f32 %v1791_v41  ;;  %v1790_v43 = vsub.f32 %v1781_v37, %v1788_v42  ;;  %v8312_v37 = vpop.f32.mrb[13].mxu0 }
 0x2e6   : > { %v2060_v50 = vpop.f32.mrb[14].mxu0  ;;  %v8744_v37 = vld [vmem:[%s10168_s8 + $0x20] sm:$0xff]  }
 0x2e7   : > { %v1793_v44 = vmul.f32 1.442695, %v1790_v43  ;;  %v8313_v52 = vpop.f32.mrb[15].mxu0 }
 0x2e9   : > { %8906 = vpow2.f32 %v1793_v44 }
 0x2ef   : > { %v8905_v45 = vpop.eup %8904 }
 0x2f0   : > { %v1795_v46 = vsel %vm1782_vm5, %v8905_v45, 0.0 }
 0x2f1   : > { %1796 = vadd.xlane.f32.xlu1 %v1795_v46 }
 0x2f3   : > { %v8907_v47 = vpop.eup %8906 }
 0x2f4   : > { %v1798_v48 = vsel %vm1782_vm5, %v8907_v47, 0.0 }
 0x2f5   : > { %1799 = vadd.xlane.f32.xlu1 %v1798_v48  ;;  %v7604_v48 = vld [vmem:[%s10172_s4 + $0x1] ss:$0 sm:$0xff] }
 0x2f6   : > { %v2058_v49 = vadd.f32 %v7604_v48, %v2057_v36  ;;  %v2061_v51 = vadd.f32 %v7604_v48, %v2060_v50 }
 0x2f8   : > { %v8620_v53 = vpack.c.bf16 %v2061_v51, %v2058_v49 }
 0x2fa   : > { %8621 = vmatprep.subr.bf16.mxu0 %v8620_v53 }
 0x2fb   : > { %8623 = vmatpush3.bf16.msra.mxu0 %v8620_v53 }
 0x2fc   : > { %8334 = vmatprep.subr.bf16.mxu0 %v9029_v4 }
 0x37e   : > { %v1797_v59 = vpop.xlane.xlu1 %1796 }
 0x37f   : > { %8908 = vrcp.f32 %v1797_v59 }
 0x382   : > { %v1800_v60 = vpop.xlane.xlu1 %1799 }
 0x383   : > { %8910 = vrcp.f32 %v1800_v60 }
 0x389   : > { %v8909_v61 = vpop.eup %8908 }
 0x38a   : > { %v1803_v62 = vmul.f32 %v8909_v61, %v8905_v45  ;;  %v2311_v61 = vsel %vm2262_vm6, %v1503_v57, 0 }
 0x38c   : > { %8287 = vmatprep.mubr.msk.f32.mxu1 %vm1782_vm5, %v1803_v62  ;;  %v8740_v62 = vld [vmem:[%s10164_s9 + $0x20] sm:$0xff]  }
 0x38d   : > { %v8911_v63 = vpop.eup %8910 }
 0x38e   : > { %v1804_v1 = vmul.f32 %v8911_v63, %v8907_v47  ;;  %v8741_v63 = vld [vmem:[%s10164_s9 + $0x28] sm:$0xff]  }
 0x390   : > { %8288 = vmatmul.mubr.msk.f32.vlgmr.msra.gmra.mrb[6].mxu1 %vm1782_vm5, %v1804_v1 }
 0x391   : > { %8299 = vmatpush3.bf16.msra.mxu1 %v8734_v0  ;;  %8302 = vmatprep.mubr.msk.bf16.mxu1 %vm9030_vm1, %v9029_v4  ;;  %v1504_v0 = vld [vmem:[%s10173_s7 + $0x4] sm:$0xf] }
 0x392   : > { %8300 = vmatprep.subr.bf16.mxu1 %v9029_v4  ;;  %v2264_v1 = vsel %vm2262_vm6, %v1504_v0, 0 }
 0x395   : > { %8301 = vmatpush3.bf16.msra.mxu1 %v8735_v2 }
 0x398   : > { %8303 = vmatmul.mubr.msk.bf16.vlgmr.msra.gmra.mrb[8].mxu1 %vm1527_vm2, %v9307_v10 }
 0x399   : > { %8318 = vmatprep.mubr.msk.f32.mxu1 %vm1690_vm3, %v1940_v6 }
 0x463   : > { %v9372_v12 = vpop.f32.mrb[6].mxu1 }
 0x464   : > { %v9374_v13 = vpop.f32.mrb[7].mxu1 }
 0x465   : > { %v1886_v14 = vpack.c.bf16 %v9372_v12, %v9374_v13  ;;  %v7620_v13 = vld [vmem:[%s10166_s29 + $0x2] ss:$0 sm:$0xff] }
 0x46b   : > { %v1998_v16 = vpop.f32.mrb[8].mxu1 }
 0x46c   : > { %v8304_v17 = vpop.f32.mrb[9].mxu1  ;;  %v1999_v19 = vadd.f32 %v7600_v15, %v1998_v16 }
 0x46d   : > { %v2001_v18 = vpop.f32.mrb[10].mxu1 }
 0x46e   : > { %v2002_v20 = vadd.f32 %v7600_v15, %v2001_v18  ;;  %v8305_v21 = vpop.f32.mrb[11].mxu1 }
 0x470   : > { %v8614_v23 = vpack.c.bf16 %v2002_v20, %v1999_v19 }
 0x472   : > { %8616 = vmatprep.subr.msk.bf16.mxu1 %vm9321_vm4, %v8614_v23 }
 0x473   : > { %8619 = vmatpush3.bf16.xpose.msk.msra.mxu1 %vm9321_vm4, %v8614_v23 }
 0x474   : > { %8328 = vmatprep.subr.bf16.mxu1 %v9029_v4 }
 0x47a   : > { %8319 = vmatmul.mubr.msk.f32.vlgmr.msra.gmra.mrb[12].mxu1 %vm1690_vm3, %v1943_v9  ;;  %v8743_v9 = vld [vmem:[%s10165_s17 + $0x28] sm:$0xff]  }
 0x47b   : > { %8330 = vmatprep.mubr.msk.bf16.mxu1 %vm9030_vm1, %v9029_v4  ;;  %8329 = vmatpush3.bf16.msra.mxu1 %v2264_v1  ;;  %v1505_v1 = vld [vmem:[%s10173_s7 + $0x8] sm:$0xf] }
 0x47c   : > { %8340 = vmatprep.subr.bf16.mxu1 %v9029_v4 }
 0x54d   : > { %v8320_v26 = vpop.f32.mrb[12].mxu1 }
 0x54e   : > { %v2152_v27 = vmul.f32 0.35355338, %v8320_v26  ;;  %v2142_v28 = vpop.f32.mrb[13].mxu1 }
 0x54f   : > { %v2151_v29 = vmul.f32 0.35355338, %v2142_v28  ;;  %v7616_v28 = vld [vmem:[%s10167_s3 + $0x2] ss:$0 sm:$0xff] }
 0x550   : > { %v2154_v30 = vadd.f32 %v2152_v27, %v9343_v34 }
 0x551   : > { %v2153_v32 = vadd.f32 %v2151_v29, %v9340_v31 }
 0x552   : > { %v2158_v33 = vsel %vm1782_vm5, %v2154_v30, -inf }
 0x553   : > { %2159 = vmax.xlane.f32.xlu1 %v2158_v33  ;;  %v2155_v35 = vsel %vm1782_vm5, %v2153_v32, -inf }
 0x554   : > { %2156 = vmax.xlane.f32.xlu0 %v2155_v35 }
 0x5e0   : > { %v2160_v38 = vpop.xlane.xlu1 %2159 }
 0x5e1   : > { %v2162_v39 = vsub.f32 %v2154_v30, %v2160_v38  ;;  %v2157_v40 = vpop.xlane.xlu0 %2156  ;;  %v8745_v38 = vld [vmem:[%s10168_s8 + $0x28] sm:$0xff]  }
 0x5e2   : > { %v2161_v41 = vsub.f32 %v2153_v32, %v2157_v40 }
 0x5e3   : > { %v2165_v42 = vmul.f32 1.442695, %v2162_v39 }
 0x5e4   : > { %v2163_v43 = vmul.f32 1.442695, %v2161_v41 }
 0x5e5   : > { %8912 = vpow2.f32 %v2165_v42 }
 0x5e6   : > { %8914 = vpow2.f32 %v2163_v43 }
 0x5ef   : > { %v8913_v44 = vpop.eup %8912 }
 0x5f0   : > { %v8915_v45 = vpop.eup %8914  ;;  %v2170_v46 = vsel %vm1782_vm5, %v8913_v44, 0.0 }
 0x5f1   : > { %2171 = vadd.xlane.f32.xlu1 %v2170_v46  ;;  %v2167_v47 = vsel %vm1782_vm5, %v8915_v45, 0.0 }
 0x5f2   : > { %2168 = vadd.xlane.f32.xlu0 %v2167_v47 }
 0x67e   : > { %v2172_v54 = vpop.xlane.xlu1 %2171 }
 0x67f   : > { %8916 = vrcp.f32 %v2172_v54  ;;  %v2169_v55 = vpop.xlane.xlu0 %2168 }
 0x680   : > { %8918 = vrcp.f32 %v2169_v55 }
 0x689   : > { %v8917_v56 = vpop.eup %8916 }
 0x68a   : > { %v8919_v58 = vpop.eup %8918  ;;  %v2176_v60 = vmul.f32 %v8917_v56, %v8913_v44 }
 0x68b   : > { %v2175_v59 = vmul.f32 %v8919_v58, %v8915_v45 }
 0x68d   : > { %8325 = vmatprep.mubr.msk.f32.mxu0 %vm1782_vm5, %v2175_v59  ;;  %v7624_v59 = vld [vmem:[%s10172_s4 + $0x2] ss:$0 sm:$0xff] }
 0x68e   : > { %8326 = vmatmul.mubr.msk.f32.vlgmr.msra.gmra.mrb[16].mxu0 %vm1782_vm5, %v2176_v60 }
 0x68f   : > { %8335 = vmatpush3.bf16.msra.mxu0 %v2311_v61  ;;  %8336 = vmatprep.mubr.msk.bf16.mxu0 %vm9030_vm1, %v9029_v4 }
 0x690   : > { %8348 = vmatprep.subr.bf16.mxu0 %v9029_v4 }
 0x692   : > { %8337 = vmatmul.mubr.msk.bf16.vlgmr.msra.gmra.mrb[20].mxu0 %vm1690_vm3, %v1886_v14 }
 0x693   : > { %8349 = vmatpush3.bf16.msra.mxu0 %v8740_v62  ;;  %8352 = vmatprep.mubr.msk.bf16.mxu0 %vm9030_vm1, %v9029_v4 }
 0x694   : > { %8350 = vmatprep.subr.bf16.mxu0 %v9029_v4 }
 0x697   : > { %8351 = vmatpush3.bf16.msra.mxu0 %v8741_v63 }
 0x69a   : > { %8353 = vmatmul.mubr.msk.bf16.vlgmr.msra.gmra.mrb[24].mxu0 %vm1527_vm2, %v9307_v10 }
 0x761   : > { %v8327_v2 = vpop.f32.mrb[16].mxu0 }
 0x762   : > { %v2249_v3 = vpop.f32.mrb[17].mxu0 }
 0x763   : > { %v2258_v6 = vpack.c.bf16 %v8327_v2, %v2249_v3  ;;  %v2730_v2 = vsel %vm2262_vm6, %v1505_v1, 0 }
 0x765   : > { %8331 = vmatmul.mubr.msk.bf16.vlgmr.msra.gmra.mrb[16].mxu1 %vm1690_vm3, %v2258_v6  ;;  %v2347_v7 = vpop.f32.mrb[20].mxu0 }
 0x766   : > { %v8338_v8 = vpop.f32.mrb[21].mxu0  ;;  %8341 = vmatpush3.bf16.msra.mxu1 %v8742_v5  ;;  %8344 = vmatprep.mubr.msk.bf16.mxu1 %vm9030_vm1, %v9029_v4 }
 0x767   : > { %v2350_v11 = vpop.f32.mrb[22].mxu0  ;;  %8342 = vmatprep.subr.bf16.mxu1 %v9029_v4 }
 0x768   : > { %v8339_v12 = vpop.f32.mrb[23].mxu0 }
 0x769   : > { %v8749_v12 = vld [vmem:[%s10165_s17 + $0x38] sm:$0xff]  }
 0x76a   : > { %8343 = vmatpush3.bf16.msra.mxu1 %v8743_v9 }
 0x76b   : > { %8356 = vmatprep.subr.bf16.mxu1 %v9029_v4 }
 0x76d   : > { %8345 = vmatmul.mubr.msk.bf16.vlgmr.msra.gmra.mrb[20].mxu1 %vm1527_vm2, %v9307_v10  ;;  %v2465_v14 = vpop.f32.mrb[24].mxu0 }
 0x76e   : > { %v2466_v15 = vadd.f32 %v7620_v13, %v2465_v14  ;;  %v8354_v16 = vpop.f32.mrb[25].mxu0  ;;  %8360 = vmatprep.mubr.msk.bf16.mxu1 %vm9030_vm1, %v9029_v4  ;;  %8357 = vmatpush3.bf16.msra.mxu1 %v8744_v37 }
 0x76f   : > { %v2468_v17 = vpop.f32.mrb[26].mxu0  ;;  %8358 = vmatprep.subr.bf16.mxu1 %v9029_v4 }
 0x770   : > { %v2469_v18 = vadd.f32 %v7620_v13, %v2468_v17  ;;  %v8355_v19 = vpop.f32.mrb[27].mxu0  ;;  %v8747_v17 = vld [vmem:[%s10164_s9 + $0x38] sm:$0xff]  }
 0x772   : > { %v8624_v20 = vpack.c.bf16 %v2469_v18, %v2466_v15  ;;  %8359 = vmatpush3.bf16.msra.mxu1 %v8745_v38  ;;  %v8746_v15 = vld [vmem:[%s10164_s9 + $0x30] sm:$0xff]   ;;  %v7635_v18 = vld [vmem:[%s10167_s3 + $0x3] ss:$0 sm:$0xff]  ;;  %s10182_s9 = sld [smem:[#allocation48_spill]] }
 0x773   : > { %8378 = vmatprep.subr.bf16.mxu1 %v9029_v4 }
 0x774   : > { %8626 = vmatprep.subr.msk.bf16.mxu0 %vm9321_vm4, %v8624_v20 }
 0x775   : > { %8629 = vmatpush3.bf16.xpose.msk.msra.mxu0 %vm9321_vm4, %v8624_v20  ;;  %8361 = vmatmul.mubr.msk.bf16.vlgmr.msra.gmra.mrb[24].mxu1 %vm1527_vm2, %v9307_v10 }
 0x776   : > { %8380 = vmatprep.mubr.msk.bf16.mxu1 %vm9030_vm1, %v9029_v4  ;;  %8379 = vmatpush3.bf16.msra.mxu1 %v2730_v2 }
 0x777   : > { %8392 = vmatprep.subr.bf16.mxu1 %v9029_v4 }
 0x838   : > { %v2300_v21 = vpop.f32.mrb[16].mxu1 }
 0x839   : > { %v9437_v23 = vadd.f32 %v2347_v7, %v2300_v21  ;;  %v8332_v24 = vpop.f32.mrb[17].mxu1 }
 0x83a   : > { %v2303_v25 = vpop.f32.mrb[18].mxu1 }
 0x83b   : > { %v9439_v26 = vadd.f32 %v2350_v11, %v2303_v25  ;;  %v8333_v27 = vpop.f32.mrb[19].mxu1  ;;  %v8748_v11 = vld [vmem:[%s10165_s17 + $0x30] sm:$0xff]   ;;  %s10183_s17 = sld [smem:[#allocation47_spill]] }
 0x840   : > { %v2406_v29 = vpop.f32.mrb[20].mxu1 }
 0x841   : > { %v2407_v30 = vadd.f32 %v7616_v28, %v2406_v29  ;;  %v8346_v32 = vpop.f32.mrb[21].mxu1 }
 0x842   : > { %v2409_v33 = vpop.f32.mrb[22].mxu1 }
 0x843   : > { %v2410_v35 = vadd.f32 %v7616_v28, %v2409_v33  ;;  %v8347_v36 = vpop.f32.mrb[23].mxu1  ;;  %8368 = vmatprep.mubr.msk.f32.mxu0 %vm1690_vm3, %v2407_v30 }
 0x844   : > { %v7639_v36 = vld [vmem:[%s10166_s29 + $0x3] ss:$0 sm:$0xff] }
 0x845   : > { %8369 = vmatmul.mubr.msk.f32.vlgmr.msra.gmra.mrb[18].mxu0 %vm1690_vm3, %v2410_v35 }
 0x848   : > { %v2524_v57 = vpop.f32.mrb[24].mxu1 }
 0x849   : > { %v8362_v58 = vpop.f32.mrb[25].mxu1  ;;  %v2525_v61 = vadd.f32 %v7624_v59, %v2524_v57 }
 0x84a   : > { %v2527_v60 = vpop.f32.mrb[26].mxu1 }
 0x84b   : > { %v2528_v62 = vadd.f32 %v7624_v59, %v2527_v60  ;;  %v8363_v63 = vpop.f32.mrb[27].mxu1 }
 0x84c   : > { %v7643_v63 = vld [vmem:[%s10172_s4 + $0x3] ss:$0 sm:$0xff] }
 0x84d   : > { %v8630_v0 = vpack.c.bf16 %v2528_v62, %v2525_v61 }
 0x84f   : > { %8631 = vmatprep.subr.bf16.mxu0 %v8630_v0 }
 0x850   : > { %8633 = vmatpush3.bf16.msra.mxu0 %v8630_v0 }
 0x851   : > { %8384 = vmatprep.subr.bf16.mxu0 %v9029_v4 }
 0x918   : > { %v8370_v39 = vpop.f32.mrb[18].mxu0 }
 0x919   : > { %v2619_v40 = vmul.f32 0.35355338, %v8370_v39  ;;  %v2609_v41 = vpop.f32.mrb[19].mxu0 }
 0x91a   : > { %v2618_v42 = vmul.f32 0.35355338, %v2609_v41 }
 0x91b   : > { %v2621_v43 = vadd.f32 %v2619_v40, %v9343_v34 }
 0x91c   : > { %v2620_v44 = vadd.f32 %v2618_v42, %v9340_v31 }
 0x91d   : > { %v2625_v45 = vsel %vm1782_vm5, %v2621_v43, -inf }
 0x91e   : > { %2626 = vmax.xlane.f32.xlu1 %v2625_v45  ;;  %v2622_v46 = vsel %vm1782_vm5, %v2620_v44, -inf }
 0x91f   : > { %2623 = vmax.xlane.f32.xlu0 %v2622_v46 }
 0x9ab   : > { %v2627_v47 = vpop.xlane.xlu1 %2626 }
 0x9ac   : > { %v2629_v48 = vsub.f32 %v2621_v43, %v2627_v47  ;;  %v2624_v49 = vpop.xlane.xlu0 %2623 }
 0x9ad   : > { %v2628_v50 = vsub.f32 %v2620_v44, %v2624_v49 }
 0x9ae   : > { %v2632_v51 = vmul.f32 1.442695, %v2629_v48 }
 0x9af   : > { %v2630_v52 = vmul.f32 1.442695, %v2628_v50 }
 0x9b0   : > { %8920 = vpow2.f32 %v2632_v51 }
 0x9b1   : > { %8922 = vpow2.f32 %v2630_v52 }
 0x9ba   : > { %v8921_v53 = vpop.eup %8920 }
 0x9bb   : > { %v8923_v54 = vpop.eup %8922  ;;  %v2637_v55 = vsel %vm1782_vm5, %v8921_v53, 0.0 }
 0x9bc   : > { %2638 = vadd.xlane.f32.xlu1 %v2637_v55  ;;  %v2634_v56 = vsel %vm1782_vm5, %v8923_v54, 0.0 }
 0x9bd   : > { %2635 = vadd.xlane.f32.xlu0 %v2634_v56 }
 0xa49   : > { %v2639_v3 = vpop.xlane.xlu1 %2638 }
 0xa4a   : > { %8924 = vrcp.f32 %v2639_v3  ;;  %v2636_v5 = vpop.xlane.xlu0 %2635 }
 0xa4b   : > { %8926 = vrcp.f32 %v2636_v5 }
 0xa54   : > { %v8925_v6 = vpop.eup %8924 }
 0xa55   : > { %v8927_v7 = vpop.eup %8926  ;;  %v2643_v9 = vmul.f32 %v8925_v6, %v8921_v53  ;;  %v1506_v6 = vld [vmem:[%s10173_s7 + $0xc] sm:$0xf] }
 0xa56   : > { %v2642_v8 = vmul.f32 %v8927_v7, %v8923_v54  ;;  %v3151_v7 = vsel %vm2262_vm6, %v1506_v6, 0 }
 0xa58   : > { %8375 = vmatprep.mubr.msk.f32.mxu0 %vm1782_vm5, %v2642_v8 }
 0xa59   : > { %8376 = vmatmul.mubr.msk.f32.vlgmr.msra.gmra.mrb[28].mxu0 %vm1782_vm5, %v2643_v9 }
 0xa5a   : > { %8388 = vmatprep.mubr.msk.bf16.mxu0 %vm9030_vm1, %v9029_v4  ;;  %8385 = vmatpush3.bf16.msra.mxu0 %v8748_v11 }
 0xa5b   : > { %8386 = vmatprep.subr.bf16.mxu0 %v9029_v4 }
 0xa5e   : > { %8387 = vmatpush3.bf16.msra.mxu0 %v8749_v12 }
 0xa5f   : > { %8400 = vmatprep.subr.bf16.mxu0 %v9029_v4 }
 0xa61   : > { %8389 = vmatmul.mubr.msk.bf16.vlgmr.msra.gmra.mrb[32].mxu0 %vm1527_vm2, %v9307_v10 }
 0xa62   : > { %8404 = vmatprep.mubr.msk.bf16.mxu0 %vm9030_vm1, %v9029_v4 }
 0xb2c   : > { %v8377_v13 = vpop.f32.mrb[28].mxu0 }
 0xb2d   : > { %v2716_v14 = vpop.f32.mrb[29].mxu0 }
 0xb2e   : > { %v2725_v16 = vpack.c.bf16 %v8377_v13, %v2716_v14 }
 0xb30   : > { %8381 = vmatmul.mubr.msk.bf16.vlgmr.msra.gmra.mrb[28].mxu1 %vm1690_vm3, %v2725_v16 }
 0xb31   : > { %8393 = vmatpush3.bf16.msra.mxu1 %v8746_v15  ;;  %8396 = vmatprep.mubr.msk.bf16.mxu1 %vm9030_vm1, %v9029_v4 }
 0xb32   : > { %8394 = vmatprep.subr.bf16.mxu1 %v9029_v4 }
 0xb34   : > { %v2827_v19 = vpop.f32.mrb[32].mxu0 }
 0xb35   : > { %8395 = vmatpush3.bf16.msra.mxu1 %v8747_v17  ;;  %v2828_v20 = vadd.f32 %v7635_v18, %v2827_v19  ;;  %v8390_v21 = vpop.f32.mrb[33].mxu0 }
 0xb36   : > { %v2830_v24 = vpop.f32.mrb[34].mxu0 }
 0xb37   : > { %v2831_v25 = vadd.f32 %v7635_v18, %v2830_v24  ;;  %v8391_v27 = vpop.f32.mrb[35].mxu0  ;;  %v7654_v18 = vld [vmem:[%s10175_s18] ss:$0 sm:$0xff] }
 0xb38   : > { %8397 = vmatmul.mubr.msk.bf16.vlgmr.msra.gmra.mrb[32].mxu1 %vm1527_vm2, %v9307_v10 }
 0xb39   : > { %8412 = vmatprep.mubr.msk.f32.mxu1 %vm1690_vm3, %v2828_v20 }
 0xc03   : > { %v2766_v28 = vpop.f32.mrb[28].mxu1 }
 0xc04   : > { %v9486_v29 = vadd.f32 %v2766_v28, %v9437_v23  ;;  %v8382_v30 = vpop.f32.mrb[29].mxu1  ;;  %v8750_v23 = vld [vmem:[%s10168_s8 + $0x30] sm:$0xff]  }
 0xc05   : > { %v2769_v32 = vpop.f32.mrb[30].mxu1  ;;  %8401 = vmatpush3.bf16.msra.mxu0 %v8750_v23 }
 0xc06   : > { %v9489_v33 = vadd.f32 %v2769_v32, %v9439_v26  ;;  %v8383_v35 = vpop.f32.mrb[31].mxu1  ;;  %v8751_v26 = vld [vmem:[%s10168_s8 + $0x38] sm:$0xff]   ;;  %8402 = vmatprep.subr.bf16.mxu0 %v9029_v4  ;;  %v8980_v32 = vld [vmem:[#allocation2] sm:$0xff] }
 0xc09   : > { %8403 = vmatpush3.bf16.msra.mxu0 %v8751_v26 }
 0xc0a   : > { %8422 = vmatprep.subr.bf16.mxu0 %v9029_v4 }
 0xc0b   : > { %v2886_v37 = vpop.f32.mrb[32].mxu1 }
 0xc0c   : > { %v8398_v38 = vpop.f32.mrb[33].mxu1  ;;  %v2887_v40 = vadd.f32 %v7639_v36, %v2886_v37  ;;  %8405 = vmatmul.mubr.msk.bf16.vlgmr.msra.gmra.mrb[36].mxu0 %vm1527_vm2, %v9307_v10  ;;  %v8981_v37 = vld [vmem:[#allocation2 + $0x8] sm:$0xff] }
 0xc0d   : > { %v2889_v39 = vpop.f32.mrb[34].mxu1  ;;  %8424 = vmatprep.mubr.msk.bf16.mxu0 %vm9030_vm1, %v9029_v4  ;;  %8423 = vmatpush3.bf16.msra.mxu0 %v3151_v7  ;;  %v8757_v7 = vld [vmem:[%s9262_s14 + $0x8] sm:$0xff]  }
 0xc0e   : > { %v2890_v41 = vadd.f32 %v7639_v36, %v2889_v39  ;;  %v8399_v42 = vpop.f32.mrb[35].mxu1  ;;  %8436 = vmatprep.subr.bf16.mxu0 %v9029_v4 }
 0xc10   : > { %v8634_v43 = vpack.c.bf16 %v2890_v41, %v2887_v40 }
 0xc12   : > { %8636 = vmatprep.subr.msk.bf16.mxu1 %vm9321_vm4, %v8634_v43 }
 0xc13   : > { %8639 = vmatpush3.bf16.xpose.msk.msra.mxu1 %vm9321_vm4, %v8634_v43 }
 0xc1a   : > { %8413 = vmatmul.mubr.msk.f32.vlgmr.msra.gmra.mrb[14].mxu1 %vm1690_vm3, %v2831_v25 }
 0xcdf   : > { %v2945_v61 = vpop.f32.mrb[36].mxu0 }
 0xce0   : > { %v8406_v62 = vpop.f32.mrb[37].mxu0  ;;  %v2946_v1 = vadd.f32 %v7643_v63, %v2945_v61 }
 0xce1   : > { %v2948_v0 = vpop.f32.mrb[38].mxu0 }
 0xce2   : > { %v2949_v2 = vadd.f32 %v7643_v63, %v2948_v0  ;;  %v8407_v3 = vpop.f32.mrb[39].mxu0  ;;  %v7656_v0 = vld [vmem:[%s10181_s5] ss:$0 sm:$0xff] }
 0xce4   : > { %v8640_v5 = vpack.c.bf16 %v2949_v2, %v2946_v1 }
 0xce6   : > { %8641 = vmatprep.subr.bf16.mxu1 %v8640_v5 }
 0xce7   : > { %8643 = vmatpush3.bf16.msra.mxu1 %v8640_v5  ;;  %v8756_v5 = vld [vmem:[%s9262_s14] sm:$0xff]  }
 0xce8   : > { %8428 = vmatprep.subr.bf16.mxu1 %v9029_v4 }
 0xced   : > { %v8414_v44 = vpop.f32.mrb[14].mxu1 }
 0xcee   : > { %v3040_v45 = vmul.f32 0.35355338, %v8414_v44  ;;  %v3030_v46 = vpop.f32.mrb[15].mxu1 }
 0xcef   : > { %v3039_v47 = vmul.f32 0.35355338, %v3030_v46  ;;  %v8752_v46 = vld [vmem:[%s9256_s13] sm:$0xff]  }
 0xcf0   : > { %v3042_v48 = vadd.f32 %v3040_v45, %v9343_v34 }
 0xcf1   : > { %v3041_v49 = vadd.f32 %v3039_v47, %v9340_v31  ;;  %v8753_v47 = vld [vmem:[%s9256_s13 + $0x8] sm:$0xff]  }
 0xcf2   : > { %v3046_v50 = vsel %vm1782_vm5, %v3042_v48, -inf }
 0xcf3   : > { %3047 = vmax.xlane.f32.xlu1 %v3046_v50  ;;  %v3043_v51 = vsel %vm1782_vm5, %v3041_v49, -inf }
 0xcf4   : > { %3044 = vmax.xlane.f32.xlu0 %v3043_v51  ;;  %v8754_v51 = vld [vmem:[%s10177_s23] sm:$0xff]  }
 0xd80   : > { %v3048_v52 = vpop.xlane.xlu1 %3047 }
 0xd81   : > { %v3050_v10 = vsub.f32 %v3042_v48, %v3048_v52  ;;  %v3045_v53 = vpop.xlane.xlu0 %3044  ;;  %v1439_v48 = vld [vmem:[%s10176_s22] sm:$0xff]  ;;  %v8755_v52 = vld [vmem:[%s10177_s23 + $0x8] sm:$0xff]  }
 0xd82   : > { %v3049_v54 = vsub.f32 %v3041_v49, %v3045_v53  ;;  %v1440_v49 = vld [vmem:[%s10176_s22 + $0x8] sm:$0xff] }
 0xd83   : > { %v3053_v55 = vmul.f32 1.442695, %v3050_v10  ;;  %v9537_v50 = vpack.c.bf16 %v1440_v49, %v1439_v48 }
 0xd84   : > { %v3051_v56 = vmul.f32 1.442695, %v3049_v54 }
 0xd85   : > { %8928 = vpow2.f32 %v3053_v55 }
 0xd86   : > { %8930 = vpow2.f32 %v3051_v56 }
 0xd8f   : > { %v8929_v57 = vpop.eup %8928 }
 0xd90   : > { %v8931_v58 = vpop.eup %8930  ;;  %v3058_v59 = vsel %vm1782_vm5, %v8929_v57, 0.0 }
 0xd91   : > { %3059 = vadd.xlane.f32.xlu1 %v3058_v59  ;;  %v3055_v60 = vsel %vm1782_vm5, %v8931_v58, 0.0  ;;  %v7655_v59 = vld [vmem:[%s10180_s2] ss:$0 sm:$0xff] }
 0xd92   : > { %3056 = vadd.xlane.f32.xlu0 %v3055_v60 }
 0xe1e   : > { %v3060_v8 = vpop.xlane.xlu1 %3059 }
 0xe1f   : > { %8932 = vrcp.f32 %v3060_v8  ;;  %v3057_v9 = vpop.xlane.xlu0 %3056  ;;  %v8758_v8 = vld [vmem:[%s10177_s23 + $0x10] sm:$0xff]  }
 0xe20   : > { %8934 = vrcp.f32 %v3057_v9  ;;  %v8759_v9 = vld [vmem:[%s10177_s23 + $0x18] sm:$0xff]  }
 0xe29   : > { %v8933_v11 = vpop.eup %8932 }
 0xe2a   : > { %v8935_v12 = vpop.eup %8934  ;;  %v3064_v14 = vmul.f32 %v8933_v11, %v8929_v57  ;;  %v7661_v11 = vld [vmem:[%s10182_s9] ss:$0 sm:$0xff] }
 0xe2b   : > { %v3063_v13 = vmul.f32 %v8935_v12, %v8931_v58 }
 0xe2d   : > { %8419 = vmatprep.mubr.msk.f32.mxu1 %vm1782_vm5, %v3063_v13 }
 0xe2e   : > { %8420 = vmatmul.mubr.msk.f32.vlgmr.msra.gmra.mrb[36].mxu1 %vm1782_vm5, %v3064_v14 }
 0xe2f   : > { %8432 = vmatprep.mubr.msk.bf16.mxu1 %vm9030_vm1, %v9029_v4  ;;  %8429 = vmatpush3.bf16.msra.mxu1 %v8754_v51 }
 0xe30   : > { %8430 = vmatprep.subr.bf16.mxu1 %v9029_v4 }
 0xe33   : > { %8431 = vmatpush3.bf16.msra.mxu1 %v8755_v52 }
 0xe34   : > { %8444 = vmatprep.subr.bf16.mxu1 %v9029_v4 }
 0xf01   : > { %v8421_v15 = vpop.f32.mrb[36].mxu1 }
 0xf02   : > { %v3137_v16 = vpop.f32.mrb[37].mxu1 }
 0xf03   : > { %v3146_v17 = vpack.c.bf16 %v8421_v15, %v3137_v16 }
 0xf05   : > { %8425 = vmatmul.mubr.msk.bf16.vlgmr.msra.gmra.mrb[40].mxu0 %vm1690_vm3, %v3146_v17 }
 0xf06   : > { %8440 = vmatprep.mubr.msk.bf16.mxu0 %vm9030_vm1, %v9029_v4  ;;  %8437 = vmatpush3.bf16.msra.mxu0 %v8752_v46 }
 0xf07   : > { %8438 = vmatprep.subr.bf16.mxu0 %v9029_v4 }
 0xf0a   : > { %8439 = vmatpush3.bf16.msra.mxu0 %v8753_v47 }
 0xf0d   : > { %8441 = vmatmul.mubr.msk.bf16.vlgmr.msra.gmra.mrb[44].mxu0 %vm1527_vm2, %v9537_v50 }
 0xfd8   : > { %v3187_v19 = vpop.f32.mrb[40].mxu0 }
 0xfd9   : > { %v3194_v20 = vadd.f32 %v3187_v19, %v9486_v29  ;;  %v8426_v21 = vpop.f32.mrb[41].mxu0  ;;  %v7657_v19 = vld [vmem:[%s10183_s17] ss:$0 sm:$0xff] }
 0xfda   : > { %v3190_v24 = vpop.f32.mrb[42].mxu0 }
 0xfdb   : > { %v3202_v25 = vadd.f32 %v7654_v18, %v3194_v20  ;;  %v3195_v27 = vadd.f32 %v3190_v24, %v9489_v33  ;;  %v8427_v28 = vpop.f32.mrb[43].mxu0 }
 0xfdd   : > { %v3203_v30 = vadd.f32 %v7654_v18, %v3195_v27  ;;  %v3204_v35 = vadd.f32 %v8980_v32, %v3202_v25 }
 0xfdf   : > { %v3208_v36 = vsel %vm1527_vm2, %v3204_v35, 0.0  ;;  %v3205_v38 = vadd.f32 %v8981_v37, %v3203_v30  ;;  %v7665_v30 = vld [vmem:[%s9265_s19] ss:$0 sm:$0xff] }
 0xfe0   : > { %3209 = vadd.xlane.f32.xlu0 %v3208_v36  ;;  %v3435_v12 = vpop.f32.mrb[44].mxu0 }
 0xfe1   : > { %v3211_v39 = vsel %vm1527_vm2, %v3205_v38, 0.0  ;;  %v3436_v13 = vadd.f32 %v7661_v11, %v3435_v12  ;;  %v8442_v14 = vpop.f32.mrb[45].mxu0  ;;  %v7679_v12 = vld [vmem:[%s10182_s9 + $0x1] ss:$0 sm:$0xff] }
 0xfe2   : > { %3212 = vadd.xlane.f32.xlu1 %v3211_v39  ;;  %v3438_v15 = vpop.f32.mrb[46].mxu0 }
 0xfe3   : > { %v3439_v16 = vadd.f32 %v7661_v11, %v3438_v15  ;;  %v8443_v17 = vpop.f32.mrb[47].mxu0 }
 0xfe5   : > { %v8644_v18 = vpack.c.bf16 %v3439_v16, %v3436_v13 }
 0xfe7   : > { %8646 = vmatprep.subr.msk.bf16.mxu0 %vm9321_vm4, %v8644_v18 }
 0xfe8   : > { %8649 = vmatpush3.bf16.xpose.msk.msra.mxu0 %vm9321_vm4, %v8644_v18 }
0x106d   : > { %v3210_v29 = vpop.xlane.xlu0 %3209 }
0x106e   : > { %v3215_v40 = vmul.f32 0.03125, %v3210_v29 }
0x106f   : > { %v3213_v41 = vpop.xlane.xlu1 %3212 }
0x1070   : > { %v3217_v33 = vsub.f32 %v3204_v35, %v3215_v40  ;;  %v3216_v42 = vmul.f32 0.03125, %v3213_v41 }
0x1072   : > { %v3218_v43 = vsub.f32 %v3205_v38, %v3216_v42  ;;  %v3219_v23 = vmul.f32 %v3217_v33, %v3217_v33 }
0x1074   : > { %v3221_v26 = vsel %vm1527_vm2, %v3219_v23, 0.0  ;;  %v3220_v44 = vmul.f32 %v3218_v43, %v3218_v43 }
0x1075   : > { %3222 = vadd.xlane.f32.xlu0 %v3221_v26 }
0x1076   : > { %v3224_v45 = vsel %vm1527_vm2, %v3220_v44, 0.0 }
0x1077   : > { %3225 = vadd.xlane.f32.xlu1 %v3224_v45 }
0x1102   : > { %v3223_v10 = vpop.xlane.xlu0 %3222 }
0x1103   : > { %v3227_v53 = vmul.f32 0.03125, %v3223_v10 }
0x1104   : > { %v3226_v54 = vpop.xlane.xlu1 %3225 }
0x1105   : > { %v3229_v55 = vadd.f32 1e-05, %v3227_v53  ;;  %v3228_v56 = vmul.f32 0.03125, %v3226_v54 }
0x1107   : > { %8936 = vrsqrt.f32 %v3229_v55  ;;  %v3230_v57 = vadd.f32 1e-05, %v3228_v56 }
0x1109   : > { %8938 = vrsqrt.f32 %v3230_v57 }
0x1111   : > { %v8937_v58 = vpop.eup %8936 }
0x1112   : > { %v3233_v60 = vmul.f32 %v8937_v58, %v3217_v33  ;;  %v7675_v33 = vld [vmem:[%s10183_s17 + $0x1] ss:$0 sm:$0xff] }
0x1113   : > { %v8939_v61 = vpop.eup %8938 }
0x1114   : > { %v3241_v62 = vmul.f32 %v7655_v59, %v3233_v60  ;;  %v3234_v63 = vmul.f32 %v8939_v61, %v3218_v43 }
0x1116   : > { %v3242_v1 = vmul.f32 %v7655_v59, %v3234_v63  ;;  %v9551_v2 = vadd.f32 %v7656_v0, %v3241_v62 }
0x1118   : > { %v9553_v3 = vadd.f32 %v7656_v0, %v3242_v1  ;;  %v8760_v0 = vld [vmem:[%s9256_s13 + $0x10] sm:$0xff]  }
0x111a   : > { %v9558_v6 = vpack.c.bf16 %v9553_v3, %v9551_v2 }
0x111c   : > { %8433 = vmatmul.mubr.msk.bf16.vlgmr.msra.gmra.mrb[40].mxu1 %vm1527_vm2, %v9558_v6 }
0x111d   : > { %8445 = vmatpush3.bf16.msra.mxu1 %v8756_v5  ;;  %8448 = vmatprep.mubr.msk.bf16.mxu1 %vm9030_vm1, %v9029_v4  ;;  %v8761_v5 = vld [vmem:[%s9256_s13 + $0x18] sm:$0xff]  }
0x111e   : > { %8446 = vmatprep.subr.bf16.mxu1 %v9029_v4 }
0x1121   : > { %8447 = vmatpush3.bf16.msra.mxu1 %v8757_v7 }
0x1122   : > { %8466 = vmatprep.subr.bf16.mxu1 %v9029_v4 }
0x1124   : > { %8449 = vmatmul.mubr.msk.bf16.vlgmr.msra.gmra.mrb[44].mxu1 %vm1527_vm2, %v9537_v50 }
0x1125   : > { %8467 = vmatpush3.bf16.msra.mxu1 %v8758_v8  ;;  %8470 = vmatprep.mubr.msk.bf16.mxu1 %vm9030_vm1, %v9029_v4 }
0x1126   : > { %8468 = vmatprep.subr.bf16.mxu1 %v9029_v4 }
0x1129   : > { %8469 = vmatpush3.bf16.msra.mxu1 %v8759_v9 }
0x112a   : > { %8482 = vmatprep.subr.bf16.mxu1 %v9029_v4 }
0x112c   : > { %8471 = vmatmul.mubr.msk.bf16.vlgmr.msra.gmra.mrb[48].mxu1 %vm1527_vm2, %v9558_v6 }
0x112d   : > { %8486 = vmatprep.mubr.msk.bf16.mxu1 %vm9030_vm1, %v9029_v4 }
0x11ef   : > { %v3373_v20 = vpop.f32.mrb[40].mxu1 }
0x11f0   : > { %v3374_v21 = vadd.f32 %v7657_v19, %v3373_v20  ;;  %v8434_v24 = vpop.f32.mrb[41].mxu1  ;;  %v8762_v20 = vld [vmem:[%s9262_s14 + $0x10] sm:$0xff]  }
0x11f1   : > { %v3376_v25 = vpop.f32.mrb[42].mxu1  ;;  %8483 = vmatpush3.bf16.msra.mxu1 %v8762_v20 }
0x11f2   : > { %v3377_v27 = vadd.f32 %v7657_v19, %v3376_v25  ;;  %v8435_v28 = vpop.f32.mrb[43].mxu1  ;;  %8456 = vmatprep.mubr.msk.f32.mxu0 %vm1690_vm3, %v3374_v21  ;;  %v8763_v21 = vld [vmem:[%s9262_s14 + $0x18] sm:$0xff]   ;;  %8484 = vmatprep.subr.bf16.mxu1 %v9029_v4 }
0x11f4   : > { %8457 = vmatmul.mubr.msk.f32.vlgmr.msra.gmra.mrb[30].mxu0 %vm1690_vm3, %v3377_v27 }
0x11f5   : > { %8485 = vmatpush3.bf16.msra.mxu1 %v8763_v21 }
0x11f7   : > { %v3494_v32 = vpop.f32.mrb[44].mxu1 }
0x11f8   : > { %v3495_v35 = vadd.f32 %v7665_v30, %v3494_v32  ;;  %v8450_v36 = vpop.f32.mrb[45].mxu1  ;;  %8487 = vmatmul.mubr.msk.bf16.vlgmr.msra.gmra.mrb[52].mxu1 %vm1527_vm2, %v9537_v50 }
0x11f9   : > { %v3497_v37 = vpop.f32.mrb[46].mxu1 }
0x11fa   : > { %v3498_v38 = vadd.f32 %v7665_v30, %v3497_v37  ;;  %v8451_v39 = vpop.f32.mrb[47].mxu1  ;;  %v9627_v30 = vld [vmem:[%s10171_s24 + $0x8] sm:$0xff] }
0x11fb   : > { %v7683_v39 = vld [vmem:[%s9265_s19 + $0x1] ss:$0 sm:$0xff] }
0x11fc   : > { %v8650_v29 = vpack.c.bf16 %v3498_v38, %v3495_v35  ;;  %v9631_v35 = vld [vmem:[%s10171_s24] sm:$0xff] }
0x11fe   : > { %8651 = vmatprep.subr.bf16.mxu0 %v8650_v29 }
0x11ff   : > { %v3748_v40 = vpop.f32.mrb[48].mxu1  ;;  %8653 = vmatpush3.bf16.msra.mxu0 %v8650_v29 }
0x1200   : > { %v8472_v41 = vpop.f32.mrb[49].mxu1  ;;  %8474 = vmatprep.subr.bf16.mxu0 %v9029_v4  ;;  %v3749_v7 = vadd.f32 %v7675_v33, %v3748_v40 }
0x1201   : > { %v3751_v42 = vpop.f32.mrb[50].mxu1 }
0x1202   : > { %v3752_v43 = vadd.f32 %v7675_v33, %v3751_v42  ;;  %v8473_v23 = vpop.f32.mrb[51].mxu1 }
0x12c7   : > { %v8458_v26 = vpop.f32.mrb[30].mxu0 }
0x12c8   : > { %v3589_v44 = vmul.f32 0.35355338, %v8458_v26  ;;  %v3579_v45 = vpop.f32.mrb[31].mxu0 }
0x12c9   : > { %v3588_v46 = vmul.f32 0.35355338, %v3579_v45 }
0x12ca   : > { %v3591_v47 = vadd.f32 %v3589_v44, %v9343_v34 }
0x12cb   : > { %v3590_v48 = vadd.f32 %v3588_v46, %v9340_v31  ;;  %v3866_v29 = vpop.f32.mrb[52].mxu1 }
0x12cc   : > { %v3595_v49 = vsel %vm1782_vm5, %v3591_v47, -inf  ;;  %v3867_v40 = vadd.f32 %v7683_v39, %v3866_v29  ;;  %v8488_v41 = vpop.f32.mrb[53].mxu1 }
0x12cd   : > { %3596 = vmax.xlane.f32.xlu1 %v3595_v49  ;;  %v3592_v51 = vsel %vm1782_vm5, %v3590_v48, -inf  ;;  %v3869_v33 = vpop.f32.mrb[54].mxu1 }
0x12ce   : > { %3593 = vmax.xlane.f32.xlu0 %v3592_v51  ;;  %v3870_v42 = vadd.f32 %v7683_v39, %v3869_v33  ;;  %v8768_v33 = vld [vmem:[%s9262_s14 + $0x20] sm:$0xff]  }
0x12d0   : > { %v8660_v23 = vpack.c.bf16 %v3870_v42, %v3867_v40  ;;  %v8769_v42 = vld [vmem:[%s9262_s14 + $0x28] sm:$0xff]  }
0x12d2   : > { %8661 = vmatprep.subr.bf16.mxu1 %v8660_v23 }
0x12d3   : > { %8663 = vmatpush3.bf16.msra.mxu1 %v8660_v23 }
0x12d4   : > { %8510 = vmatprep.subr.bf16.mxu1 %v9029_v4 }
0x135a   : > { %v3597_v52 = vpop.xlane.xlu1 %3596 }
0x135b   : > { %v3599_v10 = vsub.f32 %v3591_v47, %v3597_v52  ;;  %v3594_v53 = vpop.xlane.xlu0 %3593 }
0x135c   : > { %v3598_v54 = vsub.f32 %v3590_v48, %v3594_v53 }
0x135d   : > { %v3602_v55 = vmul.f32 1.442695, %v3599_v10 }
0x135e   : > { %v3600_v56 = vmul.f32 1.442695, %v3598_v54 }
0x135f   : > { %8940 = vpow2.f32 %v3602_v55 }
0x1360   : > { %8942 = vpow2.f32 %v3600_v56  ;;  %v3311_v56 = vld [vmem:[%s9268_s25] sm:$0xf] }
0x1369   : > { %v8941_v57 = vpop.eup %8940 }
0x136a   : > { %v8943_v58 = vpop.eup %8942  ;;  %v3607_v34 = vsel %vm1782_vm5, %v8941_v57, 0.0 }
0x136b   : > { %3608 = vadd.xlane.f32.xlu1 %v3607_v34  ;;  %v3604_v31 = vsel %vm1782_vm5, %v8943_v58, 0.0 }
0x136c   : > { %3605 = vadd.xlane.f32.xlu0 %v3604_v31  ;;  %v4119_v31 = vsel %vm2262_vm6, %v3311_v56, 0 }
0x13f8   : > { %v3609_v59 = vpop.xlane.xlu1 %3608 }
0x13f9   : > { %8944 = vrcp.f32 %v3609_v59  ;;  %v3606_v60 = vpop.xlane.xlu0 %3605  ;;  %v8764_v59 = vld [vmem:[%s9256_s13 + $0x20] sm:$0xff]  }
0x13fa   : > { %8946 = vrcp.f32 %v3606_v60  ;;  %v8765_v60 = vld [vmem:[%s9256_s13 + $0x28] sm:$0xff]  }
0x1403   : > { %v8945_v61 = vpop.eup %8944 }
0x1404   : > { %v8947_v62 = vpop.eup %8946  ;;  %v3613_v1 = vmul.f32 %v8945_v61, %v8941_v57  ;;  %v3312_v61 = vld [vmem:[%s9268_s25 + $0x4] sm:$0xf] }
0x1405   : > { %v3612_v63 = vmul.f32 %v8947_v62, %v8943_v58  ;;  %v4072_v62 = vsel %vm2262_vm6, %v3312_v61, 0 }
0x1407   : > { %8463 = vmatprep.mubr.msk.f32.mxu0 %vm1782_vm5, %v3612_v63 }
0x1408   : > { %8464 = vmatmul.mubr.msk.f32.vlgmr.msra.gmra.mrb[48].mxu0 %vm1782_vm5, %v3613_v1  ;;  %v8766_v1 = vld [vmem:[%s10177_s23 + $0x20] sm:$0xff]  }
0x1409   : > { %8475 = vmatpush3.bf16.msra.mxu0 %v8760_v0  ;;  %8478 = vmatprep.mubr.msk.bf16.mxu0 %vm9030_vm1, %v9029_v4 }
0x140a   : > { %8476 = vmatprep.subr.bf16.mxu0 %v9029_v4 }
0x140d   : > { %8477 = vmatpush3.bf16.msra.mxu0 %v8761_v5 }
0x1410   : > { %8479 = vmatmul.mubr.msk.bf16.vlgmr.msra.gmra.mrb[52].mxu0 %vm1527_vm2, %v9537_v50 }
0x1411   : > { %8494 = vmatprep.mubr.msk.f32.mxu0 %vm1690_vm3, %v3749_v7 }
0x14db   : > { %v9606_v8 = vpop.f32.mrb[48].mxu0 }
0x14dc   : > { %v9608_v9 = vpop.f32.mrb[49].mxu0 }
0x14dd   : > { %v3695_v11 = vpack.c.bf16 %v9606_v8, %v9608_v9  ;;  %v8767_v9 = vld [vmem:[%s10177_s23 + $0x28] sm:$0xff]  }
0x14e3   : > { %v3807_v13 = vpop.f32.mrb[52].mxu0 }
0x14e4   : > { %v8480_v14 = vpop.f32.mrb[53].mxu0  ;;  %v3808_v16 = vadd.f32 %v7679_v12, %v3807_v13  ;;  %v7699_v13 = vld [vmem:[%s10182_s9 + $0x2] ss:$0 sm:$0xff] }
0x14e5   : > { %v3810_v15 = vpop.f32.mrb[54].mxu0 }
0x14e6   : > { %v3811_v17 = vadd.f32 %v7679_v12, %v3810_v15  ;;  %v8481_v18 = vpop.f32.mrb[55].mxu0 }
0x14e8   : > { %v8654_v19 = vpack.c.bf16 %v3811_v17, %v3808_v16 }
0x14ea   : > { %8656 = vmatprep.subr.msk.bf16.mxu0 %vm9321_vm4, %v8654_v19 }
0x14eb   : > { %8659 = vmatpush3.bf16.xpose.msk.msra.mxu0 %vm9321_vm4, %v8654_v19 }
0x14ec   : > { %8504 = vmatprep.subr.bf16.mxu0 %v9029_v4 }
0x14f2   : > { %8495 = vmatmul.mubr.msk.f32.vlgmr.msra.gmra.mrb[50].mxu0 %vm1690_vm3, %v3752_v43  ;;  %v8489_v43 = vpop.f32.mrb[55].mxu1 }
0x14f3   : > { %8506 = vmatprep.mubr.msk.bf16.mxu0 %vm9030_vm1, %v9029_v4  ;;  %8505 = vmatpush3.bf16.msra.mxu0 %v4072_v62 }
0x14f4   : > { %8516 = vmatprep.subr.bf16.mxu0 %v9029_v4 }
0x15c5   : > { %v8496_v24 = vpop.f32.mrb[50].mxu0 }
0x15c6   : > { %v3961_v25 = vmul.f32 0.35355338, %v8496_v24  ;;  %v3951_v27 = vpop.f32.mrb[51].mxu0 }
0x15c7   : > { %v3960_v28 = vmul.f32 0.35355338, %v3951_v27 }
0x15c8   : > { %v3963_v32 = vadd.f32 %v9627_v30, %v3961_v25 }
0x15c9   : > { %v3962_v36 = vadd.f32 %v9631_v35, %v3960_v28 }
0x15ca   : > { %v3967_v37 = vsel %vm1782_vm5, %v3963_v32, -inf }
0x15cb   : > { %3968 = vmax.xlane.f32.xlu1 %v3967_v37  ;;  %v3964_v38 = vsel %vm1782_vm5, %v3962_v36, -inf }
0x15cc   : > { %3965 = vmax.xlane.f32.xlu0 %v3964_v38 }
0x1658   : > { %v3969_v26 = vpop.xlane.xlu1 %3968 }
0x1659   : > { %v3971_v44 = vsub.f32 %v3963_v32, %v3969_v26  ;;  %v3966_v45 = vpop.xlane.xlu0 %3965 }
0x165a   : > { %v3970_v46 = vsub.f32 %v3962_v36, %v3966_v45  ;;  %v7695_v36 = vld [vmem:[%s10183_s17 + $0x2] ss:$0 sm:$0xff] }
0x165b   : > { %v3974_v47 = vmul.f32 1.442695, %v3971_v44 }
0x165c   : > { %v3972_v48 = vmul.f32 1.442695, %v3970_v46 }
0x165d   : > { %8948 = vpow2.f32 %v3974_v47 }
0x165e   : > { %8950 = vpow2.f32 %v3972_v48 }
0x1667   : > { %v8949_v49 = vpop.eup %8948 }
0x1668   : > { %v8951_v51 = vpop.eup %8950  ;;  %v3979_v52 = vsel %vm1782_vm5, %v8949_v49, 0.0 }
0x1669   : > { %3980 = vadd.xlane.f32.xlu1 %v3979_v52  ;;  %v3976_v10 = vsel %vm1782_vm5, %v8951_v51, 0.0 }
0x166a   : > { %3977 = vadd.xlane.f32.xlu0 %v3976_v10 }
0x16f6   : > { %v3981_v53 = vpop.xlane.xlu1 %3980 }
0x16f7   : > { %8952 = vrcp.f32 %v3981_v53  ;;  %v3978_v54 = vpop.xlane.xlu0 %3977 }
0x16f8   : > { %8954 = vrcp.f32 %v3978_v54 }
0x1701   : > { %v8953_v55 = vpop.eup %8952 }
0x1702   : > { %v8955_v57 = vpop.eup %8954  ;;  %v3985_v34 = vmul.f32 %v8953_v55, %v8949_v49 }
0x1703   : > { %v3984_v58 = vmul.f32 %v8955_v57, %v8951_v51 }
0x1705   : > { %8501 = vmatprep.mubr.msk.f32.mxu1 %vm1782_vm5, %v3984_v58 }
0x1706   : > { %8502 = vmatmul.mubr.msk.f32.vlgmr.msra.gmra.mrb[38].mxu1 %vm1782_vm5, %v3985_v34 }
0x1707   : > { %8511 = vmatpush3.bf16.msra.mxu1 %v4119_v31  ;;  %8512 = vmatprep.mubr.msk.bf16.mxu1 %vm9030_vm1, %v9029_v4 }
0x1708   : > { %8524 = vmatprep.subr.bf16.mxu1 %v9029_v4 }
0x170a   : > { %8513 = vmatmul.mubr.msk.bf16.vlgmr.msra.gmra.mrb[56].mxu1 %vm1690_vm3, %v3695_v11 }
0x170b   : > { %8525 = vmatpush3.bf16.msra.mxu1 %v8764_v59  ;;  %8528 = vmatprep.mubr.msk.bf16.mxu1 %vm9030_vm1, %v9029_v4  ;;  %v7703_v59 = vld [vmem:[%s9265_s19 + $0x2] ss:$0 sm:$0xff] }
0x170c   : > { %8526 = vmatprep.subr.bf16.mxu1 %v9029_v4 }
0x170f   : > { %8527 = vmatpush3.bf16.msra.mxu1 %v8765_v60 }
0x1712   : > { %8529 = vmatmul.mubr.msk.bf16.vlgmr.msra.gmra.mrb[60].mxu1 %vm1527_vm2, %v9537_v50 }
0x17d9   : > { %v8503_v63 = vpop.f32.mrb[38].mxu1 }
0x17da   : > { %v4058_v0 = vpop.f32.mrb[39].mxu1 }
0x17db   : > { %v4067_v5 = vpack.c.bf16 %v8503_v63, %v4058_v0 }
0x17dd   : > { %8507 = vmatmul.mubr.msk.bf16.vlgmr.msra.gmra.mrb[56].mxu0 %vm1690_vm3, %v4067_v5  ;;  %v4155_v7 = vpop.f32.mrb[56].mxu1 }
0x17de   : > { %v8514_v8 = vpop.f32.mrb[57].mxu1  ;;  %8517 = vmatpush3.bf16.msra.mxu0 %v8766_v1  ;;  %8520 = vmatprep.mubr.msk.bf16.mxu0 %vm9030_vm1, %v9029_v4  ;;  %v3313_v1 = vld [vmem:[%s9268_s25 + $0x8] sm:$0xf] }
0x17df   : > { %v4158_v11 = vpop.f32.mrb[58].mxu1  ;;  %8518 = vmatprep.subr.bf16.mxu0 %v9029_v4  ;;  %v4538_v5 = vsel %vm2262_vm6, %v3313_v1, 0 }
0x17e0   : > { %v8515_v12 = vpop.f32.mrb[59].mxu1 }
0x17e2   : > { %8519 = vmatpush3.bf16.msra.mxu0 %v8767_v9 }
0x17e3   : > { %8532 = vmatprep.subr.bf16.mxu0 %v9029_v4 }
0x17e5   : > { %8521 = vmatmul.mubr.msk.bf16.vlgmr.msra.gmra.mrb[60].mxu0 %vm1527_vm2, %v9558_v6  ;;  %v4273_v14 = vpop.f32.mrb[60].mxu1 }
0x17e6   : > { %v4274_v15 = vadd.f32 %v7699_v13, %v4273_v14  ;;  %v8530_v16 = vpop.f32.mrb[61].mxu1  ;;  %8536 = vmatprep.mubr.msk.bf16.mxu0 %vm9030_vm1, %v9029_v4  ;;  %8533 = vmatpush3.bf16.msra.mxu0 %v8768_v33 }
0x17e7   : > { %v4276_v17 = vpop.f32.mrb[62].mxu1  ;;  %8534 = vmatprep.subr.bf16.mxu0 %v9029_v4 }
0x17e8   : > { %v4277_v18 = vadd.f32 %v7699_v13, %v4276_v17  ;;  %v8531_v19 = vpop.f32.mrb[63].mxu1  ;;  %v8770_v13 = vld [vmem:[%s10177_s23 + $0x30] sm:$0xff]  }
0x17ea   : > { %v8664_v20 = vpack.c.bf16 %v4277_v18, %v4274_v15  ;;  %8535 = vmatpush3.bf16.msra.mxu0 %v8769_v42  ;;  %v8771_v15 = vld [vmem:[%s10177_s23 + $0x38] sm:$0xff]   ;;  %v8772_v18 = vld [vmem:[%s9256_s13 + $0x30] sm:$0xff]   ;;  %v7718_v42 = vld [vmem:[%s10182_s9 + $0x3] ss:$0 sm:$0xff] }
0x17eb   : > { %8554 = vmatprep.subr.bf16.mxu0 %v9029_v4 }
0x17ec   : > { %8666 = vmatprep.subr.msk.bf16.mxu1 %vm9321_vm4, %v8664_v20 }
0x17ed   : > { %8669 = vmatpush3.bf16.xpose.msk.msra.mxu1 %vm9321_vm4, %v8664_v20  ;;  %8537 = vmatmul.mubr.msk.bf16.vlgmr.msra.gmra.mrb[64].mxu0 %vm1527_vm2, %v9537_v50  ;;  %v8773_v20 = vld [vmem:[%s9256_s13 + $0x38] sm:$0xff]  }
0x17ee   : > { %8556 = vmatprep.mubr.msk.bf16.mxu0 %vm9030_vm1, %v9029_v4  ;;  %8555 = vmatpush3.bf16.msra.mxu0 %v4538_v5 }
0x17ef   : > { %8568 = vmatprep.subr.bf16.mxu0 %v9029_v4 }
0x18b0   : > { %v4108_v21 = vpop.f32.mrb[56].mxu0 }
0x18b1   : > { %v9677_v24 = vadd.f32 %v4155_v7, %v4108_v21  ;;  %v8508_v25 = vpop.f32.mrb[57].mxu0  ;;  %v7714_v21 = vld [vmem:[%s10183_s17 + $0x3] ss:$0 sm:$0xff] }
0x18b2   : > { %v4111_v27 = vpop.f32.mrb[58].mxu0 }
0x18b3   : > { %v9679_v28 = vadd.f32 %v4158_v11, %v4111_v27  ;;  %v8509_v32 = vpop.f32.mrb[59].mxu0 }
0x18b8   : > { %v4214_v37 = vpop.f32.mrb[60].mxu0 }
0x18b9   : > { %v4215_v38 = vadd.f32 %v7695_v36, %v4214_v37  ;;  %v8522_v39 = vpop.f32.mrb[61].mxu0 }
0x18ba   : > { %v4217_v29 = vpop.f32.mrb[62].mxu0 }
0x18bb   : > { %v4218_v40 = vadd.f32 %v7695_v36, %v4217_v29  ;;  %v8523_v41 = vpop.f32.mrb[63].mxu0  ;;  %8544 = vmatprep.mubr.msk.f32.mxu1 %vm1690_vm3, %v4215_v38 }
0x18bd   : > { %8545 = vmatmul.mubr.msk.f32.vlgmr.msra.gmra.mrb[64].mxu1 %vm1690_vm3, %v4218_v40 }
0x18c0   : > { %v4332_v34 = vpop.f32.mrb[64].mxu0 }
0x18c1   : > { %v8538_v31 = vpop.f32.mrb[65].mxu0  ;;  %v4333_v61 = vadd.f32 %v7703_v59, %v4332_v34 }
0x18c2   : > { %v4335_v60 = vpop.f32.mrb[66].mxu0 }
0x18c3   : > { %v4336_v62 = vadd.f32 %v7703_v59, %v4335_v60  ;;  %v8539_v63 = vpop.f32.mrb[67].mxu0 }
0x18c5   : > { %v8670_v0 = vpack.c.bf16 %v4336_v62, %v4333_v61  ;;  %v7722_v61 = vld [vmem:[%s9265_s19 + $0x3] ss:$0 sm:$0xff] }
0x18c7   : > { %8671 = vmatprep.subr.bf16.mxu1 %v8670_v0 }
0x18c8   : > { %8673 = vmatpush3.bf16.msra.mxu1 %v8670_v0 }
0x18c9   : > { %8560 = vmatprep.subr.bf16.mxu1 %v9029_v4 }
0x1990   : > { %v8546_v43 = vpop.f32.mrb[64].mxu1 }
0x1991   : > { %v4427_v23 = vmul.f32 0.35355338, %v8546_v43  ;;  %v4417_v26 = vpop.f32.mrb[65].mxu1 }
0x1992   : > { %v4426_v44 = vmul.f32 0.35355338, %v4417_v26 }
0x1993   : > { %v4429_v45 = vadd.f32 %v9627_v30, %v4427_v23 }
0x1994   : > { %v4428_v46 = vadd.f32 %v9631_v35, %v4426_v44 }
0x1995   : > { %v4433_v47 = vsel %vm1782_vm5, %v4429_v45, -inf }
0x1996   : > { %4434 = vmax.xlane.f32.xlu1 %v4433_v47  ;;  %v4430_v48 = vsel %vm1782_vm5, %v4428_v46, -inf }
0x1997   : > { %4431 = vmax.xlane.f32.xlu0 %v4430_v48 }
0x1a23   : > { %v4435_v49 = vpop.xlane.xlu1 %4434 }
0x1a24   : > { %v4437_v51 = vsub.f32 %v4429_v45, %v4435_v49  ;;  %v4432_v52 = vpop.xlane.xlu0 %4431 }
0x1a25   : > { %v4436_v10 = vsub.f32 %v4428_v46, %v4432_v52 }
0x1a26   : > { %v4440_v53 = vmul.f32 1.442695, %v4437_v51 }
0x1a27   : > { %v4438_v54 = vmul.f32 1.442695, %v4436_v10 }
0x1a28   : > { %8956 = vpow2.f32 %v4440_v53 }
0x1a29   : > { %8958 = vpow2.f32 %v4438_v54 }
0x1a32   : > { %v8957_v55 = vpop.eup %8956 }
0x1a33   : > { %v8959_v56 = vpop.eup %8958  ;;  %v4445_v57 = vsel %vm1782_vm5, %v8957_v55, 0.0 }
0x1a34   : > { %4446 = vadd.xlane.f32.xlu1 %v4445_v57  ;;  %v4442_v58 = vsel %vm1782_vm5, %v8959_v56, 0.0 }
0x1a35   : > { %4443 = vadd.xlane.f32.xlu0 %v4442_v58 }
0x1ac1   : > { %v4447_v7 = vpop.xlane.xlu1 %4446 }
0x1ac2   : > { %8960 = vrcp.f32 %v4447_v7  ;;  %v4444_v8 = vpop.xlane.xlu0 %4443  ;;  %v3314_v7 = vld [vmem:[%s9268_s25 + $0xc] sm:$0xf] }
0x1ac3   : > { %8962 = vrcp.f32 %v4444_v8  ;;  %v4959_v8 = vsel %vm2262_vm6, %v3314_v7, 0 }
0x1acc   : > { %v8961_v9 = vpop.eup %8960 }
0x1acd   : > { %v8963_v11 = vpop.eup %8962  ;;  %v4451_v14 = vmul.f32 %v8961_v9, %v8957_v55 }
0x1ace   : > { %v4450_v12 = vmul.f32 %v8963_v11, %v8959_v56 }
0x1ad0   : > { %8551 = vmatprep.mubr.msk.f32.mxu1 %vm1782_vm5, %v4450_v12 }
0x1ad1   : > { %8552 = vmatmul.mubr.msk.f32.vlgmr.msra.gmra.mrb[66].mxu1 %vm1782_vm5, %v4451_v14 }
0x1ad2   : > { %8561 = vmatpush3.bf16.msra.mxu1 %v8770_v13  ;;  %8564 = vmatprep.mubr.msk.bf16.mxu1 %vm9030_vm1, %v9029_v4 }
0x1ad3   : > { %8562 = vmatprep.subr.bf16.mxu1 %v9029_v4 }
0x1ad6   : > { %8563 = vmatpush3.bf16.msra.mxu1 %v8771_v15 }
0x1ad7   : > { %8576 = vmatprep.subr.bf16.mxu1 %v9029_v4 }
0x1ad9   : > { %8565 = vmatmul.mubr.msk.bf16.vlgmr.msra.gmra.mrb[68].mxu1 %vm1527_vm2, %v9558_v6 }
0x1ada   : > { %8580 = vmatprep.mubr.msk.bf16.mxu1 %vm9030_vm1, %v9029_v4 }
0x1ba4   : > { %v8553_v16 = vpop.f32.mrb[66].mxu1 }
0x1ba5   : > { %v4524_v17 = vpop.f32.mrb[67].mxu1 }
0x1ba6   : > { %v4533_v19 = vpack.c.bf16 %v8553_v16, %v4524_v17 }
0x1ba8   : > { %8557 = vmatmul.mubr.msk.bf16.vlgmr.msra.gmra.mrb[68].mxu0 %vm1690_vm3, %v4533_v19  ;;  %v7733_v19 = vld [vmem:[%s1397_s28] ss:$0 sm:$0xff] }
0x1ba9   : > { %8569 = vmatpush3.bf16.msra.mxu0 %v8772_v18  ;;  %8572 = vmatprep.mubr.msk.bf16.mxu0 %vm9030_vm1, %v9029_v4 }
0x1baa   : > { %8570 = vmatprep.subr.bf16.mxu0 %v9029_v4 }
0x1bac   : > { %v4635_v25 = vpop.f32.mrb[68].mxu1 }
0x1bad   : > { %v8566_v6 = vpop.f32.mrb[69].mxu1  ;;  %8571 = vmatpush3.bf16.msra.mxu0 %v8773_v20  ;;  %v4636_v32 = vadd.f32 %v7714_v21, %v4635_v25 }
0x1bae   : > { %v4638_v27 = vpop.f32.mrb[70].mxu1 }
0x1baf   : > { %v4639_v36 = vadd.f32 %v7714_v21, %v4638_v27  ;;  %v8567_v37 = vpop.f32.mrb[71].mxu1 }
0x1bb0   : > { %8573 = vmatmul.mubr.msk.bf16.vlgmr.msra.gmra.mrb[72].mxu0 %vm1527_vm2, %v9537_v50 }
0x1bb1   : > { %8588 = vmatprep.mubr.msk.f32.mxu0 %vm1690_vm3, %v4636_v32 }
0x1c7b   : > { %v4574_v38 = vpop.f32.mrb[68].mxu0 }
0x1c7c   : > { %v9726_v39 = vadd.f32 %v4574_v38, %v9677_v24  ;;  %v8558_v29 = vpop.f32.mrb[69].mxu0  ;;  %v8774_v24 = vld [vmem:[%s9262_s14 + $0x30] sm:$0xff]  }
0x1c7d   : > { %v4577_v40 = vpop.f32.mrb[70].mxu0  ;;  %8577 = vmatpush3.bf16.msra.mxu1 %v8774_v24  ;;  %v5059_v24 = vld [vmem:[%s9278_s10 + $0x8] sm:$0xff] }
0x1c7e   : > { %v9729_v41 = vadd.f32 %v4577_v40, %v9679_v28  ;;  %v8559_v33 = vpop.f32.mrb[71].mxu0  ;;  %v8775_v28 = vld [vmem:[%s9262_s14 + $0x38] sm:$0xff]   ;;  %8578 = vmatprep.subr.bf16.mxu1 %v9029_v4 }
0x1c81   : > { %8579 = vmatpush3.bf16.msra.mxu1 %v8775_v28 }
0x1c82   : > { %8598 = vmatprep.subr.bf16.mxu1 %v9029_v4 }
0x1c83   : > { %v4694_v43 = vpop.f32.mrb[72].mxu0 }
0x1c84   : > { %v8574_v23 = vpop.f32.mrb[73].mxu0  ;;  %v4695_v44 = vadd.f32 %v7718_v42, %v4694_v43  ;;  %8581 = vmatmul.mubr.msk.bf16.vlgmr.msra.gmra.mrb[72].mxu1 %vm1527_vm2, %v9537_v50 }
0x1c85   : > { %v4697_v26 = vpop.f32.mrb[74].mxu0  ;;  %8600 = vmatprep.mubr.msk.bf16.mxu1 %vm9030_vm1, %v9029_v4  ;;  %8599 = vmatpush3.bf16.msra.mxu1 %v4959_v8 }
0x1c86   : > { %v4698_v45 = vadd.f32 %v7718_v42, %v4697_v26  ;;  %v8575_v46 = vpop.f32.mrb[75].mxu0 }
0x1c87   : > { %v5058_v46 = vld [vmem:[%s9278_s10] sm:$0xff] }
0x1c88   : > { %v8674_v47 = vpack.c.bf16 %v4698_v45, %v4695_v44 }
0x1c8a   : > { %8676 = vmatprep.subr.msk.bf16.mxu0 %vm9321_vm4, %v8674_v47 }
0x1c8b   : > { %8679 = vmatpush3.bf16.xpose.msk.msra.mxu0 %vm9321_vm4, %v8674_v47  ;;  %v5066_v47 = vld [vmem:[%s9278_s10 + $0x40] sm:$0xff] }
0x1c8c   : > { %v7737_v28 = vcombine.high %v5058_v46, %v5066_v47 }
0x1c92   : > { %8589 = vmatmul.mubr.msk.f32.vlgmr.msra.gmra.mrb[76].mxu0 %vm1690_vm3, %v4639_v36 }
0x1d57   : > { %v4753_v59 = vpop.f32.mrb[72].mxu1 }
0x1d58   : > { %v8582_v60 = vpop.f32.mrb[73].mxu1  ;;  %v4754_v63 = vadd.f32 %v7722_v61, %v4753_v59 }
0x1d59   : > { %v4756_v62 = vpop.f32.mrb[74].mxu1 }
0x1d5a   : > { %v4757_v0 = vadd.f32 %v7722_v61, %v4756_v62  ;;  %v8583_v1 = vpop.f32.mrb[75].mxu1 }
0x1d5c   : > { %v8680_v5 = vpack.c.bf16 %v4757_v0, %v4754_v63 }
0x1d5e   : > { %8681 = vmatprep.subr.bf16.mxu0 %v8680_v5 }
0x1d5f   : > { %8683 = vmatpush3.bf16.msra.mxu0 %v8680_v5 }
0x1d60   : > { %5338 = vmatprep.subr.bf16.mxu0 %v7737_v28  ;;  %v5073_v28 = vld [vmem:[%s9278_s10 + $0x78] sm:$0xff] }
0x1d65   : > { %v8590_v48 = vpop.f32.mrb[76].mxu0 }
0x1d66   : > { %v4848_v49 = vmul.f32 0.35355338, %v8590_v48  ;;  %v4838_v22 = vpop.f32.mrb[77].mxu0  ;;  %v5067_v48 = vld [vmem:[%s9278_s10 + $0x48] sm:$0xff] }
0x1d67   : > { %v4847_v51 = vmul.f32 0.35355338, %v4838_v22  ;;  %v7738_v22 = vcombine.low %v5059_v24, %v5067_v48 }
0x1d68   : > { %v4850_v52 = vadd.f32 %v9627_v30, %v4848_v49  ;;  %v7736_v49 = vcombine.low %v5058_v46, %v5066_v47  ;;  %v5064_v46 = vld [vmem:[%s9278_s10 + $0x30] sm:$0xff] }
0x1d69   : > { %v4849_v10 = vadd.f32 %v9631_v35, %v4847_v51  ;;  %v7739_v51 = vcombine.high %v5059_v24, %v5067_v48  ;;  %v5072_v47 = vld [vmem:[%s9278_s10 + $0x70] sm:$0xff]  ;;  %v5065_v24 = vld [vmem:[%s9278_s10 + $0x38] sm:$0xff] }
0x1d6a   : > { %v4854_v53 = vsel %vm1782_vm5, %v4850_v52, -inf }
0x1d6b   : > { %4855 = vmax.xlane.f32.xlu1 %v4854_v53  ;;  %v4851_v54 = vsel %vm1782_vm5, %v4849_v10, -inf  ;;  %5381 = vmatprep.subr.bf16.mxu1 %v7739_v51  ;;  %v5075_v53 = vld [vmem:[%s9278_s10 + $0x88] sm:$0xff]  ;;  %v7751_v51 = vcombine.high %v5065_v24, %v5073_v28 }
0x1d6c   : > { %4852 = vmax.xlane.f32.xlu0 %v4851_v54 }
0x1df8   : > { %v4856_v55 = vpop.xlane.xlu1 %4855 }
0x1df9   : > { %v4858_v50 = vsub.f32 %v4850_v52, %v4856_v55  ;;  %v4853_v56 = vpop.xlane.xlu0 %4852  ;;  %v5074_v52 = vld [vmem:[%s9278_s10 + $0x80] sm:$0xff]  ;;  %v5083_v55 = vld [vmem:[%s9278_s10 + $0xc8] sm:$0xff] }
0x1dfa   : > { %v4857_v57 = vsub.f32 %v4849_v10, %v4853_v56  ;;  %v5082_v10 = vld [vmem:[%s9278_s10 + $0xc0] sm:$0xff]  ;;  %v7754_v56 = vcombine.low %v5075_v53, %v5083_v55 }
0x1dfb   : > { %v4861_v4 = vmul.f32 1.442695, %v4858_v50  ;;  %v7753_v54 = vcombine.high %v5074_v52, %v5082_v10  ;;  %v7752_v50 = vcombine.low %v5074_v52, %v5082_v10  ;;  %v5080_v52 = vld [vmem:[%s9278_s10 + $0xb0] sm:$0xff] }
0x1dfc   : > { %v4859_v58 = vmul.f32 1.442695, %v4857_v57  ;;  %v7755_v57 = vcombine.high %v5075_v53, %v5083_v55  ;;  %v5088_v10 = vld [vmem:[%s9278_s10 + $0xf0] sm:$0xff]  ;;  %v5081_v53 = vld [vmem:[%s9278_s10 + $0xb8] sm:$0xff]  ;;  %v7748_v55 = vcombine.low %v5064_v46, %v5072_v47 }
0x1dfd   : > { %8964 = vpow2.f32 %v4861_v4  ;;  %v5060_v4 = vld [vmem:[%s9278_s10 + $0x10] sm:$0xff] }
0x1dfe   : > { %8966 = vpow2.f32 %v4859_v58  ;;  %v5068_v58 = vld [vmem:[%s9278_s10 + $0x50] sm:$0xff] }
0x1dff   : > { %v7740_v59 = vcombine.low %v5060_v4, %v5068_v58 }
0x1e07   : > { %v8965_v34 = vpop.eup %8964 }
0x1e08   : > { %v8967_v30 = vpop.eup %8966  ;;  %v4866_v35 = vsel %vm1782_vm5, %v8965_v34, 0.0 }
0x1e09   : > { %4867 = vadd.xlane.f32.xlu1 %v4866_v35  ;;  %v4863_v31 = vsel %vm1782_vm5, %v8967_v30, 0.0  ;;  %v7741_v35 = vcombine.high %v5060_v4, %v5068_v58  ;;  %v7764_v4 = vcombine.low %v5080_v52, %v5088_v10 }
0x1e0a   : > { %4864 = vadd.xlane.f32.xlu0 %v4863_v31  ;;  %v5069_v31 = vld [vmem:[%s9278_s10 + $0x58] sm:$0xff] }
0x1e96   : > { %v4868_v9 = vpop.xlane.xlu1 %4867 }
0x1e97   : > { %8968 = vrcp.f32 %v4868_v9  ;;  %v4865_v11 = vpop.xlane.xlu0 %4864  ;;  %v7734_v9 = vld [vmem:[%s1400_s30] ss:$0 sm:$0xff] }
0x1e98   : > { %8970 = vrcp.f32 %v4865_v11 }
0x1ea1   : > { %v8969_v12 = vpop.eup %8968 }
0x1ea2   : > { %v8971_v13 = vpop.eup %8970  ;;  %v4872_v15 = vmul.f32 %v8969_v12, %v8965_v34  ;;  %v5061_v34 = vld [vmem:[%s9278_s10 + $0x18] sm:$0xff] }
0x1ea3   : > { %v4871_v14 = vmul.f32 %v8971_v13, %v8967_v30  ;;  %v9031_v30 = vmov 0   ;;  %v7742_v60 = vcombine.low %v5061_v34, %v5069_v31  ;;  %v7743_v61 = vcombine.high %v5061_v34, %v5069_v31  ;;  %v8776_v34 = vld [vmem:[%s9287_s20 + $0x40] sm:$0xff]  }
0x1ea4   : > { %v8778_v31 = vld [vmem:[%s9287_s20] sm:$0xff]  }
0x1ea5   : > { %8595 = vmatprep.mubr.msk.f32.mxu0 %vm1782_vm5, %v4871_v14 }
0x1ea6   : > { %8596 = vmatmul.mubr.msk.f32.vlgmr.msra.gmra.mrb[78].mxu0 %vm1782_vm5, %v4872_v15  ;;  %v7735_v15 = vld [vmem:[%s1403_s6] ss:$0 sm:$0xff] }
0x1ea7   : > { %5339 = vmatpush1.bf16.msra.mxu0 %v7736_v49  ;;  %5370 = vmatprep.mubr.bf16.mxu0 %v9031_v30 }
0x1ea8   : > { %5340 = vmatprep.subr.bf16.mxu0 %v7753_v54  ;;  %v5089_v54 = vld [vmem:[%s9278_s10 + $0xf8] sm:$0xff] }
0x1ea9   : > { %v7766_v58 = vcombine.low %v5081_v53, %v5089_v54 }
0x1eab   : > { %5341 = vmatpush1.bf16.msra.mxu0 %v7752_v50  ;;  %v7750_v50 = vcombine.low %v5065_v24, %v5073_v28 }
0x1eac   : > { %5424 = vmatprep.subr.bf16.mxu0 %v7741_v35  ;;  %v8777_v35 = vld [vmem:[%s9287_s20 + $0xc0] sm:$0xff]  }
0x1f79   : > { %v8597_v16 = vpop.f32.mrb[78].mxu0 }
0x1f7a   : > { %v4945_v17 = vpop.f32.mrb[79].mxu0 }
0x1f7b   : > { %v4954_v18 = vpack.c.bf16 %v8597_v16, %v4945_v17  ;;  %v5076_v17 = vld [vmem:[%s9278_s10 + $0x90] sm:$0xff] }
0x1f7d   : > { %8601 = vmatmul.mubr.msk.bf16.vlgmr.msra.gmra.mrb[76].mxu1 %vm1690_vm3, %v4954_v18  ;;  %v5084_v18 = vld [vmem:[%s9278_s10 + $0xd0] sm:$0xff] }
0x1f7e   : > { %5382 = vmatpush1.bf16.msra.mxu1 %v7738_v22  ;;  %5413 = vmatprep.mubr.bf16.mxu1 %v9031_v30  ;;  %v7749_v22 = vcombine.high %v5064_v46, %v5072_v47 }
0x1f7f   : > { %5383 = vmatprep.subr.bf16.mxu1 %v7755_v57  ;;  %v7767_v57 = vcombine.high %v5081_v53, %v5089_v54 }
0x1f82   : > { %5384 = vmatpush1.bf16.msra.mxu1 %v7754_v56  ;;  %v7765_v56 = vcombine.high %v5080_v52, %v5088_v10 }
0x1f83   : > { %5467 = vmatprep.subr.bf16.mxu1 %v7743_v61  ;;  %v8781_v61 = vld [vmem:[%s9287_s20 + $0xc8] sm:$0xff]  }
0x2050   : > { %v4995_v20 = vpop.f32.mrb[76].mxu1 }
0x2051   : > { %v5002_v21 = vadd.f32 %v4995_v20, %v9726_v39  ;;  %v8602_v25 = vpop.f32.mrb[77].mxu1  ;;  %v5085_v20 = vld [vmem:[%s9278_s10 + $0xd8] sm:$0xff] }
0x2052   : > { %v4998_v6 = vpop.f32.mrb[78].mxu1 }
0x2053   : > { %v5010_v27 = vadd.f32 %v7733_v19, %v5002_v21  ;;  %v5003_v32 = vadd.f32 %v4998_v6, %v9729_v41  ;;  %v8603_v36 = vpop.f32.mrb[79].mxu1 }
0x2054   : > { %v5062_v36 = vld [vmem:[%s9278_s10 + $0x20] sm:$0xff] }
0x2055   : > { %v5011_v37 = vadd.f32 %v7733_v19, %v5003_v32  ;;  %v5012_v38 = vadd.f32 %v5010_v27, %v9551_v2  ;;  %v5077_v19 = vld [vmem:[%s9278_s10 + $0x98] sm:$0xff]  ;;  %v7757_v27 = vcombine.high %v5076_v17, %v5084_v18 }
0x2056   : > { %v7759_v32 = vcombine.high %v5077_v19, %v5085_v20 }
0x2057   : > { %v5016_v29 = vsel %vm1527_vm2, %v5012_v38, 0.0  ;;  %v5013_v40 = vadd.f32 %v5011_v37, %v9553_v3  ;;  %v5070_v37 = vld [vmem:[%s9278_s10 + $0x60] sm:$0xff] }
0x2058   : > { %5017 = vadd.xlane.f32.xlu0 %v5016_v29  ;;  %v5071_v29 = vld [vmem:[%s9278_s10 + $0x68] sm:$0xff] }
0x2059   : > { %v5019_v33 = vsel %vm1527_vm2, %v5013_v40, 0.0 }
0x205a   : > { %5020 = vadd.xlane.f32.xlu1 %v5019_v33  ;;  %v7758_v33 = vcombine.low %v5077_v19, %v5085_v20  ;;  %v8799_v19 = vld [vmem:[%s9287_s20 + $0xa8] sm:$0xff]   ;;  %v8800_v20 = vld [vmem:[%s9287_s20 + $0x70] sm:$0xff]  }
0x20e5   : > { %v5018_v39 = vpop.xlane.xlu0 %5017 }
0x20e6   : > { %v5022_v42 = vmul.f32 0.03125, %v5018_v39  ;;  %v7745_v39 = vcombine.high %v5062_v36, %v5070_v37 }
0x20e7   : > { %v5021_v43 = vpop.xlane.xlu1 %5020 }
0x20e8   : > { %v5024_v41 = vsub.f32 %v5012_v38, %v5022_v42  ;;  %v5023_v23 = vmul.f32 0.03125, %v5021_v43  ;;  %v5063_v38 = vld [vmem:[%s9278_s10 + $0x28] sm:$0xff]  ;;  %v5078_v43 = vld [vmem:[%s9278_s10 + $0xa0] sm:$0xff] }
0x20e9   : > { %v7747_v42 = vcombine.high %v5063_v38, %v5071_v29 }
0x20ea   : > { %v5025_v26 = vsub.f32 %v5013_v40, %v5023_v23  ;;  %v5026_v44 = vmul.f32 %v5024_v41, %v5024_v41  ;;  %v7756_v40 = vcombine.low %v5076_v17, %v5084_v18  ;;  %v5079_v23 = vld [vmem:[%s9278_s10 + $0xa8] sm:$0xff] }
0x20eb   : > { %v8797_v17 = vld [vmem:[%s9287_s20 + $0xe8] sm:$0xff]  }
0x20ec   : > { %v5028_v2 = vsel %vm1527_vm2, %v5026_v44, 0.0  ;;  %v5027_v45 = vmul.f32 %v5025_v26, %v5025_v26  ;;  %v7744_v44 = vcombine.low %v5062_v36, %v5070_v37  ;;  %v8798_v18 = vld [vmem:[%s9287_s20 + $0x28] sm:$0xff]   ;;  %v8804_v36 = vld [vmem:[%s9287_s20 + $0x78] sm:$0xff]  }
0x20ed   : > { %5029 = vadd.xlane.f32.xlu0 %v5028_v2  ;;  %v7746_v2 = vcombine.low %v5063_v38, %v5071_v29  ;;  %v8805_v37 = vld [vmem:[%s9287_s20 + $0xf8] sm:$0xff]  }
0x20ee   : > { %v5031_v3 = vsel %vm1527_vm2, %v5027_v45, 0.0  ;;  %v8806_v38 = vld [vmem:[%s9287_s20 + $0x38] sm:$0xff]  }
0x20ef   : > { %5032 = vadd.xlane.f32.xlu1 %v5031_v3  ;;  %v8807_v29 = vld [vmem:[%s9287_s20 + $0xb8] sm:$0xff]  }
0x217a   : > { %v5030_v62 = vpop.xlane.xlu0 %5029 }
0x217b   : > { %v5034_v63 = vmul.f32 0.03125, %v5030_v62  ;;  %v8783_v62 = vld [vmem:[%s9287_s20 + $0x88] sm:$0xff]  }
0x217c   : > { %v5033_v0 = vpop.xlane.xlu1 %5032 }
0x217d   : > { %v5036_v1 = vadd.f32 1e-05, %v5034_v63  ;;  %v5035_v5 = vmul.f32 0.03125, %v5033_v0  ;;  %v8784_v63 = vld [vmem:[%s9287_s20 + $0x50] sm:$0xff]  }
0x217e   : > { %v8785_v0 = vld [vmem:[%s9287_s20 + $0xd0] sm:$0xff]  }
0x217f   : > { %8972 = vrsqrt.f32 %v5036_v1  ;;  %v5037_v7 = vadd.f32 1e-05, %v5035_v5  ;;  %v8786_v1 = vld [vmem:[%s9287_s20 + $0x10] sm:$0xff]  }
0x2180   : > { %v8787_v5 = vld [vmem:[%s9287_s20 + $0x90] sm:$0xff]  }
0x2181   : > { %8974 = vrsqrt.f32 %v5037_v7  ;;  %v8788_v7 = vld [vmem:[%s9287_s20 + $0x58] sm:$0xff]  }
0x2189   : > { %v8973_v8 = vpop.eup %8972 }
0x218a   : > { %v5040_v11 = vmul.f32 %v8973_v8, %v5024_v41  ;;  %v5086_v41 = vld [vmem:[%s9278_s10 + $0xe0] sm:$0xff]  ;;  %v8789_v8 = vld [vmem:[%s9287_s20 + $0xd8] sm:$0xff]  }
0x218b   : > { %v8975_v12 = vpop.eup %8974  ;;  %v7761_v45 = vcombine.high %v5078_v43, %v5086_v41  ;;  %v7760_v48 = vcombine.low %v5078_v43, %v5086_v41  ;;  %v9876_v41 = vld [vmem:[%s9281_s12 + $0x8] sm:$0xff] }
0x218c   : > { %v5048_v13 = vmul.f32 %v7734_v9, %v5040_v11  ;;  %v5041_v14 = vmul.f32 %v8975_v12, %v5025_v26  ;;  %v5087_v26 = vld [vmem:[%s9278_s10 + $0xe8] sm:$0xff]  ;;  %v8791_v11 = vld [vmem:[%s9287_s20 + $0x98] sm:$0xff]   ;;  %v8792_v12 = vld [vmem:[%s9287_s20 + $0x60] sm:$0xff]  }
0x218d   : > { %v7763_v3 = vcombine.high %v5079_v23, %v5087_v26  ;;  %v7762_v49 = vcombine.low %v5079_v23, %v5087_v26 }
0x218e   : > { %v5049_v16 = vmul.f32 %v7734_v9, %v5041_v14  ;;  %v9792_v21 = vadd.f32 %v7735_v15, %v5048_v13  ;;  %v8790_v9 = vld [vmem:[%s9287_s20 + $0x18] sm:$0xff]   ;;  %v8793_v13 = vld [vmem:[%s9287_s20 + $0xe0] sm:$0xff]  }
0x218f   : > { %v8794_v14 = vld [vmem:[%s9287_s20 + $0x20] sm:$0xff]  }
0x2190   : > { %v9794_v25 = vadd.f32 %v7735_v15, %v5049_v16  ;;  %v8795_v15 = vld [vmem:[%s9287_s20 + $0xa0] sm:$0xff]   ;;  %v8796_v16 = vld [vmem:[%s9287_s20 + $0x68] sm:$0xff]  }
0x2192   : > { %v9798_v6 = vpack.c.bf16 %v9794_v25, %v9792_v21 }
0x2194   : > { %7768 = vmatmul.mubr.msk.bf16.vlgmr.msra.gmra.mrb[80].mxu0 %vm1527_vm2, %v9798_v6  ;;  %7769 = vmatmul.mubr.msk.bf16.vlgmr.msra.gmra.mrb[80].mxu1 %vm1527_vm2, %v9798_v6 }
0x2195   : > { %5425 = vmatpush1.bf16.msra.mxu0 %v7740_v59  ;;  %5468 = vmatpush1.bf16.msra.mxu1 %v7742_v60  ;;  %v8779_v59 = vld [vmem:[%s9287_s20 + $0x80] sm:$0xff]   ;;  %v8780_v60 = vld [vmem:[%s9287_s20 + $0x48] sm:$0xff]  }
0x2196   : > { %5426 = vmatprep.subr.bf16.mxu0 %v7757_v27  ;;  %5469 = vmatprep.subr.bf16.mxu1 %v7759_v32  ;;  %v8802_v27 = vld [vmem:[%s9287_s20 + $0x30] sm:$0xff]  }
0x2197   : > { %5456 = vmatprep.mubr.bf16.mxu0 %v9031_v30  ;;  %5499 = vmatprep.mubr.bf16.mxu1 %v9031_v30  ;;  %v8803_v32 = vld [vmem:[%s9287_s20 + $0xb0] sm:$0xff]  }
0x2199   : > { %5427 = vmatpush1.bf16.msra.mxu0 %v7756_v40  ;;  %5470 = vmatpush1.bf16.msra.mxu1 %v7758_v33  ;;  %v8808_v40 = vld [vmem:[%s9287_s20 + $0x140] sm:$0xff]  }
0x219a   : > { %5510 = vmatprep.subr.bf16.mxu0 %v7745_v39  ;;  %5553 = vmatprep.subr.bf16.mxu1 %v7747_v42  ;;  %v8809_v33 = vld [vmem:[%s9287_s20 + $0x1c0] sm:$0xff]   ;;  %v5095_v39 = vlaneseq }
0x219c   : > { %7770 = vmatmul.mubr.msk.bf16.vlgmr.msra.gmra.mrb[84].mxu0 %vm1527_vm2, %v9798_v6  ;;  %7771 = vmatmul.mubr.msk.bf16.vlgmr.msra.gmra.mrb[84].mxu1 %vm1527_vm2, %v9798_v6  ;;  %v9872_v42 = vshrl.u32 %v5095_v39, 7 }
0x219d   : > { %5511 = vmatpush1.bf16.msra.mxu0 %v7744_v44  ;;  %5554 = vmatpush1.bf16.msra.mxu1 %v7746_v2  ;;  %v5090_v2 = vld [vmem:[%s9281_s12] sm:$0xff]  ;;  %s10190_s12 = sld [smem:[#allocation38_spill]] }
0x219e   : > { %5512 = vmatprep.subr.bf16.mxu0 %v7761_v45  ;;  %5555 = vmatprep.subr.bf16.mxu1 %v7763_v3  ;;  %v5121_v43 = vsub.s32 6, %v9872_v42  ;;  %v5097_v26 = vsub.s32 0, %v9872_v42  ;;  %v5105_v44 = vsub.s32 2, %v9872_v42  ;;  %v5101_v45 = vsub.s32 1, %v9872_v42 }
0x219f   : > { %5542 = vmatprep.mubr.bf16.mxu0 %v9031_v30  ;;  %5585 = vmatprep.mubr.bf16.mxu1 %v9031_v30  ;;  %v5109_v3 = vsub.s32 3, %v9872_v42  ;;  %v5125_v52 = vsub.s32 7, %v9872_v42 }
0x21a0   : > { %v9879_v23 = vrot.slane %v9876_v41, %v5121_v43  ;;  %v5098_v46 = vrot.slane %v5090_v2, %v5097_v26  ;;  %v5106_v47 = vrot.slane %v5090_v2, %v5105_v44  ;;  %v5102_v24 = vrot.slane %v5090_v2, %v5101_v45 }
0x21a1   : > { %5513 = vmatpush1.bf16.msra.mxu0 %v7760_v48  ;;  %5556 = vmatpush1.bf16.msra.mxu1 %v7762_v49  ;;  %v5110_v28 = vrot.slane %v5090_v2, %v5109_v3  ;;  %v5113_v48 = vsub.s32 4, %v9872_v42 }
0x21a2   : > { %5596 = vmatprep.subr.bf16.mxu0 %v7749_v22  ;;  %5639 = vmatprep.subr.bf16.mxu1 %v7751_v51  ;;  %v5117_v51 = vsub.s32 5, %v9872_v42 }
0x21a3   : > { %p7907_p5 = scmp.ne.s32.totalorder %s10190_s12, 1 }
0x21a4   : > { %7772 = vmatmul.mubr.msk.bf16.vlgmr.msra.gmra.mrb[88].mxu0 %vm1527_vm2, %v9798_v6  ;;  %7773 = vmatmul.mubr.msk.bf16.vlgmr.msra.gmra.mrb[88].mxu1 %vm1527_vm2, %v9798_v6  ;;  %s10194_s10 = sld [smem:[#allocation36_spill]] (!%p7907_p5)  ;;  %vm7209_vm7 = vcmask (!%p7907_p5), 7168  }
0x21a5   : > { %5597 = vmatpush1.bf16.msra.mxu0 %v7748_v55  ;;  %5640 = vmatpush1.bf16.msra.mxu1 %v7750_v50 }
0x21a6   : > { %5598 = vmatprep.subr.bf16.mxu0 %v7765_v56  ;;  %5641 = vmatprep.subr.bf16.mxu1 %v7767_v57 }
0x21a7   : > { %5628 = vmatprep.mubr.bf16.mxu0 %v9031_v30  ;;  %5671 = vmatprep.mubr.bf16.mxu1 %v9031_v30  ;;  %v8782_v30 = vld [vmem:[%s9287_s20 + $0x8] sm:$0xff]  }
0x21a9   : > { %5599 = vmatpush1.bf16.msra.mxu0 %v7764_v4  ;;  %5642 = vmatpush1.bf16.msra.mxu1 %v7766_v58 }
0x21aa   : > { %8076 = vmatprep.subr.bf16.mxu0 %v8776_v34  ;;  %8098 = vmatprep.subr.bf16.mxu1 %v8777_v35 }
0x21ac   : > { %7774 = vmatmul.mubr.msk.bf16.vlgmr.msra.gmra.mrb[92].mxu0 %vm1527_vm2, %v9798_v6  ;;  %7775 = vmatmul.mubr.msk.bf16.vlgmr.msra.gmra.mrb[92].mxu1 %vm1527_vm2, %v9798_v6  ;;  %v8801_v6 = vld [vmem:[%s9287_s20 + $0xf0] sm:$0xff]  }
0x21ad   : > { %8077 = vmatpush3.bf16.msra.mxu0 %v8778_v31  ;;  %8099 = vmatpush3.bf16.msra.mxu1 %v8779_v59  ;;  %v5114_v59 = vrot.slane %v5090_v2, %v5113_v48 }
0x21ae   : > { %8078 = vmatprep.subr.bf16.mxu0 %v8780_v60  ;;  %8100 = vmatprep.subr.bf16.mxu1 %v8781_v61  ;;  %v5122_v60 = vrot.slane %v5090_v2, %v5121_v43 }
0x21b1   : > { %8079 = vmatpush3.bf16.msra.mxu0 %v8782_v30  ;;  %8101 = vmatpush3.bf16.msra.mxu1 %v8783_v62  ;;  %v5118_v62 = vrot.slane %v5090_v2, %v5117_v51 }
0x21b2   : > { %8080 = vmatprep.subr.bf16.mxu0 %v8784_v63  ;;  %8102 = vmatprep.subr.bf16.mxu1 %v8785_v0  ;;  %v5126_v63 = vrot.slane %v5090_v2, %v5125_v52  ;;  %v5138_v2 = vrot.slane %v9876_v41, %v5105_v44  ;;  %v5142_v44 = vrot.slane %v9876_v41, %v5109_v3 }
0x21b5   : > { %8081 = vmatpush3.bf16.msra.mxu0 %v8786_v1  ;;  %8103 = vmatpush3.bf16.msra.mxu1 %v8787_v5 }
0x21b6   : > { %8082 = vmatprep.subr.bf16.mxu0 %v8788_v7  ;;  %8104 = vmatprep.subr.bf16.mxu1 %v8789_v8 }
0x21b9   : > { %8083 = vmatpush3.bf16.msra.mxu0 %v8790_v9  ;;  %8105 = vmatpush3.bf16.msra.mxu1 %v8791_v11 }
0x21ba   : > { %8084 = vmatprep.subr.bf16.mxu0 %v8792_v12  ;;  %8106 = vmatprep.subr.bf16.mxu1 %v8793_v13 }
0x21bd   : > { %8085 = vmatpush3.bf16.msra.mxu0 %v8794_v14  ;;  %8107 = vmatpush3.bf16.msra.mxu1 %v8795_v15 }
0x21be   : > { %8086 = vmatprep.subr.bf16.mxu0 %v8796_v16  ;;  %8108 = vmatprep.subr.bf16.mxu1 %v8797_v17 }
0x21c1   : > { %8087 = vmatpush3.bf16.msra.mxu0 %v8798_v18  ;;  %8109 = vmatpush3.bf16.msra.mxu1 %v8799_v19  ;;  %v8810_v19 = vld [vmem:[%s9287_s20 + $0x100] sm:$0xff]  }
0x21c2   : > { %8088 = vmatprep.subr.bf16.mxu0 %v8800_v20  ;;  %8110 = vmatprep.subr.bf16.mxu1 %v8801_v6  ;;  %v8811_v20 = vld [vmem:[%s9287_s20 + $0x180] sm:$0xff]  }
0x21c5   : > { %8089 = vmatpush3.bf16.msra.mxu0 %v8802_v27  ;;  %8111 = vmatpush3.bf16.msra.mxu1 %v8803_v32 }
0x21c6   : > { %8090 = vmatprep.subr.bf16.mxu0 %v8804_v36  ;;  %8112 = vmatprep.subr.bf16.mxu1 %v8805_v37  ;;  %v8812_v37 = vld [vmem:[%s9287_s20 + $0x148] sm:$0xff]  }
0x21c9   : > { %8091 = vmatpush3.bf16.msra.mxu0 %v8806_v38  ;;  %8113 = vmatpush3.bf16.msra.mxu1 %v8807_v29  ;;  %v8813_v38 = vld [vmem:[%s9287_s20 + $0x1c8] sm:$0xff]   ;;  %v5130_v29 = vrot.slane %v9876_v41, %v5097_v26  ;;  %v5134_v26 = vrot.slane %v9876_v41, %v5101_v45  ;;  %v8817_v45 = vld [vmem:[%s9287_s20 + $0x1d0] sm:$0xff]  }
0x21ca   : > { %8120 = vmatprep.subr.bf16.mxu0 %v8808_v40  ;;  %8142 = vmatprep.subr.bf16.mxu1 %v8809_v33 }
0x2267   : > { %v5372_v49 = vpop.f32.mrb[80].mxu0  ;;  %v5415_v22 = vpop.f32.mrb[80].mxu1 }
0x2268   : > { %v5373_v10 = vadd.f32 %v5372_v49, %v5098_v46  ;;  %v5416_v53 = vadd.f32 %v5415_v22, %v5106_v47  ;;  %v5374_v54 = vpop.f32.mrb[81].mxu0  ;;  %v5417_v55 = vpop.f32.mrb[81].mxu1 }
0x2269   : > { %v5375_v50 = vadd.f32 %v5374_v54, %v5102_v24  ;;  %v5418_v56 = vadd.f32 %v5417_v55, %v5110_v28  ;;  %v5376_v57 = vpop.f32.mrb[82].mxu0  ;;  %v5419_v4 = vpop.f32.mrb[82].mxu1 }
0x226a   : > { %v5377_v58 = vadd.f32 %v5376_v57, %v5098_v46  ;;  %v5420_v34 = vadd.f32 %v5419_v4, %v5106_v47  ;;  %v5378_v35 = vpop.f32.mrb[83].mxu0  ;;  %v5421_v31 = vpop.f32.mrb[83].mxu1  ;;  %v5682_v0 = vmax.f32 %v5373_v10, 0.0  ;;  %v5684_v1 = vmax.f32 %v5416_v53, 0.0  ;;  %v8814_v10 = vld [vmem:[%s9287_s20 + $0x108] sm:$0xff]   ;;  %v8816_v57 = vld [vmem:[%s9287_s20 + $0x150] sm:$0xff]  }
0x226b   : > { %v5379_v61 = vadd.f32 %v5378_v35, %v5102_v24  ;;  %v5422_v30 = vadd.f32 %v5421_v31, %v5110_v28  ;;  %v5683_v8 = vmax.f32 %v5375_v50, 0.0  ;;  %v5685_v9 = vmax.f32 %v5418_v56, 0.0  ;;  %v8815_v53 = vld [vmem:[%s9287_s20 + $0x188] sm:$0xff]  }
0x226c   : > { %v5698_v5 = vmax.f32 %v5377_v58, 0.0  ;;  %v5700_v7 = vmax.f32 %v5420_v34, 0.0 }
0x226d   : > { %v5699_v11 = vmax.f32 %v5379_v61, 0.0  ;;  %v5701_v12 = vmax.f32 %v5422_v30, 0.0 }
0x226e   : > { %v5971_v13 = vpack.c.bf16 %v5698_v5, %v5682_v0  ;;  %v5973_v14 = vpack.c.bf16 %v5700_v7, %v5684_v1 }
0x226f   : > { %v5972_v15 = vpack.c.bf16 %v5699_v11, %v5683_v8  ;;  %v5974_v16 = vpack.c.bf16 %v5701_v12, %v5685_v9  ;;  %v5458_v17 = vpop.f32.mrb[84].mxu0  ;;  %v5501_v18 = vpop.f32.mrb[84].mxu1  ;;  %v8820_v8 = vld [vmem:[%s9287_s20 + $0x158] sm:$0xff]  }
0x2270   : > { %v5459_v6 = vadd.f32 %v5458_v17, %v5114_v59  ;;  %v5502_v27 = vadd.f32 %v5501_v18, %v5122_v60  ;;  %v5460_v32 = vpop.f32.mrb[85].mxu0  ;;  %v5503_v36 = vpop.f32.mrb[85].mxu1  ;;  %v8821_v9 = vld [vmem:[%s9287_s20 + $0x1d8] sm:$0xff]  }
0x2271   : > { %v5461_v40 = vadd.f32 %v5460_v32, %v5118_v62  ;;  %v5504_v33 = vadd.f32 %v5503_v36, %v5126_v63  ;;  %v5462_v39 = vpop.f32.mrb[86].mxu0  ;;  %v5505_v43 = vpop.f32.mrb[86].mxu1  ;;  %6793 = vmatprep.mubr.bf16.mxu0 %v5972_v15  ;;  %6834 = vmatprep.mubr.bf16.mxu1 %v5974_v16  ;;  %v8822_v32 = vld [vmem:[%s9287_s20 + $0x118] sm:$0xff]  }
0x2272   : > { %v5463_v46 = vadd.f32 %v5462_v39, %v5114_v59  ;;  %v5506_v47 = vadd.f32 %v5505_v43, %v5122_v60  ;;  %v5464_v24 = vpop.f32.mrb[87].mxu0  ;;  %v5507_v28 = vpop.f32.mrb[87].mxu1  ;;  %6794 = vmatmul.mubr.bf16.vlgmr.msra.gmra.mrb[96].mxu0 %v5971_v13  ;;  %6835 = vmatmul.mubr.bf16.vlgmr.msra.gmra.mrb[96].mxu1 %v5973_v14  ;;  %v5686_v54 = vmax.f32 %v5459_v6, 0.0  ;;  %v5688_v55 = vmax.f32 %v5502_v27, 0.0  ;;  %v8823_v36 = vld [vmem:[%s9287_s20 + $0x198] sm:$0xff]  }
0x2273   : > { %v5465_v49 = vadd.f32 %v5464_v24, %v5118_v62  ;;  %v5508_v22 = vadd.f32 %v5507_v28, %v5126_v63  ;;  %8121 = vmatpush3.bf16.msra.mxu0 %v8810_v19  ;;  %8143 = vmatpush3.bf16.msra.mxu1 %v8811_v20  ;;  %v5687_v4 = vmax.f32 %v5461_v40, 0.0  ;;  %v5689_v58 = vmax.f32 %v5504_v33, 0.0  ;;  %v8818_v62 = vld [vmem:[%s9287_s20 + $0x110] sm:$0xff]  }
0x2274   : > { %v5702_v50 = vmax.f32 %v5463_v46, 0.0  ;;  %v5704_v56 = vmax.f32 %v5506_v47, 0.0  ;;  %8122 = vmatprep.subr.bf16.mxu0 %v8812_v37  ;;  %8144 = vmatprep.subr.bf16.mxu1 %v8813_v38  ;;  %v8819_v63 = vld [vmem:[%s9287_s20 + $0x190] sm:$0xff]   ;;  %v5146_v19 = vrot.slane %v9876_v41, %v5113_v48  ;;  %v5150_v20 = vrot.slane %v9876_v41, %v5117_v51  ;;  %v8824_v48 = vld [vmem:[%s9287_s20 + $0x160] sm:$0xff]  }
0x2275   : > { %v5703_v34 = vmax.f32 %v5465_v49, 0.0  ;;  %v5705_v35 = vmax.f32 %v5508_v22, 0.0  ;;  %v5158_v37 = vrot.slane %v9876_v41, %v5125_v52  ;;  %v8825_v51 = vld [vmem:[%s9287_s20 + $0x1e0] sm:$0xff]  }
0x2276   : > { %v9915_v31 = vpack.c.bf16 %v5702_v50, %v5686_v54  ;;  %v9917_v59 = vpack.c.bf16 %v5704_v56, %v5688_v55  ;;  %v8827_v49 = vld [vmem:[%s9287_s20 + $0x1a0] sm:$0xff]   ;;  %v8828_v54 = vld [vmem:[%s9287_s20 + $0x168] sm:$0xff]  }
0x2277   : > { %v5976_v3 = vpack.c.bf16 %v5703_v34, %v5687_v4  ;;  %v5978_v60 = vpack.c.bf16 %v5705_v35, %v5689_v58  ;;  %8123 = vmatpush3.bf16.msra.mxu0 %v8814_v10  ;;  %8145 = vmatpush3.bf16.msra.mxu1 %v8815_v53  ;;  %v5544_v61 = vpop.f32.mrb[88].mxu0  ;;  %v5587_v30 = vpop.f32.mrb[88].mxu1  ;;  %v8829_v55 = vld [vmem:[%s9287_s20 + $0x1e8] sm:$0xff]  }
0x2278   : > { %v5545_v0 = vadd.f32 %v5544_v61, %v5130_v29  ;;  %v5588_v1 = vadd.f32 %v5587_v30, %v5138_v2  ;;  %v5546_v5 = vpop.f32.mrb[89].mxu0  ;;  %v5589_v7 = vpop.f32.mrb[89].mxu1  ;;  %8124 = vmatprep.subr.bf16.mxu0 %v8816_v57  ;;  %8146 = vmatprep.subr.bf16.mxu1 %v8817_v45  ;;  %v8830_v61 = vld [vmem:[%s9287_s20 + $0x128] sm:$0xff]  }
0x2279   : > { %v5547_v11 = vadd.f32 %v5546_v5, %v5134_v26  ;;  %v5590_v12 = vadd.f32 %v5589_v7, %v5142_v44  ;;  %v5548_v13 = vpop.f32.mrb[90].mxu0  ;;  %v5591_v14 = vpop.f32.mrb[90].mxu1  ;;  %6875 = vmatprep.mubr.bf16.mxu0 %v5976_v3  ;;  %6916 = vmatprep.mubr.bf16.mxu1 %v5978_v60  ;;  %v8831_v30 = vld [vmem:[%s9287_s20 + $0x1a8] sm:$0xff]   ;;  %v8832_v5 = vld [vmem:[%s9287_s20 + $0x170] sm:$0xff]  }
0x227a   : > { %v5549_v15 = vadd.f32 %v5548_v13, %v5130_v29  ;;  %v5592_v16 = vadd.f32 %v5591_v14, %v5138_v2  ;;  %v5550_v17 = vpop.f32.mrb[91].mxu0  ;;  %v5593_v18 = vpop.f32.mrb[91].mxu1  ;;  %v5690_v38 = vmax.f32 %v5545_v0, 0.0  ;;  %v5692_v29 = vmax.f32 %v5588_v1, 0.0 }
0x227b   : > { %v5551_v6 = vadd.f32 %v5550_v17, %v5134_v26  ;;  %v5594_v27 = vadd.f32 %v5593_v18, %v5142_v44  ;;  %8125 = vmatpush3.bf16.msra.mxu0 %v8818_v62  ;;  %8147 = vmatpush3.bf16.msra.mxu1 %v8819_v63  ;;  %v5691_v39 = vmax.f32 %v5547_v11, 0.0  ;;  %v5693_v43 = vmax.f32 %v5590_v12, 0.0  ;;  %v8826_v26 = vld [vmem:[%s9287_s20 + $0x120] sm:$0xff]   ;;  %v8835_v17 = vld [vmem:[%s9287_s20 + $0x1b0] sm:$0xff]   ;;  %v8836_v18 = vld [vmem:[%s9287_s20 + $0x178] sm:$0xff]  }
0x227c   : > { %v5706_v40 = vmax.f32 %v5549_v15, 0.0  ;;  %v5708_v33 = vmax.f32 %v5592_v16, 0.0  ;;  %8126 = vmatprep.subr.bf16.mxu0 %v8820_v8  ;;  %8148 = vmatprep.subr.bf16.mxu1 %v8821_v9  ;;  %v8834_v16 = vld [vmem:[%s9287_s20 + $0x130] sm:$0xff]  }
0x227d   : > { %v5707_v2 = vmax.f32 %v5551_v6, 0.0  ;;  %v5709_v46 = vmax.f32 %v5594_v27, 0.0  ;;  %v8839_v6 = vld [vmem:[%s9287_s20 + $0x1b8] sm:$0xff]   ;;  %v8840_v27 = vld [vmem:[%s9287_s20 + $0x240] sm:$0xff]  }
0x227e   : > { %v9936_v47 = vpack.c.bf16 %v5706_v40, %v5690_v38  ;;  %v9938_v42 = vpack.c.bf16 %v5708_v33, %v5692_v29  ;;  %v8844_v38 = vld [vmem:[%s9287_s20 + $0x248] sm:$0xff]  }
0x227f   : > { %v9940_v41 = vpack.c.bf16 %v5707_v2, %v5691_v39  ;;  %v9942_v52 = vpack.c.bf16 %v5709_v46, %v5693_v43  ;;  %8127 = vmatpush3.bf16.msra.mxu0 %v8822_v32  ;;  %8149 = vmatpush3.bf16.msra.mxu1 %v8823_v36  ;;  %v5630_v24 = vpop.f32.mrb[92].mxu0  ;;  %v5673_v28 = vpop.f32.mrb[92].mxu1  ;;  %v8841_v32 = vld [vmem:[%s9287_s20 + $0x2c0] sm:$0xff]   ;;  %v8845_v29 = vld [vmem:[%s9287_s20 + $0x2c8] sm:$0xff]   ;;  %v8852_v39 = vld [vmem:[%s9287_s20 + $0x258] sm:$0xff]  }
0x2280   : > { %v5631_v22 = vadd.f32 %v5630_v24, %v5146_v19  ;;  %v5674_v10 = vadd.f32 %v5673_v28, %v9879_v23  ;;  %v5632_v53 = vpop.f32.mrb[93].mxu0  ;;  %v5675_v44 = vpop.f32.mrb[93].mxu1  ;;  %8128 = vmatprep.subr.bf16.mxu0 %v8824_v48  ;;  %8150 = vmatprep.subr.bf16.mxu1 %v8825_v51  ;;  %v8842_v36 = vld [vmem:[%s9287_s20 + $0x200] sm:$0xff]   ;;  %v8846_v40 = vld [vmem:[%s9287_s20 + $0x208] sm:$0xff]   ;;  %v8848_v48 = vld [vmem:[%s9287_s20 + $0x250] sm:$0xff]  }
0x2281   : > { %v5633_v50 = vadd.f32 %v5632_v53, %v5150_v20  ;;  %v5676_v56 = vadd.f32 %v5675_v44, %v5158_v37  ;;  %v5634_v57 = vpop.f32.mrb[94].mxu0  ;;  %v5677_v45 = vpop.f32.mrb[94].mxu1  ;;  %v8847_v33 = vld [vmem:[%s9287_s20 + $0x288] sm:$0xff]   ;;  %v8851_v51 = vld [vmem:[%s9287_s20 + $0x290] sm:$0xff]   ;;  %v8853_v43 = vld [vmem:[%s9287_s20 + $0x2d8] sm:$0xff]  }
0x2282   : > { %v5635_v4 = vadd.f32 %v5634_v57, %v5146_v19  ;;  %v5678_v58 = vadd.f32 %v5677_v45, %v9879_v23  ;;  %v5636_v34 = vpop.f32.mrb[95].mxu0  ;;  %v5679_v35 = vpop.f32.mrb[95].mxu1  ;;  %v5694_v62 = vmax.f32 %v5631_v22, 0.0  ;;  %v5696_v63 = vmax.f32 %v5674_v10, 0.0  ;;  %v8833_v23 = vld [vmem:[%s9287_s20 + $0x1f0] sm:$0xff]   ;;  %v8837_v19 = vld [vmem:[%s9287_s20 + $0x1f8] sm:$0xff]  }
0x2283   : > { %v5637_v3 = vadd.f32 %v5636_v34, %v5150_v20  ;;  %v5680_v60 = vadd.f32 %v5679_v35, %v5158_v37  ;;  %8129 = vmatpush3.bf16.msra.mxu0 %v8826_v26  ;;  %8151 = vmatpush3.bf16.msra.mxu1 %v8827_v49  ;;  %v5695_v7 = vmax.f32 %v5633_v50, 0.0  ;;  %v5697_v8 = vmax.f32 %v5676_v56, 0.0  ;;  %v8838_v20 = vld [vmem:[%s9287_s20 + $0x138] sm:$0xff]   ;;  %v8843_v37 = vld [vmem:[%s9287_s20 + $0x280] sm:$0xff]   ;;  %v8860_v26 = vld [vmem:[%s9287_s20 + $0x268] sm:$0xff]  }
0x2284   : > { %v5710_v0 = vmax.f32 %v5635_v4, 0.0  ;;  %v5712_v1 = vmax.f32 %v5678_v58, 0.0  ;;  %8130 = vmatprep.subr.bf16.mxu0 %v8828_v54  ;;  %8152 = vmatprep.subr.bf16.mxu1 %v8829_v55  ;;  %v8854_v2 = vld [vmem:[%s9287_s20 + $0x218] sm:$0xff]   ;;  %v8858_v24 = vld [vmem:[%s9287_s20 + $0x220] sm:$0xff]   ;;  %v8861_v49 = vld [vmem:[%s9287_s20 + $0x2e8] sm:$0xff]  }
0x2285   : > { %v5711_v9 = vmax.f32 %v5637_v3, 0.0  ;;  %v5713_v11 = vmax.f32 %v5680_v60, 0.0  ;;  %v8855_v46 = vld [vmem:[%s9287_s20 + $0x298] sm:$0xff]   ;;  %v8859_v28 = vld [vmem:[%s9287_s20 + $0x2a0] sm:$0xff]   ;;  %v8862_v22 = vld [vmem:[%s9287_s20 + $0x228] sm:$0xff]  }
0x2286   : > { %v9954_v12 = vpack.c.bf16 %v5710_v0, %v5694_v62  ;;  %v9956_v13 = vpack.c.bf16 %v5712_v1, %v5696_v63  ;;  %v8863_v10 = vld [vmem:[%s9287_s20 + $0x2a8] sm:$0xff]   ;;  %v8864_v53 = vld [vmem:[%s9287_s20 + $0x270] sm:$0xff]   ;;  %v8868_v50 = vld [vmem:[%s9287_s20 + $0x278] sm:$0xff]  }
0x2287   : > { %v9958_v14 = vpack.c.bf16 %v5711_v9, %v5695_v7  ;;  %v9960_v15 = vpack.c.bf16 %v5713_v11, %v5697_v8  ;;  %8131 = vmatpush3.bf16.msra.mxu0 %v8830_v61  ;;  %8153 = vmatpush3.bf16.msra.mxu1 %v8831_v30  ;;  %v8865_v44 = vld [vmem:[%s9287_s20 + $0x2f0] sm:$0xff]   ;;  %v8869_v56 = vld [vmem:[%s9287_s20 + $0x2f8] sm:$0xff]   ;;  %v8872_v4 = vld [vmem:[%s9287_s20 + $0x340] sm:$0xff]  }
0x2288   : > { %8132 = vmatprep.subr.bf16.mxu0 %v8832_v5  ;;  %8154 = vmatprep.subr.bf16.mxu1 %v8833_v23  ;;  %v8866_v54 = vld [vmem:[%s9287_s20 + $0x230] sm:$0xff]   ;;  %v8870_v57 = vld [vmem:[%s9287_s20 + $0x238] sm:$0xff]   ;;  %v8873_v58 = vld [vmem:[%s9287_s20 + $0x3c0] sm:$0xff]  }
0x2289   : > { %v8867_v55 = vld [vmem:[%s9287_s20 + $0x2b0] sm:$0xff]   ;;  %v8871_v45 = vld [vmem:[%s9287_s20 + $0x2b8] sm:$0xff]   ;;  %v8874_v34 = vld [vmem:[%s9287_s20 + $0x300] sm:$0xff]  }
0x228a   : > { %v8875_v35 = vld [vmem:[%s9287_s20 + $0x380] sm:$0xff]   ;;  %v8876_v3 = vld [vmem:[%s9287_s20 + $0x348] sm:$0xff]   ;;  %v8880_v62 = vld [vmem:[%s9287_s20 + $0x350] sm:$0xff]  }
0x228b   : > { %8133 = vmatpush3.bf16.msra.mxu0 %v8834_v16  ;;  %8155 = vmatpush3.bf16.msra.mxu1 %v8835_v17  ;;  %v8877_v60 = vld [vmem:[%s9287_s20 + $0x3c8] sm:$0xff]   ;;  %v8883_v63 = vld [vmem:[%s9287_s20 + $0x390] sm:$0xff]   ;;  %v8884_v0 = vld [vmem:[%s9287_s20 + $0x358] sm:$0xff]  }
0x228c   : > { %8134 = vmatprep.subr.bf16.mxu0 %v8836_v18  ;;  %8156 = vmatprep.subr.bf16.mxu1 %v8837_v19  ;;  %v8878_v61 = vld [vmem:[%s9287_s20 + $0x308] sm:$0xff]   ;;  %v8885_v1 = vld [vmem:[%s9287_s20 + $0x3d8] sm:$0xff]   ;;  %v8888_v7 = vld [vmem:[%s9287_s20 + $0x360] sm:$0xff]  }
0x228d   : > { %v8879_v30 = vld [vmem:[%s9287_s20 + $0x388] sm:$0xff]   ;;  %v8886_v5 = vld [vmem:[%s9287_s20 + $0x318] sm:$0xff]   ;;  %v8889_v8 = vld [vmem:[%s9287_s20 + $0x3e0] sm:$0xff]  }
0x228e   : > { %v8887_v23 = vld [vmem:[%s9287_s20 + $0x398] sm:$0xff]   ;;  %v8890_v9 = vld [vmem:[%s9287_s20 + $0x320] sm:$0xff]   ;;  %v8894_v16 = vld [vmem:[%s9287_s20 + $0x328] sm:$0xff]  }
0x228f   : > { %8135 = vmatpush3.bf16.msra.mxu0 %v8838_v20  ;;  %8157 = vmatpush3.bf16.msra.mxu1 %v8839_v6  ;;  %v8891_v11 = vld [vmem:[%s9287_s20 + $0x3a0] sm:$0xff]   ;;  %v8895_v17 = vld [vmem:[%s9287_s20 + $0x3a8] sm:$0xff]   ;;  %v8896_v18 = vld [vmem:[%s9287_s20 + $0x370] sm:$0xff]  }
0x2290   : > { %8164 = vmatprep.subr.bf16.mxu0 %v8840_v27  ;;  %8186 = vmatprep.subr.bf16.mxu1 %v8841_v32  ;;  %v8897_v19 = vld [vmem:[%s9287_s20 + $0x3f0] sm:$0xff]   ;;  %v8900_v27 = vld [vmem:[%s9287_s20 + $0x378] sm:$0xff]  }
0x2291   : > { %v8898_v20 = vld [vmem:[%s9287_s20 + $0x330] sm:$0xff]   ;;  %v8901_v32 = vld [vmem:[%s9287_s20 + $0x3f8] sm:$0xff]  }
0x2292   : > { %6876 = vmatmul.mubr.bf16.vlgmr.msra.gmra.mrb[100].mxu0 %v9915_v31  ;;  %6917 = vmatmul.mubr.bf16.vlgmr.msra.gmra.mrb[100].mxu1 %v9917_v59  ;;  %v8849_v31 = vld [vmem:[%s9287_s20 + $0x2d0] sm:$0xff]  }
0x2293   : > { %8165 = vmatpush3.bf16.msra.mxu0 %v8842_v36  ;;  %6957 = vmatprep.mubr.bf16.mxu0 %v9940_v41  ;;  %v8850_v59 = vld [vmem:[%s9287_s20 + $0x210] sm:$0xff]   ;;  %v8856_v41 = vld [vmem:[%s9287_s20 + $0x260] sm:$0xff]   ;;  %v8902_v36 = vld [vmem:[%s9287_s20 + $0x338] sm:$0xff]  }
0x2294   : > { %8187 = vmatpush3.bf16.msra.mxu1 %v8843_v37  ;;  %6998 = vmatprep.mubr.bf16.mxu1 %v9942_v52  ;;  %v8857_v52 = vld [vmem:[%s9287_s20 + $0x2e0] sm:$0xff]   ;;  %v8899_v6 = vld [vmem:[%s9287_s20 + $0x3b0] sm:$0xff]   ;;  %v8903_v37 = vld [vmem:[%s9287_s20 + $0x3b8] sm:$0xff]  }
0x2295   : > { %8166 = vmatprep.subr.bf16.mxu0 %v8844_v38  ;;  %8188 = vmatprep.subr.bf16.mxu1 %v8845_v29 }
0x2297   : > { %8167 = vmatpush3.bf16.msra.mxu0 %v8846_v40  ;;  %v7776_v40 = vld [vmem:[%s1420_s16] ss:$0 sm:$0xff] }
0x2298   : > { %8189 = vmatpush3.bf16.msra.mxu1 %v8847_v33  ;;  %8168 = vmatprep.subr.bf16.mxu0 %v8848_v48 }
0x2299   : > { %8190 = vmatprep.subr.bf16.mxu1 %v8849_v31 }
0x229b   : > { %8169 = vmatpush3.bf16.msra.mxu0 %v8850_v59 }
0x229c   : > { %8191 = vmatpush3.bf16.msra.mxu1 %v8851_v51  ;;  %8170 = vmatprep.subr.bf16.mxu0 %v8852_v39 }
0x229d   : > { %8192 = vmatprep.subr.bf16.mxu1 %v8853_v43 }
0x229f   : > { %8171 = vmatpush3.bf16.msra.mxu0 %v8854_v2 }
0x22a0   : > { %8193 = vmatpush3.bf16.msra.mxu1 %v8855_v46  ;;  %8172 = vmatprep.subr.bf16.mxu0 %v8856_v41 }
0x22a1   : > { %8194 = vmatprep.subr.bf16.mxu1 %v8857_v52 }
0x22a3   : > { %8173 = vmatpush3.bf16.msra.mxu0 %v8858_v24 }
0x22a4   : > { %8195 = vmatpush3.bf16.msra.mxu1 %v8859_v28  ;;  %8174 = vmatprep.subr.bf16.mxu0 %v8860_v26 }
0x22a5   : > { %8196 = vmatprep.subr.bf16.mxu1 %v8861_v49 }
0x22a7   : > { %8175 = vmatpush3.bf16.msra.mxu0 %v8862_v22 }
0x22a8   : > { %8197 = vmatpush3.bf16.msra.mxu1 %v8863_v10  ;;  %8176 = vmatprep.subr.bf16.mxu0 %v8864_v53 }
0x22a9   : > { %8198 = vmatprep.subr.bf16.mxu1 %v8865_v44 }
0x22ab   : > { %8177 = vmatpush3.bf16.msra.mxu0 %v8866_v54 }
0x22ac   : > { %8199 = vmatpush3.bf16.msra.mxu1 %v8867_v55  ;;  %8178 = vmatprep.subr.bf16.mxu0 %v8868_v50 }
0x22ad   : > { %8200 = vmatprep.subr.bf16.mxu1 %v8869_v56 }
0x22af   : > { %8179 = vmatpush3.bf16.msra.mxu0 %v8870_v57 }
0x22b0   : > { %8201 = vmatpush3.bf16.msra.mxu1 %v8871_v45  ;;  %8208 = vmatprep.subr.bf16.mxu0 %v8872_v4 }
0x22b1   : > { %8230 = vmatprep.subr.bf16.mxu1 %v8873_v58 }
0x22b2   : > { %6958 = vmatmul.mubr.bf16.vlgmr.msra.gmra.mrb[104].mxu0 %v9936_v47  ;;  %v8881_v47 = vld [vmem:[%s9287_s20 + $0x3d0] sm:$0xff]  }
0x22b3   : > { %6999 = vmatmul.mubr.bf16.vlgmr.msra.gmra.mrb[104].mxu1 %v9938_v42  ;;  %8209 = vmatpush3.bf16.msra.mxu0 %v8874_v34  ;;  %v8882_v42 = vld [vmem:[%s9287_s20 + $0x310] sm:$0xff]  }
0x22b4   : > { %7039 = vmatprep.mubr.bf16.mxu0 %v9958_v14  ;;  %8231 = vmatpush3.bf16.msra.mxu1 %v8875_v35  ;;  %v8892_v14 = vld [vmem:[%s9287_s20 + $0x368] sm:$0xff]  }
0x22b5   : > { %7080 = vmatprep.mubr.bf16.mxu1 %v9960_v15  ;;  %8210 = vmatprep.subr.bf16.mxu0 %v8876_v3  ;;  %v8893_v15 = vld [vmem:[%s9287_s20 + $0x3e8] sm:$0xff]   ;;  %s10192_s20 = sld [smem:[#allocation34_spill]] (!%p7907_p5) }
0x22b6   : > { %8232 = vmatprep.subr.bf16.mxu1 %v8877_v60 }
0x22b7   : > { %8211 = vmatpush3.bf16.msra.mxu0 %v8878_v61 }
0x22b8   : > { %8233 = vmatpush3.bf16.msra.mxu1 %v8879_v30  ;;  %8212 = vmatprep.subr.bf16.mxu0 %v8880_v62 }
0x22b9   : > { %8234 = vmatprep.subr.bf16.mxu1 %v8881_v47 }
0x22bb   : > { %8213 = vmatpush3.bf16.msra.mxu0 %v8882_v42 }
0x22bc   : > { %8235 = vmatpush3.bf16.msra.mxu1 %v8883_v63  ;;  %8214 = vmatprep.subr.bf16.mxu0 %v8884_v0 }
0x22bd   : > { %8236 = vmatprep.subr.bf16.mxu1 %v8885_v1 }
0x22bf   : > { %8215 = vmatpush3.bf16.msra.mxu0 %v8886_v5 }
0x22c0   : > { %8237 = vmatpush3.bf16.msra.mxu1 %v8887_v23  ;;  %8216 = vmatprep.subr.bf16.mxu0 %v8888_v7 }
0x22c1   : > { %8238 = vmatprep.subr.bf16.mxu1 %v8889_v8 }
0x22c3   : > { %8217 = vmatpush3.bf16.msra.mxu0 %v8890_v9 }
0x22c4   : > { %8239 = vmatpush3.bf16.msra.mxu1 %v8891_v11  ;;  %8218 = vmatprep.subr.bf16.mxu0 %v8892_v14 }
0x22c5   : > { %8240 = vmatprep.subr.bf16.mxu1 %v8893_v15 }
0x22c7   : > { %8219 = vmatpush3.bf16.msra.mxu0 %v8894_v16 }
0x22c8   : > { %8241 = vmatpush3.bf16.msra.mxu1 %v8895_v17  ;;  %8220 = vmatprep.subr.bf16.mxu0 %v8896_v18 }
0x22c9   : > { %8242 = vmatprep.subr.bf16.mxu1 %v8897_v19 }
0x22cb   : > { %8221 = vmatpush3.bf16.msra.mxu0 %v8898_v20 }
0x22cc   : > { %8243 = vmatpush3.bf16.msra.mxu1 %v8899_v6  ;;  %8222 = vmatprep.subr.bf16.mxu0 %v8900_v27 }
0x22cd   : > { %8244 = vmatprep.subr.bf16.mxu1 %v8901_v32 }
0x22cf   : > { %8223 = vmatpush3.bf16.msra.mxu0 %v8902_v36 }
0x22d0   : > { %8245 = vmatpush3.bf16.msra.mxu1 %v8903_v37 }
0x22d2   : > { %7040 = vmatmul.mubr.bf16.vlgmr.msra.gmra.mrb[108].mxu0 %v9954_v12 }
0x22d3   : > { %7081 = vmatmul.mubr.bf16.vlgmr.msra.gmra.mrb[108].mxu1 %v9956_v13 }
0x2345   : > { %v8092_v38 = vpop.f32.mrb[96].mxu0  ;;  %v8114_v29 = vpop.f32.mrb[96].mxu1 }
0x2346   : > { %v8093_v33 = vpop.f32.mrb[97].mxu0  ;;  %v8115_v48 = vpop.f32.mrb[97].mxu1 }
0x2347   : > { %v8094_v31 = vadd.f32 %v8093_v33, %v8092_v38  ;;  %v8116_v59 = vadd.f32 %v8115_v48, %v8114_v29  ;;  %v8095_v51 = vpop.f32.mrb[98].mxu0  ;;  %v8117_v39 = vpop.f32.mrb[98].mxu1 }
0x2348   : > { %v8096_v43 = vpop.f32.mrb[99].mxu0  ;;  %v8118_v2 = vpop.f32.mrb[99].mxu1 }
0x2349   : > { %v6796_v46 = vadd.f32 %v8094_v31, %v7776_v40  ;;  %v8097_v41 = vadd.f32 %v8096_v43, %v8095_v51  ;;  %v8119_v52 = vadd.f32 %v8118_v2, %v8117_v39 }
0x234b   : > { %v6837_v24 = vadd.f32 %v8116_v59, %v6796_v46  ;;  %v6799_v28 = vadd.f32 %v8097_v41, %v7776_v40 }
0x234d   : > { %v6840_v12 = vadd.f32 %v8119_v52, %v6799_v28 }
0x2365   : > { %v8136_v26 = vpop.f32.mrb[100].mxu0  ;;  %v8158_v13 = vpop.f32.mrb[100].mxu1 }
0x2366   : > { %v8137_v49 = vpop.f32.mrb[101].mxu0  ;;  %v8159_v22 = vpop.f32.mrb[101].mxu1 }
0x2367   : > { %v8138_v10 = vadd.f32 %v8137_v49, %v8136_v26  ;;  %v8160_v53 = vadd.f32 %v8159_v22, %v8158_v13  ;;  %v8139_v44 = vpop.f32.mrb[102].mxu0  ;;  %v8161_v54 = vpop.f32.mrb[102].mxu1 }
0x2368   : > { %v8140_v55 = vpop.f32.mrb[103].mxu0  ;;  %v8162_v50 = vpop.f32.mrb[103].mxu1 }
0x2369   : > { %v6878_v56 = vadd.f32 %v8138_v10, %v6837_v24  ;;  %v8141_v57 = vadd.f32 %v8140_v55, %v8139_v44  ;;  %v8163_v45 = vadd.f32 %v8162_v50, %v8161_v54  ;;  %v7906_v55 = vld [vmem:[%s1426_s21] ss:$0 sm:$0xff]  ;;  %s10191_s21 = sld [smem:[#allocation33_spill]] (!%p7907_p5) }
0x236b   : > { %v6919_v4 = vadd.f32 %v8160_v53, %v6878_v56  ;;  %v6881_v58 = vadd.f32 %v8141_v57, %v6840_v12  ;;  %v7905_v53 = vld [vmem:[%s1423_s27] ss:$0 sm:$0xff]  ;;  %s10193_s27 = sld [smem:[#allocation35_spill]] (!%p7907_p5) }
0x236d   : > { %v6922_v34 = vadd.f32 %v8163_v45, %v6881_v58 }
0x2385   : > { %v8180_v35 = vpop.f32.mrb[104].mxu0 }
0x2386   : > { %v8202_v3 = vpop.f32.mrb[104].mxu1  ;;  %v8181_v60 = vpop.f32.mrb[105].mxu0 }
0x2387   : > { %v8182_v61 = vadd.f32 %v8181_v60, %v8180_v35  ;;  %v8203_v30 = vpop.f32.mrb[105].mxu1  ;;  %v8183_v62 = vpop.f32.mrb[106].mxu0 }
0x2388   : > { %v8204_v47 = vadd.f32 %v8203_v30, %v8202_v3  ;;  %v8205_v42 = vpop.f32.mrb[106].mxu1  ;;  %v8184_v63 = vpop.f32.mrb[107].mxu0 }
0x2389   : > { %v6960_v0 = vadd.f32 %v8182_v61, %v6919_v4  ;;  %v8185_v1 = vadd.f32 %v8184_v63, %v8183_v62  ;;  %v8206_v5 = vpop.f32.mrb[107].mxu1 }
0x238a   : > { %v8207_v23 = vadd.f32 %v8206_v5, %v8205_v42 }
0x238b   : > { %v7001_v7 = vadd.f32 %v8204_v47, %v6960_v0  ;;  %v6963_v8 = vadd.f32 %v8185_v1, %v6922_v34 }
0x238d   : > { %v7004_v9 = vadd.f32 %v8207_v23, %v6963_v8 }
0x23a5   : > { %v8224_v11 = vpop.f32.mrb[108].mxu0 }
0x23a6   : > { %v8246_v14 = vpop.f32.mrb[108].mxu1  ;;  %v8225_v15 = vpop.f32.mrb[109].mxu0 }
0x23a7   : > { %v8226_v16 = vadd.f32 %v8225_v15, %v8224_v11  ;;  %v8247_v17 = vpop.f32.mrb[109].mxu1  ;;  %v8227_v18 = vpop.f32.mrb[110].mxu0 }
0x23a8   : > { %v8248_v19 = vadd.f32 %v8247_v17, %v8246_v14  ;;  %v8249_v20 = vpop.f32.mrb[110].mxu1  ;;  %v8228_v6 = vpop.f32.mrb[111].mxu0  ;;  %v7908_v14 = vld [vmem:[%s10191_s21] ss:$0 sm:$0xff] (!%p7907_p5) }
0x23a9   : > { %v7042_v27 = vadd.f32 %v8226_v16, %v7001_v7  ;;  %v8229_v32 = vadd.f32 %v8228_v6, %v8227_v18  ;;  %v8250_v36 = vpop.f32.mrb[111].mxu1  ;;  %v7909_v16 = vld [vmem:[%s10192_s20] ss:$0 sm:$0xff] (!%p7907_p5) }
0x23aa   : > { %v8251_v37 = vadd.f32 %v8250_v36, %v8249_v20 }
0x23ab   : > { %v7083_v38 = vadd.f32 %v8248_v19, %v7042_v27  ;;  %v7045_v29 = vadd.f32 %v8229_v32, %v7004_v9  ;;  %v7910_v19 = vld [vmem:[%s10193_s27] ss:$0 sm:$0xff] (!%p7907_p5) }
0x23ad   : > { %v7086_v40 = vadd.f32 %v8251_v37, %v7045_v29  ;;  %v7089_v33 = vadd.f32 %v7083_v38, %v9792_v21 }
0x23af   : > { %v7093_v48 = vsel %vm1527_vm2, %v7089_v33, 0.0  ;;  %v7090_v31 = vadd.f32 %v7086_v40, %v9794_v25  ;;  %v7911_v40 = vld [vmem:[#allocation3] ss:$0 sm:$0xff] (!%p7907_p5) }
0x23b0   : > { %7094 = vadd.xlane.f32.xlu0 %v7093_v48 }
0x23b1   : > { %v7096_v59 = vsel %vm1527_vm2, %v7090_v31, 0.0 }
0x23b2   : > { %7097 = vadd.xlane.f32.xlu1 %v7096_v59 }
0x243d   : > { %v7095_v51 = vpop.xlane.xlu0 %7094 }
0x243e   : > { %v7099_v39 = vmul.f32 0.03125, %v7095_v51 }
0x243f   : > { %v7098_v43 = vpop.xlane.xlu1 %7097 }
0x2440   : > { %v7101_v2 = vsub.f32 %v7089_v33, %v7099_v39  ;;  %v7100_v46 = vmul.f32 0.03125, %v7098_v43 }
0x2442   : > { %v7102_v41 = vsub.f32 %v7090_v31, %v7100_v46  ;;  %v7103_v52 = vmul.f32 %v7101_v2, %v7101_v2 }
0x2444   : > { %v7105_v24 = vsel %vm1527_vm2, %v7103_v52, 0.0  ;;  %v7104_v21 = vmul.f32 %v7102_v41, %v7102_v41 }
0x2445   : > { %7106 = vadd.xlane.f32.xlu0 %v7105_v24 }
0x2446   : > { %v7108_v25 = vsel %vm1527_vm2, %v7104_v21, 0.0 }
0x2447   : > { %7109 = vadd.xlane.f32.xlu1 %v7108_v25 }
0x24d2   : > { %v7107_v28 = vpop.xlane.xlu0 %7106 }
0x24d3   : > { %v7111_v12 = vmul.f32 0.03125, %v7107_v28 }
0x24d4   : > { %v7110_v26 = vpop.xlane.xlu1 %7109 }
0x24d5   : > { %v7113_v13 = vadd.f32 1e-05, %v7111_v12  ;;  %v7112_v49 = vmul.f32 0.03125, %v7110_v26 }
0x24d7   : > { %8976 = vrsqrt.f32 %v7113_v13  ;;  %v7114_v22 = vadd.f32 1e-05, %v7112_v49 }
0x24d9   : > { %8978 = vrsqrt.f32 %v7114_v22 }
0x24e1   : > { %v8977_v10 = vpop.eup %8976 }
0x24e2   : > { %v7117_v44 = vmul.f32 %v8977_v10, %v7101_v2 }
0x24e3   : > { %v8979_v54 = vpop.eup %8978 }
0x24e4   : > { %v7125_v50 = vmul.f32 %v7905_v53, %v7117_v44  ;;  %v7118_v56 = vmul.f32 %v8979_v54, %v7102_v41  ;;  %7140 = sbr.rel (%p7907_p5) target bundleno = 9913 (0x26b9), region = 160 }
0x24e6   : > { %v7133_v57 = vadd.f32 %v7906_v55, %v7125_v50  ;;  %v7126_v45 = vmul.f32 %v7905_v53, %v7118_v56 }
0x24e8   : > { %7135 = vst.msk [vmem:[#allocation2] sm:$0xff] %vm1527_vm2, %v7133_v57  ;;  %v7134_v4 = vadd.f32 %v7906_v55, %v7126_v45  ;;  %v7143_v58 = vsel (!%p7907_p5), %vm1527_vm2, %v7133_v57, 0.0 }
0x24e9   : > { %7144 = vadd.xlane.f32.xlu0 (!%p7907_p5), %v7143_v58 }
0x24ea   : > { %7136 = vst.msk [vmem:[#allocation2 + $0x8] sm:$0xff] %vm1527_vm2, %v7134_v4  ;;  %v7146_v34 = vsel (!%p7907_p5), %vm1527_vm2, %v7134_v4, 0.0 }
0x24ed   : > { %7147 = vadd.xlane.f32.xlu0 %v7146_v34 }
0x2576   : > { %v7145_v35 = vpop.xlane.xlu0 %7144 }
0x2577   : > { %v7149_v3 = vmul.f32 0.03125, %v7145_v35 }
0x2579   : > { %v7151_v60 = vsub.f32 %v7133_v57, %v7149_v3 }
0x257a   : > { %v7148_v61 = vpop.xlane.xlu0 %7147 }
0x257b   : > { %v7150_v30 = vmul.f32 0.03125, %v7148_v61  ;;  %v7153_v62 = vmul.f32 %v7151_v60, %v7151_v60 }
0x257d   : > { %v7152_v47 = vsub.f32 %v7134_v4, %v7150_v30  ;;  %v7155_v42 = vsel %vm1527_vm2, %v7153_v62, 0.0 }
0x257e   : > { %7156 = vadd.xlane.f32.xlu1 %v7155_v42 }
0x257f   : > { %v7154_v63 = vmul.f32 %v7152_v47, %v7152_v47 }
0x2581   : > { %v7158_v0 = vsel %vm1527_vm2, %v7154_v63, 0.0 }
0x2582   : > { %7159 = vadd.xlane.f32.xlu1 %v7158_v0 }
0x260b   : > { %v7157_v1 = vpop.xlane.xlu1 %7156 }
0x260c   : > { %v7161_v5 = vmul.f32 0.03125, %v7157_v1 }
0x260e   : > { %v7163_v23 = vadd.f32 1e-05, %v7161_v5 }
0x260f   : > { %v7160_v7 = vpop.xlane.xlu1 %7159 }
0x2610   : > { %8984 = vrsqrt.f32 %v7163_v23  ;;  %v7162_v8 = vmul.f32 0.03125, %v7160_v7 }
0x2612   : > { %v7164_v9 = vadd.f32 1e-05, %v7162_v8 }
0x2614   : > { %8986 = vrsqrt.f32 %v7164_v9 }
0x261a   : > { %v8985_v11 = vpop.eup %8984 }
0x261b   : > { %v7167_v15 = vmul.f32 %v8985_v11, %v7151_v60 }
0x261d   : > { %v7175_v17 = vmul.f32 %v7908_v14, %v7167_v15 }
0x261e   : > { %v8987_v18 = vpop.eup %8986 }
0x261f   : > { %v7183_v20 = vadd.f32 %v7909_v16, %v7175_v17  ;;  %v7168_v6 = vmul.f32 %v8987_v18, %v7152_v47 }
0x2621   : > { %v7192_v27 = vmul.f32 %v7910_v19, %v7183_v20  ;;  %v7176_v32 = vmul.f32 %v7908_v14, %v7168_v6 }
0x2623   : > { %v7194_v36 = vsel %vm1527_vm2, %v7192_v27, 0.0  ;;  %v7184_v37 = vadd.f32 %v7909_v16, %v7176_v32 }
0x2624   : > { %7195 = vadd.xlane.f32.xlu0 %v7194_v36 }
0x2625   : > { %v7193_v38 = vmul.f32 %v7910_v19, %v7184_v37 }
0x2627   : > { %v7197_v29 = vsel %vm1527_vm2, %v7193_v38, 0.0 }
0x2628   : > { %7198 = vadd.xlane.f32.xlu1 %v7197_v29 }
0x26b1   : > { %v7196_v33 = vpop.xlane.xlu0 %7195 }
0x26b2   : > { %v7207_v48 = vadd.f32 %v7911_v40, %v7196_v33 }
0x26b4   : > { %7210 = vst.msk [vmem:[%s10194_s10] sm:$0xff] %vm7209_vm7, %v7207_v48 }
0x26b5   : > { %v7199_v31 = vpop.xlane.xlu1 %7198 }
0x26b6   : > { %v7208_v59 = vadd.f32 %v7911_v40, %v7199_v31 }
0x26b8   : > { %7211 = vst.msk [vmem:[%s10194_s10 + $0x8] sm:$0xff] %vm7209_vm7, %v7208_v59 }
0x26b9 PF: > { %s10195_s0 = sld [smem:[#allocation37_spill]] }
0x26bf   : > { %s79_s7 = sadd.s32 1, %s10195_s0  }
0x26c0   : > { %p76_p6 = scmp.ge.s32.totalorder %s79_s7, 4  }
0x26c2   :  { %78 = sbr.rel (!%p76_p6) target bundleno = 77 (0x4d), region = 294 }

</bundles_post_ra>
